<compile_context>
chip_gen: v5e
topology: v5e:2x2
jax: 0.10.0
libtpu: 0.0.40
codegen_flags: <defaults>
</compile_context>

<pallas_src>
import math

import jax
import jax.numpy as jnp
from jax.experimental import pallas as pl
from jax.experimental.pallas import tpu as pltpu

# ----------------------------- configuration -------------------------------
NUM_FEATURE = 32     # num_feature
HEAD_NUM = 8         # head_num
BS = 4               # pairs per group (per PyTorch forward call)
SEQ = 2 * BS         # attention sequence length per group (input1 ++ input2)
SUB = NUM_FEATURE // HEAD_NUM
H1, H2 = 512, 128    # score MLP hidden sizes
LN_EPS = 1e-5
SCALE = 1.0 / math.sqrt(SUB)
GPB_DEFAULT = 16     # groups per grid step -> M = 128 rows (raise to 32 on v6e/v7x)


# ------------------------------- kernel ------------------------------------
def ranknet_kernel(x_ref, wq_ref, wk_ref, wv_ref, wo_ref, g_ref, beta_ref,
                   w1a_ref, w1b_ref, b1_ref, w2_ref, b2_ref, w3_ref, b3_ref,
                   hmask_ref, gbias_ref, sel_ref, out_ref, att_ref):
    D = NUM_FEATURE
    H = HEAD_NUM
    x = x_ref[0]                                           # (M, D) f32
    M = x.shape[0]                                         # GPB * SEQ (static)

    # --- Q/K/V projections (Wq pre-scaled by 1/sqrt(dk) in the wrapper) -----
    q = jnp.dot(x, wq_ref[...], preferred_element_type=jnp.float32)   # (M, D)
    k = jnp.dot(x, wk_ref[...], preferred_element_type=jnp.float32)   # (M, D)
    v = jnp.dot(x, wv_ref[...], preferred_element_type=jnp.float32)   # (M, D)

    # --- stack q per head along sublanes and mask to that head's features ---
    hmask = hmask_ref[...]                                 # (H*M, D) 0/1 mask
    q_stk = jnp.broadcast_to(q[None], (H, M, D)).reshape(H * M, D) * hmask

    # --- all heads x all groups scores in ONE matmul ------------------------
    # contraction over full D is exact (masked feature products are exact 0);
    # cross-group key columns killed by the additive -1e9 group bias.
    scores = jax.lax.dot_general(q_stk, k, (((1,), (1,)), ((), ())),
                                 preferred_element_type=jnp.float32)  # (H*M, M)
    scores = scores + gbias_ref[...]

    # --- full-lane-width softmax ---------------------------------------------
    m = jnp.max(scores, axis=-1, keepdims=True)
    e = jnp.exp(scores - m)                                # cross-group -> exact 0
    attn = e * (1.0 / jnp.sum(e, axis=-1, keepdims=True))  # (H*M, M)

    # --- head-mean attention map, written lane-dense as (SEQ, M) -------------
    mean_attn = attn.reshape(H, M, M).sum(axis=0) * (1.0 / H)          # (M, M)
    # sel[j, c] = 1 iff c % SEQ == j; cross-group entries of mean_attn are 0,
    # so this matmul extracts exactly the per-group (i, j) attention values,
    # transposed so the output tile is 128 lanes wide.
    att_ref[0] = jax.lax.dot_general(sel_ref[...], mean_attn,
                                     (((1,), (1,)), ((), ())),
                                     preferred_element_type=jnp.float32)  # (SEQ, M)

    # --- context for all heads/groups in ONE matmul + head recombination -----
    ctx_stacked = jnp.dot(attn, v, preferred_element_type=jnp.float32)    # (H*M, D)
    ctx = (ctx_stacked * hmask).reshape(H, M, D).sum(axis=0)              # (M, D)

    # --- output projection + residual + LayerNorm -----------------------------
    y = jnp.dot(ctx, wo_ref[...], preferred_element_type=jnp.float32) + x
    mu = jnp.mean(y, axis=-1, keepdims=True)
    var = jnp.mean((y - mu) ** 2, axis=-1, keepdims=True)
    ctx_fea = (y - mu) * jax.lax.rsqrt(var + LN_EPS) * g_ref[...] + beta_ref[...]

    # --- score MLP (dropout = identity at inference) --------------------------
    # layer 1 split: concat([x, ctx_fea]) @ W1  ==  x @ W1a + ctx_fea @ W1b
    h1 = (jnp.dot(x, w1a_ref[...], preferred_element_type=jnp.float32)
          + jnp.dot(ctx_fea, w1b_ref[...], preferred_element_type=jnp.float32)
          + b1_ref[...])
    h1 = jnp.maximum(h1, 0.0)
    h2 = jnp.maximum(
        jnp.dot(h1, w2_ref[...], preferred_element_type=jnp.float32) + b2_ref[...],
        0.0)                                                            # (M, H2)

    # final 128 -> 1 layer as a (1, M) row so the score vector is lane-major
    logit = jax.lax.dot_general(w3_ref[...], h2, (((1,), (1,)), ((), ())),
                                preferred_element_type=jnp.float32)     # (1, M)
    s = jax.nn.sigmoid(logit + b3_ref[...])                             # (1, M)

    # pairwise out = sigmoid(s_i - s_j): partner row is s shifted by +BS lanes;
    # only lanes with (lane % SEQ) < BS are valid and kept by the wrapper.
    partner = jnp.concatenate([s[:, BS:], s[:, :BS]], axis=1)
    out_ref[0] = jax.nn.sigmoid(s - partner)                            # (1, M)


# ------------------------------- wrapper ------------------------------------
def ranknet_forward(input1, input2, params, groups_per_block=GPB_DEFAULT):
    """input1/input2: (BS, D) for one module forward, or (G, BS, D) for G
    independent forwards batched into a single kernel launch."""
    single = input1.ndim == 2
    if single:
        input1, input2 = input1[None], input2[None]
    G = input1.shape[0]
    GPB = groups_per_block
    D = NUM_FEATURE
    M = GPB * SEQ
    nsteps = pl.cdiv(G, GPB)
    Gp = nsteps * GPB

    x = jnp.concatenate([input1, input2], axis=1)            # (G, SEQ, D)
    if Gp != G:                                              # pad to full steps
        x = jnp.concatenate(
            [x, jnp.zeros((Gp - G, SEQ, D), x.dtype)], axis=0)
    x = x.reshape(nsteps, M, D)                              # rows: g*SEQ + t

    # ---- constant masks / selectors (hoisted out of the kernel) -------------
    rows = jnp.arange(HEAD_NUM * M)
    head_mask = (jnp.arange(D)[None, :] // SUB
                 == (rows // M)[:, None]).astype(jnp.float32)          # (H*M, D)
    row_grp = (rows % M) // SEQ
    col_grp = jnp.arange(M) // SEQ
    group_bias = jnp.where(row_grp[:, None] == col_grp[None, :],
                           0.0, -1e9).astype(jnp.float32)              # (H*M, M)
    sel = (jnp.arange(M)[None, :] % SEQ
           == jnp.arange(SEQ)[:, None]).astype(jnp.float32)            # (SEQ, M)

    wq_scaled = params["wq_t"] * SCALE        # fold 1/sqrt(dk) into Wq (free)
    w1a = params["w1_t"][:D]
    w1b = params["w1_t"][D:]

    args = (x, wq_scaled, params["wk_t"], params["wv_t"], params["wo_t"],
            params["ln_g"], params["ln_b"],
            w1a, w1b, params["b1"],
            params["w2_t"], params["b2"], params["w3_row"], params["b3"],
            head_mask, group_bias, sel)

    def const_spec(shape):                    # full block, constant index_map
        nd = len(shape)
        return pl.BlockSpec(shape, lambda t, _n=nd: (0,) * _n)

    in_specs = ([pl.BlockSpec((1, M, D), lambda t: (t, 0, 0))]
                + [const_spec(a.shape) for a in args[1:]])
    out_specs = (pl.BlockSpec((1, 1, M), lambda t: (t, 0, 0)),
                 pl.BlockSpec((1, SEQ, M), lambda t: (t, 0, 0)))
    out_shape = (jax.ShapeDtypeStruct((nsteps, 1, M), jnp.float32),
                 jax.ShapeDtypeStruct((nsteps, SEQ, M), jnp.float32))

    out_slab, att_slab = pl.pallas_call(
        ranknet_kernel,
        out_shape=out_shape,
        grid_spec=pltpu.PrefetchScalarGridSpec(
            num_scalar_prefetch=0, grid=(nsteps,),
            in_specs=in_specs, out_specs=out_specs),
        compiler_params=pltpu.CompilerParams(
            dimension_semantics=("parallel",)),   # v7x: shard steps on 2 TCs
    )(*args)

    # out_slab[t, 0, g*SEQ + b] (b < BS)  ->  (G, BS, 1)
    out = out_slab.reshape(nsteps, GPB, SEQ)[:, :, :BS]
    out = out.reshape(Gp, BS, 1)[:G]
    # att_slab[t, j, g*SEQ + i]  ->  (G, SEQ, SEQ) indexed [g, i, j]
    att = att_slab.reshape(nsteps, SEQ, GPB, SEQ).transpose(0, 2, 3, 1)
    att = att.reshape(Gp, SEQ, SEQ)[:G]

    if single:
        return out[0], att[0]
    return out, att


# ----------------------- deterministic parameter init -----------------------
def init_params(key):
    ks = jax.random.split(key, 10)
    D = NUM_FEATURE
    std_qkv = math.sqrt(2.0 / D)
    xavier_o = math.sqrt(2.0 / (D + D))

    def unif(k, shape, fan_in):
        b = 1.0 / math.sqrt(fan_in)
        return jax.random.uniform(k, shape, jnp.float32, -b, b)

    return {
        # attention projections, stored transposed (in, out), bias=False
        "wq_t": jax.random.normal(ks[0], (D, D), jnp.float32) * std_qkv,
        "wk_t": jax.random.normal(ks[1], (D, D), jnp.float32) * std_qkv,
        "wv_t": jax.random.normal(ks[2], (D, D), jnp.float32) * std_qkv,
        "wo_t": jax.random.normal(ks[3], (D, D), jnp.float32) * xavier_o,
        # LayerNorm affine
        "ln_g": jnp.ones((1, D), jnp.float32),
        "ln_b": jnp.zeros((1, D), jnp.float32),
        # score MLP (all f32, matching the PyTorch module)
        "w1_t": unif(ks[4], (2 * D, H1), 2 * D),
        "b1": unif(ks[5], (1, H1), 2 * D),
        "w2_t": unif(ks[6], (H1, H2), H1),
        "b2": unif(ks[7], (1, H2), H1),
        "w3_row": unif(ks[8], (1, H2), H2),       # final (128 -> 1) layer as a row
        "b3": unif(ks[9], (1, 1), H2),
    }


# ------------------------- pure-JAX reference check --------------------------
def ranknet_ref(input1, input2, p):
    D = NUM_FEATURE
    x = jnp.concatenate([input1, input2], axis=0)            # (SEQ, D)
    q, k, v = x @ p["wq_t"], x @ p["wk_t"], x @ p["wv_t"]
    qh = q.reshape(SEQ, HEAD_NUM, SUB).transpose(1, 0, 2)
    kh = k.reshape(SEQ, HEAD_NUM, SUB).transpose(1, 0, 2)
    vh = v.reshape(SEQ, HEAD_NUM, SUB).transpose(1, 0, 2)
    scores = jnp.einsum("hqd,hkd->hqk", qh, kh) / math.sqrt(SUB)
    attn = jax.nn.softmax(scores, axis=-1)
    ctx = jnp.einsum("hqk,hkd->hqd", attn, vh).transpose(1, 0, 2).reshape(SEQ, D)
    att_mean = jnp.mean(attn, axis=0)
    y = ctx @ p["wo_t"] + x
    mean = jnp.mean(y, -1, keepdims=True)
    var = jnp.mean((y - mean) ** 2, -1, keepdims=True)
    ctx_fea = (y - mean) / jnp.sqrt(var + LN_EPS) * p["ln_g"] + p["ln_b"]
    feats = jnp.concatenate([x, ctx_fea], axis=1)
    h1 = jax.nn.relu(feats @ p["w1_t"] + p["b1"])
    h2 = jax.nn.relu(h1 @ p["w2_t"] + p["b2"])
    s = jax.nn.sigmoid(jnp.sum(h2 * p["w3_row"], axis=-1, keepdims=True) + p["b3"])
    return jax.nn.sigmoid(s[:BS] - s[BS:]), att_mean


# --------------------------------- main --------------------------------------
if __name__ == "__main__":
    key = jax.random.PRNGKey(0)
    kp, k1, k2 = jax.random.split(key, 3)
    params = init_params(kp)

    G = 64  # independent ranking groups -> 4 grid steps of 16 groups each
    inputs1 = jax.random.normal(k1, (G, BS, NUM_FEATURE), jnp.float32)
    inputs2 = jax.random.normal(k2, (G, BS, NUM_FEATURE), jnp.float32)

    out, att = jax.block_until_ready(ranknet_forward(inputs1, inputs2, params))

    ref_out, ref_att = jax.vmap(lambda a, b: ranknet_ref(a, b, params))(inputs1, inputs2)
    assert out.shape == (G, BS, 1) and att.shape == (G, SEQ, SEQ)
    assert jnp.allclose(out, ref_out, rtol=1e-3, atol=1e-3)
    assert jnp.allclose(att, ref_att, rtol=1e-3, atol=1e-3)

    # single-group path: exactly the PyTorch module's forward(input1, input2)
    out1, att1 = jax.block_until_ready(
        ranknet_forward(inputs1[0], inputs2[0], params))
    assert out1.shape == (BS, 1) and att1.shape == (SEQ, SEQ)
    assert jnp.allclose(out1, ref_out[0], rtol=1e-3, atol=1e-3)
    assert jnp.allclose(att1, ref_att[0], rtol=1e-3, atol=1e-3)

    print("KERNEL_OK")
</pallas_src>

<mosaic_0001>
module attributes {stable_mosaic.version = 11 : i64} {
  func.func @ranknet_kernel(%arg0: i32, %arg1: memref<1x128x32xf32, #tpu.memory_space<vmem>>, %arg2: memref<32x32xf32, #tpu.memory_space<vmem>>, %arg3: memref<32x32xf32, #tpu.memory_space<vmem>>, %arg4: memref<32x32xf32, #tpu.memory_space<vmem>>, %arg5: memref<32x32xf32, #tpu.memory_space<vmem>>, %arg6: memref<1x32xf32, #tpu.memory_space<vmem>>, %arg7: memref<1x32xf32, #tpu.memory_space<vmem>>, %arg8: memref<32x512xf32, #tpu.memory_space<vmem>>, %arg9: memref<32x512xf32, #tpu.memory_space<vmem>>, %arg10: memref<1x512xf32, #tpu.memory_space<vmem>>, %arg11: memref<512x128xf32, #tpu.memory_space<vmem>>, %arg12: memref<1x128xf32, #tpu.memory_space<vmem>>, %arg13: memref<1x128xf32, #tpu.memory_space<vmem>>, %arg14: memref<1x1xf32, #tpu.memory_space<vmem>>, %arg15: memref<1024x32xf32, #tpu.memory_space<vmem>>, %arg16: memref<1024x128xf32, #tpu.memory_space<vmem>>, %arg17: memref<8x128xf32, #tpu.memory_space<vmem>>, %arg18: memref<1x1x128xf32, #tpu.memory_space<vmem>>, %arg19: memref<1x8x128xf32, #tpu.memory_space<vmem>>) attributes {dimension_semantics = [#tpu.dimension_semantics<parallel>], iteration_bounds = array<i64: 4>, scalar_prefetch = 0 : i64, scratch_operands = 0 : i64, tpu.core_type = #tpu.core_type<tc>, window_params = [{transform_indices = @transform_0, window_bounds = array<i64: 1, 128, 32>}, {pipeline_mode = #tpu.pipeline_mode<synchronous>, transform_indices = @transform_1, window_bounds = array<i64: 32, 32>}, {pipeline_mode = #tpu.pipeline_mode<synchronous>, transform_indices = @transform_2, window_bounds = array<i64: 32, 32>}, {pipeline_mode = #tpu.pipeline_mode<synchronous>, transform_indices = @transform_3, window_bounds = array<i64: 32, 32>}, {pipeline_mode = #tpu.pipeline_mode<synchronous>, transform_indices = @transform_4, window_bounds = array<i64: 32, 32>}, {pipeline_mode = #tpu.pipeline_mode<synchronous>, transform_indices = @transform_5, window_bounds = array<i64: 1, 32>}, {pipeline_mode = #tpu.pipeline_mode<synchronous>, transform_indices = @transform_6, window_bounds = array<i64: 1, 32>}, {pipeline_mode = #tpu.pipeline_mode<synchronous>, transform_indices = @transform_7, window_bounds = array<i64: 32, 512>}, {pipeline_mode = #tpu.pipeline_mode<synchronous>, transform_indices = @transform_8, window_bounds = array<i64: 32, 512>}, {pipeline_mode = #tpu.pipeline_mode<synchronous>, transform_indices = @transform_9, window_bounds = array<i64: 1, 512>}, {pipeline_mode = #tpu.pipeline_mode<synchronous>, transform_indices = @transform_10, window_bounds = array<i64: 512, 128>}, {pipeline_mode = #tpu.pipeline_mode<synchronous>, transform_indices = @transform_11, window_bounds = array<i64: 1, 128>}, {pipeline_mode = #tpu.pipeline_mode<synchronous>, transform_indices = @transform_12, window_bounds = array<i64: 1, 128>}, {pipeline_mode = #tpu.pipeline_mode<synchronous>, transform_indices = @transform_13, window_bounds = array<i64: 1, 1>}, {pipeline_mode = #tpu.pipeline_mode<synchronous>, transform_indices = @transform_14, window_bounds = array<i64: 1024, 32>}, {pipeline_mode = #tpu.pipeline_mode<synchronous>, transform_indices = @transform_15, window_bounds = array<i64: 1024, 128>}, {pipeline_mode = #tpu.pipeline_mode<synchronous>, transform_indices = @transform_16, window_bounds = array<i64: 8, 128>}, {transform_indices = @transform_17, window_bounds = array<i64: 1, 1, 128>}, {transform_indices = @transform_18, window_bounds = array<i64: 1, 8, 128>}]} {
    %c0 = arith.constant 0 : index
    %c0_0 = arith.constant 0 : index
    %c0_1 = arith.constant 0 : index
    %0 = vector.load %arg1[%c0, %c0_0, %c0_1] : memref<1x128x32xf32, #tpu.memory_space<vmem>>, vector<1x128x32xf32>
    %1 = vector.shape_cast %0 : vector<1x128x32xf32> to vector<128x32xf32>
    %c0_2 = arith.constant 0 : index
    %c0_3 = arith.constant 0 : index
    %2 = vector.load %arg2[%c0_2, %c0_3] : memref<32x32xf32, #tpu.memory_space<vmem>>, vector<32x32xf32>
    %cst = arith.constant dense<0.000000e+00> : vector<128x32xf32>
    %3 = tpu.matmul %1, %2, %cst {dimension_numbers = #tpu.dot_dimension_numbers<[1], [0], [0], [1], [0, 0, 1, 1], [], []>} : vector<128x32xf32>, vector<32x32xf32>, vector<128x32xf32> -> vector<128x32xf32>
    %c0_4 = arith.constant 0 : index
    %c0_5 = arith.constant 0 : index
    %4 = vector.load %arg3[%c0_4, %c0_5] : memref<32x32xf32, #tpu.memory_space<vmem>>, vector<32x32xf32>
    %cst_6 = arith.constant dense<0.000000e+00> : vector<128x32xf32>
    %5 = tpu.matmul %1, %4, %cst_6 {dimension_numbers = #tpu.dot_dimension_numbers<[1], [0], [0], [1], [0, 0, 1, 1], [], []>} : vector<128x32xf32>, vector<32x32xf32>, vector<128x32xf32> -> vector<128x32xf32>
    %c0_7 = arith.constant 0 : index
    %c0_8 = arith.constant 0 : index
    %6 = vector.load %arg4[%c0_7, %c0_8] : memref<32x32xf32, #tpu.memory_space<vmem>>, vector<32x32xf32>
    %cst_9 = arith.constant dense<0.000000e+00> : vector<128x32xf32>
    %7 = tpu.matmul %1, %6, %cst_9 {dimension_numbers = #tpu.dot_dimension_numbers<[1], [0], [0], [1], [0, 0, 1, 1], [], []>} : vector<128x32xf32>, vector<32x32xf32>, vector<128x32xf32> -> vector<128x32xf32>
    %c0_10 = arith.constant 0 : index
    %c0_11 = arith.constant 0 : index
    %8 = vector.load %arg15[%c0_10, %c0_11] : memref<1024x32xf32, #tpu.memory_space<vmem>>, vector<1024x32xf32>
    %9 = vector.shape_cast %3 : vector<128x32xf32> to vector<1x128x32xf32>
    %10 = vector.shape_cast %9 : vector<1x128x32xf32> to vector<1x128x32xf32>
    %11 = vector.broadcast %10 : vector<1x128x32xf32> to vector<8x128x32xf32>
    %12 = vector.shape_cast %11 : vector<8x128x32xf32> to vector<1024x32xf32>
    %13 = arith.mulf %12, %8 : vector<1024x32xf32>
    %cst_12 = arith.constant dense<0.000000e+00> : vector<1024x128xf32>
    %14 = tpu.matmul %13, %5, %cst_12 {dimension_numbers = #tpu.dot_dimension_numbers<[1], [1], [0], [0], [0, 0, 1, 0], [], []>} : vector<1024x32xf32>, vector<128x32xf32>, vector<1024x128xf32> -> vector<1024x128xf32>
    %c0_13 = arith.constant 0 : index
    %c0_14 = arith.constant 0 : index
    %15 = vector.load %arg16[%c0_13, %c0_14] : memref<1024x128xf32, #tpu.memory_space<vmem>>, vector<1024x128xf32>
    %16 = arith.addf %14, %15 : vector<1024x128xf32>
    %cst_15 = arith.constant dense<0xFF800000> : vector<1024xf32>
    %17 = vector.multi_reduction <maximumf>, %16, %cst_15 [1] : vector<1024x128xf32> to vector<1024xf32>
    %18 = vector.shape_cast %17 : vector<1024xf32> to vector<1024x1xf32>
    %19 = vector.broadcast %18 : vector<1024x1xf32> to vector<1024x128xf32>
    %20 = arith.subf %16, %19 : vector<1024x128xf32>
    %21 = math.exp %20 : vector<1024x128xf32>
    %cst_16 = arith.constant dense<0.000000e+00> : vector<1024xf32>
    %22 = vector.multi_reduction <add>, %21, %cst_16 [1] : vector<1024x128xf32> to vector<1024xf32>
    %23 = vector.shape_cast %22 : vector<1024xf32> to vector<1024x1xf32>
    %cst_17 = arith.constant 1.000000e+00 : f32
    %24 = vector.broadcast %cst_17 : f32 to vector<1024x1xf32>
    %25 = arith.divf %24, %23 : vector<1024x1xf32>
    %26 = vector.broadcast %25 : vector<1024x1xf32> to vector<1024x128xf32>
    %27 = arith.mulf %21, %26 : vector<1024x128xf32>
    %28 = vector.shape_cast %27 : vector<1024x128xf32> to vector<8x128x128xf32>
    %cst_18 = arith.constant dense<0.000000e+00> : vector<128x128xf32>
    %29 = vector.multi_reduction <add>, %28, %cst_18 [0] : vector<8x128x128xf32> to vector<128x128xf32>
    %cst_19 = arith.constant 1.250000e-01 : f32
    %30 = vector.broadcast %cst_19 : f32 to vector<128x128xf32>
    %31 = arith.mulf %29, %30 : vector<128x128xf32>
    %c0_20 = arith.constant 0 : index
    %c0_21 = arith.constant 0 : index
    %32 = vector.load %arg17[%c0_20, %c0_21] : memref<8x128xf32, #tpu.memory_space<vmem>>, vector<8x128xf32>
    %cst_22 = arith.constant dense<0.000000e+00> : vector<8x128xf32>
    %33 = tpu.matmul %32, %31, %cst_22 {dimension_numbers = #tpu.dot_dimension_numbers<[1], [1], [0], [0], [0, 0, 1, 0], [], []>} : vector<8x128xf32>, vector<128x128xf32>, vector<8x128xf32> -> vector<8x128xf32>
    %c0_23 = arith.constant 0 : index
    %c0_24 = arith.constant 0 : index
    %c0_25 = arith.constant 0 : index
    %34 = vector.load %arg19[%c0_23, %c0_24, %c0_25] : memref<1x8x128xf32, #tpu.memory_space<vmem>>, vector<1x8x128xf32>
    %35 = vector.shape_cast %34 : vector<1x8x128xf32> to vector<8x128xf32>
    %36 = vector.shape_cast %33 : vector<8x128xf32> to vector<1x8x128xf32>
    tpu.vector_store %arg19[%c0_23, %c0_24, %c0_25], %36 {strides = array<i32>} : memref<1x8x128xf32, #tpu.memory_space<vmem>>, vector<1x8x128xf32>,
    %cst_26 = arith.constant dense<0.000000e+00> : vector<1024x32xf32>
    %37 = tpu.matmul %27, %7, %cst_26 {dimension_numbers = #tpu.dot_dimension_numbers<[1], [0], [0], [1], [0, 0, 1, 1], [], []>} : vector<1024x128xf32>, vector<128x32xf32>, vector<1024x32xf32> -> vector<1024x32xf32>
    %38 = arith.mulf %37, %8 : vector<1024x32xf32>
    %39 = vector.shape_cast %38 : vector<1024x32xf32> to vector<8x128x32xf32>
    %cst_27 = arith.constant dense<0.000000e+00> : vector<128x32xf32>
    %40 = vector.multi_reduction <add>, %39, %cst_27 [0] : vector<8x128x32xf32> to vector<128x32xf32>
    %c0_28 = arith.constant 0 : index
    %c0_29 = arith.constant 0 : index
    %41 = vector.load %arg5[%c0_28, %c0_29] : memref<32x32xf32, #tpu.memory_space<vmem>>, vector<32x32xf32>
    %cst_30 = arith.constant dense<0.000000e+00> : vector<128x32xf32>
    %42 = tpu.matmul %40, %41, %cst_30 {dimension_numbers = #tpu.dot_dimension_numbers<[1], [0], [0], [1], [0, 0, 1, 1], [], []>} : vector<128x32xf32>, vector<32x32xf32>, vector<128x32xf32> -> vector<128x32xf32>
    %43 = arith.addf %42, %1 : vector<128x32xf32>
    %cst_31 = arith.constant dense<0.000000e+00> : vector<128xf32>
    %44 = vector.multi_reduction <add>, %43, %cst_31 [1] : vector<128x32xf32> to vector<128xf32>
    %45 = vector.shape_cast %44 : vector<128xf32> to vector<128x1xf32>
    %cst_32 = arith.constant 3.200000e+01 : f32
    %46 = vector.broadcast %cst_32 : f32 to vector<128x1xf32>
    %47 = arith.divf %45, %46 : vector<128x1xf32>
    %48 = vector.broadcast %47 : vector<128x1xf32> to vector<128x32xf32>
    %49 = arith.subf %43, %48 : vector<128x32xf32>
    %50 = arith.mulf %49, %49 : vector<128x32xf32>
    %cst_33 = arith.constant dense<0.000000e+00> : vector<128xf32>
    %51 = vector.multi_reduction <add>, %50, %cst_33 [1] : vector<128x32xf32> to vector<128xf32>
    %52 = vector.shape_cast %51 : vector<128xf32> to vector<128x1xf32>
    %cst_34 = arith.constant 3.200000e+01 : f32
    %53 = vector.broadcast %cst_34 : f32 to vector<128x1xf32>
    %54 = arith.divf %52, %53 : vector<128x1xf32>
    %55 = vector.broadcast %47 : vector<128x1xf32> to vector<128x32xf32>
    %56 = arith.subf %43, %55 : vector<128x32xf32>
    %cst_35 = arith.constant 9.99999974E-6 : f32
    %57 = vector.broadcast %cst_35 : f32 to vector<128x1xf32>
    %58 = arith.addf %54, %57 : vector<128x1xf32>
    %59 = math.rsqrt %58 : vector<128x1xf32>
    %60 = vector.broadcast %59 : vector<128x1xf32> to vector<128x32xf32>
    %61 = arith.mulf %56, %60 : vector<128x32xf32>
    %c0_36 = arith.constant 0 : index
    %c0_37 = arith.constant 0 : index
    %62 = vector.load %arg6[%c0_36, %c0_37] : memref<1x32xf32, #tpu.memory_space<vmem>>, vector<1x32xf32>
    %63 = vector.broadcast %62 : vector<1x32xf32> to vector<128x32xf32>
    %64 = arith.mulf %61, %63 : vector<128x32xf32>
    %c0_38 = arith.constant 0 : index
    %c0_39 = arith.constant 0 : index
    %65 = vector.load %arg7[%c0_38, %c0_39] : memref<1x32xf32, #tpu.memory_space<vmem>>, vector<1x32xf32>
    %66 = vector.broadcast %65 : vector<1x32xf32> to vector<128x32xf32>
    %67 = arith.addf %64, %66 : vector<128x32xf32>
    %c0_40 = arith.constant 0 : index
    %c0_41 = arith.constant 0 : index
    %68 = vector.load %arg8[%c0_40, %c0_41] : memref<32x512xf32, #tpu.memory_space<vmem>>, vector<32x512xf32>
    %cst_42 = arith.constant dense<0.000000e+00> : vector<128x512xf32>
    %69 = tpu.matmul %1, %68, %cst_42 {dimension_numbers = #tpu.dot_dimension_numbers<[1], [0], [0], [1], [0, 0, 1, 1], [], []>} : vector<128x32xf32>, vector<32x512xf32>, vector<128x512xf32> -> vector<128x512xf32>
    %c0_43 = arith.constant 0 : index
    %c0_44 = arith.constant 0 : index
    %70 = vector.load %arg9[%c0_43, %c0_44] : memref<32x512xf32, #tpu.memory_space<vmem>>, vector<32x512xf32>
    %cst_45 = arith.constant dense<0.000000e+00> : vector<128x512xf32>
    %71 = tpu.matmul %67, %70, %cst_45 {dimension_numbers = #tpu.dot_dimension_numbers<[1], [0], [0], [1], [0, 0, 1, 1], [], []>} : vector<128x32xf32>, vector<32x512xf32>, vector<128x512xf32> -> vector<128x512xf32>
    %72 = arith.addf %69, %71 : vector<128x512xf32>
    %c0_46 = arith.constant 0 : index
    %c0_47 = arith.constant 0 : index
    %73 = vector.load %arg10[%c0_46, %c0_47] : memref<1x512xf32, #tpu.memory_space<vmem>>, vector<1x512xf32>
    %74 = vector.broadcast %73 : vector<1x512xf32> to vector<128x512xf32>
    %75 = arith.addf %72, %74 : vector<128x512xf32>
    %cst_48 = arith.constant 0.000000e+00 : f32
    %76 = vector.broadcast %cst_48 : f32 to vector<128x512xf32>
    %77 = arith.maximumf %75, %76 : vector<128x512xf32>
    %c0_49 = arith.constant 0 : index
    %c0_50 = arith.constant 0 : index
    %78 = vector.load %arg11[%c0_49, %c0_50] : memref<512x128xf32, #tpu.memory_space<vmem>>, vector<512x128xf32>
    %cst_51 = arith.constant dense<0.000000e+00> : vector<128x128xf32>
    %79 = tpu.matmul %77, %78, %cst_51 {dimension_numbers = #tpu.dot_dimension_numbers<[1], [0], [0], [1], [0, 0, 1, 1], [], []>} : vector<128x512xf32>, vector<512x128xf32>, vector<128x128xf32> -> vector<128x128xf32>
    %c0_52 = arith.constant 0 : index
    %c0_53 = arith.constant 0 : index
    %80 = vector.load %arg12[%c0_52, %c0_53] : memref<1x128xf32, #tpu.memory_space<vmem>>, vector<1x128xf32>
    %81 = vector.broadcast %80 : vector<1x128xf32> to vector<128x128xf32>
    %82 = arith.addf %79, %81 : vector<128x128xf32>
    %cst_54 = arith.constant 0.000000e+00 : f32
    %83 = vector.broadcast %cst_54 : f32 to vector<128x128xf32>
    %84 = arith.maximumf %82, %83 : vector<128x128xf32>
    %c0_55 = arith.constant 0 : index
    %c0_56 = arith.constant 0 : index
    %85 = vector.load %arg13[%c0_55, %c0_56] : memref<1x128xf32, #tpu.memory_space<vmem>>, vector<1x128xf32>
    %cst_57 = arith.constant dense<0.000000e+00> : vector<1x128xf32>
    %86 = tpu.matmul %85, %84, %cst_57 {dimension_numbers = #tpu.dot_dimension_numbers<[1], [1], [0], [0], [0, 0, 1, 0], [], []>} : vector<1x128xf32>, vector<128x128xf32>, vector<1x128xf32> -> vector<1x128xf32>
    %c0_58 = arith.constant 0 : index
    %c0_59 = arith.constant 0 : index
    %87 = vector.load %arg14[%c0_58, %c0_59] : memref<1x1xf32, #tpu.memory_space<vmem>>, vector<1x1xf32>
    %88 = vector.broadcast %87 : vector<1x1xf32> to vector<1x128xf32>
    %89 = arith.addf %86, %88 : vector<1x128xf32>
    %90 = arith.negf %89 : vector<1x128xf32>
    %91 = math.exp %90 : vector<1x128xf32>
    %cst_60 = arith.constant 1.000000e+00 : f32
    %92 = vector.broadcast %cst_60 : f32 to vector<1x128xf32>
    %93 = arith.addf %92, %91 : vector<1x128xf32>
    %94 = arith.divf %92, %93 : vector<1x128xf32>
    %95 = vector.extract_strided_slice %94 {offsets = [0, 4], sizes = [1, 124], strides = [1, 1]} : vector<1x128xf32> to vector<1x124xf32>
    %96 = vector.extract_strided_slice %94 {offsets = [0, 0], sizes = [1, 4], strides = [1, 1]} : vector<1x128xf32> to vector<1x4xf32>
    %97 = tpu.concatenate %95, %96 in 1 : vector<1x124xf32>, vector<1x4xf32> -> vector<1x128xf32>
    %98 = arith.subf %94, %97 : vector<1x128xf32>
    %99 = arith.negf %98 : vector<1x128xf32>
    %100 = math.exp %99 : vector<1x128xf32>
    %cst_61 = arith.constant 1.000000e+00 : f32
    %101 = vector.broadcast %cst_61 : f32 to vector<1x128xf32>
    %102 = arith.addf %101, %100 : vector<1x128xf32>
    %103 = arith.divf %101, %102 : vector<1x128xf32>
    %c0_62 = arith.constant 0 : index
    %c0_63 = arith.constant 0 : index
    %c0_64 = arith.constant 0 : index
    %104 = vector.load %arg18[%c0_62, %c0_63, %c0_64] : memref<1x1x128xf32, #tpu.memory_space<vmem>>, vector<1x1x128xf32>
    %105 = vector.shape_cast %104 : vector<1x1x128xf32> to vector<1x128xf32>
    %106 = vector.shape_cast %103 : vector<1x128xf32> to vector<1x1x128xf32>
    tpu.vector_store %arg18[%c0_62, %c0_63, %c0_64], %106 {strides = array<i32>} : memref<1x1x128xf32, #tpu.memory_space<vmem>>, vector<1x1x128xf32>,
    return
  }
  func.func @transform_0(%arg0: i32) -> (i32, i32, i32) {
    %c0_i32 = arith.constant 0 : i32
    %c0_i32_0 = arith.constant 0 : i32
    %c0_i32_1 = arith.constant 0 : i32
    return %arg0, %c0_i32, %c0_i32_0 : i32, i32, i32
  }
  func.func @transform_1(%arg0: i32) -> (i32, i32) {
    %c0_i32 = arith.constant 0 : i32
    %c0_i32_0 = arith.constant 0 : i32
    %c0_i32_1 = arith.constant 0 : i32
    return %c0_i32, %c0_i32_0 : i32, i32
  }
  func.func @transform_2(%arg0: i32) -> (i32, i32) {
    %c0_i32 = arith.constant 0 : i32
    %c0_i32_0 = arith.constant 0 : i32
    %c0_i32_1 = arith.constant 0 : i32
    return %c0_i32, %c0_i32_0 : i32, i32
  }
  func.func @transform_3(%arg0: i32) -> (i32, i32) {
    %c0_i32 = arith.constant 0 : i32
    %c0_i32_0 = arith.constant 0 : i32
    %c0_i32_1 = arith.constant 0 : i32
    return %c0_i32, %c0_i32_0 : i32, i32
  }
  func.func @transform_4(%arg0: i32) -> (i32, i32) {
    %c0_i32 = arith.constant 0 : i32
    %c0_i32_0 = arith.constant 0 : i32
    %c0_i32_1 = arith.constant 0 : i32
    return %c0_i32, %c0_i32_0 : i32, i32
  }
  func.func @transform_5(%arg0: i32) -> (i32, i32) {
    %c0_i32 = arith.constant 0 : i32
    %c0_i32_0 = arith.constant 0 : i32
    %c0_i32_1 = arith.constant 0 : i32
    return %c0_i32, %c0_i32_0 : i32, i32
  }
  func.func @transform_6(%arg0: i32) -> (i32, i32) {
    %c0_i32 = arith.constant 0 : i32
    %c0_i32_0 = arith.constant 0 : i32
    %c0_i32_1 = arith.constant 0 : i32
    return %c0_i32, %c0_i32_0 : i32, i32
  }
  func.func @transform_7(%arg0: i32) -> (i32, i32) {
    %c0_i32 = arith.constant 0 : i32
    %c0_i32_0 = arith.constant 0 : i32
    %c0_i32_1 = arith.constant 0 : i32
    return %c0_i32, %c0_i32_0 : i32, i32
  }
  func.func @transform_8(%arg0: i32) -> (i32, i32) {
    %c0_i32 = arith.constant 0 : i32
    %c0_i32_0 = arith.constant 0 : i32
    %c0_i32_1 = arith.constant 0 : i32
    return %c0_i32, %c0_i32_0 : i32, i32
  }
  func.func @transform_9(%arg0: i32) -> (i32, i32) {
    %c0_i32 = arith.constant 0 : i32
    %c0_i32_0 = arith.constant 0 : i32
    %c0_i32_1 = arith.constant 0 : i32
    return %c0_i32, %c0_i32_0 : i32, i32
  }
  func.func @transform_10(%arg0: i32) -> (i32, i32) {
    %c0_i32 = arith.constant 0 : i32
    %c0_i32_0 = arith.constant 0 : i32
    %c0_i32_1 = arith.constant 0 : i32
    return %c0_i32, %c0_i32_0 : i32, i32
  }
  func.func @transform_11(%arg0: i32) -> (i32, i32) {
    %c0_i32 = arith.constant 0 : i32
    %c0_i32_0 = arith.constant 0 : i32
    %c0_i32_1 = arith.constant 0 : i32
    return %c0_i32, %c0_i32_0 : i32, i32
  }
  func.func @transform_12(%arg0: i32) -> (i32, i32) {
    %c0_i32 = arith.constant 0 : i32
    %c0_i32_0 = arith.constant 0 : i32
    %c0_i32_1 = arith.constant 0 : i32
    return %c0_i32, %c0_i32_0 : i32, i32
  }
  func.func @transform_13(%arg0: i32) -> (i32, i32) {
    %c0_i32 = arith.constant 0 : i32
    %c0_i32_0 = arith.constant 0 : i32
    %c0_i32_1 = arith.constant 0 : i32
    return %c0_i32, %c0_i32_0 : i32, i32
  }
  func.func @transform_14(%arg0: i32) -> (i32, i32) {
    %c0_i32 = arith.constant 0 : i32
    %c0_i32_0 = arith.constant 0 : i32
    %c0_i32_1 = arith.constant 0 : i32
    return %c0_i32, %c0_i32_0 : i32, i32
  }
  func.func @transform_15(%arg0: i32) -> (i32, i32) {
    %c0_i32 = arith.constant 0 : i32
    %c0_i32_0 = arith.constant 0 : i32
    %c0_i32_1 = arith.constant 0 : i32
    return %c0_i32, %c0_i32_0 : i32, i32
  }
  func.func @transform_16(%arg0: i32) -> (i32, i32) {
    %c0_i32 = arith.constant 0 : i32
    %c0_i32_0 = arith.constant 0 : i32
    %c0_i32_1 = arith.constant 0 : i32
    return %c0_i32, %c0_i32_0 : i32, i32
  }
  func.func @transform_17(%arg0: i32) -> (i32, i32, i32) {
    %c0_i32 = arith.constant 0 : i32
    %c0_i32_0 = arith.constant 0 : i32
    %c0_i32_1 = arith.constant 0 : i32
    return %arg0, %c0_i32, %c0_i32_0 : i32, i32, i32
  }
  func.func @transform_18(%arg0: i32) -> (i32, i32, i32) {
    %c0_i32 = arith.constant 0 : i32
    %c0_i32_0 = arith.constant 0 : i32
    %c0_i32_1 = arith.constant 0 : i32
    return %arg0, %c0_i32, %c0_i32_0 : i32, i32, i32
  }
}

</mosaic_0001>

<bundles_post_ra>
// kernel: tpu_custom_call.1
= control target key start
LH: loop header
LB: loop body
LE: loop exit
PB: predicated region body
PF: predicated region fallthrough
CT: control target
= control target key end

     0   :  { %s16525_s0 = inlined_call_operand.vmem [shape: f32[4,128,32], index: 0, kind: input, shape index: {}]   ;;  %s16526_s1 = inlined_call_operand.hbm [shape: f32[32,32], index: 1, kind: input, shape index: {}]   ;;  %s16527_s2 = inlined_call_operand.hbm [shape: f32[32,32], index: 2, kind: input, shape index: {}]   ;;  %s16528_s3 = inlined_call_operand.hbm [shape: f32[32,32], index: 3, kind: input, shape index: {}]   ;;  %s16529_s4 = inlined_call_operand.hbm [shape: f32[32,32], index: 4, kind: input, shape index: {}]   ;;  %s16530_s5 = inlined_call_operand.hbm [shape: f32[1,32], index: 5, kind: input, shape index: {}]   ;;  %s16531_s6 = inlined_call_operand.hbm [shape: f32[1,32], index: 6, kind: input, shape index: {}]   ;;  %s16532_s7 = inlined_call_operand.vmem [shape: f32[32,512], index: 7, kind: input, shape index: {}]   ;;  %s16533_s8 = inlined_call_operand.hbm [shape: f32[32,512], index: 8, kind: input, shape index: {}]   ;;  %s16534_s9 = inlined_call_operand.hbm [shape: f32[1,512], index: 9, kind: input, shape index: {}]   ;;  %s16535_s10 = inlined_call_operand.vmem [shape: f32[512,128], index: 10, kind: input, shape index: {}]   ;;  %s16536_s11 = inlined_call_operand.hbm [shape: f32[1,128], index: 11, kind: input, shape index: {}]   ;;  %s16537_s12 = inlined_call_operand.hbm [shape: f32[1,128], index: 12, kind: input, shape index: {}]   ;;  %s16538_s13 = inlined_call_operand.<no memory space> [shape: f32[1,1], index: 13, kind: input, shape index: {}]   ;;  %s16539_s14 = inlined_call_operand.vmem [shape: f32[1024,32], index: 14, kind: input, shape index: {}]   ;;  %s16540_s15 = inlined_call_operand.vmem [shape: f32[1024,128], index: 15, kind: input, shape index: {}]   ;;  %s16541_s16 = inlined_call_operand.hbm [shape: f32[8,128], index: 16, kind: input, shape index: {}]   ;;  %s16542_s17 = inlined_call_operand.hbm [shape: f32[4,1,128], index: 17, kind: output, shape index: {0}]   ;;  %s16543_s18 = inlined_call_operand.hbm [shape: f32[4,8,128], index: 18, kind: output, shape index: {1}]  }
   0x1   :  { %16581 = sst [smem:[#allocation139_spill]] %s16525_s0  ;;  %v24_v0 = vstv %s16538_s13 }
   0x2   :  { %16582 = sst [smem:[#allocation140_spill]] %s16526_s1  ;;  %25 = vst [vmem:[#allocation2] sm:$0x1] %v24_v0 }
   0x3   :  { %16583 = sst [smem:[#allocation141_spill]] %s16527_s2 }
   0x4   :  { %16584 = sst [smem:[#allocation142_spill]] %s16529_s4 }
   0x5   :  { %16585 = sst [smem:[#allocation143_spill]] %s16531_s6 }
   0x6   :  { %16586 = sst [smem:[#allocation144_spill]] %s16542_s17 }
   0x7   :  { %16587 = sst [smem:[#allocation145_spill]] %s16543_s18 }
   0x8   :  { %26 = vsyncpa [#allocation4], 0 }
   0x9   :  { %27 = vsyncpa [#allocation7], 0 }
   0xa   :  { %28 = vsyncpa [#allocation10], 0 }
   0xb   :  { %29 = vsyncpa [#allocation13], 0 }
   0xc   :  { %30 = vsyncpa [#allocation16], 0 }
   0xd   :  { %31 = vsyncpa [#allocation19], 0 }
   0xe   :  { %32 = vsyncpa [#allocation5], 0 }
   0xf   :  { %34 = vsyncpa [#allocation5 + $0x1], 0 }
  0x10   :  { %35 = vsyncpa [#allocation23], 0 }
  0x11   :  { %37 = vsyncpa [#allocation23 + $0x1], 0  ;;  %s9843_s29 = smov 0   ;;  %s9845_s30 = smov 0  }
  0x12   :  { %s9847_s0 = smov 0   ;;  %s9849_s19 = smov 0  }
  0x13 LB: > { %16588 = sst [smem:[#allocation32_spill]] %s9713_s29  ;;  %s9864_s13 = sadd.s32 4294967295, %s9725_s19   ;;  %s9725_s19 = sphi %s9849_s19, %s17112_s19   ;;  %s9721_s0 = sphi %s9847_s0, %s17114_s0   ;;  %s9717_s30 = sphi %s9845_s30, %s17116_s30   ;;  %s9713_s29 = sphi %s9843_s29, %s17115_s29  }
  0x14   : > { %16589 = sst [smem:[#allocation33_spill]] %s9721_s0  ;;  %s8005_s1 = sadd.s32 4294967294, %s9725_s19  }
  0x15   : > { %16590 = sst [smem:[#allocation34_spill]] %s9725_s19  ;;  %s9868_s20 = sadd.s32 1, %s9725_s19  }
  0x16   : > { %16591 = sst [smem:[#allocation35_spill]] %s9868_s20  ;;  %s412_s21 = sadd.s32 1, %s9721_s0 }
  0x17   : > { %s409_s22 = ssub.s32 %s9725_s19, %s9868_s20  ;;  %p422_p0 = scmp.ne.s32.totalorder %s9721_s0, %s9717_s30 }
  0x18   : > { %p410_p1 = scmp.eq.s32.totalorder %s409_s22, 0  ;;  %p423_p2 = scmp.eq.s32.totalorder %s9864_s13, 3 }
  0x19   : > { %p428_p3 = scmp.ne.s32.totalorder %s9717_s30, %s9713_s29  ;;  %p429_p4 = scmp.eq.s32.totalorder %s8005_s1, 3 }
  0x1a   : > { %s9879_s2 = scalar_select %p410_p1, %s9721_s0, %s412_s21  }
  0x1b   : > { %p9881_p5 = por %p423_p2, %p422_p0  ;;  %p9885_p6 = por %p429_p4, %p428_p3 }
  0x1c   : > { %16592 = sst [smem:[#allocation36_spill]] %s9879_s2  ;;  %p8006_p7 = scmp.ge.s32.totalorder %s9725_s19, 1 }
  0x1d   : > { %s16594_s24 = scalar_select %p9885_p6, 1, 0 }
  0x1e   : > { %p462_p8 = scmp.lt.s32.totalorder %s9725_s19, 5  ;;  %p8486_p9 = scmp.eq.s32.totalorder %s9864_s13, 0 }
  0x1f   : > { %16595 = sst [smem:[#allocation37_spill]] %s16594_s24  ;;  %s9727_s20 = smov [#allocation6]  }
  0x20   : > { %p9892_p10 = pnand %p8006_p7, %p462_p8  ;;  %s16597_s28 = sld [smem:[#allocation141_spill]] }
  0x21   : > { %s16598_s4 = sld [smem:[#allocation142_spill]]  ;;  %s489_s24 = sshll.u32 %s9727_s20, 4  ;;  %s490_s24 = int_to_ptr.vmem [resolvable:$true] %s489_s24 }
  0x22   : > { %p8445_p11 = pneg %p9892_p10  ;;  %s16552_s26 = smov 128  }
  0x23   : > { %s9729_s27 = smov 8   ;;  %s16600_s6 = sld [smem:[#allocation143_spill]] }
  0x24   : > { %p9906_p12 = pnand %p8486_p9, %p8445_p11  ;;  %s571_s17 = sshll.u32 %s16534_s9, 4  ;;  %s572_s17 = int_to_ptr.hbm [resolvable:$true] %s571_s17 }
  0x25   : > { %s9731_s18 = smov [#allocation12]   ;;  %s501_s22 = sshll.u32 %s16528_s3, 4  ;;  %s502_s22 = int_to_ptr.hbm [resolvable:$true] %s501_s22 }
  0x26   : > { %s487_s1 = sshll.u32 %s16597_s28, 4  ;;  %s9730_s28 = smov [#allocation9]   ;;  %s488_s1 = int_to_ptr.hbm [resolvable:$true] %s487_s1 }
  0x27   : > { %s515_s2 = sshll.u32 %s16598_s4, 4  ;;  %s517_s21 = sshll.u32 %s9730_s28, 4  ;;  %s516_s2 = int_to_ptr.hbm [resolvable:$true] %s515_s2  ;;  %s518_s21 = int_to_ptr.vmem [resolvable:$true] %s517_s21 }
  0x28   : > { %8451 = dma.hbm_to_vmem [thread:$0]  (!%p9906_p12), %s488_s1, 512, %s490_s24, [#allocation7], %s16552_s26, %s16552_s26, %s9729_s27  }
  0x29   : > { %s542_s29 = sshll.u32 %s16600_s6, 4  ;;  %s544_s24 = sshll.u32 %s9731_s18, 4  ;;  %s543_s29 = int_to_ptr.hbm [resolvable:$true] %s542_s29  ;;  %s545_s24 = int_to_ptr.vmem [resolvable:$true] %s544_s24 }
  0x2a   : > { %8457 = dma.hbm_to_vmem [thread:$0]  (!%p9906_p12), %s516_s2, 512, %s518_s21, [#allocation10], %s16552_s26, %s16552_s26, %s9729_s27  }
  0x2b   : > { %8463 = dma.hbm_to_vmem [thread:$0]  (!%p9906_p12), %s543_s29, 16, %s545_s24, [#allocation13]  }
  0x2c   : > { %s9732_s4 = smov [#allocation15]   ;;  %s598_s6 = sshll.u32 %s16537_s12, 4  ;;  %s599_s6 = int_to_ptr.hbm [resolvable:$true] %s598_s6 }
  0x2d   : > { %s573_s1 = sshll.u32 %s9732_s4, 4  ;;  %s16601_s21 = sld [smem:[#allocation140_spill]]  ;;  %s574_s1 = int_to_ptr.vmem [resolvable:$true] %s573_s1 }
  0x2e   : > { %8469 = dma.hbm_to_vmem [thread:$0]  (!%p9906_p12), %s572_s17, 64, %s574_s1, [#allocation16]  }
  0x2f   : > { %s9733_s18 = smov [#allocation18]   ;;  %s9734_s29 = smov [#allocation3]  }
  0x30   : > { %s600_s26 = sshll.u32 %s9733_s18, 4  ;;  %s475_s24 = sshll.u32 %s9734_s29, 4  ;;  %s601_s26 = int_to_ptr.vmem [resolvable:$true] %s600_s26  ;;  %s476_s24 = int_to_ptr.vmem [resolvable:$true] %s475_s24 }
  0x31   : > { %8475 = dma.hbm_to_vmem [thread:$0]  (!%p9906_p12), %s599_s6, 16, %s601_s26, [#allocation19]  }
  0x32   : > { %s16602_s17 = smov 128   ;;  %s530_s2 = sshll.u32 %s16530_s5, 4  ;;  %s531_s2 = int_to_ptr.hbm [resolvable:$true] %s530_s2 }
  0x33   : > { %s473_s20 = sshll.u32 %s16601_s21, 4  ;;  %s9735_s21 = smov [#allocation8]   ;;  %s474_s20 = int_to_ptr.hbm [resolvable:$true] %s473_s20 }
  0x34   : > { %8448 = dma.hbm_to_vmem [thread:$0]  (!%p9906_p12), %s474_s20, 512, %s476_s24, [#allocation4], %s16602_s17, %s16602_s17, %s9729_s27  }
  0x35   : > { %s503_s6 = sshll.u32 %s9735_s21, 4  ;;  %s9736_s26 = smov [#allocation11]   ;;  %s504_s6 = int_to_ptr.vmem [resolvable:$true] %s503_s6 }
  0x36   : > { %8454 = dma.hbm_to_vmem [thread:$0]  (!%p9906_p12), %s502_s22, 512, %s504_s6, [#allocation7], %s16602_s17, %s16602_s17, %s9729_s27  }
  0x37   : > { %s532_s18 = sshll.u32 %s9736_s26, 4  ;;  %s556_s20 = sshll.u32 %s16533_s8, 4  ;;  %s533_s18 = int_to_ptr.vmem [resolvable:$true] %s532_s18  ;;  %s557_s20 = int_to_ptr.hbm [resolvable:$true] %s556_s20 }
  0x38   : > { %8460 = dma.hbm_to_vmem [thread:$0]  (!%p9906_p12), %s531_s2, 16, %s533_s18, [#allocation10]  }
  0x39   : > { %s9737_s24 = smov [#allocation14]   ;;  %s586_s21 = sshll.u32 %s16536_s11, 4  ;;  %s587_s21 = int_to_ptr.hbm [resolvable:$true] %s586_s21 }
  0x3a   : > { %s558_s28 = sshll.u32 %s9737_s24, 4  ;;  %s9738_s27 = smov 512   ;;  %s559_s28 = int_to_ptr.vmem [resolvable:$true] %s558_s28 }
  0x3b   : > { %s9739_s22 = smov 32   ;;  %s9740_s17 = smov [#allocation17]  }
  0x3c   : > { %8466 = dma.hbm_to_vmem [thread:$0]  (!%p9906_p12), %s557_s20, 2048, %s559_s28, [#allocation13], %s9738_s27, %s9738_s27, %s9739_s22  }
  0x3d   : > { %s588_s6 = sshll.u32 %s9740_s17, 4  ;;  %s619_s4 = sshll.u32 %s16541_s16, 4  ;;  %s589_s6 = int_to_ptr.vmem [resolvable:$true] %s588_s6  ;;  %s620_s4 = int_to_ptr.hbm [resolvable:$true] %s619_s4 }
  0x3e   : > { %8472 = dma.hbm_to_vmem [thread:$0]  (!%p9906_p12), %s587_s21, 16, %s589_s6, [#allocation16]  }
  0x3f   : > { %s9741_s2 = smov [#allocation20]   ;;  %642 = sbr.rel (%p9892_p10) target bundleno = 4839 (0x12e7), region = 88 }
  0x40   : > { %s621_s18 = sshll.u32 %s9741_s2, 4  ;;  %s622_s18 = int_to_ptr.vmem [resolvable:$true] %s621_s18 }
  0x41   : > { %8478 = dma.hbm_to_vmem [thread:$0]  (!%p9906_p12), %s620_s4, 128, %s622_s18, [#allocation19]  }
  0x44   : > { %9680 = dma.done.wait (%p8486_p9), [#allocation4], 512  }
  0x45   : > { %9682 = vsyncadd (%p8486_p9), [#allocation4], 4294966784 }
  0x46   : > { %9684 = dma.done.wait (%p8486_p9), [#allocation7], 1024  }
  0x47   : > { %9686 = vsyncadd (%p8486_p9), [#allocation7], 4294966272 }
  0x48   : > { %9688 = dma.done.wait (%p8486_p9), [#allocation10], 528  }
  0x49   : > { %9690 = vsyncadd (%p8486_p9), [#allocation10], 4294966768 }
  0x4a   : > { %9692 = dma.done.wait (%p8486_p9), [#allocation13], 2064  }
  0x4b   : > { %9694 = vsyncadd (%p8486_p9), [#allocation13], 4294965232 }
  0x4c   : > { %9696 = dma.done.wait (%p8486_p9), [#allocation16], 80  }
  0x4d   : > { %9698 = vsyncadd (%p8486_p9), [#allocation16], 4294967216 }
  0x4e   : > { %9700 = dma.done.wait (%p8486_p9), [#allocation19], 144  }
  0x4f   : > { %9702 = vsyncadd (%p8486_p9), [#allocation19], 4294967152  ;;  %p751_p13 = scmp.lt.s32.totalorder %s9864_s13, 3  ;;  %v775_v1 = vld [vmem:[#allocation3 + $0x18] sm:$0xff]  ;;  %v774_v2 = vld [vmem:[#allocation3 + $0x10] sm:$0xff]  ;;  %s16603_s28 = sld [smem:[#allocation139_spill]] }
  0x50   : > { %837 = vmatpush.msra.mxu0 %v775_v1  ;;  %v773_v3 = vld [vmem:[#allocation3 + $0x8] sm:$0xff]  ;;  %v772_v4 = vld [vmem:[#allocation3] sm:$0xff]  ;;  %vm776_vm0 = vcmask 261120   ;;  %v893_v10 = vld [vmem:[#allocation6 + $0x18] sm:$0xff]  ;;  %s15020_s19 = sand.u32 1, %s9717_s30   ;;  %s9744_s17 = smov 124  }
  0x51   : > { %s752_s0 = scalar_select %p751_p13, %s9864_s13, 3  ;;  %v892_v15 = vld [vmem:[#allocation6 + $0x10] sm:$0xff]  ;;  %v891_v19 = vld [vmem:[#allocation6 + $0x8] sm:$0xff]  ;;  %v890_v21 = vld [vmem:[#allocation6] sm:$0xff] }
  0x52   : > { %838 = vmatpush.msra.mxu0 %v774_v2  ;;  %v962_v25 = vld [vmem:[#allocation8 + $0x18] sm:$0xff]  ;;  %v961_v26 = vld [vmem:[#allocation8 + $0x10] sm:$0xff]  ;;  %v960_v27 = vld [vmem:[#allocation8 + $0x8] sm:$0xff]  ;;  %s8031_s21 = sshll.u32 %s15020_s19, 3  ;;  %s8373_s26 = sshll.u32 %s9864_s13, 3 }
  0x53   : > { %s8376_s25 = sshll.u32 %s752_s0, 7  ;;  %975 = vmatpush.msra.mxu2 %v962_v25  ;;  %v959_v29 = vld [vmem:[#allocation8] sm:$0xff]  ;;  %v1031_v25 = vld [vmem:[%s16539_s14 + $0x18] sm:$0xff]  ;;  %s15025_s27 = scalar_lea.vmem [#allocation22], %s8031_s21 }
  0x54   : > { %839 = vmatpush.msra.mxu0 %v773_v3  ;;  %s7808_s6 = sshll.u32 %s15025_s27, 4  ;;  %s17106_s2 = sld [smem:[#allocation145_spill]]  ;;  %s7809_s6 = int_to_ptr.vmem [resolvable:$true] %s7808_s6 }
  0x55   : > { %s10002_s1 = scalar_lea.vmem %s16603_s28, %s8376_s25  ;;  %976 = vmatpush.msra.mxu2 %v961_v26  ;;  %v1035_v26 = vld [vmem:[%s16539_s14 + $0x38] sm:$0xff]  ;;  %s7783_s25 = scalar_lea.sflag [#allocation23], %s15020_s19 }
  0x56   : > { %v756_v5 = vld [vmem:[%s10002_s1] sm:$0xff]  ;;  %840 = vmatpush.msra.mxu0 %v772_v4  ;;  %v757_v6 = vld [vmem:[%s10002_s1 + $0x8] sm:$0xff]  ;;  %v758_v7 = vld [vmem:[%s10002_s1 + $0x10] sm:$0xff] }
  0x57   : > { %8034 = vmatmul.msk.f32.vlgmr.msra.gmra.mxu0 %vm776_vm0, %v756_v5  ;;  %v759_v8 = vld [vmem:[%s10002_s1 + $0x18] sm:$0xff]  ;;  %v760_v9 = vld [vmem:[%s10002_s1 + $0x20] sm:$0xff]  ;;  %v761_v11 = vld [vmem:[%s10002_s1 + $0x28] sm:$0xff]  ;;  %977 = vmatpush.msra.mxu2 %v960_v27 }
  0x58   : > { %906 = vmatpush.msrb.mxu0 %v893_v10  ;;  %v762_v12 = vld [vmem:[%s10002_s1 + $0x30] sm:$0xff]  ;;  %v763_v13 = vld [vmem:[%s10002_s1 + $0x38] sm:$0xff]  ;;  %v764_v14 = vld [vmem:[%s10002_s1 + $0x40] sm:$0xff] }
  0x59   : > { %v765_v16 = vld [vmem:[%s10002_s1 + $0x48] sm:$0xff]  ;;  %v766_v17 = vld [vmem:[%s10002_s1 + $0x50] sm:$0xff]  ;;  %v767_v18 = vld [vmem:[%s10002_s1 + $0x58] sm:$0xff]  ;;  %978 = vmatpush.msra.mxu2 %v959_v29 }
  0x5a   : > { %907 = vmatpush.msrb.mxu0 %v892_v15  ;;  %v768_v20 = vld [vmem:[%s10002_s1 + $0x60] sm:$0xff]  ;;  %v769_v22 = vld [vmem:[%s10002_s1 + $0x68] sm:$0xff]  ;;  %v770_v23 = vld [vmem:[%s10002_s1 + $0x70] sm:$0xff]  ;;  %8066 = vmatmul.msk.f32.vlgmr.msra.gmra.mxu2 %vm776_vm0, %v756_v5  ;;  %s7806_s18 = scalar_lea.hbm %s17106_s2, %s8373_s26 }
  0x5b   : > { %v771_v24 = vld [vmem:[%s10002_s1 + $0x78] sm:$0xff]  ;;  %s7810_s0 = sshll.u32 %s7806_s18, 4  ;;  %s7811_s0 = int_to_ptr.hbm [resolvable:$true] %s7810_s0 }
  0x5c   : > { %908 = vmatpush.msrb.mxu0 %v891_v19  ;;  %s9621_s20 = sshra.s32 %s7811_s0, 4  ;;  %s9622_s20 = int_to_ptr.hbm [resolvable:$true] %s9621_s20 }
  0x5d   : > { %s9623_s24 = scalar_lea.hbm %s9622_s20, 8  ;;  %p9628_p3 = scmp.lt.s32.totalorder %s9622_s20, %s17106_s2 }
  0x5e   : > { %909 = vmatpush.msrb.mxu0 %v890_v21  ;;  %v1030_v21 = vld [vmem:[%s16539_s14 + $0x10] sm:$0xff]  ;;  %p9624_p0 = scmp.ne.s32.totalorder %s9622_s20, %s9623_s24 }
  0x5f   : > { %8035 = vmatmul.msk.f32.gmra.mxu0 %vm776_vm0, %v757_v6 }
  0x60   : > { %p9625_p1 = pnand %p9624_p0, %p9881_p5 }
  0x62   : > { %8067 = vmatmul.msk.f32.gmra.mxu2 %vm776_vm0, %v757_v6  ;;  %p9626_p2 = pneg %p9625_p1 }
  0x67   : > { %8036 = vmatmul.msk.f32.gmra.mxu0 %vm776_vm0, %v758_v7 }
  0x6a   : > { %8068 = vmatmul.msk.f32.gmra.mxu2 %vm776_vm0, %v758_v7 }
  0x6f   : > { %8037 = vmatmul.msk.f32.gmra.mxu0 %vm776_vm0, %v759_v8 }
  0x72   : > { %8069 = vmatmul.msk.f32.gmra.mxu2 %vm776_vm0, %v759_v8 }
  0x77   : > { %8038 = vmatmul.msk.f32.gmra.mxu0 %vm776_vm0, %v760_v9 }
  0x7a   : > { %8070 = vmatmul.msk.f32.gmra.mxu2 %vm776_vm0, %v760_v9 }
  0x7f   : > { %8039 = vmatmul.msk.f32.gmra.mxu0 %vm776_vm0, %v761_v11 }
  0x82   : > { %8071 = vmatmul.msk.f32.gmra.mxu2 %vm776_vm0, %v761_v11 }
  0x87   : > { %8040 = vmatmul.msk.f32.gmra.mxu0 %vm776_vm0, %v762_v12 }
  0x8a   : > { %8072 = vmatmul.msk.f32.gmra.mxu2 %vm776_vm0, %v762_v12 }
  0x8f   : > { %8041 = vmatmul.msk.f32.gmra.mxu0 %vm776_vm0, %v763_v13 }
  0x92   : > { %8073 = vmatmul.msk.f32.gmra.mxu2 %vm776_vm0, %v763_v13 }
  0x97   : > { %8042 = vmatmul.msk.f32.gmra.mxu0 %vm776_vm0, %v764_v14 }
  0x9a   : > { %8074 = vmatmul.msk.f32.gmra.mxu2 %vm776_vm0, %v764_v14 }
  0x9f   : > { %8043 = vmatmul.msk.f32.gmra.mxu0 %vm776_vm0, %v765_v16 }
  0xa2   : > { %8075 = vmatmul.msk.f32.gmra.mxu2 %vm776_vm0, %v765_v16 }
  0xa7   : > { %8044 = vmatmul.msk.f32.gmra.mxu0 %vm776_vm0, %v766_v17 }
  0xaa   : > { %8076 = vmatmul.msk.f32.gmra.mxu2 %vm776_vm0, %v766_v17 }
  0xaf   : > { %8045 = vmatmul.msk.f32.gmra.mxu0 %vm776_vm0, %v767_v18 }
  0xb2   : > { %8077 = vmatmul.msk.f32.gmra.mxu2 %vm776_vm0, %v767_v18 }
  0xb7   : > { %8046 = vmatmul.msk.f32.gmra.mxu0 %vm776_vm0, %v768_v20 }
  0xba   : > { %8078 = vmatmul.msk.f32.gmra.mxu2 %vm776_vm0, %v768_v20 }
  0xbf   : > { %8047 = vmatmul.msk.f32.gmra.mxu0 %vm776_vm0, %v769_v22 }
  0xc2   : > { %8079 = vmatmul.msk.f32.gmra.mxu2 %vm776_vm0, %v769_v22 }
  0xc7   : > { %8048 = vmatmul.msk.f32.gmra.mxu0 %vm776_vm0, %v770_v23 }
  0xca   : > { %8080 = vmatmul.msk.f32.gmra.mxu2 %vm776_vm0, %v770_v23 }
  0xcf   : > { %8049 = vmatmul.msk.f32.gmra.mxu0 %vm776_vm0, %v771_v24 }
  0xd2   : > { %8081 = vmatmul.msk.f32.gmra.mxu2 %vm776_vm0, %v771_v24 }
  0xd4   : > { %v10036_v28 = vpop.f32.mrf.mxu0 }
  0xd7   : > { %8050 = vmatmul.msk.f32.vlgmr.msrb.gmra.mxu0 %vm776_vm0, %v756_v5 }
  0xdc   : > { %v10040_v30 = vpop.f32.mrf.mxu0 }
  0xdd   : > { %v10102_v46 = vpop.f32.mrf.mxu2 }
  0xdf   : > { %8051 = vmatmul.msk.f32.gmra.mxu0 %vm776_vm0, %v757_v6 }
  0xe4   : > { %v10044_v31 = vpop.f32.mrf.mxu0 }
  0xe5   : > { %v983_v48 = vpop.f32.mrf.mxu2 }
  0xe7   : > { %8052 = vmatmul.msk.f32.gmra.mxu0 %vm776_vm0, %v758_v7 }
  0xec   : > { %v10048_v32 = vpop.f32.mrf.mxu0 }
  0xed   : > { %v986_v50 = vpop.f32.mrf.mxu2  ;;  %v1159_v27 = vmul.f32 %v1031_v25, %v10048_v32 }
  0xef   : > { %8053 = vmatmul.msk.f32.gmra.mxu0 %vm776_vm0, %v759_v8 }
  0xf4   : > { %v10052_v33 = vpop.f32.mrf.mxu0 }
  0xf5   : > { %v989_v52 = vpop.f32.mrf.mxu2 }
  0xf7   : > { %8054 = vmatmul.msk.f32.gmra.mxu0 %vm776_vm0, %v760_v9 }
  0xfc   : > { %v10056_v34 = vpop.f32.mrf.mxu0 }
  0xfd   : > { %v992_v54 = vpop.f32.mrf.mxu2 }
  0xff   : > { %8055 = vmatmul.msk.f32.gmra.mxu0 %vm776_vm0, %v761_v11 }
 0x104   : > { %v10060_v35 = vpop.f32.mrf.mxu0 }
 0x105   : > { %v995_v56 = vpop.f32.mrf.mxu2 }
 0x107   : > { %8056 = vmatmul.msk.f32.gmra.mxu0 %vm776_vm0, %v762_v12 }
 0x10c   : > { %v10064_v36 = vpop.f32.mrf.mxu0 }
 0x10d   : > { %v998_v58 = vpop.f32.mrf.mxu2  ;;  %v1163_v29 = vmul.f32 %v1035_v26, %v10064_v36 }
 0x10f   : > { %8057 = vmatmul.msk.f32.gmra.mxu0 %vm776_vm0, %v763_v13  ;;  %v1028_v13 = vld [vmem:[%s16539_s14] sm:$0xff] }
 0x110   : > { %v1156_v15 = vmul.f32 %v1028_v13, %v10036_v28 }
 0x114   : > { %v10068_v37 = vpop.f32.mrf.mxu0 }
 0x115   : > { %v1001_v60 = vpop.f32.mrf.mxu2 }
 0x117   : > { %8058 = vmatmul.msk.f32.gmra.mxu0 %vm776_vm0, %v764_v14  ;;  %v1032_v14 = vld [vmem:[%s16539_s14 + $0x20] sm:$0xff] }
 0x11c   : > { %v10072_v38 = vpop.f32.mrf.mxu0 }
 0x11d   : > { %v1004_v62 = vpop.f32.mrf.mxu2 }
 0x11f   : > { %8059 = vmatmul.msk.f32.gmra.mxu0 %vm776_vm0, %v765_v16  ;;  %v1160_v16 = vmul.f32 %v1032_v14, %v10052_v33 }
 0x124   : > { %v10076_v39 = vpop.f32.mrf.mxu0 }
 0x125   : > { %v1007_v0 = vpop.f32.mrf.mxu2 }
 0x127   : > { %8060 = vmatmul.msk.f32.gmra.mxu0 %vm776_vm0, %v766_v17  ;;  %v1029_v17 = vld [vmem:[%s16539_s14 + $0x8] sm:$0xff] }
 0x128   : > { %v1157_v19 = vmul.f32 %v1029_v17, %v10040_v30 }
 0x12c   : > { %v10080_v40 = vpop.f32.mrf.mxu0 }
 0x12d   : > { %v1010_v2 = vpop.f32.mrf.mxu2 }
 0x12f   : > { %8061 = vmatmul.msk.f32.gmra.mxu0 %vm776_vm0, %v767_v18  ;;  %v1033_v18 = vld [vmem:[%s16539_s14 + $0x28] sm:$0xff] }
 0x134   : > { %v10084_v41 = vpop.f32.mrf.mxu0 }
 0x135   : > { %v1013_v4 = vpop.f32.mrf.mxu2 }
 0x137   : > { %8062 = vmatmul.msk.f32.gmra.mxu0 %vm776_vm0, %v768_v20  ;;  %v1161_v20 = vmul.f32 %v1033_v18, %v10056_v34 }
 0x13c   : > { %v10088_v42 = vpop.f32.mrf.mxu0 }
 0x13d   : > { %v1016_v6 = vpop.f32.mrf.mxu2 }
 0x13f   : > { %8063 = vmatmul.msk.f32.gmra.mxu0 %vm776_vm0, %v769_v22  ;;  %v1034_v22 = vld [vmem:[%s16539_s14 + $0x30] sm:$0xff] }
 0x144   : > { %v10092_v43 = vpop.f32.mrf.mxu0 }
 0x145   : > { %v1019_v8 = vpop.f32.mrf.mxu2 }
 0x147   : > { %8064 = vmatmul.msk.f32.gmra.mxu0 %vm776_vm0, %v770_v23  ;;  %v1158_v23 = vmul.f32 %v1030_v21, %v10044_v31 }
 0x14c   : > { %v10096_v44 = vpop.f32.mrf.mxu0 }
 0x14d   : > { %v1022_v10 = vpop.f32.mrf.mxu2 }
 0x14f   : > { %8065 = vmatmul.msk.f32.gmra.mxu0 %vm776_vm0, %v771_v24  ;;  %v1162_v24 = vmul.f32 %v1034_v22, %v10060_v35 }
 0x154   : > { %v10100_v45 = vpop.f32.mrf.mxu0 }
 0x155   : > { %v1025_v12 = vpop.f32.mrf.mxu2 }
 0x156   : > { %5339 = vmatpush.msra.mxu1 %v1025_v12 }
 0x158   : > { %5340 = vmatpush.msra.mxu1 %v1022_v10 }
 0x15a   : > { %5341 = vmatpush.msra.mxu1 %v1019_v8  ;;  %v1284_v8 = vld [vmem:[%s16540_s15] sm:$0xff] }
 0x15c   : > { %v10104_v47 = vpop.f32.mrf.mxu0  ;;  %5342 = vmatpush.msra.mxu1 %v1016_v6 }
 0x15e   : > { %5343 = vmatpush.msra.mxu1 %v1013_v4 }
 0x160   : > { %5344 = vmatpush.msra.mxu1 %v1010_v2 }
 0x162   : > { %5345 = vmatpush.msra.mxu1 %v1007_v0 }
 0x164   : > { %v10106_v49 = vpop.f32.mrf.mxu0  ;;  %5346 = vmatpush.msra.mxu1 %v1004_v62 }
 0x166   : > { %5347 = vmatpush.msra.mxu1 %v1001_v60 }
 0x168   : > { %5348 = vmatpush.msra.mxu1 %v998_v58 }
 0x16a   : > { %5349 = vmatpush.msra.mxu1 %v995_v56 }
 0x16c   : > { %v10108_v51 = vpop.f32.mrf.mxu0  ;;  %5350 = vmatpush.msra.mxu1 %v992_v54 }
 0x16e   : > { %5351 = vmatpush.msra.mxu1 %v989_v52 }
 0x170   : > { %5352 = vmatpush.msra.mxu1 %v986_v50 }
 0x172   : > { %5353 = vmatpush.msra.mxu1 %v983_v48 }
 0x174   : > { %v10110_v53 = vpop.f32.mrf.mxu0  ;;  %5354 = vmatpush.msra.mxu1 %v10102_v46 }
 0x17c   : > { %v926_v55 = vpop.f32.mrf.mxu0 }
 0x184   : > { %v929_v57 = vpop.f32.mrf.mxu0 }
 0x18c   : > { %v932_v59 = vpop.f32.mrf.mxu0 }
 0x194   : > { %v935_v61 = vpop.f32.mrf.mxu0 }
 0x19c   : > { %v938_v63 = vpop.f32.mrf.mxu0 }
 0x1a4   : > { %v941_v1 = vpop.f32.mrf.mxu0 }
 0x1ac   : > { %v944_v3 = vpop.f32.mrf.mxu0 }
 0x1b4   : > { %v947_v5 = vpop.f32.mrf.mxu0 }
 0x1bc   : > { %v950_v7 = vpop.f32.mrf.mxu0 }
 0x1c4   : > { %v953_v9 = vpop.f32.mrf.mxu0 }
 0x1cc   : > { %v956_v11 = vpop.f32.mrf.mxu0 }
 0x1cd   : > { %8082 = vmatpush.xpose.msk.msrb.mxu2 %vm776_vm0, %v956_v11  ;;  %8377 = vmatpush.xpose.msk.msra.mxu3 %vm776_vm0, %v956_v11  ;;  %v1049_v11 = vld [vmem:[%s16539_s14 + $0xa8] sm:$0xff] }
 0x1ce   : > { %v1177_v14 = vmul.f32 %v1049_v11, %v10056_v34 }
 0x1d1   : > { %8083 = vmatpush.xpose.msk.msrb.mxu2 %vm776_vm0, %v953_v9  ;;  %8378 = vmatpush.xpose.msk.msra.mxu3 %vm776_vm0, %v953_v9 }
 0x1d5   : > { %8084 = vmatpush.xpose.msk.msrb.mxu2 %vm776_vm0, %v950_v7  ;;  %8379 = vmatpush.xpose.msk.msra.mxu3 %vm776_vm0, %v950_v7  ;;  %v1288_v7 = vld [vmem:[%s16540_s15 + $0x20] sm:$0xff] }
 0x1d9   : > { %8085 = vmatpush.xpose.msk.msrb.mxu2 %vm776_vm0, %v947_v5  ;;  %8380 = vmatpush.xpose.msk.msra.mxu3 %vm776_vm0, %v947_v5  ;;  %v1048_v5 = vld [vmem:[%s16539_s14 + $0xa0] sm:$0xff] }
 0x1da   : > { %v1176_v6 = vmul.f32 %v1048_v5, %v10052_v33 }
 0x1dd   : > { %8086 = vmatpush.xpose.msk.msrb.mxu2 %vm776_vm0, %v944_v3  ;;  %8381 = vmatpush.xpose.msk.msra.mxu3 %vm776_vm0, %v944_v3  ;;  %v1047_v3 = vld [vmem:[%s16539_s14 + $0x98] sm:$0xff] }
 0x1de   : > { %v1175_v4 = vmul.f32 %v1047_v3, %v10048_v32 }
 0x1e1   : > { %8087 = vmatpush.xpose.msk.msrb.mxu2 %vm776_vm0, %v941_v1  ;;  %8382 = vmatpush.xpose.msk.msra.mxu3 %vm776_vm0, %v941_v1  ;;  %v1046_v1 = vld [vmem:[%s16539_s14 + $0x90] sm:$0xff] }
 0x1e2   : > { %v1174_v2 = vmul.f32 %v1046_v1, %v10044_v31  ;;  %v1056_v1 = vld [vmem:[%s16539_s14 + $0xe0] sm:$0xff] }
 0x1e5   : > { %8088 = vmatpush.xpose.msk.msrb.mxu2 %vm776_vm0, %v938_v63  ;;  %8383 = vmatpush.xpose.msk.msra.mxu3 %vm776_vm0, %v938_v63  ;;  %v1045_v63 = vld [vmem:[%s16539_s14 + $0x88] sm:$0xff] }
 0x1e6   : > { %v1173_v0 = vmul.f32 %v1045_v63, %v10040_v30 }
 0x1e9   : > { %8089 = vmatpush.xpose.msk.msrb.mxu2 %vm776_vm0, %v935_v61  ;;  %8384 = vmatpush.xpose.msk.msra.mxu3 %vm776_vm0, %v935_v61  ;;  %v1044_v61 = vld [vmem:[%s16539_s14 + $0x80] sm:$0xff] }
 0x1ea   : > { %v1172_v62 = vmul.f32 %v1044_v61, %v10036_v28 }
 0x1ed   : > { %8090 = vmatpush.xpose.msk.msrb.mxu2 %vm776_vm0, %v932_v59  ;;  %8385 = vmatpush.xpose.msk.msra.mxu3 %vm776_vm0, %v932_v59  ;;  %v1043_v59 = vld [vmem:[%s16539_s14 + $0x78] sm:$0xff] }
 0x1ee   : > { %v1171_v60 = vmul.f32 %v1043_v59, %v10096_v44  ;;  %v1054_v59 = vld [vmem:[%s16539_s14 + $0xd0] sm:$0xff] }
 0x1f1   : > { %8091 = vmatpush.xpose.msk.msrb.mxu2 %vm776_vm0, %v929_v57  ;;  %8386 = vmatpush.xpose.msk.msra.mxu3 %vm776_vm0, %v929_v57  ;;  %v1042_v57 = vld [vmem:[%s16539_s14 + $0x70] sm:$0xff] }
 0x1f2   : > { %v1170_v58 = vmul.f32 %v1042_v57, %v10092_v43 }
 0x1f5   : > { %8092 = vmatpush.xpose.msk.msrb.mxu2 %vm776_vm0, %v926_v55  ;;  %8387 = vmatpush.xpose.msk.msra.mxu3 %vm776_vm0, %v926_v55  ;;  %v1041_v55 = vld [vmem:[%s16539_s14 + $0x68] sm:$0xff] }
 0x1f6   : > { %v1169_v56 = vmul.f32 %v1041_v55, %v10088_v42 }
 0x1f9   : > { %8093 = vmatpush.xpose.msk.msrb.mxu2 %vm776_vm0, %v10110_v53  ;;  %8388 = vmatpush.xpose.msk.msra.mxu3 %vm776_vm0, %v10110_v53  ;;  %v1040_v53 = vld [vmem:[%s16539_s14 + $0x60] sm:$0xff] }
 0x1fa   : > { %v1168_v54 = vmul.f32 %v1040_v53, %v10084_v41 }
 0x1fd   : > { %8094 = vmatpush.xpose.msk.msrb.mxu2 %vm776_vm0, %v10108_v51  ;;  %8389 = vmatpush.xpose.msk.msra.mxu3 %vm776_vm0, %v10108_v51  ;;  %v1039_v51 = vld [vmem:[%s16539_s14 + $0x58] sm:$0xff] }
 0x1fe   : > { %v1167_v52 = vmul.f32 %v1039_v51, %v10080_v40  ;;  %v1052_v51 = vld [vmem:[%s16539_s14 + $0xc0] sm:$0xff] }
 0x201   : > { %8095 = vmatpush.xpose.msk.msrb.mxu2 %vm776_vm0, %v10106_v49  ;;  %8390 = vmatpush.xpose.msk.msra.mxu3 %vm776_vm0, %v10106_v49  ;;  %v1038_v49 = vld [vmem:[%s16539_s14 + $0x50] sm:$0xff] }
 0x202   : > { %v1166_v50 = vmul.f32 %v1038_v49, %v10076_v39 }
 0x205   : > { %8096 = vmatpush.xpose.msk.msrb.mxu2 %vm776_vm0, %v10104_v47  ;;  %8391 = vmatpush.xpose.msk.msra.mxu3 %vm776_vm0, %v10104_v47  ;;  %v1037_v47 = vld [vmem:[%s16539_s14 + $0x48] sm:$0xff] }
 0x206   : > { %v1165_v48 = vmul.f32 %v1037_v47, %v10072_v38  ;;  %v1291_v47 = vld [vmem:[%s16540_s15 + $0x38] sm:$0xff] }
 0x209   : > { %8097 = vmatpush.xpose.msk.msrb.mxu2 %vm776_vm0, %v10100_v45  ;;  %8392 = vmatpush.xpose.msk.msra.mxu3 %vm776_vm0, %v10100_v45  ;;  %v1036_v45 = vld [vmem:[%s16539_s14 + $0x40] sm:$0xff] }
 0x20a   : > { %v1164_v46 = vmul.f32 %v1036_v45, %v10068_v37 }
 0x20c   : > { %8098 = vmatmul.msk.f32.vlgmr.msrb.gmra.mxu2 %vm776_vm0, %v1156_v15  ;;  %8102 = vmatmul.msk.f32.vlgmr.msra.gmra.mxu3 %vm776_vm0, %v1160_v16  ;;  %v1289_v15 = vld [vmem:[%s16540_s15 + $0x28] sm:$0xff] }
 0x20d   : > { %v1285_v16 = vld [vmem:[%s16540_s15 + $0x8] sm:$0xff] }
 0x214   : > { %8099 = vmatmul.msk.f32.gmra.mxu2 %vm776_vm0, %v1157_v19  ;;  %8103 = vmatmul.msk.f32.gmra.mxu3 %vm776_vm0, %v1161_v20  ;;  %v1050_v19 = vld [vmem:[%s16539_s14 + $0xb0] sm:$0xff] }
 0x215   : > { %v1178_v22 = vmul.f32 %v1050_v19, %v10060_v35 }
 0x21c   : > { %8100 = vmatmul.msk.f32.gmra.mxu2 %vm776_vm0, %v1158_v23  ;;  %8104 = vmatmul.msk.f32.gmra.mxu3 %vm776_vm0, %v1162_v24  ;;  %v1286_v23 = vld [vmem:[%s16540_s15 + $0x10] sm:$0xff] }
 0x21d   : > { %v1290_v24 = vld [vmem:[%s16540_s15 + $0x30] sm:$0xff] }
 0x224   : > { %8101 = vmatmul.msk.f32.gmra.mxu2 %vm776_vm0, %v1159_v27  ;;  %8105 = vmatmul.msk.f32.gmra.mxu3 %vm776_vm0, %v1163_v29  ;;  %v1051_v27 = vld [vmem:[%s16539_s14 + $0xb8] sm:$0xff] }
 0x22c   : > { %8106 = vmatmul.msk.f32.gmra.mxu3 %vm776_vm0, %v1164_v46  ;;  %v1179_v46 = vmul.f32 %v1051_v27, %v10064_v36 }
 0x234   : > { %8107 = vmatmul.msk.f32.gmra.mxu3 %vm776_vm0, %v1165_v48  ;;  %v1287_v48 = vld [vmem:[%s16540_s15 + $0x18] sm:$0xff] }
 0x23c   : > { %8108 = vmatmul.msk.f32.gmra.mxu3 %vm776_vm0, %v1166_v50 }
 0x244   : > { %8109 = vmatmul.msk.f32.gmra.mxu3 %vm776_vm0, %v1167_v52 }
 0x24c   : > { %8110 = vmatmul.msk.f32.gmra.mxu3 %vm776_vm0, %v1168_v54  ;;  %v1180_v54 = vmul.f32 %v1052_v51, %v10068_v37 }
 0x254   : > { %8111 = vmatmul.msk.f32.gmra.mxu3 %vm776_vm0, %v1169_v56  ;;  %v1053_v56 = vld [vmem:[%s16539_s14 + $0xc8] sm:$0xff] }
 0x255   : > { %v1181_v57 = vmul.f32 %v1053_v56, %v10072_v38 }
 0x25c   : > { %8112 = vmatmul.msk.f32.gmra.mxu3 %vm776_vm0, %v1170_v58 }
 0x264   : > { %8113 = vmatmul.msk.f32.gmra.mxu3 %vm776_vm0, %v1171_v60  ;;  %v1182_v60 = vmul.f32 %v1054_v59, %v10076_v39 }
 0x26c   : > { %8114 = vmatmul.msk.f32.gmra.mxu3 %vm776_vm0, %v1172_v62  ;;  %v1055_v62 = vld [vmem:[%s16539_s14 + $0xd8] sm:$0xff] }
 0x26d   : > { %v1183_v63 = vmul.f32 %v1055_v62, %v10080_v40 }
 0x274   : > { %8115 = vmatmul.msk.f32.gmra.mxu3 %vm776_vm0, %v1173_v0 }
 0x27c   : > { %8116 = vmatmul.msk.f32.gmra.mxu3 %vm776_vm0, %v1174_v2  ;;  %v1184_v2 = vmul.f32 %v1056_v1, %v10084_v41 }
 0x284   : > { %8117 = vmatmul.msk.f32.gmra.mxu3 %vm776_vm0, %v1175_v4  ;;  %v1057_v4 = vld [vmem:[%s16539_s14 + $0xe8] sm:$0xff] }
 0x285   : > { %v1185_v5 = vmul.f32 %v1057_v4, %v10088_v42 }
 0x28c   : > { %8118 = vmatmul.msk.f32.gmra.mxu3 %vm776_vm0, %v1176_v6 }
 0x28f   : > { %v1861_v9 = vpop.f32.mrf.mxu2  ;;  %v1873_v10 = vpop.f32.mrf.mxu3 }
 0x290   : > { %v10269_v12 = vadd.f32 %v1873_v10, %v1288_v7  ;;  %v10271_v13 = vadd.f32 %v1861_v9, %v1284_v8  ;;  %v1058_v7 = vld [vmem:[%s16539_s14 + $0xf0] sm:$0xff]  ;;  %v1059_v10 = vld [vmem:[%s16539_s14 + $0xf8] sm:$0xff] }
 0x291   : > { %v1186_v8 = vmul.f32 %v1058_v7, %v10092_v43  ;;  %v1187_v11 = vmul.f32 %v1059_v10, %v10096_v44 }
 0x292   : > { %2253 = vmax.xlane.f32.xlu2 %v10269_v12  ;;  %2245 = vmax.xlane.f32.xlu0 %v10271_v13 }
 0x294   : > { %8119 = vmatmul.msk.f32.gmra.mxu3 %vm776_vm0, %v1177_v14 }
 0x297   : > { %v1864_v17 = vpop.f32.mrf.mxu2  ;;  %v1876_v18 = vpop.f32.mrf.mxu3 }
 0x298   : > { %v10286_v20 = vadd.f32 %v1876_v18, %v1289_v15  ;;  %v10288_v21 = vadd.f32 %v1864_v17, %v1285_v16  ;;  %v1060_v15 = vld [vmem:[%s16539_s14 + $0x100] sm:$0xff]  ;;  %v1061_v18 = vld [vmem:[%s16539_s14 + $0x108] sm:$0xff] }
 0x299   : > { %v1188_v16 = vmul.f32 %v1060_v15, %v10036_v28  ;;  %v1189_v19 = vmul.f32 %v1061_v18, %v10040_v30 }
 0x29a   : > { %2255 = vmax.xlane.f32.xlu2 %v10286_v20  ;;  %2247 = vmax.xlane.f32.xlu0 %v10288_v21 }
 0x29c   : > { %8120 = vmatmul.msk.f32.gmra.mxu3 %vm776_vm0, %v1178_v22 }
 0x29f   : > { %v1867_v25 = vpop.f32.mrf.mxu2  ;;  %v1879_v26 = vpop.f32.mrf.mxu3 }
 0x2a0   : > { %v10303_v29 = vadd.f32 %v1867_v25, %v1286_v23  ;;  %v10305_v45 = vadd.f32 %v1879_v26, %v1290_v24  ;;  %v1062_v23 = vld [vmem:[%s16539_s14 + $0x110] sm:$0xff]  ;;  %v1063_v26 = vld [vmem:[%s16539_s14 + $0x118] sm:$0xff] }
 0x2a1   : > { %v1190_v24 = vmul.f32 %v1062_v23, %v10044_v31  ;;  %v1191_v27 = vmul.f32 %v1063_v26, %v10048_v32 }
 0x2a2   : > { %2249 = vmax.xlane.f32.xlu1 %v10303_v29  ;;  %2257 = vmax.xlane.f32.xlu0 %v10305_v45 }
 0x2a4   : > { %8121 = vmatmul.msk.f32.gmra.mxu3 %vm776_vm0, %v1179_v46 }
 0x2a7   : > { %v1870_v49 = vpop.f32.mrf.mxu2  ;;  %v1882_v50 = vpop.f32.mrf.mxu3 }
 0x2a8   : > { %v10320_v52 = vadd.f32 %v1882_v50, %v1291_v47  ;;  %v10322_v53 = vadd.f32 %v1870_v49, %v1287_v48  ;;  %v1064_v49 = vld [vmem:[%s16539_s14 + $0x120] sm:$0xff] }
 0x2a9   : > { %v1192_v51 = vmul.f32 %v1064_v49, %v10052_v33 }
 0x2aa   : > { %2259 = vmax.xlane.f32.xlu2 %v10320_v52  ;;  %2251 = vmax.xlane.f32.xlu1 %v10322_v53 }
 0x2ac   : > { %8122 = vmatmul.msk.f32.gmra.mxu3 %vm776_vm0, %v1180_v54 }
 0x2af   : > { %v10328_v55 = vpop.f32.mrf.mxu3 }
 0x2b4   : > { %8123 = vmatmul.msk.f32.gmra.mxu3 %vm776_vm0, %v1181_v57 }
 0x2b7   : > { %v10335_v58 = vpop.f32.mrf.mxu3 }
 0x2bc   : > { %8124 = vmatmul.msk.f32.gmra.mxu3 %vm776_vm0, %v1182_v60 }
 0x2bf   : > { %v10342_v61 = vpop.f32.mrf.mxu3 }
 0x2c4   : > { %8125 = vmatmul.msk.f32.gmra.mxu3 %vm776_vm0, %v1183_v63 }
 0x2c7   : > { %v10349_v0 = vpop.f32.mrf.mxu3 }
 0x2cc   : > { %8126 = vmatmul.msk.f32.gmra.mxu3 %vm776_vm0, %v1184_v2 }
 0x2cf   : > { %v10356_v3 = vpop.f32.mrf.mxu3 }
 0x2d4   : > { %8127 = vmatmul.msk.f32.gmra.mxu3 %vm776_vm0, %v1185_v5  ;;  %v1066_v5 = vld [vmem:[%s16539_s14 + $0x130] sm:$0xff] }
 0x2d7   : > { %v10363_v6 = vpop.f32.mrf.mxu3 }
 0x2dc   : > { %8128 = vmatmul.msk.f32.gmra.mxu3 %vm776_vm0, %v1186_v8 }
 0x2df   : > { %v10370_v9 = vpop.f32.mrf.mxu3 }
 0x2e4   : > { %8129 = vmatmul.msk.f32.gmra.mxu3 %vm776_vm0, %v1187_v11 }
 0x2e7   : > { %v10377_v14 = vpop.f32.mrf.mxu3 }
 0x2ec   : > { %8130 = vmatmul.msk.f32.gmra.mxu3 %vm776_vm0, %v1188_v16  ;;  %v1293_v16 = vld [vmem:[%s16540_s15 + $0x48] sm:$0xff] }
 0x2ef   : > { %v10384_v17 = vpop.f32.mrf.mxu3 }
 0x2f4   : > { %8131 = vmatmul.msk.f32.gmra.mxu3 %vm776_vm0, %v1189_v19 }
 0x2f7   : > { %v10391_v22 = vpop.f32.mrf.mxu3 }
 0x2fc   : > { %8132 = vmatmul.msk.f32.gmra.mxu3 %vm776_vm0, %v1190_v24 }
 0x2ff   : > { %v10398_v25 = vpop.f32.mrf.mxu3 }
 0x304   : > { %8133 = vmatmul.msk.f32.gmra.mxu3 %vm776_vm0, %v1191_v27  ;;  %v10455_v27 = vadd.f32 %v10335_v58, %v1293_v16  ;;  %v1070_v16 = vld [vmem:[%s16539_s14 + $0x150] sm:$0xff] }
 0x305   : > { %v2246_v46 = vpop.xlane.xlu0 %2245  ;;  %v2254_v63 = vpop.xlane.xlu2 %2253 }
 0x306   : > { %v2501_v47 = vsub.f32 %v10271_v13, %v2246_v46  ;;  %v1065_v13 = vld [vmem:[%s16539_s14 + $0x128] sm:$0xff]  ;;  %v2505_v11 = vsub.f32 %v10269_v12, %v2254_v63  ;;  %v1067_v12 = vld [vmem:[%s16539_s14 + $0x138] sm:$0xff] }
 0x307   : > { %v10406_v48 = vpop.f32.mrf.mxu3  ;;  %v1193_v62 = vmul.f32 %v1065_v13, %v10056_v34  ;;  %v1295_v63 = vld [vmem:[%s16540_s15 + $0x58] sm:$0xff] }
 0x308   : > { %v2629_v50 = vmul.f32 1.442695, %v2501_v47  ;;  %v1294_v47 = vld [vmem:[%s16540_s15 + $0x50] sm:$0xff] }
 0x30a   : > { %8563 = vpow2.f32 %v2629_v50 }
 0x30c   : > { %8134 = vmatmul.msk.f32.gmra.mxu3 %vm776_vm0, %v1192_v51  ;;  %v10468_v51 = vadd.f32 %v10342_v61, %v1294_v47 }
 0x30d   : > { %v2248_v54 = vpop.xlane.xlu0 %2247  ;;  %v2256_v19 = vpop.xlane.xlu2 %2255 }
 0x30e   : > { %v2502_v56 = vsub.f32 %v10288_v21, %v2248_v54  ;;  %v1292_v21 = vld [vmem:[%s16540_s15 + $0x40] sm:$0xff]  ;;  %v2506_v46 = vsub.f32 %v10286_v20, %v2256_v19  ;;  %v1198_v19 = vmul.f32 %v1070_v16, %v10076_v39 }
 0x30f   : > { %v10414_v57 = vpop.f32.mrf.mxu3  ;;  %v10434_v8 = vadd.f32 %v10328_v55, %v1292_v21  ;;  %v2637_v55 = vmul.f32 1.442695, %v2505_v11  ;;  %v1068_v20 = vld [vmem:[%s16539_s14 + $0x140] sm:$0xff] }
 0x310   : > { %v2631_v59 = vmul.f32 1.442695, %v2502_v56  ;;  %v10419_v60 = vpop.eup %8563  ;;  %v2639_v49 = vmul.f32 1.442695, %v2506_v46  ;;  %v1196_v61 = vmul.f32 %v1068_v20, %v10068_v37  ;;  %v1071_v46 = vld [vmem:[%s16539_s14 + $0x158] sm:$0xff]  ;;  %v1072_v20 = vld [vmem:[%s16539_s14 + $0x160] sm:$0xff] }
 0x311   : > { %2885 = vadd.xlane.f32.xlu1 %v10419_v60 }
 0x312   : > { %8565 = vpow2.f32 %v2631_v59 }
 0x314   : > { %8135 = vmatmul.msk.f32.gmra.mxu3 %vm776_vm0, %v1193_v62 }
 0x315   : > { %v2250_v1 = vpop.xlane.xlu1 %2249  ;;  %v2258_v50 = vpop.xlane.xlu0 %2257 }
 0x316   : > { %v2503_v2 = vsub.f32 %v10303_v29, %v2250_v1  ;;  %v1194_v29 = vmul.f32 %v1066_v5, %v10060_v35  ;;  %v2507_v59 = vsub.f32 %v10305_v45, %v2258_v50  ;;  %v1296_v1 = vld [vmem:[%s16540_s15 + $0x60] sm:$0xff]  ;;  %v1069_v5 = vld [vmem:[%s16539_s14 + $0x148] sm:$0xff] }
 0x317   : > { %v10428_v4 = vpop.f32.mrf.mxu3  ;;  %v10501_v11 = vadd.f32 %v10356_v3, %v1296_v1 }
 0x318   : > { %v2633_v7 = vmul.f32 1.442695, %v2503_v2  ;;  %v10436_v10 = vpop.eup %8565  ;;  %v2641_v21 = vmul.f32 1.442695, %v2507_v59 }
 0x319   : > { %2261 = vmax.xlane.f32.xlu1 %v10434_v8  ;;  %2887 = vadd.xlane.f32.xlu0 %v10436_v10 }
 0x31a   : > { %8567 = vpow2.f32 %v2633_v7 }
 0x31b   : > { %8569 = vpow2.f32 %v2637_v55 }
 0x31c   : > { %8136 = vmatmul.msk.f32.gmra.mxu3 %vm776_vm0, %v1194_v29  ;;  %v1197_v29 = vmul.f32 %v1069_v5, %v10072_v38 }
 0x31d   : > { %v2252_v15 = vpop.xlane.xlu1 %2251  ;;  %v2260_v56 = vpop.xlane.xlu2 %2259 }
 0x31e   : > { %v2504_v18 = vsub.f32 %v10322_v53, %v2252_v15  ;;  %v1195_v53 = vmul.f32 %v1067_v12, %v10064_v36  ;;  %v2508_v62 = vsub.f32 %v10320_v52, %v2260_v56  ;;  %v10498_v52 = vadd.f32 %v10349_v0, %v1295_v63  ;;  %v1297_v0 = vld [vmem:[%s16540_s15 + $0x68] sm:$0xff]  ;;  %v1298_v12 = vld [vmem:[%s16540_s15 + $0x70] sm:$0xff] }
 0x31f   : > { %v10447_v23 = vpop.f32.mrf.mxu3  ;;  %v10514_v3 = vadd.f32 %v10363_v6, %v1297_v0  ;;  %v1299_v6 = vld [vmem:[%s16540_s15 + $0x78] sm:$0xff]  ;;  %v10543_v47 = vadd.f32 %v10370_v9, %v1298_v12  ;;  %v1073_v56 = vld [vmem:[%s16539_s14 + $0x168] sm:$0xff] }
 0x320   : > { %v10452_v24 = vpop.eup %8567  ;;  %v2635_v26 = vmul.f32 1.442695, %v2504_v18  ;;  %v2643_v45 = vmul.f32 1.442695, %v2508_v62  ;;  %v1201_v59 = vmul.f32 %v1073_v56, %v10088_v42  ;;  %v1074_v62 = vld [vmem:[%s16539_s14 + $0x170] sm:$0xff] }
 0x321   : > { %2889 = vadd.xlane.f32.xlu2 %v10452_v24  ;;  %2263 = vmax.xlane.f32.xlu0 %v10455_v27  ;;  %v10473_v54 = vpop.eup %8569  ;;  %v1202_v63 = vmul.f32 %v1074_v62, %v10092_v43 }
 0x322   : > { %8571 = vpow2.f32 %v2635_v26 }
 0x323   : > { %8573 = vpow2.f32 %v2639_v49  ;;  %v1199_v49 = vmul.f32 %v1071_v46, %v10080_v40  ;;  %v1078_v46 = vld [vmem:[%s16539_s14 + $0x190] sm:$0xff] }
 0x324   : > { %8137 = vmatmul.msk.f32.gmra.mxu3 %vm776_vm0, %v1195_v53  ;;  %8575 = vpow2.f32 %v2641_v21  ;;  %v10540_v53 = vadd.f32 %v10377_v14, %v1299_v6  ;;  %v1200_v14 = vmul.f32 %v1072_v20, %v10084_v41  ;;  %v1075_v21 = vld [vmem:[%s16539_s14 + $0x178] sm:$0xff] }
 0x325   : > { %8577 = vpow2.f32 %v2643_v45  ;;  %v1203_v45 = vmul.f32 %v1075_v21, %v10096_v44 }
 0x327   : > { %v10465_v58 = vpop.f32.mrf.mxu3 }
 0x328   : > { %v10475_v13 = vpop.eup %8571 }
 0x329   : > { %2265 = vmax.xlane.f32.xlu2 %v10468_v51  ;;  %2891 = vadd.xlane.f32.xlu1 %v10475_v13  ;;  %v10495_v7 = vpop.eup %8573 }
 0x32a   : > { %2893 = vadd.xlane.f32.xlu0 %v10473_v54  ;;  %v10519_v55 = vpop.eup %8575 }
 0x32b   : > { %v10521_v18 = vpop.eup %8577 }
 0x32c   : > { %8138 = vmatmul.msk.f32.gmra.mxu3 %vm776_vm0, %v1196_v61 }
 0x32f   : > { %v10490_v2 = vpop.f32.mrf.mxu3 }
 0x331   : > { %2895 = vadd.xlane.f32.xlu2 %v10495_v7  ;;  %2267 = vmax.xlane.f32.xlu1 %v10498_v52 }
 0x332   : > { %2269 = vmax.xlane.f32.xlu0 %v10501_v11 }
 0x334   : > { %8139 = vmatmul.msk.f32.gmra.mxu3 %vm776_vm0, %v1197_v29  ;;  %v1076_v29 = vld [vmem:[%s16539_s14 + $0x180] sm:$0xff] }
 0x335   : > { %v1204_v0 = vmul.f32 %v1076_v29, %v10036_v28 }
 0x337   : > { %v10511_v15 = vpop.f32.mrf.mxu3 }
 0x339   : > { %2271 = vmax.xlane.f32.xlu2 %v10514_v3  ;;  %2897 = vadd.xlane.f32.xlu1 %v10519_v55 }
 0x33a   : > { %2899 = vadd.xlane.f32.xlu0 %v10521_v18 }
 0x33c   : > { %8140 = vmatmul.msk.f32.gmra.mxu3 %vm776_vm0, %v1198_v19  ;;  %v1077_v19 = vld [vmem:[%s16539_s14 + $0x188] sm:$0xff] }
 0x33d   : > { %v1205_v6 = vmul.f32 %v1077_v19, %v10040_v30 }
 0x33f   : > { %v10534_v26 = vpop.f32.mrf.mxu3 }
 0x341   : > { %2273 = vmax.xlane.f32.xlu1 %v10543_v47 }
 0x342   : > { %2275 = vmax.xlane.f32.xlu0 %v10540_v53 }
 0x344   : > { %8141 = vmatmul.msk.f32.gmra.mxu3 %vm776_vm0, %v1199_v49  ;;  %v1206_v49 = vmul.f32 %v1078_v46, %v10044_v31 }
 0x347   : > { %v10549_v50 = vpop.f32.mrf.mxu3 }
 0x34c   : > { %8142 = vmatmul.msk.f32.gmra.mxu3 %vm776_vm0, %v1200_v14  ;;  %v1079_v14 = vld [vmem:[%s16539_s14 + $0x198] sm:$0xff] }
 0x34d   : > { %v1207_v56 = vmul.f32 %v1079_v14, %v10048_v32  ;;  %v1081_v14 = vld [vmem:[%s16539_s14 + $0x1a8] sm:$0xff] }
 0x34f   : > { %v10556_v9 = vpop.f32.mrf.mxu3 }
 0x354   : > { %8143 = vmatmul.msk.f32.gmra.mxu3 %vm776_vm0, %v1201_v59 }
 0x357   : > { %v10563_v61 = vpop.f32.mrf.mxu3 }
 0x35c   : > { %8144 = vmatmul.msk.f32.gmra.mxu3 %vm776_vm0, %v1202_v63  ;;  %v1080_v63 = vld [vmem:[%s16539_s14 + $0x1a0] sm:$0xff] }
 0x35d   : > { %v1208_v21 = vmul.f32 %v1080_v63, %v10052_v33 }
 0x35f   : > { %v10570_v1 = vpop.f32.mrf.mxu3 }
 0x360   : > { %16604 = vst [vmem:[#allocation38_spill] sm:$0xff] %v10570_v1 }
 0x364   : > { %8145 = vmatmul.msk.f32.gmra.mxu3 %vm776_vm0, %v1203_v45 }
 0x367   : > { %v10577_v5 = vpop.f32.mrf.mxu3 }
 0x368   : > { %16605 = vst [vmem:[#allocation39_spill] sm:$0xff] %v10577_v5 }
 0x36c   : > { %8146 = vmatmul.msk.f32.gmra.mxu3 %vm776_vm0, %v1204_v0 }
 0x36f   : > { %v10584_v16 = vpop.f32.mrf.mxu3 }
 0x370   : > { %16606 = vst [vmem:[#allocation40_spill] sm:$0xff] %v10584_v16 }
 0x374   : > { %8147 = vmatmul.msk.f32.gmra.mxu3 %vm776_vm0, %v1205_v6 }
 0x377   : > { %v10591_v12 = vpop.f32.mrf.mxu3 }
 0x378   : > { %16607 = vst [vmem:[#allocation41_spill] sm:$0xff] %v10591_v12 }
 0x37c   : > { %8148 = vmatmul.msk.f32.gmra.mxu3 %vm776_vm0, %v1206_v49 }
 0x37f   : > { %v10598_v20 = vpop.f32.mrf.mxu3 }
 0x380   : > { %16608 = vst [vmem:[#allocation42_spill] sm:$0xff] %v10598_v20 }
 0x384   : > { %8149 = vmatmul.msk.f32.gmra.mxu3 %vm776_vm0, %v1207_v56  ;;  %v2886_v59 = vpop.xlane.xlu1 %2885 }
 0x385   : > { %8579 = vrcp.f32 %v2886_v59  ;;  %v3150_v63 = vand.u32 2147483647, %v2886_v59  ;;  %vm3146_vm2 = vweird.f32 %v2886_v59 }
 0x387   : > { %v10605_v62 = vpop.f32.mrf.mxu3  ;;  %vm3151_vm4 = vcmp.eq.f32.partialorder %v3150_v63, 8.507059e+37 }
 0x388   : > { %16609 = vst [vmem:[#allocation43_spill] sm:$0xff] %v10605_v62  ;;  %v3152_v62 = vand.u32 2147483648, %v2886_v59 }
 0x38b   : > { %v8580_v45 = vpop.eup %8579 }
 0x38c   : > { %8150 = vmatmul.msk.f32.gmra.mxu3 %vm776_vm0, %v1208_v21  ;;  %v3142_v29 = vmul.f32 %v8580_v45, %v2886_v59  ;;  %v2262_v0 = vpop.xlane.xlu1 %2261  ;;  %v2888_v19 = vpop.xlane.xlu0 %2887  ;;  %vm3147_vm1 = vweird.f32 %v8580_v45  ;;  %v1209_v21 = vmul.f32 %v1081_v14, %v10056_v34  ;;  %v1082_v59 = vld [vmem:[%s16539_s14 + $0x1b0] sm:$0xff] }
 0x38d   : > { %v2509_v6 = vsub.f32 %v10434_v8, %v2262_v0  ;;  %8581 = vrcp.f32 %v2888_v19  ;;  %vm3148_vm3 = vmor %vm3146_vm2, %vm3147_vm1  ;;  %v3167_v1 = vand.u32 2147483648, %v2888_v19  ;;  %vm3161_vm6 = vweird.f32 %v2888_v19 }
 0x38e   : > { %v3143_v46 = vsub.f32 1.0, %v3142_v29  ;;  %v3153_v29 = vor.u32 1.1754944e-38, %v3152_v62 }
 0x38f   : > { %v10613_v49 = vpop.f32.mrf.mxu3  ;;  %v2645_v56 = vmul.f32 1.442695, %v2509_v6 }
 0x390   : > { %16610 = vst [vmem:[#allocation44_spill] sm:$0xff] %v10613_v49  ;;  %v3144_v20 = vmul.f32 %v8580_v45, %v3143_v46 }
 0x391   : > { %8583 = vpow2.f32 %v2645_v56 }
 0x392   : > { %v3145_v12 = vadd.f32 %v8580_v45, %v3144_v20 }
 0x393   : > { %v8582_v16 = vpop.eup %8581 }
 0x394   : > { %8151 = vmatmul.msk.f32.gmra.mxu3 %vm776_vm0, %v1209_v21  ;;  %v10620_v8 = vpop.xlane.xlu2 %2889  ;;  %v3157_v0 = vmul.f32 %v8582_v16, %v2888_v19  ;;  %v2264_v6 = vpop.xlane.xlu0 %2263  ;;  %v3149_v49 = vsel %vm3148_vm3, %v8580_v45, %v3145_v12  ;;  %vm3162_vm5 = vweird.f32 %v8582_v16  ;;  %v3165_v12 = vand.u32 2147483647, %v2888_v19 }
 0x395   : > { %8585 = vrcp.f32 %v10620_v8  ;;  %v2510_v46 = vsub.f32 %v10455_v27, %v2264_v6  ;;  %v3154_v56 = vsel %vm3151_vm4, %v3153_v29, %v3149_v49  ;;  %v1210_v45 = vmul.f32 %v1082_v59, %v10060_v35  ;;  %v1300_v49 = vld [vmem:[%s16540_s15 + $0x80] sm:$0xff]  ;;  %vm3163_vm7 = vmor %vm3161_vm6, %vm3162_vm5 }
 0x396   : > { %v3158_v5 = vsub.f32 1.0, %v3157_v0  ;;  %v10627_v20 = vmul.f32 %v10419_v60, %v3154_v56  ;;  %v3168_v6 = vor.u32 1.1754944e-38, %v3167_v1  ;;  %vm3166_vm8 = vcmp.eq.f32.partialorder %v3165_v12, 8.507059e+37  ;;  %v1083_v1 = vld [vmem:[%s16539_s14 + $0x1b8] sm:$0xff] }
 0x397   : > { %v10624_v14 = vpop.f32.mrf.mxu3  ;;  %v10632_v62 = vpop.eup %8583  ;;  %v2647_v21 = vmul.f32 1.442695, %v2510_v46  ;;  %v10649_v19 = vadd.f32 %v10384_v17, %v1300_v49  ;;  %v3180_v17 = vand.u32 2147483647, %v10620_v8  ;;  %vm3176_vm10 = vweird.f32 %v10620_v8 }
 0x398   : > { %16611 = vst [vmem:[#allocation45_spill] sm:$0xff] %v10627_v20  ;;  %5355 = vmatmul.f32.vlgmr.msra.gmra.mxu1 %v10627_v20  ;;  %2901 = vadd.xlane.f32.xlu2 %v10632_v62  ;;  %v3159_v27 = vmul.f32 %v8582_v16, %v3158_v5 }
 0x399   : > { %8587 = vpow2.f32 %v2647_v21  ;;  %vm3181_vm12 = vcmp.eq.f32.partialorder %v3180_v17, 8.507059e+37 }
 0x39a   : > { %v3160_v63 = vadd.f32 %v8582_v16, %v3159_v27 }
 0x39b   : > { %v8586_v60 = vpop.eup %8585 }
 0x39c   : > { %v3172_v29 = vmul.f32 %v8586_v60, %v10620_v8  ;;  %8152 = vmatmul.msk.f32.gmra.mxu3 %vm776_vm0, %v1210_v45  ;;  %v2266_v0 = vpop.xlane.xlu2 %2265  ;;  %v10643_v46 = vpop.xlane.xlu1 %2891  ;;  %v3164_v59 = vsel %vm3163_vm7, %v8582_v16, %v3160_v63  ;;  %v3182_v16 = vand.u32 2147483648, %v10620_v8  ;;  %vm3177_vm9 = vweird.f32 %v8586_v60 }
 0x39d   : > { %v2511_v5 = vsub.f32 %v10468_v51, %v2266_v0  ;;  %v10645_v56 = vpop.xlane.xlu0 %2893  ;;  %8589 = vrcp.f32 %v10643_v46  ;;  %v3169_v27 = vsel %vm3166_vm8, %v3168_v6, %v3164_v59  ;;  %vm3178_vm11 = vmor %vm3176_vm10, %vm3177_vm9  ;;  %vm3191_vm14 = vweird.f32 %v10643_v46 }
 0x39e   : > { %v3173_v21 = vsub.f32 1.0, %v3172_v29  ;;  %8591 = vrcp.f32 %v10645_v56  ;;  %v10655_v51 = vmul.f32 %v10436_v10, %v3169_v27  ;;  %v1211_v10 = vmul.f32 %v1083_v1, %v10064_v36 }
 0x39f   : > { %v2649_v20 = vmul.f32 1.442695, %v2511_v5  ;;  %v10652_v45 = vpop.f32.mrf.mxu3  ;;  %v10661_v12 = vpop.eup %8587  ;;  %v3183_v29 = vor.u32 1.1754944e-38, %v3182_v16  ;;  %vm3206_vm3 = vweird.f32 %v10645_v56 }
 0x3a0   : > { %16612 = vst [vmem:[#allocation46_spill] sm:$0xff] %v10652_v45  ;;  %v3174_v63 = vmul.f32 %v8586_v60, %v3173_v21  ;;  %2277 = vmax.xlane.f32.xlu2 %v10649_v19  ;;  %5358 = vmatmul.f32.gmra.mxu1 %v10655_v51 }
 0x3a1   : > { %16613 = vst [vmem:[#allocation47_spill] sm:$0xff] %v10655_v51  ;;  %8593 = vpow2.f32 %v2649_v20  ;;  %2903 = vadd.xlane.f32.xlu1 %v10661_v12  ;;  %v1301_v20 = vld [vmem:[%s16540_s15 + $0x88] sm:$0xff] }
 0x3a2   : > { %v3175_v49 = vadd.f32 %v8586_v60, %v3174_v63  ;;  %v10691_v45 = vadd.f32 %v10391_v22, %v1301_v20  ;;  %v1302_v22 = vld [vmem:[%s16540_s15 + $0x90] sm:$0xff] }
 0x3a3   : > { %v8590_v0 = vpop.eup %8589 }
 0x3a4   : > { %8153 = vmatmul.msk.f32.gmra.mxu3 %vm776_vm0, %v1211_v10  ;;  %v10670_v6 = vpop.xlane.xlu2 %2895  ;;  %v3179_v5 = vsel %vm3178_vm11, %v8586_v60, %v3175_v49  ;;  %v10675_v59 = vpop.eup %8591  ;;  %v3187_v21 = vmul.f32 %v8590_v0, %v10643_v46  ;;  %vm3192_vm13 = vweird.f32 %v8590_v0 }
 0x3a5   : > { %8595 = vrcp.f32 %v10670_v6  ;;  %v2268_v8 = vpop.xlane.xlu1 %2267  ;;  %v2270_v27 = vpop.xlane.xlu0 %2269  ;;  %v3184_v1 = vsel %vm3181_vm12, %v3183_v29, %v3179_v5  ;;  %v3202_v16 = vmul.f32 %v10675_v59, %v10645_v56  ;;  %v1084_v29 = vld [vmem:[%s16539_s14 + $0x1c0] sm:$0xff]  ;;  %v3195_v5 = vand.u32 2147483647, %v10643_v46  ;;  %vm3193_vm15 = vmor %vm3191_vm14, %vm3192_vm13 }
 0x3a6   : > { %v2512_v63 = vsub.f32 %v10498_v52, %v2268_v8  ;;  %v2513_v60 = vsub.f32 %v10501_v11, %v2270_v27  ;;  %v10684_v17 = vmul.f32 %v10452_v24, %v3184_v1  ;;  %v3188_v49 = vsub.f32 1.0, %v3187_v21 }
 0x3a7   : > { %v10686_v10 = vpop.eup %8593  ;;  %v10688_v51 = vpop.f32.mrf.mxu3  ;;  %v3203_v52 = vsub.f32 1.0, %v3202_v16  ;;  %v3197_v24 = vand.u32 2147483648, %v10643_v46  ;;  %v1212_v21 = vmul.f32 %v1084_v29, %v10068_v37  ;;  %vm3196_vm1 = vcmp.eq.f32.partialorder %v3195_v5, 8.507059e+37 }
 0x3a8   : > { %16614 = vst [vmem:[#allocation48_spill] sm:$0xff] %v10684_v17  ;;  %v2651_v8 = vmul.f32 1.442695, %v2512_v63  ;;  %v2653_v11 = vmul.f32 1.442695, %v2513_v60  ;;  %2905 = vadd.xlane.f32.xlu0 %v10686_v10  ;;  %5361 = vmatmul.f32.gmra.mxu1 %v10684_v17  ;;  %v3189_v20 = vmul.f32 %v8590_v0, %v3188_v49  ;;  %v10713_v49 = vadd.f32 %v10398_v25, %v1302_v22 }
 0x3a9   : > { %16615 = vst [vmem:[#allocation49_spill] sm:$0xff] %v10688_v51  ;;  %2279 = vmax.xlane.f32.xlu1 %v10691_v45  ;;  %v3204_v27 = vmul.f32 %v10675_v59, %v3203_v52  ;;  %v3198_v29 = vor.u32 1.1754944e-38, %v3197_v24  ;;  %vm3207_vm2 = vweird.f32 %v10675_v59  ;;  %v3212_v25 = vand.u32 2147483648, %v10645_v56  ;;  %v1086_v51 = vld [vmem:[%s16539_s14 + $0x1d0] sm:$0xff] }
 0x3aa   : > { %8597 = vpow2.f32 %v2651_v8  ;;  %v3190_v16 = vadd.f32 %v8590_v0, %v3189_v20  ;;  %v3210_v24 = vand.u32 2147483647, %v10645_v56  ;;  %vm3208_vm4 = vmor %vm3206_vm3, %vm3207_vm2  ;;  %vm3221_vm7 = vweird.f32 %v10670_v6 }
 0x3ab   : > { %v10706_v1 = vpop.eup %8595  ;;  %8599 = vpow2.f32 %v2653_v11  ;;  %v3205_v46 = vadd.f32 %v10675_v59, %v3204_v27 }
 0x3ac   : > { %v3217_v63 = vmul.f32 %v10706_v1, %v10670_v6  ;;  %8154 = vmatmul.msk.f32.gmra.mxu3 %vm776_vm0, %v1212_v21  ;;  %v2272_v60 = vpop.xlane.xlu2 %2271  ;;  %v3194_v20 = vsel %vm3193_vm15, %v8590_v0, %v3190_v16  ;;  %v1085_v0 = vld [vmem:[%s16539_s14 + $0x1c8] sm:$0xff]  ;;  %vm3211_vm5 = vcmp.eq.f32.partialorder %v3210_v24, 8.507059e+37  ;;  %vm3222_vm6 = vweird.f32 %v10706_v1 }
 0x3ad   : > { %v2514_v52 = vsub.f32 %v10514_v3, %v2272_v60  ;;  %v10716_v8 = vpop.xlane.xlu1 %2897  ;;  %v10718_v11 = vpop.xlane.xlu0 %2899  ;;  %v3199_v21 = vsel %vm3196_vm1, %v3198_v29, %v3194_v20  ;;  %v1213_v56 = vmul.f32 %v1085_v0, %v10072_v38  ;;  %v3213_v60 = vor.u32 1.1754944e-38, %v3212_v25  ;;  %v1303_v29 = vld [vmem:[%s16540_s15 + $0x98] sm:$0xff]  ;;  %vm3223_vm8 = vmor %vm3221_vm7, %vm3222_vm6 }
 0x3ae   : > { %v3218_v17 = vsub.f32 1.0, %v3217_v63  ;;  %8601 = vrcp.f32 %v10716_v8  ;;  %v10727_v3 = vmul.f32 %v10475_v13, %v3199_v21  ;;  %v3209_v13 = vsel %vm3208_vm4, %v10675_v59, %v3205_v46  ;;  %v1304_v21 = vld [vmem:[%s16540_s15 + $0xa0] sm:$0xff] }
 0x3af   : > { %v2655_v22 = vmul.f32 1.442695, %v2514_v52  ;;  %v10724_v5 = vpop.f32.mrf.mxu3  ;;  %8603 = vrcp.f32 %v10718_v11  ;;  %v3214_v20 = vsel %vm3211_vm5, %v3213_v60, %v3209_v13  ;;  %v10764_v13 = vadd.f32 %v10406_v48, %v1303_v29 }
 0x3b0   : > { %16616 = vst [vmem:[#allocation50_spill] sm:$0xff] %v10724_v5  ;;  %v10734_v27 = vpop.eup %8597  ;;  %2281 = vmax.xlane.f32.xlu0 %v10713_v49  ;;  %5364 = vmatmul.f32.gmra.mxu1 %v10727_v3  ;;  %v3219_v63 = vmul.f32 %v10706_v1, %v3218_v17  ;;  %v10781_v29 = vadd.f32 %v10414_v57, %v1304_v21  ;;  %vm3236_vm11 = vweird.f32 %v10716_v8  ;;  %vm3251_vm15 = vweird.f32 %v10718_v11 }
 0x3b1   : > { %16617 = vst [vmem:[#allocation51_spill] sm:$0xff] %v10727_v3  ;;  %v10738_v16 = vpop.eup %8599  ;;  %8605 = vpow2.f32 %v2655_v22  ;;  %2907 = vadd.xlane.f32.xlu2 %v10734_v27  ;;  %v1214_v57 = vmul.f32 %v1086_v51, %v10076_v39  ;;  %v3242_v51 = vand.u32 2147483648, %v10716_v8 }
 0x3b2   : > { %2909 = vadd.xlane.f32.xlu1 %v10738_v16  ;;  %v3220_v25 = vadd.f32 %v10706_v1, %v3219_v63  ;;  %v10772_v63 = vmul.f32 %v10473_v54, %v3214_v20 }
 0x3b4   : > { %v10749_v52 = vpop.eup %8601  ;;  %8155 = vmatmul.msk.f32.gmra.mxu3 %vm776_vm0, %v1213_v56  ;;  %v3227_v56 = vand.u32 2147483648, %v10670_v6  ;;  %16618 = vst [vmem:[#allocation52_spill] sm:$0xff] %v10772_v63  ;;  %v3224_v20 = vsel %vm3223_vm8, %v10706_v1, %v3220_v25 }
 0x3b5   : > { %v3232_v59 = vmul.f32 %v10749_v52, %v10716_v8  ;;  %v2274_v46 = vpop.xlane.xlu1 %2273  ;;  %v2276_v17 = vpop.xlane.xlu0 %2275  ;;  %vm3237_vm10 = vweird.f32 %v10749_v52 }
 0x3b6   : > { %v10759_v22 = vpop.eup %8603  ;;  %v2515_v0 = vsub.f32 %v10543_v47, %v2274_v46  ;;  %v2516_v24 = vsub.f32 %v10540_v53, %v2276_v17  ;;  %v3225_v53 = vand.u32 2147483647, %v10670_v6  ;;  %v1305_v46 = vld [vmem:[%s16540_s15 + $0xa8] sm:$0xff]  ;;  %vm3238_vm12 = vmor %vm3236_vm11, %vm3237_vm10 }
 0x3b7   : > { %v10767_v60 = vpop.eup %8605  ;;  %v3233_v3 = vsub.f32 1.0, %v3232_v59  ;;  %v10769_v5 = vpop.f32.mrf.mxu3  ;;  %v3247_v54 = vmul.f32 %v10759_v22, %v10718_v11  ;;  %v3228_v59 = vor.u32 1.1754944e-38, %v3227_v56  ;;  %v3240_v56 = vand.u32 2147483647, %v10716_v8 }
 0x3b8   : > { %v2657_v48 = vmul.f32 1.442695, %v2515_v0  ;;  %v2659_v47 = vmul.f32 1.442695, %v2516_v24  ;;  %2911 = vadd.xlane.f32.xlu0 %v10767_v60  ;;  %5367 = vmatmul.f32.gmra.mxu1 %v10772_v63  ;;  %vm3226_vm9 = vcmp.eq.f32.partialorder %v3225_v53, 8.507059e+37  ;;  %v1087_v24 = vld [vmem:[%s16539_s14 + $0x1d8] sm:$0xff]  ;;  %vm3252_vm14 = vweird.f32 %v10759_v22 }
 0x3b9   : > { %2283 = vmax.xlane.f32.xlu2 %v10764_v13  ;;  %v3234_v6 = vmul.f32 %v10749_v52, %v3233_v3  ;;  %v3229_v17 = vsel %vm3226_vm9, %v3228_v59, %v3224_v20  ;;  %v3248_v21 = vsub.f32 1.0, %v3247_v54  ;;  %v10800_v3 = vadd.f32 %v10428_v4, %v1305_v46  ;;  %v1306_v54 = vld [vmem:[%s16540_s15 + $0xb0] sm:$0xff]  ;;  %vm3253_vm1 = vmor %vm3251_vm15, %vm3252_vm14 }
 0x3ba   : > { %8607 = vpow2.f32 %v2657_v48  ;;  %2285 = vmax.xlane.f32.xlu1 %v10781_v29  ;;  %v10806_v0 = vmul.f32 %v10495_v7, %v3229_v17  ;;  %v3243_v8 = vor.u32 1.1754944e-38, %v3242_v51  ;;  %vm3241_vm13 = vcmp.eq.f32.partialorder %v3240_v56, 8.507059e+37 }
 0x3bb   : > { %8609 = vpow2.f32 %v2659_v47  ;;  %v3235_v1 = vadd.f32 %v10749_v52, %v3234_v6  ;;  %v3249_v48 = vmul.f32 %v10759_v22, %v3248_v21  ;;  %v1215_v47 = vmul.f32 %v1087_v24, %v10080_v40  ;;  %v1307_v6 = vld [vmem:[%s16540_s15 + $0xb8] sm:$0xff]  ;;  %v1088_v21 = vld [vmem:[%s16539_s14 + $0x1e0] sm:$0xff] }
 0x3bc   : > { %8156 = vmatmul.msk.f32.gmra.mxu3 %vm776_vm0, %v1214_v57  ;;  %16619 = vst [vmem:[#allocation53_spill] sm:$0xff] %v10806_v0  ;;  %v3257_v57 = vand.u32 2147483648, %v10718_v11  ;;  %v10837_v46 = vadd.f32 %v10447_v23, %v1306_v54  ;;  %v10848_v51 = vadd.f32 %v10465_v58, %v1307_v6  ;;  %v1091_v54 = vld [vmem:[%s16539_s14 + $0x1f8] sm:$0xff] }
 0x3bd   : > { %v3239_v7 = vsel %vm3238_vm12, %v10749_v52, %v3235_v1  ;;  %v3250_v52 = vadd.f32 %v10759_v22, %v3249_v48  ;;  %v3255_v1 = vand.u32 2147483647, %v10718_v11 }
 0x3be   : > { %v3244_v20 = vsel %vm3241_vm13, %v3243_v8, %v3239_v7  ;;  %v3258_v24 = vor.u32 1.1754944e-38, %v3257_v57  ;;  %v1089_v7 = vld [vmem:[%s16539_s14 + $0x1e8] sm:$0xff] }
 0x3bf   : > { %v10803_v25 = vpop.f32.mrf.mxu3  ;;  %v10840_v17 = vmul.f32 %v10519_v55, %v3244_v20  ;;  %v3254_v23 = vsel %vm3253_vm1, %v10759_v22, %v3250_v52  ;;  %v1216_v55 = vmul.f32 %v1088_v21, %v10084_v41  ;;  %vm3256_vm2 = vcmp.eq.f32.partialorder %v3255_v1, 8.507059e+37  ;;  %v1092_v52 = vld [vmem:[%s16539_s14 + $0x200] sm:$0xff]  ;;  %v1093_v1 = vld [vmem:[%s16539_s14 + $0x208] sm:$0xff] }
 0x3c0   : > { %v10813_v53 = vpop.eup %8607  ;;  %2287 = vmax.xlane.f32.xlu0 %v10800_v3  ;;  %5370 = vmatmul.f32.gmra.mxu1 %v10806_v0  ;;  %v3259_v56 = vsel %vm3256_vm2, %v3258_v24, %v3254_v23  ;;  %v1217_v22 = vmul.f32 %v1089_v7, %v10088_v42  ;;  %v1219_v20 = vmul.f32 %v1091_v54, %v10096_v44  ;;  %v1094_v24 = vld [vmem:[%s16539_s14 + $0x210] sm:$0xff]  ;;  %v1096_v54 = vld [vmem:[%s16539_s14 + $0x220] sm:$0xff] }
 0x3c1   : > { %v10816_v4 = vpop.eup %8609  ;;  %2913 = vadd.xlane.f32.xlu2 %v10813_v53  ;;  %16620 = vst [vmem:[#allocation54_spill] sm:$0xff] %v10840_v17  ;;  %v10859_v58 = vmul.f32 %v10521_v18, %v3259_v56  ;;  %v1220_v57 = vmul.f32 %v1092_v52, %v10036_v28  ;;  %v1221_v23 = vmul.f32 %v1093_v1, %v10040_v30  ;;  %v1097_v1 = vld [vmem:[%s16539_s14 + $0x228] sm:$0xff] }
 0x3c2   : > { %2915 = vadd.xlane.f32.xlu1 %v10816_v4  ;;  %v1222_v56 = vmul.f32 %v1094_v24, %v10044_v31 }
 0x3c3   : > { %16621 = vst [vmem:[#allocation55_spill] sm:$0xff] %v10859_v58 }
 0x3c4   : > { %8157 = vmatmul.msk.f32.gmra.mxu3 %vm776_vm0, %v1215_v47  ;;  %v1090_v47 = vld [vmem:[%s16539_s14 + $0x1f0] sm:$0xff] }
 0x3c5   : > { %v1218_v8 = vmul.f32 %v1090_v47, %v10092_v43 }
 0x3c7   : > { %v10834_v59 = vpop.f32.mrf.mxu3 }
 0x3c8   : > { %5373 = vmatmul.f32.gmra.mxu1 %v10840_v17 }
 0x3c9   : > { %2289 = vmax.xlane.f32.xlu2 %v10837_v46 }
 0x3ca   : > { %2291 = vmax.xlane.f32.xlu1 %v10848_v51 }
 0x3cc   : > { %8158 = vmatmul.msk.f32.gmra.mxu3 %vm776_vm0, %v1216_v55 }
 0x3cf   : > { %v10856_v11 = vpop.f32.mrf.mxu3 }
 0x3d0   : > { %5376 = vmatmul.f32.gmra.mxu1 %v10859_v58 }
 0x3d4   : > { %8159 = vmatmul.msk.f32.gmra.mxu3 %vm776_vm0, %v1217_v22  ;;  %v1095_v22 = vld [vmem:[%s16539_s14 + $0x218] sm:$0xff] }
 0x3d5   : > { %v1223_v47 = vmul.f32 %v1095_v22, %v10048_v32 }
 0x3d7   : > { %v10867_v48 = vpop.f32.mrf.mxu3 }
 0x3dc   : > { %8160 = vmatmul.msk.f32.gmra.mxu3 %vm776_vm0, %v1218_v8 }
 0x3df   : > { %v10874_v18 = vpop.f32.mrf.mxu3 }
 0x3e4   : > { %8161 = vmatmul.msk.f32.gmra.mxu3 %vm776_vm0, %v1219_v20  ;;  %v1224_v20 = vmul.f32 %v1096_v54, %v10052_v33 }
 0x3e7   : > { %v10881_v6 = vpop.f32.mrf.mxu3 }
 0x3ec   : > { %8162 = vmatmul.msk.f32.gmra.mxu3 %vm776_vm0, %v1220_v57 }
 0x3ef   : > { %v10888_v21 = vpop.f32.mrf.mxu3 }
 0x3f0   : > { %16622 = vst [vmem:[#allocation56_spill] sm:$0xff] %v10888_v21 }
 0x3f4   : > { %8163 = vmatmul.msk.f32.gmra.mxu3 %vm776_vm0, %v1221_v23  ;;  %v1225_v23 = vmul.f32 %v1097_v1, %v10056_v34 }
 0x3f7   : > { %v10895_v55 = vpop.f32.mrf.mxu3 }
 0x3f8   : > { %16623 = vst [vmem:[#allocation57_spill] sm:$0xff] %v10895_v55 }
 0x3fc   : > { %8164 = vmatmul.msk.f32.gmra.mxu3 %vm776_vm0, %v1222_v56 }
 0x3ff   : > { %v10902_v7 = vpop.f32.mrf.mxu3 }
 0x400   : > { %16624 = vst [vmem:[#allocation58_spill] sm:$0xff] %v10902_v7 }
 0x404   : > { %8165 = vmatmul.msk.f32.gmra.mxu3 %vm776_vm0, %v1223_v47 }
 0x407   : > { %v10909_v8 = vpop.f32.mrf.mxu3 }
 0x408   : > { %16625 = vst [vmem:[#allocation59_spill] sm:$0xff] %v10909_v8 }
 0x40b   : > { %v2902_v52 = vpop.xlane.xlu2 %2901 }
 0x40c   : > { %8166 = vmatmul.msk.f32.gmra.mxu3 %vm776_vm0, %v1224_v20  ;;  %8611 = vrcp.f32 %v2902_v52  ;;  %v3272_v0 = vand.u32 2147483648, %v2902_v52  ;;  %v3270_v1 = vand.u32 2147483647, %v2902_v52  ;;  %vm3266_vm4 = vweird.f32 %v2902_v52 }
 0x40e   : > { %vm3271_vm6 = vcmp.eq.f32.partialorder %v3270_v1, 8.507059e+37 }
 0x40f   : > { %v10916_v57 = vpop.f32.mrf.mxu3 }
 0x410   : > { %16626 = vst [vmem:[#allocation60_spill] sm:$0xff] %v10916_v57  ;;  %v1098_v57 = vld [vmem:[%s16539_s14 + $0x230] sm:$0xff] }
 0x411   : > { %v1226_v63 = vmul.f32 %v1098_v57, %v10060_v35 }
 0x412   : > { %v8612_v24 = vpop.eup %8611 }
 0x413   : > { %v3262_v56 = vmul.f32 %v8612_v24, %v2902_v52  ;;  %v2278_v22 = vpop.xlane.xlu2 %2277  ;;  %vm3267_vm3 = vweird.f32 %v8612_v24 }
 0x414   : > { %8167 = vmatmul.msk.f32.gmra.mxu3 %vm776_vm0, %v1225_v23  ;;  %v2517_v47 = vsub.f32 %v10649_v19, %v2278_v22  ;;  %v2904_v54 = vpop.xlane.xlu1 %2903  ;;  %vm3268_vm5 = vmor %vm3266_vm4, %vm3267_vm3 }
 0x415   : > { %v3263_v58 = vsub.f32 1.0, %v3262_v56  ;;  %8613 = vrcp.f32 %v2904_v54  ;;  %v3273_v56 = vor.u32 1.1754944e-38, %v3272_v0  ;;  %v1099_v0 = vld [vmem:[%s16539_s14 + $0x238] sm:$0xff]  ;;  %vm3281_vm8 = vweird.f32 %v2904_v54 }
 0x416   : > { %v2661_v20 = vmul.f32 1.442695, %v2517_v47  ;;  %v1227_v1 = vmul.f32 %v1099_v0, %v10064_v36 }
 0x417   : > { %v10924_v17 = vpop.f32.mrf.mxu3  ;;  %v3264_v8 = vmul.f32 %v8612_v24, %v3263_v58 }
 0x418   : > { %16627 = vst [vmem:[#allocation61_spill] sm:$0xff] %v10924_v17  ;;  %8615 = vpow2.f32 %v2661_v20 }
 0x419   : > { %v3265_v23 = vadd.f32 %v8612_v24, %v3264_v8 }
 0x41b   : > { %v10930_v19 = vpop.xlane.xlu0 %2905  ;;  %v8614_v22 = vpop.eup %8613  ;;  %v3269_v47 = vsel %vm3268_vm5, %v8612_v24, %v3265_v23  ;;  %v3287_v24 = vand.u32 2147483648, %v2904_v54 }
 0x41c   : > { %8617 = vrcp.f32 %v10930_v19  ;;  %8168 = vmatmul.msk.f32.gmra.mxu3 %vm776_vm0, %v1226_v63  ;;  %v3277_v17 = vmul.f32 %v8614_v22, %v2904_v54  ;;  %v2280_v58 = vpop.xlane.xlu1 %2279  ;;  %v3274_v7 = vsel %vm3271_vm6, %v3273_v56, %v3269_v47  ;;  %vm3282_vm7 = vweird.f32 %v8614_v22 }
 0x41d   : > { %v2518_v20 = vsub.f32 %v10691_v45, %v2280_v58  ;;  %v10936_v57 = vmul.f32 %v10632_v62, %v3274_v7  ;;  %v1308_v62 = vld [vmem:[%s16540_s15 + $0xc0] sm:$0xff]  ;;  %v3285_v7 = vand.u32 2147483647, %v2904_v54  ;;  %vm3283_vm9 = vmor %vm3281_vm8, %vm3282_vm7  ;;  %vm3296_vm12 = vweird.f32 %v10930_v19 }
 0x41e   : > { %v10938_v8 = vpop.eup %8615  ;;  %v3278_v52 = vsub.f32 1.0, %v3277_v17 }
 0x41f   : > { %16628 = vst [vmem:[#allocation62_spill] sm:$0xff] %v10936_v57  ;;  %v10940_v55 = vpop.f32.mrf.mxu3  ;;  %v2663_v63 = vmul.f32 1.442695, %v2518_v20  ;;  %2917 = vadd.xlane.f32.xlu0 %v10938_v8  ;;  %5379 = vmatmul.f32.gmra.mxu1 %v10936_v57  ;;  %v10957_v57 = vadd.f32 %v10490_v2, %v1308_v62  ;;  %vm3286_vm10 = vcmp.eq.f32.partialorder %v3285_v7, 8.507059e+37 }
 0x420   : > { %16629 = vst [vmem:[#allocation63_spill] sm:$0xff] %v10940_v55  ;;  %v3279_v45 = vmul.f32 %v8614_v22, %v3278_v52  ;;  %v3288_v52 = vor.u32 1.1754944e-38, %v3287_v24  ;;  %v1100_v24 = vld [vmem:[%s16539_s14 + $0x240] sm:$0xff] }
 0x421   : > { %8619 = vpow2.f32 %v2663_v63 }
 0x422   : > { %v8618_v17 = vpop.eup %8617  ;;  %v3280_v47 = vadd.f32 %v8614_v22, %v3279_v45 }
 0x423   : > { %v3292_v23 = vmul.f32 %v8618_v17, %v10930_v19  ;;  %v2282_v56 = vpop.xlane.xlu0 %2281  ;;  %vm3297_vm11 = vweird.f32 %v8618_v17 }
 0x424   : > { %v10952_v58 = vpop.xlane.xlu2 %2907  ;;  %v2519_v20 = vsub.f32 %v10713_v49, %v2282_v56  ;;  %8169 = vmatmul.msk.f32.gmra.mxu3 %vm776_vm0, %v1227_v1  ;;  %v3284_v63 = vsel %vm3283_vm9, %v8614_v22, %v3280_v47  ;;  %v3302_v49 = vand.u32 2147483648, %v10930_v19  ;;  %v3300_v22 = vand.u32 2147483647, %v10930_v19  ;;  %vm3298_vm13 = vmor %vm3296_vm12, %vm3297_vm11  ;;  %v1309_v19 = vld [vmem:[%s16540_s15 + $0xc8] sm:$0xff] }
 0x425   : > { %v3293_v55 = vsub.f32 1.0, %v3292_v23  ;;  %8621 = vrcp.f32 %v10952_v58  ;;  %v10960_v0 = vpop.xlane.xlu1 %2909  ;;  %v3289_v45 = vsel %vm3286_vm10, %v3288_v52, %v3284_v63  ;;  %vm3311_vm1 = vweird.f32 %v10952_v58 }
 0x426   : > { %8623 = vrcp.f32 %v10960_v0  ;;  %v2665_v54 = vmul.f32 1.442695, %v2519_v20  ;;  %v10967_v2 = vmul.f32 %v10661_v12, %v3289_v45  ;;  %v1228_v12 = vmul.f32 %v1100_v24, %v10068_v37 }
 0x427   : > { %v10964_v56 = vpop.f32.mrf.mxu3  ;;  %v3294_v62 = vmul.f32 %v8618_v17, %v3293_v55  ;;  %v10973_v7 = vpop.eup %8619  ;;  %2293 = vmax.xlane.f32.xlu0 %v10957_v57  ;;  %v3303_v23 = vor.u32 1.1754944e-38, %v3302_v49  ;;  %vm3301_vm14 = vcmp.eq.f32.partialorder %v3300_v22, 8.507059e+37  ;;  %vm3326_vm5 = vweird.f32 %v10960_v0 }
 0x428   : > { %16630 = vst [vmem:[#allocation64_spill] sm:$0xff] %v10964_v56  ;;  %8625 = vpow2.f32 %v2665_v54  ;;  %2919 = vadd.xlane.f32.xlu2 %v10973_v7  ;;  %5382 = vmatmul.f32.gmra.mxu1 %v10967_v2 }
 0x429   : > { %16631 = vst [vmem:[#allocation65_spill] sm:$0xff] %v10967_v2  ;;  %v3295_v1 = vadd.f32 %v8618_v17, %v3294_v62 }
 0x42b   : > { %v8622_v55 = vpop.eup %8621  ;;  %v10980_v47 = vpop.xlane.xlu0 %2911  ;;  %v3299_v20 = vsel %vm3298_vm13, %v8618_v17, %v3295_v1 }
 0x42c   : > { %v10982_v52 = vpop.eup %8623  ;;  %v3307_v63 = vmul.f32 %v8622_v55, %v10952_v58  ;;  %v2284_v54 = vpop.xlane.xlu2 %2283  ;;  %8627 = vrcp.f32 %v10980_v47  ;;  %8170 = vmatmul.msk.f32.gmra.mxu3 %vm776_vm0, %v1228_v12  ;;  %v3304_v45 = vsel %vm3301_vm14, %v3303_v23, %v3299_v20  ;;  %v11002_v23 = vadd.f32 %v10511_v15, %v1309_v19 }
 0x42d   : > { %v3322_v49 = vmul.f32 %v10982_v52, %v10960_v0  ;;  %v2520_v17 = vsub.f32 %v10764_v13, %v2284_v54  ;;  %v2286_v24 = vpop.xlane.xlu1 %2285  ;;  %v10994_v62 = vmul.f32 %v10686_v10, %v3304_v45  ;;  %v1101_v13 = vld [vmem:[%s16539_s14 + $0x248] sm:$0xff]  ;;  %v3317_v10 = vand.u32 2147483648, %v10952_v58 }
 0x42e   : > { %v10996_v22 = vpop.eup %8625  ;;  %v3308_v1 = vsub.f32 1.0, %v3307_v63  ;;  %v2521_v2 = vsub.f32 %v10781_v29, %v2286_v24  ;;  %vm3312_vm15 = vweird.f32 %v8622_v55  ;;  %v3315_v29 = vand.u32 2147483647, %v10952_v58  ;;  %v1310_v63 = vld [vmem:[%s16540_s15 + $0xd0] sm:$0xff] }
 0x42f   : > { %16632 = vst [vmem:[#allocation66_spill] sm:$0xff] %v10994_v62  ;;  %v3323_v12 = vsub.f32 1.0, %v3322_v49  ;;  %v2667_v56 = vmul.f32 1.442695, %v2520_v17  ;;  %v10999_v21 = vpop.f32.mrf.mxu3  ;;  %2921 = vadd.xlane.f32.xlu1 %v10996_v22  ;;  %vm3313_vm2 = vmor %vm3311_vm1, %vm3312_vm15  ;;  %v11023_v24 = vadd.f32 %v10534_v26, %v1310_v63  ;;  %vm3327_vm4 = vweird.f32 %v10982_v52 }
 0x430   : > { %16633 = vst [vmem:[#allocation67_spill] sm:$0xff] %v10999_v21  ;;  %v2669_v20 = vmul.f32 1.442695, %v2521_v2  ;;  %v3309_v54 = vmul.f32 %v8622_v55, %v3308_v1  ;;  %2295 = vmax.xlane.f32.xlu2 %v11002_v23  ;;  %5385 = vmatmul.f32.gmra.mxu1 %v10994_v62  ;;  %v1229_v2 = vmul.f32 %v1101_v13, %v10072_v38  ;;  %vm3316_vm3 = vcmp.eq.f32.partialorder %v3315_v29, 8.507059e+37  ;;  %v1102_v29 = vld [vmem:[%s16539_s14 + $0x250] sm:$0xff]  ;;  %vm3328_vm6 = vmor %vm3326_vm5, %vm3327_vm4 }
 0x431   : > { %8629 = vpow2.f32 %v2667_v56  ;;  %v3324_v15 = vmul.f32 %v10982_v52, %v3323_v12  ;;  %v3318_v56 = vor.u32 1.1754944e-38, %v3317_v10  ;;  %vm3341_vm9 = vweird.f32 %v10980_v47 }
 0x432   : > { %v11016_v19 = vpop.eup %8627  ;;  %8631 = vpow2.f32 %v2669_v20  ;;  %v3310_v45 = vadd.f32 %v8622_v55, %v3309_v54 }
 0x433   : > { %v3337_v49 = vmul.f32 %v11016_v19, %v10980_v47  ;;  %v2288_v17 = vpop.xlane.xlu0 %2287  ;;  %v3325_v10 = vadd.f32 %v10982_v52, %v3324_v15  ;;  %v3330_v15 = vand.u32 2147483647, %v10960_v0  ;;  %vm3342_vm8 = vweird.f32 %v11016_v19 }
 0x434   : > { %v11025_v1 = vpop.xlane.xlu2 %2913  ;;  %v2522_v12 = vsub.f32 %v10800_v3, %v2288_v17  ;;  %8171 = vmatmul.msk.f32.gmra.mxu3 %vm776_vm0, %v1229_v2  ;;  %v3314_v20 = vsel %vm3313_vm2, %v8622_v55, %v3310_v45  ;;  %v3332_v3 = vand.u32 2147483648, %v10960_v0  ;;  %v1311_v0 = vld [vmem:[%s16540_s15 + $0xd8] sm:$0xff]  ;;  %vm3343_vm10 = vmor %vm3341_vm9, %vm3342_vm8 }
 0x435   : > { %v3338_v58 = vsub.f32 1.0, %v3337_v49  ;;  %8633 = vrcp.f32 %v11025_v1  ;;  %v11031_v13 = vpop.xlane.xlu1 %2915  ;;  %v3319_v54 = vsel %vm3316_vm3, %v3318_v56, %v3314_v20  ;;  %v3329_v2 = vsel %vm3328_vm6, %v10982_v52, %v3325_v10  ;;  %v1312_v20 = vld [vmem:[%s16540_s15 + $0xe0] sm:$0xff] }
 0x436   : > { %v2671_v26 = vmul.f32 1.442695, %v2522_v12  ;;  %v11035_v63 = vmul.f32 %v10734_v27, %v3319_v54  ;;  %8635 = vrcp.f32 %v11031_v13  ;;  %v1230_v49 = vmul.f32 %v1102_v29, %v10076_v39 }
 0x437   : > { %v11038_v17 = vpop.eup %8629  ;;  %v11041_v55 = vpop.f32.mrf.mxu3  ;;  %2297 = vmax.xlane.f32.xlu1 %v11023_v24  ;;  %v3339_v45 = vmul.f32 %v11016_v19, %v3338_v58  ;;  %v3333_v56 = vor.u32 1.1754944e-38, %v3332_v3  ;;  %vm3331_vm7 = vcmp.eq.f32.partialorder %v3330_v15, 8.507059e+37  ;;  %v11074_v3 = vadd.f32 %v10549_v50, %v1311_v0 }
 0x438   : > { %16634 = vst [vmem:[#allocation68_spill] sm:$0xff] %v11035_v63  ;;  %v11049_v27 = vpop.eup %8631  ;;  %8637 = vpow2.f32 %v2671_v26  ;;  %2923 = vadd.xlane.f32.xlu0 %v11038_v17  ;;  %5388 = vmatmul.f32.gmra.mxu1 %v11035_v63  ;;  %vm3356_vm13 = vweird.f32 %v11025_v1  ;;  %vm3371_vm2 = vweird.f32 %v11031_v13 }
 0x439   : > { %16635 = vst [vmem:[#allocation69_spill] sm:$0xff] %v11041_v55  ;;  %2925 = vadd.xlane.f32.xlu2 %v11049_v27  ;;  %v3334_v58 = vsel %vm3331_vm7, %v3333_v56, %v3329_v2  ;;  %v3340_v63 = vadd.f32 %v11016_v19, %v3339_v45  ;;  %v3347_v2 = vand.u32 2147483648, %v10980_v47  ;;  %v1103_v45 = vld [vmem:[%s16539_s14 + $0x258] sm:$0xff] }
 0x43a   : > { %v11088_v50 = vmul.f32 %v10738_v16, %v3334_v58 }
 0x43b   : > { %v11062_v12 = vpop.eup %8633  ;;  %v3344_v0 = vsel %vm3343_vm10, %v11016_v19, %v3340_v63 }
 0x43c   : > { %v3352_v54 = vmul.f32 %v11062_v12, %v11025_v1  ;;  %v2290_v52 = vpop.xlane.xlu2 %2289  ;;  %8172 = vmatmul.msk.f32.gmra.mxu3 %vm776_vm0, %v1230_v49  ;;  %v11070_v10 = vpop.eup %8635  ;;  %v11082_v49 = vadd.f32 %v10556_v9, %v1312_v20  ;;  %16637 = vst [vmem:[#allocation71_spill] sm:$0xff] %v11088_v50  ;;  %vm3357_vm12 = vweird.f32 %v11062_v12 }
 0x43d   : > { %v2523_v26 = vsub.f32 %v10837_v46, %v2290_v52  ;;  %v2292_v29 = vpop.xlane.xlu1 %2291  ;;  %v3367_v16 = vmul.f32 %v11070_v10, %v11031_v13  ;;  %vm3358_vm14 = vmor %vm3356_vm13, %vm3357_vm12  ;;  %vm3372_vm1 = vweird.f32 %v11070_v10 }
 0x43e   : > { %v11078_v15 = vpop.eup %8637  ;;  %v3353_v62 = vsub.f32 1.0, %v3352_v54  ;;  %v2524_v55 = vsub.f32 %v10848_v51, %v2292_v29  ;;  %v3345_v51 = vand.u32 2147483647, %v10980_v47  ;;  %v1231_v47 = vmul.f32 %v1103_v45, %v10080_v40  ;;  %v1313_v54 = vld [vmem:[%s16540_s15 + $0xe8] sm:$0xff]  ;;  %vm3373_vm3 = vmor %vm3371_vm2, %vm3372_vm1 }
 0x43f   : > { %v2673_v56 = vmul.f32 1.442695, %v2523_v26  ;;  %v11085_v46 = vpop.f32.mrf.mxu3  ;;  %2927 = vadd.xlane.f32.xlu1 %v11078_v15  ;;  %v3368_v58 = vsub.f32 1.0, %v3367_v16  ;;  %v11111_v26 = vadd.f32 %v10563_v61, %v1313_v54  ;;  %v1104_v61 = vld [vmem:[%s16539_s14 + $0x260] sm:$0xff]  ;;  %v3377_v54 = vand.u32 2147483648, %v11031_v13 }
 0x440   : > { %16636 = vst [vmem:[#allocation70_spill] sm:$0xff] %v11085_v46  ;;  %v2675_v9 = vmul.f32 1.442695, %v2524_v55  ;;  %2299 = vmax.xlane.f32.xlu0 %v11074_v3  ;;  %5391 = vmatmul.f32.gmra.mxu1 %v11088_v50  ;;  %v3354_v20 = vmul.f32 %v11062_v12, %v3353_v62  ;;  %v3348_v55 = vor.u32 1.1754944e-38, %v3347_v2  ;;  %vm3346_vm11 = vcmp.eq.f32.partialorder %v3345_v51, 8.507059e+37  ;;  %v16659_v50 = vld [vmem:[#allocation41_spill] sm:$0xff] }
 0x441   : > { %8639 = vpow2.f32 %v2673_v56  ;;  %2301 = vmax.xlane.f32.xlu2 %v11082_v49  ;;  %v3362_v62 = vand.u32 2147483648, %v11025_v1  ;;  %v3360_v56 = vand.u32 2147483647, %v11025_v1  ;;  %v3369_v51 = vmul.f32 %v11070_v10, %v3368_v58  ;;  %v1314_v1 = vld [vmem:[%s16540_s15 + $0xf0] sm:$0xff] }
 0x442   : > { %8641 = vpow2.f32 %v2675_v9  ;;  %v3349_v52 = vsel %vm3346_vm11, %v3348_v55, %v3344_v0  ;;  %v3355_v19 = vadd.f32 %v11062_v12, %v3354_v20  ;;  %v1232_v9 = vmul.f32 %v1104_v61, %v10084_v41  ;;  %v1315_v0 = vld [vmem:[%s16540_s15 + $0xf8] sm:$0xff]  ;;  %v16642_v58 = vld [vmem:[#allocation39_spill] sm:$0xff] }
 0x443   : > { %v11121_v2 = vmul.f32 %v10767_v60, %v3349_v52  ;;  %v3363_v16 = vor.u32 1.1754944e-38, %v3362_v62  ;;  %vm3361_vm15 = vcmp.eq.f32.partialorder %v3360_v56, 8.507059e+37  ;;  %v1105_v61 = vld [vmem:[%s16539_s14 + $0x268] sm:$0xff]  ;;  %v3375_v56 = vand.u32 2147483647, %v11031_v13 }
 0x444   : > { %8173 = vmatmul.msk.f32.gmra.mxu3 %vm776_vm0, %v1231_v47  ;;  %v3359_v60 = vsel %vm3358_vm14, %v11062_v12, %v3355_v19  ;;  %v3370_v47 = vadd.f32 %v11070_v10, %v3369_v51  ;;  %v16640_v12 = vld [vmem:[#allocation38_spill] sm:$0xff]  ;;  %v11153_v19 = vadd.f32 %v16642_v58, %v1315_v0  ;;  %v3378_v51 = vor.u32 1.1754944e-38, %v3377_v54 }
 0x445   : > { %16639 = vst [vmem:[#allocation73_spill] sm:$0xff] %v11121_v2  ;;  %v3364_v20 = vsel %vm3361_vm15, %v3363_v16, %v3359_v60  ;;  %v11147_v55 = vadd.f32 %v16640_v12, %v1314_v1  ;;  %vm3376_vm4 = vcmp.eq.f32.partialorder %v3375_v56, 8.507059e+37  ;;  %v1106_v1 = vld [vmem:[%s16539_s14 + $0x270] sm:$0xff]  ;;  %v1108_v12 = vld [vmem:[%s16539_s14 + $0x280] sm:$0xff] }
 0x446   : > { %v11156_v62 = vmul.f32 %v10813_v53, %v3364_v20  ;;  %v3374_v60 = vsel %vm3373_vm3, %v11070_v10, %v3370_v47  ;;  %v1233_v53 = vmul.f32 %v1105_v61, %v10088_v42  ;;  %v1234_v10 = vmul.f32 %v1106_v1, %v10092_v43  ;;  %v1107_v20 = vld [vmem:[%s16539_s14 + $0x278] sm:$0xff]  ;;  %v1109_v61 = vld [vmem:[%s16539_s14 + $0x288] sm:$0xff] }
 0x447   : > { %v11116_v63 = vpop.eup %8639  ;;  %v11118_v29 = vpop.f32.mrf.mxu3  ;;  %2303 = vmax.xlane.f32.xlu1 %v11111_v26  ;;  %v1235_v47 = vmul.f32 %v1107_v20, %v10096_v44  ;;  %v1236_v54 = vmul.f32 %v1108_v12, %v10036_v28  ;;  %v1237_v56 = vmul.f32 %v1109_v61, %v10040_v30  ;;  %v1111_v1 = vld [vmem:[%s16539_s14 + $0x298] sm:$0xff]  ;;  %v1113_v61 = vld [vmem:[%s16539_s14 + $0x2a8] sm:$0xff] }
 0x448   : > { %16638 = vst [vmem:[#allocation72_spill] sm:$0xff] %v11118_v29  ;;  %v11129_v45 = vpop.eup %8641  ;;  %2929 = vadd.xlane.f32.xlu0 %v11116_v63  ;;  %5394 = vmatmul.f32.gmra.mxu1 %v11121_v2 }
 0x449   : > { %2931 = vadd.xlane.f32.xlu2 %v11129_v45  ;;  %16643 = vst [vmem:[#allocation39_spill] sm:$0xff] %v11156_v62 }
 0x44c   : > { %8174 = vmatmul.msk.f32.gmra.mxu3 %vm776_vm0, %v1232_v9  ;;  %v3379_v9 = vsel %vm3376_vm4, %v3378_v51, %v3374_v60 }
 0x44d   : > { %v11172_v13 = vmul.f32 %v10816_v4, %v3379_v9 }
 0x44f   : > { %v11150_v52 = vpop.f32.mrf.mxu3  ;;  %16645 = vst [vmem:[#allocation75_spill] sm:$0xff] %v11172_v13 }
 0x450   : > { %16641 = vst [vmem:[#allocation38_spill] sm:$0xff] %v11150_v52  ;;  %2305 = vmax.xlane.f32.xlu0 %v11147_v55  ;;  %5397 = vmatmul.f32.gmra.mxu1 %v11156_v62 }
 0x451   : > { %2307 = vmax.xlane.f32.xlu2 %v11153_v19 }
 0x454   : > { %8175 = vmatmul.msk.f32.gmra.mxu3 %vm776_vm0, %v1233_v53  ;;  %v1110_v53 = vld [vmem:[%s16539_s14 + $0x290] sm:$0xff] }
 0x455   : > { %v1238_v51 = vmul.f32 %v1110_v53, %v10044_v31 }
 0x457   : > { %v11169_v16 = vpop.f32.mrf.mxu3 }
 0x458   : > { %16644 = vst [vmem:[#allocation74_spill] sm:$0xff] %v11169_v16  ;;  %5400 = vmatmul.f32.gmra.mxu1 %v11172_v13 }
 0x45c   : > { %8176 = vmatmul.msk.f32.gmra.mxu3 %vm776_vm0, %v1234_v10  ;;  %v1239_v10 = vmul.f32 %v1111_v1, %v10048_v32  ;;  %v1114_v1 = vld [vmem:[%s16539_s14 + $0x2b0] sm:$0xff] }
 0x45f   : > { %v11180_v0 = vpop.f32.mrf.mxu3 }
 0x460   : > { %16646 = vst [vmem:[#allocation76_spill] sm:$0xff] %v11180_v0 }
 0x464   : > { %8177 = vmatmul.msk.f32.gmra.mxu3 %vm776_vm0, %v1235_v47  ;;  %v1112_v47 = vld [vmem:[%s16539_s14 + $0x2a0] sm:$0xff] }
 0x465   : > { %v1240_v12 = vmul.f32 %v1112_v47, %v10052_v33  ;;  %v1242_v47 = vmul.f32 %v1114_v1, %v10060_v35 }
 0x467   : > { %v11187_v4 = vpop.f32.mrf.mxu3 }
 0x468   : > { %16647 = vst [vmem:[#allocation77_spill] sm:$0xff] %v11187_v4 }
 0x46c   : > { %8178 = vmatmul.msk.f32.gmra.mxu3 %vm776_vm0, %v1236_v54 }
 0x46f   : > { %v11194_v58 = vpop.f32.mrf.mxu3 }
 0x470   : > { %16648 = vst [vmem:[#allocation78_spill] sm:$0xff] %v11194_v58 }
 0x474   : > { %8179 = vmatmul.msk.f32.gmra.mxu3 %vm776_vm0, %v1237_v56  ;;  %v1241_v56 = vmul.f32 %v1113_v61, %v10056_v34 }
 0x477   : > { %v11201_v60 = vpop.f32.mrf.mxu3 }
 0x478   : > { %16649 = vst [vmem:[#allocation79_spill] sm:$0xff] %v11201_v60 }
 0x47c   : > { %8180 = vmatmul.msk.f32.gmra.mxu3 %vm776_vm0, %v1238_v51 }
 0x47f   : > { %v11208_v9 = vpop.f32.mrf.mxu3 }
 0x480   : > { %16650 = vst [vmem:[#allocation80_spill] sm:$0xff] %v11208_v9 }
 0x484   : > { %8181 = vmatmul.msk.f32.gmra.mxu3 %vm776_vm0, %v1239_v10 }
 0x487   : > { %v11215_v20 = vpop.f32.mrf.mxu3 }
 0x488   : > { %16651 = vst [vmem:[#allocation81_spill] sm:$0xff] %v11215_v20 }
 0x48c   : > { %8182 = vmatmul.msk.f32.gmra.mxu3 %vm776_vm0, %v1240_v12 }
 0x48f   : > { %v11222_v54 = vpop.f32.mrf.mxu3 }
 0x490   : > { %16652 = vst [vmem:[#allocation82_spill] sm:$0xff] %v11222_v54 }
 0x492   : > { %v2918_v53 = vpop.xlane.xlu0 %2917 }
 0x493   : > { %8643 = vrcp.f32 %v2918_v53  ;;  %v3390_v1 = vand.u32 2147483647, %v2918_v53  ;;  %vm3386_vm6 = vweird.f32 %v2918_v53 }
 0x494   : > { %8183 = vmatmul.msk.f32.gmra.mxu3 %vm776_vm0, %v1241_v56  ;;  %v3392_v56 = vand.u32 2147483648, %v2918_v53 }
 0x495   : > { %vm3391_vm8 = vcmp.eq.f32.partialorder %v3390_v1, 8.507059e+37 }
 0x497   : > { %v11229_v51 = vpop.f32.mrf.mxu3 }
 0x498   : > { %16653 = vst [vmem:[#allocation83_spill] sm:$0xff] %v11229_v51  ;;  %v1115_v51 = vld [vmem:[%s16539_s14 + $0x2b8] sm:$0xff] }
 0x499   : > { %v8644_v10 = vpop.eup %8643 }
 0x49a   : > { %v3382_v12 = vmul.f32 %v8644_v10, %v2918_v53  ;;  %v2294_v54 = vpop.xlane.xlu0 %2293  ;;  %vm3387_vm5 = vweird.f32 %v8644_v10 }
 0x49b   : > { %v2920_v20 = vpop.xlane.xlu2 %2919  ;;  %v2525_v9 = vsub.f32 %v10957_v57, %v2294_v54  ;;  %v1243_v57 = vmul.f32 %v1115_v51, %v10064_v36  ;;  %vm3388_vm7 = vmor %vm3386_vm6, %vm3387_vm5  ;;  %v3393_v54 = vor.u32 1.1754944e-38, %v3392_v56 }
 0x49c   : > { %8184 = vmatmul.msk.f32.gmra.mxu3 %vm776_vm0, %v1242_v47  ;;  %v3383_v61 = vsub.f32 1.0, %v3382_v12  ;;  %8645 = vrcp.f32 %v2920_v20  ;;  %v3407_v56 = vand.u32 2147483648, %v2920_v20  ;;  %vm3401_vm10 = vweird.f32 %v2920_v20 }
 0x49d   : > { %v2677_v60 = vmul.f32 1.442695, %v2525_v9 }
 0x49e   : > { %v3384_v4 = vmul.f32 %v8644_v10, %v3383_v61 }
 0x49f   : > { %v11237_v58 = vpop.f32.mrf.mxu3  ;;  %8647 = vpow2.f32 %v2677_v60 }
 0x4a0   : > { %16654 = vst [vmem:[#allocation84_spill] sm:$0xff] %v11237_v58  ;;  %v3385_v0 = vadd.f32 %v8644_v10, %v3384_v4 }
 0x4a2   : > { %v11242_v13 = vpop.xlane.xlu1 %2921  ;;  %v8646_v9 = vpop.eup %8645  ;;  %v3389_v47 = vsel %vm3388_vm7, %v8644_v10, %v3385_v0  ;;  %v1116_v10 = vld [vmem:[%s16539_s14 + $0x2c0] sm:$0xff] }
 0x4a3   : > { %8649 = vrcp.f32 %v11242_v13  ;;  %v3397_v12 = vmul.f32 %v8646_v9, %v2920_v20  ;;  %v2296_v58 = vpop.xlane.xlu2 %2295  ;;  %v3394_v61 = vsel %vm3391_vm8, %v3393_v54, %v3389_v47  ;;  %vm3402_vm9 = vweird.f32 %v8646_v9 }
 0x4a4   : > { %8185 = vmatmul.msk.f32.gmra.mxu3 %vm776_vm0, %v1243_v57  ;;  %v2526_v60 = vsub.f32 %v11002_v23, %v2296_v58  ;;  %v11249_v4 = vmul.f32 %v10938_v8, %v3394_v61  ;;  %v3405_v23 = vand.u32 2147483647, %v2920_v20  ;;  %v1316_v8 = vld [vmem:[%s16540_s15 + $0x100] sm:$0xff]  ;;  %v1244_v47 = vmul.f32 %v1116_v10, %v10068_v37  ;;  %vm3403_vm11 = vmor %vm3401_vm10, %vm3402_vm9 }
 0x4a5   : > { %v11251_v53 = vpop.eup %8647  ;;  %v3398_v51 = vsub.f32 1.0, %v3397_v12  ;;  %v3422_v10 = vand.u32 2147483648, %v11242_v13  ;;  %vm3416_vm14 = vweird.f32 %v11242_v13 }
 0x4a6   : > { %v2679_v62 = vmul.f32 1.442695, %v2526_v60  ;;  %5403 = vmatmul.f32.gmra.mxu1 %v11249_v4  ;;  %2933 = vadd.xlane.f32.xlu1 %v11251_v53  ;;  %vm3406_vm12 = vcmp.eq.f32.partialorder %v3405_v23, 8.507059e+37  ;;  %v1117_v23 = vld [vmem:[%s16539_s14 + $0x2c8] sm:$0xff] }
 0x4a7   : > { %v11255_v0 = vpop.f32.mrf.mxu3  ;;  %v3399_v1 = vmul.f32 %v8646_v9, %v3398_v51  ;;  %v3408_v51 = vor.u32 1.1754944e-38, %v3407_v56 }
 0x4a8   : > { %16655 = vst [vmem:[#allocation85_spill] sm:$0xff] %v11255_v0  ;;  %8651 = vpow2.f32 %v2679_v62  ;;  %v16656_v0 = vld [vmem:[#allocation40_spill] sm:$0xff] }
 0x4a9   : > { %v8650_v58 = vpop.eup %8649  ;;  %v3400_v12 = vadd.f32 %v8646_v9, %v3399_v1  ;;  %v11269_v16 = vadd.f32 %v16656_v0, %v1316_v8  ;;  %v3420_v1 = vand.u32 2147483647, %v11242_v13 }
 0x4aa   : > { %v3412_v57 = vmul.f32 %v8650_v58, %v11242_v13  ;;  %v2298_v54 = vpop.xlane.xlu1 %2297  ;;  %vm3417_vm13 = vweird.f32 %v8650_v58  ;;  %v1317_v13 = vld [vmem:[%s16540_s15 + $0x108] sm:$0xff] }
 0x4ab   : > { %v2527_v61 = vsub.f32 %v11023_v24, %v2298_v54  ;;  %v11266_v60 = vpop.xlane.xlu0 %2923  ;;  %v3404_v62 = vsel %vm3403_vm11, %v8646_v9, %v3400_v12  ;;  %vm3418_vm15 = vmor %vm3416_vm14, %vm3417_vm13  ;;  %vm3421_vm1 = vcmp.eq.f32.partialorder %v3420_v1, 8.507059e+37 }
 0x4ac   : > { %v3413_v52 = vsub.f32 1.0, %v3412_v57  ;;  %v11271_v2 = vpop.xlane.xlu2 %2925  ;;  %8653 = vrcp.f32 %v11266_v60  ;;  %8186 = vmatmul.msk.f32.gmra.mxu3 %vm776_vm0, %v1244_v47  ;;  %v3409_v24 = vsel %vm3406_vm12, %v3408_v51, %v3404_v62  ;;  %v1245_v47 = vmul.f32 %v1117_v23, %v10072_v38 }
 0x4ad   : > { %8655 = vrcp.f32 %v11271_v2  ;;  %v2681_v20 = vmul.f32 1.442695, %v2527_v61  ;;  %v11278_v56 = vmul.f32 %v10973_v7, %v3409_v24  ;;  %vm3431_vm3 = vweird.f32 %v11266_v60 }
 0x4ae   : > { %v3414_v0 = vmul.f32 %v8650_v58, %v3413_v52  ;;  %v11281_v8 = vpop.eup %8651  ;;  %2309 = vmax.xlane.f32.xlu1 %v11269_v16  ;;  %v3423_v52 = vor.u32 1.1754944e-38, %v3422_v10  ;;  %vm3446_vm7 = vweird.f32 %v11271_v2 }
 0x4af   : > { %8657 = vpow2.f32 %v2681_v20  ;;  %v11284_v9 = vpop.f32.mrf.mxu3  ;;  %2935 = vadd.xlane.f32.xlu0 %v11281_v8  ;;  %5406 = vmatmul.f32.gmra.mxu1 %v11278_v56 }
 0x4b0   : > { %16657 = vst [vmem:[#allocation40_spill] sm:$0xff] %v11284_v9  ;;  %v3415_v7 = vadd.f32 %v8650_v58, %v3414_v0 }
 0x4b2   : > { %v8654_v57 = vpop.eup %8653  ;;  %v11292_v54 = vpop.xlane.xlu1 %2927  ;;  %v3419_v12 = vsel %vm3418_vm15, %v8650_v58, %v3415_v7 }
 0x4b3   : > { %v11295_v61 = vpop.eup %8655  ;;  %v3427_v51 = vmul.f32 %v8654_v57, %v11266_v60  ;;  %8659 = vrcp.f32 %v11292_v54  ;;  %v2300_v62 = vpop.xlane.xlu0 %2299  ;;  %v3424_v20 = vsel %vm3421_vm1, %v3423_v52, %v3419_v12  ;;  %v11313_v52 = vadd.f32 %v16659_v50, %v1317_v13 }
 0x4b4   : > { %v3442_v24 = vmul.f32 %v11295_v61, %v11271_v2  ;;  %v2302_v10 = vpop.xlane.xlu2 %2301  ;;  %v2528_v0 = vsub.f32 %v11074_v3, %v2300_v62  ;;  %8187 = vmatmul.msk.f32.gmra.mxu3 %vm776_vm0, %v1245_v47  ;;  %v11307_v58 = vmul.f32 %v10996_v22, %v3424_v20  ;;  %v3437_v12 = vand.u32 2147483648, %v11266_v60  ;;  %v1118_v22 = vld [vmem:[%s16539_s14 + $0x2d0] sm:$0xff] }
 0x4b5   : > { %v11309_v1 = vpop.eup %8657  ;;  %v3428_v23 = vsub.f32 1.0, %v3427_v51  ;;  %v2529_v7 = vsub.f32 %v11082_v49, %v2302_v10  ;;  %v1318_v47 = vld [vmem:[%s16540_s15 + $0x110] sm:$0xff]  ;;  %vm3432_vm2 = vweird.f32 %v8654_v57  ;;  %v3435_v49 = vand.u32 2147483647, %v11266_v60 }
 0x4b6   : > { %16658 = vst [vmem:[#allocation86_spill] sm:$0xff] %v11307_v58  ;;  %v3443_v9 = vsub.f32 1.0, %v3442_v24  ;;  %v2683_v29 = vmul.f32 1.442695, %v2528_v0  ;;  %2937 = vadd.xlane.f32.xlu2 %v11309_v1  ;;  %v16661_v0 = vld [vmem:[#allocation42_spill] sm:$0xff]  ;;  %vm3433_vm4 = vmor %vm3431_vm3, %vm3432_vm2  ;;  %vm3447_vm6 = vweird.f32 %v11295_v61  ;;  %vm3461_vm11 = vweird.f32 %v11292_v54 }
 0x4b7   : > { %v2685_v3 = vmul.f32 1.442695, %v2529_v7  ;;  %v3429_v51 = vmul.f32 %v8654_v57, %v3428_v23  ;;  %2311 = vmax.xlane.f32.xlu0 %v11313_v52  ;;  %5409 = vmatmul.f32.gmra.mxu1 %v11307_v58  ;;  %v11326_v50 = vpop.f32.mrf.mxu3  ;;  %v11336_v23 = vadd.f32 %v16661_v0, %v1318_v47  ;;  %v3438_v7 = vor.u32 1.1754944e-38, %v3437_v12  ;;  %vm3448_vm8 = vmor %vm3446_vm7, %vm3447_vm6 }
 0x4b8   : > { %8661 = vpow2.f32 %v2683_v29  ;;  %16660 = vst [vmem:[#allocation41_spill] sm:$0xff] %v11326_v50  ;;  %v3444_v62 = vmul.f32 %v11295_v61, %v3443_v9  ;;  %v1246_v29 = vmul.f32 %v1118_v22, %v10076_v39  ;;  %vm3436_vm5 = vcmp.eq.f32.partialorder %v3435_v49, 8.507059e+37 }
 0x4b9   : > { %v11329_v13 = vpop.eup %8659  ;;  %8663 = vpow2.f32 %v2685_v3  ;;  %v3430_v20 = vadd.f32 %v8654_v57, %v3429_v51  ;;  %v3450_v49 = vand.u32 2147483647, %v11271_v2  ;;  %v3467_v58 = vand.u32 2147483648, %v11292_v54 }
 0x4ba   : > { %v3457_v24 = vmul.f32 %v11329_v13, %v11292_v54  ;;  %v2304_v10 = vpop.xlane.xlu1 %2303  ;;  %v3445_v47 = vadd.f32 %v11295_v61, %v3444_v62  ;;  %vm3462_vm10 = vweird.f32 %v11329_v13 }
 0x4bb   : > { %v2530_v9 = vsub.f32 %v11111_v26, %v2304_v10  ;;  %v11340_v50 = vpop.xlane.xlu0 %2929  ;;  %v3434_v3 = vsel %vm3433_vm4, %v8654_v57, %v3430_v20  ;;  %v3452_v26 = vand.u32 2147483648, %v11271_v2  ;;  %v1319_v10 = vld [vmem:[%s16540_s15 + $0x118] sm:$0xff]  ;;  %vm3451_vm9 = vcmp.eq.f32.partialorder %v3450_v49, 8.507059e+37  ;;  %vm3463_vm12 = vmor %vm3461_vm11, %vm3462_vm10 }
 0x4bc   : > { %v3458_v60 = vsub.f32 1.0, %v3457_v24  ;;  %v11343_v51 = vpop.xlane.xlu2 %2931  ;;  %8665 = vrcp.f32 %v11340_v50  ;;  %8188 = vmatmul.msk.f32.gmra.mxu3 %vm776_vm0, %v1246_v29  ;;  %v3439_v22 = vsel %vm3436_vm5, %v3438_v7, %v3434_v3  ;;  %v3449_v62 = vsel %vm3448_vm8, %v11295_v61, %v3445_v47  ;;  %v1320_v3 = vld [vmem:[%s16540_s15 + $0x120] sm:$0xff] }
 0x4bd   : > { %v2687_v0 = vmul.f32 1.442695, %v2530_v9  ;;  %v11349_v12 = vmul.f32 %v11038_v17, %v3439_v22  ;;  %8667 = vrcp.f32 %v11343_v51  ;;  %v1119_v17 = vld [vmem:[%s16539_s14 + $0x2d8] sm:$0xff]  ;;  %v3453_v24 = vor.u32 1.1754944e-38, %v3452_v26 }
 0x4be   : > { %v11352_v57 = vpop.eup %8661  ;;  %2313 = vmax.xlane.f32.xlu2 %v11336_v23  ;;  %v3459_v2 = vmul.f32 %v11329_v13, %v3458_v60  ;;  %v1247_v9 = vmul.f32 %v1119_v17, %v10080_v40  ;;  %vm3476_vm15 = vweird.f32 %v11340_v50  ;;  %vm3491_vm4 = vweird.f32 %v11343_v51 }
 0x4bf   : > { %16662 = vst [vmem:[#allocation42_spill] sm:$0xff] %v11349_v12  ;;  %v11358_v20 = vpop.eup %8663  ;;  %8669 = vpow2.f32 %v2687_v0  ;;  %2939 = vadd.xlane.f32.xlu1 %v11352_v57  ;;  %5412 = vmatmul.f32.gmra.mxu1 %v11349_v12  ;;  %v11375_v7 = vpop.f32.mrf.mxu3  ;;  %v3454_v22 = vsel %vm3451_vm9, %v3453_v24, %v3449_v62  ;;  %v16665_v62 = vld [vmem:[#allocation44_spill] sm:$0xff] }
 0x4c0   : > { %2941 = vadd.xlane.f32.xlu0 %v11358_v20  ;;  %16663 = vst [vmem:[#allocation87_spill] sm:$0xff] %v11375_v7  ;;  %v16664_v7 = vld [vmem:[#allocation43_spill] sm:$0xff]  ;;  %v3460_v17 = vadd.f32 %v11329_v13, %v3459_v2  ;;  %v11396_v24 = vadd.f32 %v16665_v62, %v1320_v3  ;;  %v3465_v2 = vand.u32 2147483647, %v11292_v54  ;;  %v3468_v3 = vor.u32 1.1754944e-38, %v3467_v58 }
 0x4c1   : > { %v11388_v46 = vadd.f32 %v16664_v7, %v1319_v10  ;;  %v11401_v10 = vmul.f32 %v11049_v27, %v3454_v22  ;;  %v3480_v62 = vand.u32 2147483647, %v11340_v50 }
 0x4c2   : > { %v11373_v29 = vpop.eup %8665  ;;  %v3464_v27 = vsel %vm3463_vm12, %v11329_v13, %v3460_v17  ;;  %vm3466_vm13 = vcmp.eq.f32.partialorder %v3465_v2, 8.507059e+37  ;;  %v3482_v13 = vand.u32 2147483648, %v11340_v50 }
 0x4c3   : > { %v3472_v61 = vmul.f32 %v11373_v29, %v11340_v50  ;;  %v2306_v60 = vpop.xlane.xlu0 %2305  ;;  %v11383_v47 = vpop.eup %8667  ;;  %vm3477_vm14 = vweird.f32 %v11373_v29  ;;  %vm3481_vm2 = vcmp.eq.f32.partialorder %v3480_v62, 8.507059e+37  ;;  %v1122_v62 = vld [vmem:[%s16539_s14 + $0x2f0] sm:$0xff] }
 0x4c4   : > { %v2308_v0 = vpop.xlane.xlu2 %2307  ;;  %v2531_v26 = vsub.f32 %v11147_v55, %v2306_v60  ;;  %8189 = vmatmul.msk.f32.gmra.mxu3 %vm776_vm0, %v1247_v9  ;;  %v3487_v9 = vmul.f32 %v11383_v47, %v11343_v51  ;;  %v3469_v60 = vsel %vm3466_vm13, %v3468_v3, %v3464_v27  ;;  %vm3478_vm1 = vmor %vm3476_vm15, %vm3477_vm14  ;;  %vm3492_vm3 = vweird.f32 %v11383_v47 }
 0x4c5   : > { %v11392_v49 = vpop.eup %8669  ;;  %v3473_v21 = vsub.f32 1.0, %v3472_v61  ;;  %v2532_v12 = vsub.f32 %v11153_v19, %v2308_v0  ;;  %v1120_v19 = vld [vmem:[%s16539_s14 + $0x2e0] sm:$0xff]  ;;  %v11432_v58 = vmul.f32 %v11078_v15, %v3469_v60  ;;  %v3497_v3 = vand.u32 2147483648, %v11343_v51  ;;  %vm3493_vm5 = vmor %vm3491_vm4, %vm3492_vm3 }
 0x4c6   : > { %v2689_v55 = vmul.f32 1.442695, %v2531_v26  ;;  %2943 = vadd.xlane.f32.xlu2 %v11392_v49  ;;  %v1248_v61 = vmul.f32 %v1120_v19, %v10084_v41  ;;  %v3488_v22 = vsub.f32 1.0, %v3487_v9  ;;  %v1322_v19 = vld [vmem:[%s16540_s15 + $0x130] sm:$0xff]  ;;  %v1323_v9 = vld [vmem:[%s16540_s15 + $0x138] sm:$0xff] }
 0x4c7   : > { %v2691_v7 = vmul.f32 1.442695, %v2532_v12  ;;  %2315 = vmax.xlane.f32.xlu1 %v11388_v46  ;;  %5415 = vmatmul.f32.gmra.mxu1 %v11401_v10  ;;  %v3474_v54 = vmul.f32 %v11373_v29, %v3473_v21  ;;  %v1321_v12 = vld [vmem:[%s16540_s15 + $0x128] sm:$0xff]  ;;  %v11419_v0 = vpop.f32.mrf.mxu3  ;;  %v16669_v60 = vld [vmem:[#allocation49_spill] sm:$0xff] }
 0x4c8   : > { %8671 = vpow2.f32 %v2689_v55  ;;  %2317 = vmax.xlane.f32.xlu0 %v11396_v24  ;;  %16666 = vst [vmem:[#allocation43_spill] sm:$0xff] %v11419_v0  ;;  %v11423_v26 = vadd.f32 %v10624_v14, %v1321_v12  ;;  %v1121_v14 = vld [vmem:[%s16539_s14 + $0x2e8] sm:$0xff]  ;;  %v3489_v2 = vmul.f32 %v11383_v47, %v3488_v22  ;;  %v11463_v22 = vadd.f32 %v16669_v60, %v1323_v9 }
 0x4c9   : > { %8673 = vpow2.f32 %v2691_v7  ;;  %v3475_v21 = vadd.f32 %v11373_v29, %v3474_v54  ;;  %v3483_v7 = vor.u32 1.1754944e-38, %v3482_v13  ;;  %v1249_v50 = vmul.f32 %v1121_v14, %v10088_v42 }
 0x4ca   : > { %v3490_v54 = vadd.f32 %v11383_v47, %v3489_v2  ;;  %v3495_v13 = vand.u32 2147483647, %v11343_v51 }
 0x4cb   : > { %v3479_v15 = vsel %vm3478_vm1, %v11373_v29, %v3475_v21  ;;  %v16667_v29 = vld [vmem:[#allocation46_spill] sm:$0xff] }
 0x4cc   : > { %8190 = vmatmul.msk.f32.gmra.mxu3 %vm776_vm0, %v1248_v61  ;;  %v3484_v27 = vsel %vm3481_vm2, %v3483_v7, %v3479_v15  ;;  %v11457_v12 = vadd.f32 %v16667_v29, %v1322_v19  ;;  %v3494_v14 = vsel %vm3493_vm5, %v11383_v47, %v3490_v54  ;;  %v3498_v15 = vor.u32 1.1754944e-38, %v3497_v3  ;;  %v1123_v7 = vld [vmem:[%s16539_s14 + $0x2f8] sm:$0xff]  ;;  %v1124_v19 = vld [vmem:[%s16539_s14 + $0x300] sm:$0xff]  ;;  %v1126_v3 = vld [vmem:[%s16539_s14 + $0x310] sm:$0xff] }
 0x4cd   : > { %v11466_v21 = vmul.f32 %v11116_v63, %v3484_v27  ;;  %v1250_v63 = vmul.f32 %v1122_v62, %v10092_v43  ;;  %vm3496_vm6 = vcmp.eq.f32.partialorder %v3495_v13, 8.507059e+37  ;;  %v1251_v47 = vmul.f32 %v1123_v7, %v10096_v44  ;;  %v1125_v27 = vld [vmem:[%s16539_s14 + $0x308] sm:$0xff]  ;;  %v1127_v62 = vld [vmem:[%s16539_s14 + $0x318] sm:$0xff] }
 0x4ce   : > { %v11428_v17 = vpop.eup %8671  ;;  %2319 = vmax.xlane.f32.xlu2 %v11423_v26  ;;  %v3499_v2 = vsel %vm3496_vm6, %v3498_v15, %v3494_v14  ;;  %v1253_v54 = vmul.f32 %v1125_v27, %v10040_v30  ;;  %v1254_v60 = vmul.f32 %v1126_v3, %v10044_v31  ;;  %v1255_v14 = vmul.f32 %v1127_v62, %v10048_v32  ;;  %v1128_v15 = vld [vmem:[%s16539_s14 + $0x320] sm:$0xff]  ;;  %v1129_v7 = vld [vmem:[%s16539_s14 + $0x328] sm:$0xff] }
 0x4cf   : > { %v11436_v55 = vpop.eup %8673  ;;  %2945 = vadd.xlane.f32.xlu1 %v11428_v17  ;;  %5418 = vmatmul.f32.gmra.mxu1 %v11432_v58  ;;  %v11460_v61 = vpop.f32.mrf.mxu3  ;;  %v11480_v51 = vmul.f32 %v11129_v45, %v3499_v2  ;;  %v1252_v45 = vmul.f32 %v1124_v19, %v10036_v28  ;;  %v1256_v2 = vmul.f32 %v1128_v15, %v10052_v33 }
 0x4d0   : > { %2947 = vadd.xlane.f32.xlu0 %v11436_v55  ;;  %16668 = vst [vmem:[#allocation44_spill] sm:$0xff] %v11460_v61  ;;  %v1257_v19 = vmul.f32 %v1129_v7, %v10056_v34 }
 0x4d4   : > { %8191 = vmatmul.msk.f32.gmra.mxu3 %vm776_vm0, %v1249_v50 }
 0x4d7   : > { %2321 = vmax.xlane.f32.xlu1 %v11457_v12  ;;  %5421 = vmatmul.f32.gmra.mxu1 %v11466_v21  ;;  %v11485_v50 = vpop.f32.mrf.mxu3 }
 0x4d8   : > { %2323 = vmax.xlane.f32.xlu0 %v11463_v22  ;;  %16670 = vst [vmem:[#allocation46_spill] sm:$0xff] %v11485_v50 }
 0x4dc   : > { %8192 = vmatmul.msk.f32.gmra.mxu3 %vm776_vm0, %v1250_v63 }
 0x4df   : > { %5424 = vmatmul.f32.gmra.mxu1 %v11480_v51  ;;  %v11493_v9 = vpop.f32.mrf.mxu3 }
 0x4e0   : > { %16671 = vst [vmem:[#allocation49_spill] sm:$0xff] %v11493_v9 }
 0x4e4   : > { %8193 = vmatmul.msk.f32.gmra.mxu3 %vm776_vm0, %v1251_v47 }
 0x4e7   : > { %v11501_v29 = vpop.f32.mrf.mxu3 }
 0x4e8   : > { %16672 = vst [vmem:[#allocation88_spill] sm:$0xff] %v11501_v29 }
 0x4ec   : > { %8194 = vmatmul.msk.f32.gmra.mxu3 %vm776_vm0, %v1252_v45  ;;  %v1130_v45 = vld [vmem:[%s16539_s14 + $0x330] sm:$0xff] }
 0x4ef   : > { %v11509_v13 = vpop.f32.mrf.mxu3 }
 0x4f0   : > { %16673 = vst [vmem:[#allocation89_spill] sm:$0xff] %v11509_v13 }
 0x4f4   : > { %8195 = vmatmul.msk.f32.gmra.mxu3 %vm776_vm0, %v1253_v54  ;;  %v1258_v54 = vmul.f32 %v1130_v45, %v10060_v35 }
 0x4f7   : > { %v11519_v63 = vpop.f32.mrf.mxu3 }
 0x4f8   : > { %16674 = vst [vmem:[#allocation90_spill] sm:$0xff] %v11519_v63 }
 0x4fc   : > { %8196 = vmatmul.msk.f32.gmra.mxu3 %vm776_vm0, %v1254_v60  ;;  %v1131_v60 = vld [vmem:[%s16539_s14 + $0x338] sm:$0xff] }
 0x4fd   : > { %v1259_v7 = vmul.f32 %v1131_v60, %v10064_v36 }
 0x4ff   : > { %v11526_v47 = vpop.f32.mrf.mxu3 }
 0x500   : > { %16675 = vst [vmem:[#allocation91_spill] sm:$0xff] %v11526_v47 }
 0x504   : > { %8197 = vmatmul.msk.f32.gmra.mxu3 %vm776_vm0, %v1255_v14  ;;  %v11540_v14 = vpop.f32.mrf.mxu1 }
 0x505   : > { %16677 = vst [vmem:[#allocation93_spill] sm:$0xff] %v11540_v14  ;;  %v1132_v14 = vld [vmem:[%s16539_s14 + $0x340] sm:$0xff] }
 0x507   : > { %v11534_v3 = vpop.f32.mrf.mxu3 }
 0x508   : > { %16676 = vst [vmem:[#allocation92_spill] sm:$0xff] %v11534_v3 }
 0x50c   : > { %8198 = vmatmul.msk.f32.gmra.mxu3 %vm776_vm0, %v1256_v2 }
 0x50f   : > { %v11545_v63 = vpop.f32.mrf.mxu3 }
 0x510   : > { %16678 = vst [vmem:[#allocation94_spill] sm:$0xff] %v11545_v63 }
 0x514   : > { %8199 = vmatmul.msk.f32.gmra.mxu3 %vm776_vm0, %v1257_v19 }
 0x519   : > { %v2934_v27 = vpop.xlane.xlu1 %2933 }
 0x51a   : > { %8675 = vrcp.f32 %v2934_v27  ;;  %v3510_v29 = vand.u32 2147483647, %v2934_v27  ;;  %vm3506_vm8 = vweird.f32 %v2934_v27 }
 0x51c   : > { %8200 = vmatmul.msk.f32.gmra.mxu3 %vm776_vm0, %v1258_v54  ;;  %v3512_v54 = vand.u32 2147483648, %v2934_v27  ;;  %vm3511_vm10 = vcmp.eq.f32.partialorder %v3510_v29, 8.507059e+37 }
 0x520   : > { %v8676_v62 = vpop.eup %8675 }
 0x521   : > { %v3502_v15 = vmul.f32 %v8676_v62, %v2934_v27  ;;  %v2310_v2 = vpop.xlane.xlu1 %2309  ;;  %vm3507_vm7 = vweird.f32 %v8676_v62 }
 0x522   : > { %v2533_v19 = vsub.f32 %v11269_v16, %v2310_v2  ;;  %v2936_v47 = vpop.xlane.xlu0 %2935  ;;  %vm3508_vm9 = vmor %vm3506_vm8, %vm3507_vm7 }
 0x523   : > { %v3503_v45 = vsub.f32 1.0, %v3502_v15  ;;  %8677 = vrcp.f32 %v2936_v47  ;;  %v3513_v15 = vor.u32 1.1754944e-38, %v3512_v54  ;;  %v3527_v29 = vand.u32 2147483648, %v2936_v47 }
 0x524   : > { %8201 = vmatmul.msk.f32.gmra.mxu3 %vm776_vm0, %v1259_v7  ;;  %v2693_v3 = vmul.f32 1.442695, %v2533_v19  ;;  %v1260_v7 = vmul.f32 %v1132_v14, %v10068_v37  ;;  %v11571_v14 = vpop.f32.mrf.mxu3  ;;  %vm3521_vm12 = vweird.f32 %v2936_v47 }
 0x525   : > { %v3504_v13 = vmul.f32 %v8676_v62, %v3503_v45  ;;  %v11554_v45 = vpop.f32.mrf.mxu1  ;;  %16681 = vst [vmem:[#allocation97_spill] sm:$0xff] %v11571_v14 }
 0x526   : > { %8679 = vpow2.f32 %v2693_v3  ;;  %16679 = vst [vmem:[#allocation95_spill] sm:$0xff] %v11554_v45  ;;  %v16682_v45 = vld [vmem:[#allocation50_spill] sm:$0xff] }
 0x527   : > { %v3505_v60 = vadd.f32 %v8676_v62, %v3504_v13 }
 0x529   : > { %v11550_v16 = vpop.xlane.xlu2 %2937  ;;  %v8678_v2 = vpop.eup %8677  ;;  %v3509_v19 = vsel %vm3508_vm9, %v8676_v62, %v3505_v60  ;;  %v1133_v62 = vld [vmem:[%s16539_s14 + $0x348] sm:$0xff] }
 0x52a   : > { %8681 = vrcp.f32 %v11550_v16  ;;  %v3517_v3 = vmul.f32 %v8678_v2, %v2936_v47  ;;  %v2312_v63 = vpop.xlane.xlu0 %2311  ;;  %v3514_v9 = vsel %vm3511_vm10, %v3513_v15, %v3509_v19  ;;  %vm3522_vm11 = vweird.f32 %v8678_v2 }
 0x52b   : > { %v2534_v50 = vsub.f32 %v11313_v52, %v2312_v63  ;;  %v11559_v13 = vmul.f32 %v11251_v53, %v3514_v9  ;;  %v1324_v52 = vld [vmem:[%s16540_s15 + $0x140] sm:$0xff]  ;;  %v3525_v53 = vand.u32 2147483647, %v2936_v47  ;;  %vm3523_vm13 = vmor %vm3521_vm12, %vm3522_vm11  ;;  %v3542_v47 = vand.u32 2147483648, %v11550_v16 }
 0x52c   : > { %8202 = vmatmul.msk.f32.gmra.mxu3 %vm776_vm0, %v1260_v7  ;;  %v11561_v27 = vpop.eup %8679  ;;  %v3518_v54 = vsub.f32 1.0, %v3517_v3  ;;  %v1261_v3 = vmul.f32 %v1133_v62, %v10072_v38  ;;  %v11579_v0 = vadd.f32 %v16682_v45, %v1324_v52  ;;  %v3540_v52 = vand.u32 2147483647, %v11550_v16 }
 0x52d   : > { %16680 = vst [vmem:[#allocation96_spill] sm:$0xff] %v11559_v13  ;;  %v2695_v61 = vmul.f32 1.442695, %v2534_v50  ;;  %2949 = vadd.xlane.f32.xlu2 %v11561_v27  ;;  %5427 = vmatmul.f32.gmra.mxu1 %v11559_v13  ;;  %vm3526_vm14 = vcmp.eq.f32.partialorder %v3525_v53, 8.507059e+37  ;;  %v11587_v62 = vpop.f32.mrf.mxu1  ;;  %vm3536_vm1 = vweird.f32 %v11550_v16 }
 0x52e   : > { %v3519_v63 = vmul.f32 %v8678_v2, %v3518_v54  ;;  %v3528_v54 = vor.u32 1.1754944e-38, %v3527_v29  ;;  %16683 = vst [vmem:[#allocation50_spill] sm:$0xff] %v11587_v62  ;;  %vm3541_vm3 = vcmp.eq.f32.partialorder %v3540_v52, 8.507059e+37 }
 0x52f   : > { %8683 = vpow2.f32 %v2695_v61 }
 0x530   : > { %v8682_v9 = vpop.eup %8681  ;;  %v3520_v15 = vadd.f32 %v8678_v2, %v3519_v63 }
 0x531   : > { %v3532_v50 = vmul.f32 %v8682_v9, %v11550_v16  ;;  %v2314_v60 = vpop.xlane.xlu2 %2313  ;;  %vm3537_vm15 = vweird.f32 %v8682_v9  ;;  %v1325_v16 = vld [vmem:[%s16540_s15 + $0x148] sm:$0xff] }
 0x532   : > { %v2535_v7 = vsub.f32 %v11336_v23, %v2314_v60  ;;  %v11575_v19 = vpop.xlane.xlu1 %2939  ;;  %v3524_v14 = vsel %vm3523_vm13, %v8678_v2, %v3520_v15  ;;  %v1134_v2 = vld [vmem:[%s16539_s14 + $0x350] sm:$0xff]  ;;  %vm3538_vm2 = vmor %vm3536_vm1, %vm3537_vm15 }
 0x533   : > { %v3533_v13 = vsub.f32 1.0, %v3532_v50  ;;  %8685 = vrcp.f32 %v11575_v19  ;;  %v11582_v61 = vpop.xlane.xlu0 %2941  ;;  %v3529_v23 = vsel %vm3526_vm14, %v3528_v54, %v3524_v14  ;;  %vm3551_vm5 = vweird.f32 %v11575_v19 }
 0x534   : > { %v2697_v63 = vmul.f32 1.442695, %v2535_v7  ;;  %8687 = vrcp.f32 %v11582_v61  ;;  %8203 = vmatmul.msk.f32.gmra.mxu3 %vm776_vm0, %v1261_v3  ;;  %v11590_v45 = vmul.f32 %v11281_v8, %v3529_v23  ;;  %v3543_v8 = vor.u32 1.1754944e-38, %v3542_v47  ;;  %v11606_v7 = vpop.f32.mrf.mxu3 }
 0x535   : > { %v3534_v29 = vmul.f32 %v8682_v9, %v3533_v13  ;;  %v11593_v50 = vpop.eup %8683  ;;  %2325 = vmax.xlane.f32.xlu2 %v11579_v0  ;;  %16685 = vst [vmem:[#allocation99_spill] sm:$0xff] %v11606_v7  ;;  %vm3566_vm9 = vweird.f32 %v11582_v61 }
 0x536   : > { %16684 = vst [vmem:[#allocation98_spill] sm:$0xff] %v11590_v45  ;;  %8689 = vpow2.f32 %v2697_v63  ;;  %5430 = vmatmul.f32.gmra.mxu1 %v11590_v45  ;;  %2951 = vadd.xlane.f32.xlu1 %v11593_v50  ;;  %v1262_v63 = vmul.f32 %v1134_v2, %v10076_v39 }
 0x537   : > { %v3535_v53 = vadd.f32 %v8682_v9, %v3534_v29 }
 0x539   : > { %v8686_v13 = vpop.eup %8685  ;;  %v11602_v14 = vpop.xlane.xlu2 %2943  ;;  %v3539_v60 = vsel %vm3538_vm2, %v8682_v9, %v3535_v53 }
 0x53a   : > { %v11604_v15 = vpop.eup %8687  ;;  %v3547_v3 = vmul.f32 %v8686_v13, %v11575_v19  ;;  %8691 = vrcp.f32 %v11602_v14  ;;  %v2316_v54 = vpop.xlane.xlu1 %2315  ;;  %v3544_v23 = vsel %vm3541_vm3, %v3543_v8, %v3539_v60  ;;  %v11626_v60 = vadd.f32 %v10769_v5, %v1325_v16 }
 0x53b   : > { %v3562_v9 = vmul.f32 %v11604_v15, %v11582_v61  ;;  %v2536_v47 = vsub.f32 %v11388_v46, %v2316_v54  ;;  %v2318_v29 = vpop.xlane.xlu0 %2317  ;;  %v11618_v52 = vmul.f32 %v11309_v1, %v3544_v23  ;;  %v3557_v46 = vand.u32 2147483648, %v11575_v19  ;;  %v1135_v1 = vld [vmem:[%s16539_s14 + $0x358] sm:$0xff]  ;;  %v11636_v23 = vpop.f32.mrf.mxu1 }
 0x53c   : > { %v11620_v53 = vpop.eup %8689  ;;  %v3548_v62 = vsub.f32 1.0, %v3547_v3  ;;  %v2537_v7 = vsub.f32 %v11396_v24, %v2318_v29  ;;  %8204 = vmatmul.msk.f32.gmra.mxu3 %vm776_vm0, %v1262_v63  ;;  %v1326_v24 = vld [vmem:[%s16540_s15 + $0x150] sm:$0xff]  ;;  %vm3552_vm4 = vweird.f32 %v8686_v13  ;;  %v3555_v63 = vand.u32 2147483647, %v11575_v19  ;;  %16687 = vst [vmem:[#allocation101_spill] sm:$0xff] %v11636_v23 }
 0x53d   : > { %16686 = vst [vmem:[#allocation100_spill] sm:$0xff] %v11618_v52  ;;  %v3563_v2 = vsub.f32 1.0, %v3562_v9  ;;  %v2699_v8 = vmul.f32 1.442695, %v2536_v47  ;;  %2953 = vadd.xlane.f32.xlu0 %v11620_v53  ;;  %v1263_v47 = vmul.f32 %v1135_v1, %v10080_v40  ;;  %v11648_v29 = vadd.f32 %v10803_v25, %v1326_v24  ;;  %vm3553_vm6 = vmor %vm3551_vm5, %vm3552_vm4  ;;  %v11659_v24 = vpop.f32.mrf.mxu3 }
 0x53e   : > { %v2701_v54 = vmul.f32 1.442695, %v2537_v7  ;;  %v3549_v3 = vmul.f32 %v8686_v13, %v3548_v62  ;;  %5433 = vmatmul.f32.gmra.mxu1 %v11618_v52  ;;  %2327 = vmax.xlane.f32.xlu1 %v11626_v60  ;;  %vm3556_vm7 = vcmp.eq.f32.partialorder %v3555_v63, 8.507059e+37  ;;  %vm3567_vm8 = vweird.f32 %v11604_v15  ;;  %16688 = vst [vmem:[#allocation102_spill] sm:$0xff] %v11659_v24 }
 0x53f   : > { %8693 = vpow2.f32 %v2699_v8  ;;  %v3564_v5 = vmul.f32 %v11604_v15, %v3563_v2  ;;  %v3558_v8 = vor.u32 1.1754944e-38, %v3557_v46  ;;  %v3570_v63 = vand.u32 2147483647, %v11582_v61  ;;  %vm11677_vm10 = vmor %vm3566_vm9, %vm3567_vm8 }
 0x540   : > { %v11641_v7 = vpop.eup %8691  ;;  %8695 = vpow2.f32 %v2701_v54  ;;  %v3550_v16 = vadd.f32 %v8686_v13, %v3549_v3  ;;  %vm3581_vm13 = vweird.f32 %v11602_v14 }
 0x541   : > { %v3577_v62 = vmul.f32 %v11641_v7, %v11602_v14  ;;  %v2320_v9 = vpop.xlane.xlu2 %2319  ;;  %v3565_v25 = vadd.f32 %v11604_v15, %v3564_v5  ;;  %vm3571_vm11 = vcmp.eq.f32.partialorder %v3570_v63, 8.507059e+37  ;;  %vm3582_vm12 = vweird.f32 %v11641_v7 }
 0x542   : > { %v2538_v2 = vsub.f32 %v11423_v26, %v2320_v9  ;;  %v11652_v23 = vpop.xlane.xlu1 %2945  ;;  %v3554_v54 = vsel %vm3553_vm6, %v8686_v13, %v3550_v16  ;;  %v3572_v13 = vand.u32 2147483648, %v11582_v61  ;;  %v1136_v16 = vld [vmem:[%s16539_s14 + $0x360] sm:$0xff]  ;;  %vm3583_vm14 = vmor %vm3581_vm13, %vm3582_vm12 }
 0x543   : > { %v3578_v19 = vsub.f32 1.0, %v3577_v62  ;;  %8697 = vrcp.f32 %v11652_v23  ;;  %v11656_v3 = vpop.xlane.xlu0 %2947  ;;  %v3559_v1 = vsel %vm3556_vm7, %v3558_v8, %v3554_v54  ;;  %v3569_v61 = vsel %vm11677_vm10, %v11604_v15, %v3565_v25  ;;  %v1327_v62 = vld [vmem:[%s16540_s15 + $0x158] sm:$0xff]  ;;  %v11695_v8 = vpop.f32.mrf.mxu1 }
 0x544   : > { %v2703_v52 = vmul.f32 1.442695, %v2538_v2  ;;  %8205 = vmatmul.msk.f32.gmra.mxu3 %vm776_vm0, %v1263_v47  ;;  %v11663_v26 = vmul.f32 %v11352_v57, %v3559_v1  ;;  %8699 = vrcp.f32 %v11656_v3  ;;  %v3573_v9 = vor.u32 1.1754944e-38, %v3572_v13  ;;  %16692 = vst [vmem:[#allocation104_spill] sm:$0xff] %v11695_v8  ;;  %v1328_v2 = vld [vmem:[%s16540_s15 + $0x160] sm:$0xff] }
 0x545   : > { %v11666_v46 = vpop.eup %8693  ;;  %2329 = vmax.xlane.f32.xlu0 %v11648_v29  ;;  %v11707_v24 = vadd.f32 %v10834_v59, %v1327_v62  ;;  %v11725_v62 = vpop.f32.mrf.mxu3  ;;  %vm3596_vm2 = vweird.f32 %v11652_v23  ;;  %vm3611_vm6 = vweird.f32 %v11656_v3 }
 0x546   : > { %16689 = vst [vmem:[#allocation103_spill] sm:$0xff] %v11663_v26  ;;  %v11672_v5 = vpop.eup %8695  ;;  %8701 = vpow2.f32 %v2703_v52  ;;  %2955 = vadd.xlane.f32.xlu2 %v11666_v46  ;;  %5436 = vmatmul.f32.gmra.mxu1 %v11663_v26  ;;  %v3579_v52 = vmul.f32 %v11641_v7, %v3578_v19  ;;  %v1264_v19 = vmul.f32 %v1136_v16, %v10084_v41 }
 0x547   : > { %2957 = vadd.xlane.f32.xlu1 %v11672_v5  ;;  %v3574_v1 = vsel %vm3571_vm11, %v3573_v9, %v3569_v61  ;;  %v11716_v16 = vadd.f32 %v10856_v11, %v1328_v2  ;;  %v1329_v9 = vld [vmem:[%s16540_s15 + $0x168] sm:$0xff] }
 0x548   : > { %v3580_v63 = vadd.f32 %v11641_v7, %v3579_v52  ;;  %v11721_v59 = vmul.f32 %v11358_v20, %v3574_v1  ;;  %v3585_v52 = vand.u32 2147483647, %v11602_v14  ;;  %v1137_v20 = vld [vmem:[%s16539_s14 + $0x368] sm:$0xff] }
 0x549   : > { %v11693_v47 = vpop.eup %8697 }
 0x54a   : > { %v3592_v54 = vmul.f32 %v11693_v47, %v11652_v23  ;;  %v2322_v15 = vpop.xlane.xlu1 %2321  ;;  %v11703_v25 = vpop.eup %8699  ;;  %vm3586_vm15 = vcmp.eq.f32.partialorder %v3585_v52, 8.507059e+37  ;;  %vm3597_vm1 = vweird.f32 %v11693_v47 }
 0x54b   : > { %v2539_v13 = vsub.f32 %v11457_v12, %v2322_v15  ;;  %v2324_v57 = vpop.xlane.xlu0 %2323  ;;  %v3587_v12 = vand.u32 2147483648, %v11602_v14  ;;  %v3607_v11 = vmul.f32 %v11703_v25, %v11656_v3  ;;  %v3584_v14 = vsel %vm3583_vm14, %v11641_v7, %v3580_v63  ;;  %vm3598_vm3 = vmor %vm3596_vm2, %vm3597_vm1 }
 0x54c   : > { %v11711_v8 = vpop.eup %8701  ;;  %v3593_v26 = vsub.f32 1.0, %v3592_v54  ;;  %v2540_v45 = vsub.f32 %v11463_v22, %v2324_v57  ;;  %8206 = vmatmul.msk.f32.gmra.mxu3 %vm776_vm0, %v1264_v19  ;;  %v1265_v54 = vmul.f32 %v1137_v20, %v10088_v42  ;;  %v11743_v19 = vpop.f32.mrf.mxu1  ;;  %vm3612_vm5 = vweird.f32 %v11703_v25 }
 0x54d   : > { %v2705_v61 = vmul.f32 1.442695, %v2539_v13  ;;  %2959 = vadd.xlane.f32.xlu0 %v11711_v8  ;;  %v3588_v2 = vor.u32 1.1754944e-38, %v3587_v12  ;;  %16693 = vst [vmem:[#allocation105_spill] sm:$0xff] %v11743_v19  ;;  %v3608_v1 = vsub.f32 1.0, %v3607_v11  ;;  %v11746_v13 = vadd.f32 %v10867_v48, %v1329_v9  ;;  %v1330_v11 = vld [vmem:[%s16540_s15 + $0x170] sm:$0xff]  ;;  %vm3613_vm7 = vmor %vm3611_vm6, %vm3612_vm5 }
 0x54e   : > { %v2707_v22 = vmul.f32 1.442695, %v2540_v45  ;;  %2331 = vmax.xlane.f32.xlu2 %v11707_v24  ;;  %5439 = vmatmul.f32.gmra.mxu1 %v11721_v59  ;;  %v3594_v45 = vmul.f32 %v11693_v47, %v3593_v26  ;;  %v3602_v26 = vand.u32 2147483648, %v11652_v23  ;;  %v3600_v48 = vand.u32 2147483647, %v11652_v23 }
 0x54f   : > { %8703 = vpow2.f32 %v2705_v61  ;;  %2333 = vmax.xlane.f32.xlu1 %v11716_v16  ;;  %v3589_v15 = vsel %vm3586_vm15, %v3588_v2, %v3584_v14  ;;  %v1138_v61 = vld [vmem:[%s16539_s14 + $0x370] sm:$0xff]  ;;  %v3609_v52 = vmul.f32 %v11703_v25, %v3608_v1  ;;  %v3617_v2 = vand.u32 2147483648, %v11656_v3 }
 0x550   : > { %8705 = vpow2.f32 %v2707_v22  ;;  %v3595_v7 = vadd.f32 %v11693_v47, %v3594_v45  ;;  %v11756_v63 = vmul.f32 %v11392_v49, %v3589_v15  ;;  %v11770_v22 = vpop.f32.mrf.mxu3  ;;  %v3603_v23 = vor.u32 1.1754944e-38, %v3602_v26  ;;  %v1331_v45 = vld [vmem:[%s16540_s15 + $0x178] sm:$0xff] }
 0x551   : > { %vm3601_vm4 = vcmp.eq.f32.partialorder %v3600_v48, 8.507059e+37  ;;  %v1266_v20 = vmul.f32 %v1138_v61, %v10092_v43  ;;  %v3610_v9 = vadd.f32 %v11703_v25, %v3609_v52  ;;  %v11792_v1 = vadd.f32 %v10881_v6, %v1331_v45  ;;  %v1143_v45 = vld [vmem:[%s16539_s14 + $0x398] sm:$0xff] }
 0x552   : > { %v3599_v49 = vsel %vm3598_vm3, %v11693_v47, %v3595_v7  ;;  %v11783_v47 = vadd.f32 %v10874_v18, %v1330_v11  ;;  %v3615_v7 = vand.u32 2147483647, %v11656_v3  ;;  %v1139_v18 = vld [vmem:[%s16539_s14 + $0x378] sm:$0xff]  ;;  %v3618_v26 = vor.u32 1.1754944e-38, %v3617_v2  ;;  %v1141_v11 = vld [vmem:[%s16539_s14 + $0x388] sm:$0xff]  ;;  %v1144_v2 = vld [vmem:[%s16539_s14 + $0x3a0] sm:$0xff] }
 0x553   : > { %v3604_v14 = vsel %vm3601_vm4, %v3603_v23, %v3599_v49  ;;  %v1267_v48 = vmul.f32 %v1139_v18, %v10096_v44  ;;  %v1145_v18 = vld [vmem:[%s16539_s14 + $0x3a8] sm:$0xff] }
 0x554   : > { %8207 = vmatmul.msk.f32.gmra.mxu3 %vm776_vm0, %v1265_v54  ;;  %v11786_v54 = vpop.f32.mrf.mxu1  ;;  %v11789_v15 = vmul.f32 %v11428_v17, %v3604_v14  ;;  %v3614_v17 = vsel %vm3613_vm7, %v11703_v25, %v3610_v9  ;;  %vm3616_vm8 = vcmp.eq.f32.partialorder %v3615_v7, 8.507059e+37  ;;  %v1140_v25 = vld [vmem:[%s16539_s14 + $0x380] sm:$0xff]  ;;  %v1142_v14 = vld [vmem:[%s16539_s14 + $0x390] sm:$0xff] }
 0x555   : > { %v11752_v57 = vpop.eup %8703  ;;  %2335 = vmax.xlane.f32.xlu0 %v11746_v13  ;;  %16694 = vst [vmem:[#allocation106_spill] sm:$0xff] %v11786_v54  ;;  %v3619_v3 = vsel %vm3616_vm8, %v3618_v26, %v3614_v17  ;;  %v1268_v52 = vmul.f32 %v1140_v25, %v10036_v28  ;;  %v1270_v28 = vmul.f32 %v1142_v14, %v10044_v31 }
 0x556   : > { %v11760_v12 = vpop.eup %8705  ;;  %2961 = vadd.xlane.f32.xlu2 %v11752_v57  ;;  %5442 = vmatmul.f32.gmra.mxu1 %v11756_v63  ;;  %v11808_v61 = vmul.f32 %v11436_v55, %v3619_v3  ;;  %v1269_v55 = vmul.f32 %v1141_v11, %v10040_v30  ;;  %v1271_v30 = vmul.f32 %v1143_v45, %v10048_v32  ;;  %v1146_v32 = vld [vmem:[%s16539_s14 + $0x3b0] sm:$0xff]  ;;  %v1147_v3 = vld [vmem:[%s16539_s14 + $0x3b8] sm:$0xff] }
 0x557   : > { %2963 = vadd.xlane.f32.xlu1 %v11760_v12  ;;  %v1272_v31 = vmul.f32 %v1144_v2, %v10052_v33  ;;  %v1273_v17 = vmul.f32 %v1145_v18, %v10056_v34  ;;  %v1275_v34 = vmul.f32 %v1147_v3, %v10064_v36 }
 0x558   : > { %v11803_v6 = vpop.f32.mrf.mxu3 }
 0x55c   : > { %8208 = vmatmul.msk.f32.gmra.mxu3 %vm776_vm0, %v1266_v20  ;;  %v11810_v49 = vpop.f32.mrf.mxu1 }
 0x55d   : > { %16695 = vst [vmem:[#allocation107_spill] sm:$0xff] %v11810_v49 }
 0x55e   : > { %2337 = vmax.xlane.f32.xlu2 %v11783_v47  ;;  %5445 = vmatmul.f32.gmra.mxu1 %v11789_v15 }
 0x55f   : > { %2339 = vmax.xlane.f32.xlu1 %v11792_v1 }
 0x560   : > { %v11817_v23 = vpop.f32.mrf.mxu3 }
 0x564   : > { %8209 = vmatmul.msk.f32.gmra.mxu3 %vm776_vm0, %v1267_v48  ;;  %v1274_v48 = vmul.f32 %v1146_v32, %v10060_v35  ;;  %v1148_v35 = vld [vmem:[%s16539_s14 + $0x3c0] sm:$0xff] }
 0x565   : > { %v1276_v2 = vmul.f32 %v1148_v35, %v10068_v37 }
 0x566   : > { %5448 = vmatmul.f32.gmra.mxu1 %v11808_v61 }
 0x568   : > { %v11825_v20 = vpop.f32.mrf.mxu3 }
 0x56c   : > { %8210 = vmatmul.msk.f32.gmra.mxu3 %vm776_vm0, %v1268_v52  ;;  %v11865_v52 = vpop.f32.mrf.mxu1 }
 0x56d   : > { %16696 = vst [vmem:[#allocation108_spill] sm:$0xff] %v11865_v52 }
 0x570   : > { %v11835_v9 = vpop.f32.mrf.mxu3 }
 0x574   : > { %8211 = vmatmul.msk.f32.gmra.mxu3 %vm776_vm0, %v1269_v55  ;;  %v11880_v35 = vpop.f32.mrf.mxu1 }
 0x575   : > { %16697 = vst [vmem:[#allocation109_spill] sm:$0xff] %v11880_v35 }
 0x578   : > { %v11842_v7 = vpop.f32.mrf.mxu3 }
 0x57c   : > { %8212 = vmatmul.msk.f32.gmra.mxu3 %vm776_vm0, %v1270_v28 }
 0x580   : > { %v11850_v26 = vpop.f32.mrf.mxu3 }
 0x584   : > { %8213 = vmatmul.msk.f32.gmra.mxu3 %vm776_vm0, %v1271_v30 }
 0x588   : > { %v11858_v33 = vpop.f32.mrf.mxu3 }
 0x58c   : > { %8214 = vmatmul.msk.f32.gmra.mxu3 %vm776_vm0, %v1272_v31 }
 0x590   : > { %v11870_v55 = vpop.f32.mrf.mxu3 }
 0x594   : > { %8215 = vmatmul.msk.f32.gmra.mxu3 %vm776_vm0, %v1273_v17 }
 0x59c   : > { %8216 = vmatmul.msk.f32.gmra.mxu3 %vm776_vm0, %v1274_v48  ;;  %v1149_v48 = vld [vmem:[%s16539_s14 + $0x3c8] sm:$0xff] }
 0x5a0   : > { %v2950_v25 = vpop.xlane.xlu2 %2949 }
 0x5a1   : > { %8707 = vrcp.f32 %v2950_v25  ;;  %v3632_v18 = vand.u32 2147483648, %v2950_v25  ;;  %v3630_v32 = vand.u32 2147483647, %v2950_v25  ;;  %vm3626_vm10 = vweird.f32 %v2950_v25 }
 0x5a3   : > { %v3633_v37 = vor.u32 1.1754944e-38, %v3632_v18  ;;  %vm3631_vm12 = vcmp.eq.f32.partialorder %v3630_v32, 8.507059e+37 }
 0x5a4   : > { %8217 = vmatmul.msk.f32.gmra.mxu3 %vm776_vm0, %v1275_v34 }
 0x5a7   : > { %v8708_v11 = vpop.eup %8707 }
 0x5a8   : > { %v3622_v14 = vmul.f32 %v8708_v11, %v2950_v25  ;;  %v2326_v28 = vpop.xlane.xlu2 %2325  ;;  %vm3627_vm9 = vweird.f32 %v8708_v11 }
 0x5a9   : > { %v2541_v45 = vsub.f32 %v11579_v0, %v2326_v28  ;;  %v2952_v30 = vpop.xlane.xlu1 %2951  ;;  %vm3628_vm11 = vmor %vm3626_vm10, %vm3627_vm9  ;;  %v11883_v28 = vpop.f32.mrf.mxu3 }
 0x5aa   : > { %v3623_v31 = vsub.f32 1.0, %v3622_v14  ;;  %8709 = vrcp.f32 %v2952_v30  ;;  %16698 = vst [vmem:[#allocation110_spill] sm:$0xff] %v11883_v28  ;;  %vm3641_vm14 = vweird.f32 %v2952_v30 }
 0x5ab   : > { %v2709_v36 = vmul.f32 1.442695, %v2541_v45 }
 0x5ac   : > { %8218 = vmatmul.msk.f32.gmra.mxu3 %vm776_vm0, %v1276_v2  ;;  %v3624_v17 = vmul.f32 %v8708_v11, %v3623_v31  ;;  %v1277_v31 = vmul.f32 %v1149_v48, %v10072_v38  ;;  %v1150_v38 = vld [vmem:[%s16539_s14 + $0x3d0] sm:$0xff]  ;;  %v3645_v48 = vand.u32 2147483647, %v2952_v30 }
 0x5ad   : > { %8711 = vpow2.f32 %v2709_v36 }
 0x5ae   : > { %v3625_v3 = vadd.f32 %v8708_v11, %v3624_v17  ;;  %v16699_v17 = vld [vmem:[#allocation45_spill] sm:$0xff]  ;;  %vm3646_vm1 = vcmp.eq.f32.partialorder %v3645_v48, 8.507059e+37 }
 0x5af   : > { %v5189_v25 = vadd.f32 %v11249_v4, %v16699_v17  ;;  %v3647_v4 = vand.u32 2147483648, %v2952_v30 }
 0x5b0   : > { %v11878_v0 = vpop.xlane.xlu0 %2953  ;;  %v8710_v34 = vpop.eup %8709  ;;  %v3629_v14 = vsel %vm3628_vm11, %v8708_v11, %v3625_v3 }
 0x5b1   : > { %8713 = vrcp.f32 %v11878_v0  ;;  %v3637_v45 = vmul.f32 %v8710_v34, %v2952_v30  ;;  %v2328_v2 = vpop.xlane.xlu1 %2327  ;;  %v3634_v36 = vsel %vm3631_vm12, %v3633_v37, %v3629_v14  ;;  %vm3642_vm13 = vweird.f32 %v8710_v34 }
 0x5b2   : > { %v2542_v52 = vsub.f32 %v11626_v60, %v2328_v2  ;;  %v5093_v18 = vmul.f32 %v11561_v27, %v3634_v36  ;;  %v1332_v27 = vld [vmem:[%s16540_s15 + $0x180] sm:$0xff]  ;;  %v1278_v14 = vmul.f32 %v1150_v38, %v10076_v39  ;;  %v16700_v2 = vld [vmem:[#allocation47_spill] sm:$0xff]  ;;  %vm3643_vm15 = vmor %vm3641_vm14, %vm3642_vm13  ;;  %v3662_v38 = vand.u32 2147483648, %v11878_v0 }
 0x5b3   : > { %v11890_v49 = vpop.eup %8711  ;;  %v3638_v35 = vsub.f32 1.0, %v3637_v45  ;;  %vm3656_vm3 = vweird.f32 %v11878_v0 }
 0x5b4   : > { %8219 = vmatmul.msk.f32.gmra.mxu3 %vm776_vm0, %v1277_v31  ;;  %v2711_v11 = vmul.f32 1.442695, %v2542_v52  ;;  %2965 = vadd.xlane.f32.xlu0 %v11890_v49  ;;  %v11894_v32 = vadd.f32 %v5189_v25, %v5093_v18  ;;  %v5196_v31 = vadd.f32 %v11278_v56, %v16700_v2  ;;  %v16701_v25 = vld [vmem:[#allocation56_spill] sm:$0xff] }
 0x5b5   : > { %5451 = vmatmul.f32.gmra.mxu1 %v5093_v18  ;;  %v3639_v60 = vmul.f32 %v8710_v34, %v3638_v35  ;;  %v11910_v35 = vadd.f32 %v16701_v25, %v1332_v27  ;;  %v3648_v18 = vor.u32 1.1754944e-38, %v3647_v4  ;;  %v1151_v27 = vld [vmem:[%s16539_s14 + $0x3d8] sm:$0xff] }
 0x5b6   : > { %8715 = vpow2.f32 %v2711_v11  ;;  %v16704_v25 = vld [vmem:[#allocation57_spill] sm:$0xff] }
 0x5b7   : > { %v8714_v3 = vpop.eup %8713  ;;  %v3640_v45 = vadd.f32 %v8710_v34, %v3639_v60  ;;  %v11917_v60 = vpop.f32.mrf.mxu1 }
 0x5b8   : > { %v3652_v52 = vmul.f32 %v8714_v3, %v11878_v0  ;;  %v2330_v37 = vpop.xlane.xlu0 %2329  ;;  %16702 = vst [vmem:[#allocation45_spill] sm:$0xff] %v11917_v60  ;;  %vm3657_vm2 = vweird.f32 %v8714_v3  ;;  %v16706_v60 = vld [vmem:[#allocation86_spill] sm:$0xff] }
 0x5b9   : > { %v11906_v36 = vpop.xlane.xlu2 %2955  ;;  %v2543_v17 = vsub.f32 %v11648_v29, %v2330_v37  ;;  %v3644_v39 = vsel %vm3643_vm15, %v8710_v34, %v3640_v45  ;;  %v11919_v29 = vpop.f32.mrf.mxu3  ;;  %v1333_v34 = vld [vmem:[%s16540_s15 + $0x188] sm:$0xff]  ;;  %v1152_v37 = vld [vmem:[%s16539_s14 + $0x3e0] sm:$0xff]  ;;  %vm3658_vm4 = vmor %vm3656_vm3, %vm3657_vm2 }
 0x5ba   : > { %v3653_v11 = vsub.f32 1.0, %v3652_v52  ;;  %8717 = vrcp.f32 %v11906_v36  ;;  %v11913_v54 = vpop.xlane.xlu1 %2957  ;;  %v3649_v56 = vsel %vm3646_vm1, %v3648_v18, %v3644_v39  ;;  %16703 = vst [vmem:[#allocation47_spill] sm:$0xff] %v11919_v29  ;;  %v3660_v52 = vand.u32 2147483647, %v11878_v0  ;;  %v16710_v29 = vld [vmem:[#allocation52_spill] sm:$0xff] }
 0x5bb   : > { %8719 = vrcp.f32 %v11913_v54  ;;  %v2713_v30 = vmul.f32 1.442695, %v2543_v17  ;;  %v5094_v4 = vmul.f32 %v11593_v50, %v3649_v56  ;;  %v1334_v50 = vld [vmem:[%s16540_s15 + $0x190] sm:$0xff]  ;;  %v1279_v17 = vmul.f32 %v1151_v27, %v10080_v40 }
 0x5bc   : > { %8220 = vmatmul.msk.f32.gmra.mxu3 %vm776_vm0, %v1278_v14  ;;  %v3654_v48 = vmul.f32 %v8714_v3, %v3653_v11  ;;  %v11933_v45 = vpop.eup %8715  ;;  %2341 = vmax.xlane.f32.xlu0 %v11910_v35  ;;  %v11945_v18 = vadd.f32 %v16704_v25, %v1333_v34  ;;  %v3663_v11 = vor.u32 1.1754944e-38, %v3662_v38  ;;  %v11948_v39 = vmul.f32 %v1152_v37, %v10084_v41  ;;  %v16705_v56 = vld [vmem:[#allocation48_spill] sm:$0xff]  ;;  %v16708_v27 = vld [vmem:[#allocation51_spill] sm:$0xff]  ;;  %v16709_v34 = vld [vmem:[#allocation42_spill] sm:$0xff] }
 0x5bd   : > { %8721 = vpow2.f32 %v2713_v30  ;;  %2967 = vadd.xlane.f32.xlu2 %v11933_v45  ;;  %v11940_v14 = vadd.f32 %v5196_v31, %v5094_v4  ;;  %5454 = vmatmul.f32.gmra.mxu1 %v5094_v4  ;;  %v5203_v19 = vadd.f32 %v16706_v60, %v16705_v56  ;;  %vm3661_vm5 = vcmp.eq.f32.partialorder %v3660_v52, 8.507059e+37 }
 0x5be   : > { %v3655_v2 = vadd.f32 %v8714_v3, %v3654_v48  ;;  %v16707_v48 = vld [vmem:[#allocation58_spill] sm:$0xff]  ;;  %v11959_v25 = vadd.f32 %v16709_v34, %v16708_v27  ;;  %v11965_v60 = vadd.f32 %v11401_v10, %v16710_v29  ;;  %v3675_v34 = vand.u32 2147483647, %v11906_v36 }
 0x5bf   : > { %v11955_v0 = vadd.f32 %v16707_v48, %v1334_v50  ;;  %vm3671_vm7 = vweird.f32 %v11906_v36  ;;  %vm3686_vm10 = vweird.f32 %v11913_v54 }
 0x5c0   : > { %v8718_v30 = vpop.eup %8717  ;;  %v11952_v31 = vpop.xlane.xlu0 %2959  ;;  %v3659_v4 = vsel %vm3658_vm4, %v8714_v3, %v3655_v2  ;;  %vm11987_vm9 = vcmp.eq.f32.partialorder %v3675_v34, 8.507059e+37 }
 0x5c1   : > { %v8720_v40 = vpop.eup %8719  ;;  %v3667_v38 = vmul.f32 %v8718_v30, %v11906_v36  ;;  %v2332_v41 = vpop.xlane.xlu2 %2331  ;;  %8723 = vrcp.f32 %v11952_v31  ;;  %v3664_v37 = vsel %vm3661_vm5, %v3663_v11, %v3659_v4  ;;  %v3677_v11 = vand.u32 2147483648, %v11906_v36 }
 0x5c2   : > { %v3682_v3 = vmul.f32 %v8720_v40, %v11913_v54  ;;  %v2544_v52 = vsub.f32 %v11707_v24, %v2332_v41  ;;  %v2334_v50 = vpop.xlane.xlu1 %2333  ;;  %v5095_v2 = vmul.f32 %v11620_v53, %v3664_v37  ;;  %v3690_v24 = vand.u32 2147483647, %v11913_v54  ;;  %v11983_v41 = vpop.f32.mrf.mxu3 }
 0x5c3   : > { %v11970_v56 = vpop.eup %8721  ;;  %v3668_v48 = vsub.f32 1.0, %v3667_v38  ;;  %v2545_v27 = vsub.f32 %v11716_v16, %v2334_v50  ;;  %vm3672_vm6 = vweird.f32 %v8718_v30  ;;  %v3692_v38 = vand.u32 2147483648, %v11913_v54  ;;  %v11981_v16 = vpop.f32.mrf.mxu1  ;;  %16712 = vst [vmem:[#allocation57_spill] sm:$0xff] %v11983_v41 }
 0x5c4   : > { %v3683_v4 = vsub.f32 1.0, %v3682_v3  ;;  %v2715_v28 = vmul.f32 1.442695, %v2544_v52  ;;  %8221 = vmatmul.msk.f32.gmra.mxu3 %vm776_vm0, %v1279_v17  ;;  %v11976_v10 = vadd.f32 %v5203_v19, %v5095_v2  ;;  %2969 = vadd.xlane.f32.xlu1 %v11970_v56  ;;  %16711 = vst [vmem:[#allocation56_spill] sm:$0xff] %v11981_v16  ;;  %vm3687_vm8 = vweird.f32 %v8720_v40  ;;  %vm3673_vm11 = vmor %vm3671_vm7, %vm3672_vm6 }
 0x5c5   : > { %v2717_v53 = vmul.f32 1.442695, %v2545_v27  ;;  %v3669_v29 = vmul.f32 %v8718_v30, %v3668_v48  ;;  %2343 = vmax.xlane.f32.xlu2 %v11945_v18  ;;  %5457 = vmatmul.f32.gmra.mxu1 %v5095_v2  ;;  %vm3691_vm12 = vcmp.eq.f32.partialorder %v3690_v24, 8.507059e+37  ;;  %vm3688_vm13 = vmor %vm3686_vm10, %vm3687_vm8  ;;  %v3693_v34 = vor.u32 1.1754944e-38, %v3692_v38 }
 0x5c6   : > { %8725 = vpow2.f32 %v2715_v28  ;;  %v3684_v19 = vmul.f32 %v8720_v40, %v3683_v4  ;;  %v3678_v28 = vor.u32 1.1754944e-38, %v3677_v11  ;;  %v3707_v4 = vand.u32 2147483648, %v11952_v31 }
 0x5c7   : > { %v8724_v17 = vpop.eup %8723  ;;  %8727 = vpow2.f32 %v2717_v53  ;;  %v3670_v37 = vadd.f32 %v8718_v30, %v3669_v29  ;;  %v3705_v3 = vand.u32 2147483647, %v11952_v31  ;;  %vm3701_vm15 = vweird.f32 %v11952_v31 }
 0x5c8   : > { %v3697_v52 = vmul.f32 %v8724_v17, %v11952_v31  ;;  %v2336_v50 = vpop.xlane.xlu0 %2335  ;;  %v3685_v2 = vadd.f32 %v8720_v40, %v3684_v19  ;;  %vm3702_vm14 = vweird.f32 %v8724_v17  ;;  %v16717_v31 = vld [vmem:[#allocation59_spill] sm:$0xff] }
 0x5c9   : > { %v11994_v36 = vpop.xlane.xlu2 %2961  ;;  %v2546_v48 = vsub.f32 %v11746_v13, %v2336_v50  ;;  %v3674_v27 = vsel %vm3673_vm11, %v8718_v30, %v3670_v37  ;;  %vm3703_vm1 = vmor %vm3701_vm15, %vm3702_vm14  ;;  %vm3706_vm2 = vcmp.eq.f32.partialorder %v3705_v3, 8.507059e+37 }
 0x5ca   : > { %v3698_v53 = vsub.f32 1.0, %v3697_v52  ;;  %8729 = vrcp.f32 %v11994_v36  ;;  %v12000_v54 = vpop.xlane.xlu1 %2963  ;;  %v3679_v11 = vsel %vm11987_vm9, %v3678_v28, %v3674_v27  ;;  %v3689_v29 = vsel %vm3688_vm13, %v8720_v40, %v3685_v2  ;;  %v1336_v27 = vld [vmem:[%s16540_s15 + $0x1a0] sm:$0xff] }
 0x5cb   : > { %8731 = vrcp.f32 %v12000_v54  ;;  %v2719_v24 = vmul.f32 1.442695, %v2546_v48  ;;  %v5096_v13 = vmul.f32 %v11666_v46, %v3679_v11  ;;  %v3694_v30 = vsel %vm3691_vm12, %v3693_v34, %v3689_v29  ;;  %v12030_v2 = vpop.f32.mrf.mxu1  ;;  %v12032_v48 = vpop.f32.mrf.mxu3 }
 0x5cc   : > { %v12006_v19 = vpop.eup %8725  ;;  %8222 = vmatmul.msk.f32.gmra.mxu3 %vm776_vm0, %v11948_v39  ;;  %2345 = vmax.xlane.f32.xlu1 %v11955_v0  ;;  %v5097_v38 = vmul.f32 %v11672_v5, %v3694_v30  ;;  %v3699_v37 = vmul.f32 %v8724_v17, %v3698_v53  ;;  %v1153_v39 = vld [vmem:[%s16539_s14 + $0x3e8] sm:$0xff]  ;;  %v1335_v5 = vld [vmem:[%s16540_s15 + $0x198] sm:$0xff]  ;;  %16715 = vst [vmem:[#allocation48_spill] sm:$0xff] %v12030_v2  ;;  %vm3716_vm5 = vweird.f32 %v11994_v36  ;;  %vm3731_vm7 = vweird.f32 %v12000_v54 }
 0x5cd   : > { %v12013_v40 = vpop.eup %8727  ;;  %8733 = vpow2.f32 %v2719_v24  ;;  %2971 = vadd.xlane.f32.xlu0 %v12006_v19  ;;  %v12017_v46 = vadd.f32 %v11959_v25, %v5096_v13  ;;  %5460 = vmatmul.f32.gmra.mxu1 %v5096_v13  ;;  %v3708_v25 = vor.u32 1.1754944e-38, %v3707_v4  ;;  %16716 = vst [vmem:[#allocation86_spill] sm:$0xff] %v12032_v48  ;;  %v1281_v29 = vmul.f32 %v1153_v39, %v10088_v42  ;;  %v16718_v13 = vld [vmem:[#allocation53_spill] sm:$0xff]  ;;  %v16719_v42 = vld [vmem:[#allocation60_spill] sm:$0xff] }
 0x5ce   : > { %2973 = vadd.xlane.f32.xlu2 %v12013_v40  ;;  %v12027_v52 = vadd.f32 %v11965_v60, %v5097_v38  ;;  %v3700_v50 = vadd.f32 %v8724_v17, %v3699_v37  ;;  %v12040_v24 = vadd.f32 %v16717_v31, %v1335_v5  ;;  %v5224_v30 = vadd.f32 %v11432_v58, %v16718_v13 }
 0x5cf   : > { %v12051_v39 = vadd.f32 %v16719_v42, %v1336_v27  ;;  %v3720_v5 = vand.u32 2147483647, %v11994_v36  ;;  %v3735_v27 = vand.u32 2147483647, %v12000_v54 }
 0x5d0   : > { %v8730_v28 = vpop.eup %8729  ;;  %v3704_v34 = vsel %vm3703_vm1, %v8724_v17, %v3700_v50 }
 0x5d1   : > { %v8732_v53 = vpop.eup %8731  ;;  %v3712_v60 = vmul.f32 %v8730_v28, %v11994_v36  ;;  %v2338_v11 = vpop.xlane.xlu2 %2337  ;;  %v3709_v4 = vsel %vm3706_vm2, %v3708_v25, %v3704_v34  ;;  %vm3717_vm3 = vweird.f32 %v8730_v28  ;;  %vm3721_vm8 = vcmp.eq.f32.partialorder %v3720_v5, 8.507059e+37  ;;  %v16724_v5 = vld [vmem:[#allocation55_spill] sm:$0xff] }
 0x5d2   : > { %v3727_v37 = vmul.f32 %v8732_v53, %v12000_v54  ;;  %v2547_v2 = vsub.f32 %v11783_v47, %v2338_v11  ;;  %v2340_v16 = vpop.xlane.xlu1 %2339  ;;  %v5098_v17 = vmul.f32 %v11711_v8, %v3709_v4  ;;  %v3722_v8 = vand.u32 2147483648, %v11994_v36  ;;  %vm3718_vm6 = vmor %vm3716_vm5, %vm3717_vm3 }
 0x5d3   : > { %v12047_v3 = vpop.eup %8733  ;;  %v3713_v50 = vsub.f32 1.0, %v3712_v60  ;;  %v2548_v48 = vsub.f32 %v11792_v1, %v2340_v16  ;;  %v3737_v1 = vand.u32 2147483648, %v12000_v54  ;;  %v1154_v16 = vld [vmem:[%s16539_s14 + $0x3f0] sm:$0xff]  ;;  %vm3732_vm4 = vweird.f32 %v8732_v53 }
 0x5d4   : > { %v3728_v25 = vsub.f32 1.0, %v3727_v37  ;;  %v2721_v34 = vmul.f32 1.442695, %v2547_v2  ;;  %8223 = vmatmul.msk.f32.gmra.mxu3 %vm776_vm0, %v1281_v29  ;;  %2975 = vadd.xlane.f32.xlu1 %v12047_v3  ;;  %v12056_v58 = vadd.f32 %v5224_v30, %v5098_v17  ;;  %v3723_v29 = vor.u32 1.1754944e-38, %v3722_v8  ;;  %vm3733_vm9 = vmor %vm3731_vm7, %vm3732_vm4  ;;  %v12072_v30 = vpop.f32.mrf.mxu1  ;;  %v12074_v37 = vpop.f32.mrf.mxu3 }
 0x5d5   : > { %v2723_v47 = vmul.f32 1.442695, %v2548_v48  ;;  %2347 = vmax.xlane.f32.xlu0 %v12040_v24  ;;  %v3714_v60 = vmul.f32 %v8730_v28, %v3713_v50  ;;  %5463 = vmatmul.f32.gmra.mxu1 %v5097_v38  ;;  %v1337_v48 = vld [vmem:[%s16540_s15 + $0x1a8] sm:$0xff]  ;;  %v1282_v38 = vmul.f32 %v1154_v16, %v10092_v43  ;;  %v3738_v13 = vor.u32 1.1754944e-38, %v3737_v1  ;;  %16720 = vst [vmem:[#allocation58_spill] sm:$0xff] %v12072_v30  ;;  %v16722_v50 = vld [vmem:[#allocation61_spill] sm:$0xff] }
 0x5d6   : > { %8735 = vpow2.f32 %v2721_v34  ;;  %2349 = vmax.xlane.f32.xlu2 %v12051_v39  ;;  %v3729_v2 = vmul.f32 %v8732_v53, %v3728_v25  ;;  %16721 = vst [vmem:[#allocation51_spill] sm:$0xff] %v12074_v37  ;;  %v12077_v42 = vadd.f32 %v16722_v50, %v1337_v48  ;;  %vm3736_vm10 = vcmp.eq.f32.partialorder %v3735_v27, 8.507059e+37  ;;  %v16723_v34 = vld [vmem:[#allocation54_spill] sm:$0xff] }
 0x5d7   : > { %8737 = vpow2.f32 %v2723_v47  ;;  %v3715_v11 = vadd.f32 %v8730_v28, %v3714_v60  ;;  %v5231_v8 = vadd.f32 %v11466_v21, %v16723_v34  ;;  %v5238_v47 = vadd.f32 %v11480_v51, %v16724_v5  ;;  %v1155_v51 = vld [vmem:[%s16539_s14 + $0x3f8] sm:$0xff] }
 0x5d8   : > { %v3730_v31 = vadd.f32 %v8732_v53, %v3729_v2  ;;  %v1283_v16 = vmul.f32 %v1155_v51, %v10096_v44  ;;  %v16725_v2 = vld [vmem:[#allocation63_spill] sm:$0xff] }
 0x5d9   : > { %v3719_v4 = vsel %vm3718_vm6, %v8730_v28, %v3715_v11  ;;  %v16728_v11 = vld [vmem:[#allocation64_spill] sm:$0xff] }
 0x5da   : > { %v3724_v25 = vsel %vm3721_vm8, %v3723_v29, %v3719_v4  ;;  %v3734_v36 = vsel %vm3733_vm9, %v8732_v53, %v3730_v31 }
 0x5db   : > { %v5099_v54 = vmul.f32 %v11752_v57, %v3724_v25  ;;  %v3739_v43 = vsel %vm3736_vm10, %v3738_v13, %v3734_v36  ;;  %v1338_v57 = vld [vmem:[%s16540_s15 + $0x1b0] sm:$0xff] }
 0x5dc   : > { %v12082_v28 = vpop.eup %8735  ;;  %8224 = vmatmul.msk.f32.gmra.mxu3 %vm776_vm0, %v1282_v38  ;;  %2351 = vmax.xlane.f32.xlu1 %v12077_v42  ;;  %v5100_v60 = vmul.f32 %v11760_v12, %v3739_v43  ;;  %v1339_v12 = vld [vmem:[%s16540_s15 + $0x1b8] sm:$0xff]  ;;  %v12108_v27 = vadd.f32 %v16725_v2, %v1338_v57  ;;  %v12112_v48 = vpop.f32.mrf.mxu3 }
 0x5dd   : > { %v12089_v1 = vpop.eup %8737  ;;  %2977 = vadd.xlane.f32.xlu0 %v12082_v28  ;;  %v12092_v53 = vadd.f32 %v5231_v8, %v5099_v54  ;;  %5466 = vmatmul.f32.gmra.mxu1 %v5098_v17  ;;  %v12110_v17 = vpop.f32.mrf.mxu1  ;;  %16727 = vst [vmem:[#allocation52_spill] sm:$0xff] %v12112_v48  ;;  %v12116_v29 = vadd.f32 %v16728_v11, %v1339_v12  ;;  %v16744_v48 = vld [vmem:[#allocation71_spill] sm:$0xff] }
 0x5de   : > { %2979 = vadd.xlane.f32.xlu2 %v12089_v1  ;;  %v12095_v21 = vadd.f32 %v5238_v47, %v5100_v60  ;;  %16726 = vst [vmem:[#allocation42_spill] sm:$0xff] %v12110_v17 }
 0x5e4   : > { %8225 = vmatmul.msk.f32.gmra.mxu3 %vm776_vm0, %v1283_v16 }
 0x5e5   : > { %2353 = vmax.xlane.f32.xlu0 %v12108_v27  ;;  %5469 = vmatmul.f32.gmra.mxu1 %v5099_v54  ;;  %v12120_v31 = vpop.f32.mrf.mxu1 }
 0x5e6   : > { %2355 = vmax.xlane.f32.xlu2 %v12116_v29  ;;  %16729 = vst [vmem:[#allocation59_spill] sm:$0xff] %v12120_v31 }
 0x5ed   : > { %5472 = vmatmul.f32.gmra.mxu1 %v5100_v60  ;;  %v12122_v4 = vpop.f32.mrf.mxu1 }
 0x5ee   : > { %16730 = vst [vmem:[#allocation53_spill] sm:$0xff] %v12122_v4 }
 0x627   : > { %v2966_v44 = vpop.xlane.xlu0 %2965 }
 0x628   : > { %8739 = vrcp.f32 %v2966_v44  ;;  %v3752_v43 = vand.u32 2147483648, %v2966_v44  ;;  %v3750_v54 = vand.u32 2147483647, %v2966_v44  ;;  %vm3746_vm12 = vweird.f32 %v2966_v44 }
 0x62a   : > { %v3753_v51 = vor.u32 1.1754944e-38, %v3752_v43  ;;  %vm3751_vm14 = vcmp.eq.f32.partialorder %v3750_v54, 8.507059e+37 }
 0x62e   : > { %v8740_v38 = vpop.eup %8739 }
 0x62f   : > { %v3742_v13 = vmul.f32 %v8740_v38, %v2966_v44  ;;  %v2342_v50 = vpop.xlane.xlu0 %2341  ;;  %vm3747_vm11 = vweird.f32 %v8740_v38 }
 0x630   : > { %v2968_v25 = vpop.xlane.xlu2 %2967  ;;  %v2549_v36 = vsub.f32 %v11910_v35, %v2342_v50  ;;  %vm3748_vm13 = vmor %vm3746_vm12, %vm3747_vm11  ;;  %v12128_v35 = vpop.f32.mrf.mxu1  ;;  %v16733_v50 = vld [vmem:[#allocation96_spill] sm:$0xff] }
 0x631   : > { %v3743_v34 = vsub.f32 1.0, %v3742_v13  ;;  %8741 = vrcp.f32 %v2968_v25  ;;  %16731 = vst [vmem:[#allocation60_spill] sm:$0xff] %v12128_v35  ;;  %v16732_v13 = vld [vmem:[#allocation62_spill] sm:$0xff]  ;;  %vm3761_vm1 = vweird.f32 %v2968_v25  ;;  %v16743_v35 = vld [vmem:[#allocation103_spill] sm:$0xff] }
 0x632   : > { %v2725_v8 = vmul.f32 1.442695, %v2549_v36  ;;  %v5245_v36 = vadd.f32 %v16733_v50, %v16732_v13 }
 0x633   : > { %v3744_v5 = vmul.f32 %v8740_v38, %v3743_v34 }
 0x634   : > { %8743 = vpow2.f32 %v2725_v8 }
 0x635   : > { %v3745_v47 = vadd.f32 %v8740_v38, %v3744_v5 }
 0x637   : > { %v12125_v60 = vpop.xlane.xlu1 %2969  ;;  %v8742_v57 = vpop.eup %8741  ;;  %v3749_v12 = vsel %vm3748_vm13, %v8740_v38, %v3745_v47  ;;  %v3767_v38 = vand.u32 2147483648, %v2968_v25  ;;  %v3765_v47 = vand.u32 2147483647, %v2968_v25 }
 0x638   : > { %8745 = vrcp.f32 %v12125_v60  ;;  %v3757_v16 = vmul.f32 %v8742_v57, %v2968_v25  ;;  %v2344_v2 = vpop.xlane.xlu2 %2343  ;;  %v3754_v11 = vsel %vm3751_vm14, %v3753_v51, %v3749_v12  ;;  %vm3762_vm15 = vweird.f32 %v8742_v57  ;;  %v1340_v51 = vld [vmem:[%s16540_s15 + $0x1c0] sm:$0xff] }
 0x639   : > { %v2550_v34 = vsub.f32 %v11945_v18, %v2344_v2  ;;  %v5101_v44 = vmul.f32 %v11890_v49, %v3754_v11  ;;  %v16734_v2 = vld [vmem:[#allocation65_spill] sm:$0xff]  ;;  %v16735_v11 = vld [vmem:[#allocation98_spill] sm:$0xff]  ;;  %vm3763_vm2 = vmor %vm3761_vm1, %vm3762_vm15  ;;  %vm3766_vm3 = vcmp.eq.f32.partialorder %v3765_v47, 8.507059e+37  ;;  %vm3776_vm5 = vweird.f32 %v12125_v60 }
 0x63a   : > { %v12134_v8 = vpop.eup %8743  ;;  %v3758_v43 = vsub.f32 1.0, %v3757_v16  ;;  %v5252_v13 = vadd.f32 %v16735_v11, %v16734_v2  ;;  %v3780_v2 = vand.u32 2147483647, %v12125_v60  ;;  %v1342_v47 = vld [vmem:[%s16540_s15 + $0x1d0] sm:$0xff] }
 0x63b   : > { %v2727_v5 = vmul.f32 1.442695, %v2550_v34  ;;  %v12136_v31 = vadd.f32 %v5245_v36, %v5101_v44  ;;  %5475 = vmatmul.f32.gmra.mxu1 %v5101_v44  ;;  %2981 = vadd.xlane.f32.xlu1 %v12134_v8  ;;  %v3768_v34 = vor.u32 1.1754944e-38, %v3767_v38  ;;  %v16736_v44 = vld [vmem:[#allocation67_spill] sm:$0xff] }
 0x63c   : > { %v3759_v54 = vmul.f32 %v8742_v57, %v3758_v43  ;;  %v12149_v43 = vadd.f32 %v16736_v44, %v1340_v51  ;;  %v1341_v51 = vld [vmem:[%s16540_s15 + $0x1c8] sm:$0xff]  ;;  %vm3781_vm7 = vcmp.eq.f32.partialorder %v3780_v2, 8.507059e+37 }
 0x63d   : > { %8747 = vpow2.f32 %v2727_v5  ;;  %v16739_v44 = vld [vmem:[#allocation66_spill] sm:$0xff] }
 0x63e   : > { %v8746_v18 = vpop.eup %8745  ;;  %v3760_v16 = vadd.f32 %v8742_v57, %v3759_v54 }
 0x63f   : > { %v3772_v49 = vmul.f32 %v8746_v18, %v12125_v60  ;;  %v2346_v12 = vpop.xlane.xlu1 %2345  ;;  %vm3777_vm4 = vweird.f32 %v8746_v18 }
 0x640   : > { %v2551_v50 = vsub.f32 %v11955_v0, %v2346_v12  ;;  %v12146_v36 = vpop.xlane.xlu0 %2971  ;;  %v3764_v5 = vsel %vm3763_vm2, %v8742_v57, %v3760_v16  ;;  %v3782_v0 = vand.u32 2147483648, %v12125_v60  ;;  %v12156_v12 = vpop.f32.mrf.mxu1  ;;  %vm3778_vm6 = vmor %vm3776_vm5, %vm3777_vm4 }
 0x641   : > { %v3773_v17 = vsub.f32 1.0, %v3772_v49  ;;  %v12151_v30 = vpop.xlane.xlu2 %2973  ;;  %8749 = vrcp.f32 %v12146_v36  ;;  %v3769_v54 = vsel %vm3766_vm3, %v3768_v34, %v3764_v5  ;;  %16737 = vst [vmem:[#allocation61_spill] sm:$0xff] %v12156_v12  ;;  %v16740_v5 = vld [vmem:[#allocation100_spill] sm:$0xff]  ;;  %v16741_v12 = vld [vmem:[#allocation70_spill] sm:$0xff]  ;;  %vm3791_vm9 = vweird.f32 %v12146_v36 }
 0x642   : > { %8751 = vrcp.f32 %v12151_v30  ;;  %v2729_v25 = vmul.f32 1.442695, %v2551_v50  ;;  %v5102_v38 = vmul.f32 %v11933_v45, %v3769_v54  ;;  %v3783_v50 = vor.u32 1.1754944e-38, %v3782_v0 }
 0x643   : > { %v3774_v49 = vmul.f32 %v8746_v18, %v3773_v17  ;;  %v12163_v57 = vpop.eup %8747  ;;  %2357 = vmax.xlane.f32.xlu1 %v12149_v43  ;;  %v16738_v17 = vld [vmem:[#allocation69_spill] sm:$0xff]  ;;  %vm3806_vm12 = vweird.f32 %v12151_v30 }
 0x644   : > { %8753 = vpow2.f32 %v2729_v25  ;;  %2983 = vadd.xlane.f32.xlu0 %v12163_v57  ;;  %v12170_v45 = vadd.f32 %v5252_v13, %v5102_v38  ;;  %5478 = vmatmul.f32.gmra.mxu1 %v5102_v38  ;;  %v12174_v11 = vadd.f32 %v16738_v17, %v1341_v51  ;;  %v5259_v25 = vadd.f32 %v16740_v5, %v16739_v44 }
 0x645   : > { %v3775_v16 = vadd.f32 %v8746_v18, %v3774_v49  ;;  %v12181_v13 = vadd.f32 %v16741_v12, %v1342_v47  ;;  %v16742_v49 = vld [vmem:[#allocation68_spill] sm:$0xff]  ;;  %v12191_v44 = vadd.f32 %v11721_v59, %v16744_v48  ;;  %v3810_v48 = vand.u32 2147483647, %v12151_v30 }
 0x646   : > { %v12185_v60 = vadd.f32 %v16743_v35, %v16742_v49  ;;  %v3795_v49 = vand.u32 2147483647, %v12146_v36 }
 0x647   : > { %v8750_v34 = vpop.eup %8749  ;;  %v12178_v54 = vpop.xlane.xlu1 %2975  ;;  %v3779_v4 = vsel %vm3778_vm6, %v8746_v18, %v3775_v16  ;;  %vm3811_vm14 = vcmp.eq.f32.partialorder %v3810_v48, 8.507059e+37 }
 0x648   : > { %v8752_v38 = vpop.eup %8751  ;;  %v3787_v51 = vmul.f32 %v8750_v34, %v12146_v36  ;;  %8755 = vrcp.f32 %v12178_v54  ;;  %v2348_v0 = vpop.xlane.xlu0 %2347  ;;  %v3784_v17 = vsel %vm3781_vm7, %v3783_v50, %v3779_v4  ;;  %v3797_v4 = vand.u32 2147483648, %v12146_v36 }
 0x649   : > { %v3802_v18 = vmul.f32 %v8752_v38, %v12151_v30  ;;  %v2350_v2 = vpop.xlane.xlu2 %2349  ;;  %v2552_v12 = vsub.f32 %v12040_v24, %v2348_v0  ;;  %v5103_v47 = vmul.f32 %v11970_v56, %v3784_v17  ;;  %vm3792_vm8 = vweird.f32 %v8750_v34 }
 0x64a   : > { %v12196_v16 = vpop.eup %8753  ;;  %v3788_v35 = vsub.f32 1.0, %v3787_v51  ;;  %v2553_v5 = vsub.f32 %v12051_v39, %v2350_v2  ;;  %v3812_v56 = vand.u32 2147483648, %v12151_v30  ;;  %v12206_v51 = vpop.f32.mrf.mxu1  ;;  %vm3807_vm10 = vweird.f32 %v8752_v38  ;;  %vm3793_vm13 = vmor %vm3791_vm9, %vm3792_vm8 }
 0x64b   : > { %v3803_v50 = vsub.f32 1.0, %v3802_v18  ;;  %v2731_v37 = vmul.f32 1.442695, %v2552_v12  ;;  %2985 = vadd.xlane.f32.xlu2 %v12196_v16  ;;  %v12202_v59 = vadd.f32 %v5259_v25, %v5103_v47  ;;  %16745 = vst [vmem:[#allocation54_spill] sm:$0xff] %v12206_v51  ;;  %vm12210_vm11 = vcmp.eq.f32.partialorder %v3795_v49, 8.507059e+37  ;;  %vm3808_vm15 = vmor %vm3806_vm12, %vm3807_vm10  ;;  %v16751_v51 = vld [vmem:[#allocation38_spill] sm:$0xff] }
 0x64c   : > { %v2733_v24 = vmul.f32 1.442695, %v2553_v5  ;;  %v3789_v0 = vmul.f32 %v8750_v34, %v3788_v35  ;;  %2359 = vmax.xlane.f32.xlu0 %v12174_v11  ;;  %5481 = vmatmul.f32.gmra.mxu1 %v5103_v47  ;;  %v3813_v49 = vor.u32 1.1754944e-38, %v3812_v56  ;;  %vm3821_vm2 = vweird.f32 %v12178_v54 }
 0x64d   : > { %8757 = vpow2.f32 %v2731_v37  ;;  %v3804_v39 = vmul.f32 %v8752_v38, %v3803_v50  ;;  %v3798_v37 = vor.u32 1.1754944e-38, %v3797_v4  ;;  %v3827_v50 = vand.u32 2147483648, %v12178_v54 }
 0x64e   : > { %v8756_v17 = vpop.eup %8755  ;;  %8759 = vpow2.f32 %v2733_v24  ;;  %v3790_v25 = vadd.f32 %v8750_v34, %v3789_v0 }
 0x64f   : > { %v3817_v2 = vmul.f32 %v8756_v17, %v12178_v54  ;;  %v2352_v12 = vpop.xlane.xlu1 %2351  ;;  %v3805_v47 = vadd.f32 %v8752_v38, %v3804_v39  ;;  %vm3822_vm1 = vweird.f32 %v8756_v17 }
 0x650   : > { %v2554_v36 = vsub.f32 %v12077_v42, %v2352_v12  ;;  %v12218_v35 = vpop.xlane.xlu0 %2977  ;;  %v3794_v5 = vsel %vm3793_vm13, %v8750_v34, %v3790_v25  ;;  %vm3823_vm3 = vmor %vm3821_vm2, %vm3822_vm1 }
 0x651   : > { %v3818_v24 = vsub.f32 1.0, %v3817_v2  ;;  %v12222_v30 = vpop.xlane.xlu2 %2979  ;;  %8761 = vrcp.f32 %v12218_v35  ;;  %v3799_v4 = vsel %vm12210_vm11, %v3798_v37, %v3794_v5  ;;  %v3809_v0 = vsel %vm3808_vm15, %v8752_v38, %v3805_v47 }
 0x652   : > { %8763 = vrcp.f32 %v12222_v30  ;;  %v2735_v42 = vmul.f32 1.442695, %v2554_v36  ;;  %v5104_v48 = vmul.f32 %v12006_v19, %v3799_v4  ;;  %v3814_v34 = vsel %vm3811_vm14, %v3813_v49, %v3809_v0  ;;  %v1344_v36 = vld [vmem:[%s16540_s15 + $0x1e0] sm:$0xff]  ;;  %v16749_v4 = vld [vmem:[#allocation72_spill] sm:$0xff] }
 0x653   : > { %v12229_v39 = vpop.eup %8757  ;;  %2361 = vmax.xlane.f32.xlu2 %v12181_v13  ;;  %v5105_v56 = vmul.f32 %v12013_v40, %v3814_v34  ;;  %v3819_v25 = vmul.f32 %v8756_v17, %v3818_v24  ;;  %v3825_v2 = vand.u32 2147483647, %v12178_v54  ;;  %v1343_v40 = vld [vmem:[%s16540_s15 + $0x1d8] sm:$0xff]  ;;  %v3828_v37 = vor.u32 1.1754944e-38, %v3827_v50 }
 0x654   : > { %v12234_v12 = vpop.eup %8759  ;;  %8765 = vpow2.f32 %v2735_v42  ;;  %v12237_v38 = vadd.f32 %v12185_v60, %v5104_v48  ;;  %2987 = vadd.xlane.f32.xlu1 %v12229_v39  ;;  %5484 = vmatmul.f32.gmra.mxu1 %v5104_v48  ;;  %v12248_v60 = vpop.f32.mrf.mxu1  ;;  %v12255_v0 = vadd.f32 %v16749_v4, %v1343_v40  ;;  %v16750_v54 = vld [vmem:[#allocation73_spill] sm:$0xff]  ;;  %v12266_v41 = vadd.f32 %v16751_v51, %v1344_v36 }
 0x655   : > { %2989 = vadd.xlane.f32.xlu0 %v12234_v12  ;;  %v12242_v19 = vadd.f32 %v12191_v44, %v5105_v56  ;;  %v3820_v18 = vadd.f32 %v8756_v17, %v3819_v25  ;;  %16748 = vst [vmem:[#allocation55_spill] sm:$0xff] %v12248_v60  ;;  %vm3826_vm4 = vcmp.eq.f32.partialorder %v3825_v2, 8.507059e+37  ;;  %v5280_v50 = vadd.f32 %v11756_v63, %v16750_v54 }
 0x656   : > { %v3840_v40 = vand.u32 2147483647, %v12218_v35  ;;  %v3855_v36 = vand.u32 2147483647, %v12222_v30  ;;  %vm3836_vm7 = vweird.f32 %v12218_v35  ;;  %vm3851_vm9 = vweird.f32 %v12222_v30 }
 0x657   : > { %v8762_v47 = vpop.eup %8761  ;;  %v3824_v5 = vsel %vm3823_vm3, %v8756_v17, %v3820_v18 }
 0x658   : > { %v8764_v44 = vpop.eup %8763  ;;  %v3832_v49 = vmul.f32 %v8762_v47, %v12218_v35  ;;  %v2354_v24 = vpop.xlane.xlu0 %2353  ;;  %v3829_v42 = vsel %vm3826_vm4, %v3828_v37, %v3824_v5  ;;  %vm3837_vm5 = vweird.f32 %v8762_v47  ;;  %vm3841_vm10 = vcmp.eq.f32.partialorder %v3840_v40, 8.507059e+37 }
 0x659   : > { %v3847_v48 = vmul.f32 %v8764_v44, %v12222_v30  ;;  %v2356_v34 = vpop.xlane.xlu2 %2355  ;;  %v2555_v25 = vsub.f32 %v12108_v27, %v2354_v24  ;;  %v5106_v60 = vmul.f32 %v12047_v3, %v3829_v42  ;;  %v3842_v27 = vand.u32 2147483648, %v12218_v35  ;;  %vm3838_vm8 = vmor %vm3836_vm7, %vm3837_vm5 }
 0x65a   : > { %v12262_v17 = vpop.eup %8765  ;;  %v3833_v2 = vsub.f32 1.0, %v3832_v49  ;;  %v2556_v18 = vsub.f32 %v12116_v29, %v2356_v34  ;;  %v3857_v29 = vand.u32 2147483648, %v12222_v30  ;;  %vm3852_vm6 = vweird.f32 %v8764_v44  ;;  %v1345_v49 = vld [vmem:[%s16540_s15 + $0x1e8] sm:$0xff] }
 0x65b   : > { %v3848_v37 = vsub.f32 1.0, %v3847_v48  ;;  %v2737_v5 = vmul.f32 1.442695, %v2555_v25  ;;  %2991 = vadd.xlane.f32.xlu2 %v12262_v17  ;;  %v12270_v63 = vadd.f32 %v5280_v50, %v5106_v60  ;;  %v3843_v42 = vor.u32 1.1754944e-38, %v3842_v27  ;;  %vm3853_vm11 = vmor %vm3851_vm9, %vm3852_vm6  ;;  %v16753_v34 = vld [vmem:[#allocation74_spill] sm:$0xff]  ;;  %v16755_v30 = vld [vmem:[#allocation75_spill] sm:$0xff] }
 0x65c   : > { %v2739_v24 = vmul.f32 1.442695, %v2556_v18  ;;  %2363 = vmax.xlane.f32.xlu1 %v12255_v0  ;;  %v3834_v3 = vmul.f32 %v8762_v47, %v3833_v2  ;;  %5487 = vmatmul.f32.gmra.mxu1 %v5105_v56  ;;  %v3858_v56 = vor.u32 1.1754944e-38, %v3857_v29  ;;  %v12282_v48 = vpop.f32.mrf.mxu1  ;;  %v12285_v25 = vadd.f32 %v16753_v34, %v1345_v49 }
 0x65d   : > { %8767 = vpow2.f32 %v2737_v5  ;;  %2365 = vmax.xlane.f32.xlu0 %v12266_v41  ;;  %v3849_v51 = vmul.f32 %v8764_v44, %v3848_v37  ;;  %16752 = vst [vmem:[#allocation63_spill] sm:$0xff] %v12282_v48  ;;  %vm3856_vm12 = vcmp.eq.f32.partialorder %v3855_v36, 8.507059e+37  ;;  %v16754_v37 = vld [vmem:[#allocation39_spill] sm:$0xff]  ;;  %v16758_v36 = vld [vmem:[#allocation77_spill] sm:$0xff] }
 0x65e   : > { %8769 = vpow2.f32 %v2739_v24  ;;  %v3835_v4 = vadd.f32 %v8762_v47, %v3834_v3  ;;  %v5287_v35 = vadd.f32 %v11789_v15, %v16754_v37  ;;  %v16783_v48 = vld [vmem:[#allocation87_spill] sm:$0xff] }
 0x65f   : > { %v3850_v54 = vadd.f32 %v8764_v44, %v3849_v51 }
 0x660   : > { %v3839_v50 = vsel %vm3838_vm8, %v8762_v47, %v3835_v4  ;;  %v5294_v47 = vadd.f32 %v11808_v61, %v16755_v30  ;;  %v1347_v61 = vld [vmem:[%s16540_s15 + $0x1f8] sm:$0xff] }
 0x661   : > { %v3844_v2 = vsel %vm3841_vm10, %v3843_v42, %v3839_v50  ;;  %v3854_v18 = vsel %vm3853_vm11, %v8764_v44, %v3850_v54  ;;  %v12316_v49 = vadd.f32 %v16758_v36, %v1347_v61 }
 0x662   : > { %v5107_v5 = vmul.f32 %v12082_v28, %v3844_v2  ;;  %v3859_v27 = vsel %vm3856_vm12, %v3858_v56, %v3854_v18  ;;  %v1346_v28 = vld [vmem:[%s16540_s15 + $0x1f0] sm:$0xff] }
 0x663   : > { %v12290_v24 = vpop.eup %8767  ;;  %2367 = vmax.xlane.f32.xlu2 %v12285_v25  ;;  %v5108_v40 = vmul.f32 %v12089_v1, %v3859_v27  ;;  %v16756_v1 = vld [vmem:[#allocation76_spill] sm:$0xff] }
 0x664   : > { %v12296_v3 = vpop.eup %8769  ;;  %2993 = vadd.xlane.f32.xlu1 %v12290_v24  ;;  %v12299_v44 = vadd.f32 %v5287_v35, %v5107_v5  ;;  %5490 = vmatmul.f32.gmra.mxu1 %v5106_v60  ;;  %v12311_v29 = vadd.f32 %v16756_v1, %v1346_v28  ;;  %v12313_v51 = vpop.f32.mrf.mxu1 }
 0x665   : > { %2995 = vadd.xlane.f32.xlu0 %v12296_v3  ;;  %v12302_v15 = vadd.f32 %v5294_v47, %v5108_v40  ;;  %16757 = vst [vmem:[#allocation64_spill] sm:$0xff] %v12313_v51 }
 0x66c   : > { %2369 = vmax.xlane.f32.xlu1 %v12311_v29  ;;  %5493 = vmatmul.f32.gmra.mxu1 %v5107_v5  ;;  %v12320_v60 = vpop.f32.mrf.mxu1 }
 0x66d   : > { %2371 = vmax.xlane.f32.xlu0 %v12316_v49  ;;  %16759 = vst [vmem:[#allocation62_spill] sm:$0xff] %v12320_v60  ;;  %v16765_v60 = vld [vmem:[#allocation80_spill] sm:$0xff] }
 0x674   : > { %5496 = vmatmul.f32.gmra.mxu1 %v5108_v40  ;;  %v12322_v54 = vpop.f32.mrf.mxu1 }
 0x675   : > { %16760 = vst [vmem:[#allocation96_spill] sm:$0xff] %v12322_v54 }
 0x6ae   : > { %v2982_v4 = vpop.xlane.xlu1 %2981 }
 0x6af   : > { %8771 = vrcp.f32 %v2982_v4  ;;  %v3872_v35 = vand.u32 2147483648, %v2982_v4  ;;  %v3870_v5 = vand.u32 2147483647, %v2982_v4  ;;  %vm3866_vm14 = vweird.f32 %v2982_v4 }
 0x6b1   : > { %v3873_v40 = vor.u32 1.1754944e-38, %v3872_v35  ;;  %vm3871_vm1 = vcmp.eq.f32.partialorder %v3870_v5, 8.507059e+37 }
 0x6b5   : > { %v8772_v42 = vpop.eup %8771 }
 0x6b6   : > { %v3862_v50 = vmul.f32 %v8772_v42, %v2982_v4  ;;  %v2358_v56 = vpop.xlane.xlu1 %2357  ;;  %vm3867_vm13 = vweird.f32 %v8772_v42 }
 0x6b7   : > { %v2557_v34 = vsub.f32 %v12149_v43, %v2358_v56  ;;  %v2984_v2 = vpop.xlane.xlu0 %2983  ;;  %vm3868_vm15 = vmor %vm3866_vm14, %vm3867_vm13  ;;  %v12328_v43 = vpop.f32.mrf.mxu1 }
 0x6b8   : > { %v3863_v18 = vsub.f32 1.0, %v3862_v50  ;;  %8773 = vrcp.f32 %v2984_v2  ;;  %16761 = vst [vmem:[#allocation65_spill] sm:$0xff] %v12328_v43  ;;  %vm3881_vm3 = vweird.f32 %v2984_v2 }
 0x6b9   : > { %v2741_v37 = vmul.f32 1.442695, %v2557_v34 }
 0x6ba   : > { %v3864_v27 = vmul.f32 %v8772_v42, %v3863_v18 }
 0x6bb   : > { %8775 = vpow2.f32 %v2741_v37 }
 0x6bc   : > { %v3865_v30 = vadd.f32 %v8772_v42, %v3864_v27  ;;  %v1348_v27 = vld [vmem:[%s16540_s15 + $0x200] sm:$0xff] }
 0x6be   : > { %v12325_v47 = vpop.xlane.xlu2 %2985  ;;  %v8774_v28 = vpop.eup %8773  ;;  %v3869_v61 = vsel %vm3868_vm15, %v8772_v42, %v3865_v30  ;;  %v3887_v42 = vand.u32 2147483648, %v2984_v2 }
 0x6bf   : > { %8777 = vrcp.f32 %v12325_v47  ;;  %v3877_v1 = vmul.f32 %v8774_v28, %v2984_v2  ;;  %v2360_v36 = vpop.xlane.xlu0 %2359  ;;  %v3874_v50 = vsel %vm3871_vm1, %v3873_v40, %v3869_v61  ;;  %vm3882_vm2 = vweird.f32 %v8774_v28 }
 0x6c0   : > { %v2558_v56 = vsub.f32 %v12174_v11, %v2360_v36  ;;  %v5109_v34 = vmul.f32 %v12134_v8, %v3874_v50  ;;  %v3885_v11 = vand.u32 2147483647, %v2984_v2  ;;  %v16762_v36 = vld [vmem:[#allocation78_spill] sm:$0xff]  ;;  %vm3883_vm4 = vmor %vm3881_vm3, %vm3882_vm2  ;;  %vm3896_vm7 = vweird.f32 %v12325_v47 }
 0x6c1   : > { %v12332_v18 = vpop.eup %8775  ;;  %v3878_v4 = vsub.f32 1.0, %v3877_v1  ;;  %v12346_v50 = vadd.f32 %v16762_v36, %v1348_v27 }
 0x6c2   : > { %v2743_v37 = vmul.f32 1.442695, %v2558_v56  ;;  %2997 = vadd.xlane.f32.xlu2 %v12332_v18  ;;  %v12336_v35 = vadd.f32 %v11894_v32, %v5109_v34  ;;  %5499 = vmatmul.f32.gmra.mxu1 %v5109_v34  ;;  %v3888_v56 = vor.u32 1.1754944e-38, %v3887_v42  ;;  %vm3886_vm5 = vcmp.eq.f32.partialorder %v3885_v11, 8.507059e+37 }
 0x6c3   : > { %v3879_v5 = vmul.f32 %v8774_v28, %v3878_v4  ;;  %v3900_v42 = vand.u32 2147483647, %v12325_v47 }
 0x6c4   : > { %8779 = vpow2.f32 %v2743_v37 }
 0x6c5   : > { %v8778_v30 = vpop.eup %8777  ;;  %v3880_v61 = vadd.f32 %v8774_v28, %v3879_v5  ;;  %v12353_v5 = vpop.f32.mrf.mxu1  ;;  %vm3901_vm9 = vcmp.eq.f32.partialorder %v3900_v42, 8.507059e+37 }
 0x6c6   : > { %v3892_v8 = vmul.f32 %v8778_v30, %v12325_v47  ;;  %v2362_v40 = vpop.xlane.xlu2 %2361  ;;  %16763 = vst [vmem:[#allocation98_spill] sm:$0xff] %v12353_v5  ;;  %vm3897_vm6 = vweird.f32 %v8778_v30 }
 0x6c7   : > { %v2559_v1 = vsub.f32 %v12181_v13, %v2362_v40  ;;  %v12343_v32 = vpop.xlane.xlu1 %2987  ;;  %v3884_v37 = vsel %vm3883_vm4, %v8774_v28, %v3880_v61  ;;  %v3902_v13 = vand.u32 2147483648, %v12325_v47  ;;  %vm3898_vm8 = vmor %vm3896_vm7, %vm3897_vm6 }
 0x6c8   : > { %v3893_v34 = vsub.f32 1.0, %v3892_v8  ;;  %8781 = vrcp.f32 %v12343_v32  ;;  %v12349_v4 = vpop.xlane.xlu0 %2989  ;;  %v3889_v2 = vsel %vm3886_vm5, %v3888_v56, %v3884_v37  ;;  %vm3911_vm11 = vweird.f32 %v12343_v32 }
 0x6c9   : > { %v2745_v43 = vmul.f32 1.442695, %v2559_v1  ;;  %8783 = vrcp.f32 %v12349_v4  ;;  %v5110_v27 = vmul.f32 %v12163_v57, %v3889_v2  ;;  %v1349_v57 = vld [vmem:[%s16540_s15 + $0x208] sm:$0xff]  ;;  %v3903_v61 = vor.u32 1.1754944e-38, %v3902_v13 }
 0x6ca   : > { %v3894_v40 = vmul.f32 %v8778_v30, %v3893_v34  ;;  %v12357_v8 = vpop.eup %8779  ;;  %2373 = vmax.xlane.f32.xlu2 %v12346_v50  ;;  %v16764_v2 = vld [vmem:[#allocation79_spill] sm:$0xff]  ;;  %vm3926_vm14 = vweird.f32 %v12349_v4 }
 0x6cb   : > { %8785 = vpow2.f32 %v2745_v43  ;;  %v12361_v28 = vadd.f32 %v11940_v14, %v5110_v27  ;;  %5502 = vmatmul.f32.gmra.mxu1 %v5110_v27  ;;  %2999 = vadd.xlane.f32.xlu1 %v12357_v8  ;;  %v1350_v43 = vld [vmem:[%s16540_s15 + $0x210] sm:$0xff]  ;;  %v12376_v27 = vadd.f32 %v16764_v2, %v1349_v57  ;;  %v3917_v57 = vand.u32 2147483648, %v12343_v32 }
 0x6cc   : > { %v3895_v11 = vadd.f32 %v8778_v30, %v3894_v40 }
 0x6ce   : > { %v8782_v1 = vpop.eup %8781  ;;  %v12371_v36 = vpop.xlane.xlu2 %2991  ;;  %v3899_v14 = vsel %vm3898_vm8, %v8778_v30, %v3895_v11  ;;  %v12382_v30 = vadd.f32 %v16765_v60, %v1350_v43 }
 0x6cf   : > { %v8784_v56 = vpop.eup %8783  ;;  %v3907_v34 = vmul.f32 %v8782_v1, %v12343_v32  ;;  %8787 = vrcp.f32 %v12371_v36  ;;  %v2364_v47 = vpop.xlane.xlu1 %2363  ;;  %v3904_v37 = vsel %vm3901_vm9, %v3903_v61, %v3899_v14  ;;  %v3915_v61 = vand.u32 2147483647, %v12343_v32 }
 0x6d0   : > { %v3922_v13 = vmul.f32 %v8784_v56, %v12349_v4  ;;  %v2560_v40 = vsub.f32 %v12255_v0, %v2364_v47  ;;  %v2366_v5 = vpop.xlane.xlu0 %2365  ;;  %v5111_v54 = vmul.f32 %v12196_v16, %v3904_v37  ;;  %v3930_v16 = vand.u32 2147483647, %v12349_v4  ;;  %v12395_v47 = vpop.f32.mrf.mxu1 }
 0x6d1   : > { %v12384_v42 = vpop.eup %8785  ;;  %v3908_v11 = vsub.f32 1.0, %v3907_v34  ;;  %v2561_v51 = vsub.f32 %v12266_v41, %v2366_v5  ;;  %vm3912_vm10 = vweird.f32 %v8782_v1  ;;  %v3932_v34 = vand.u32 2147483648, %v12349_v4  ;;  %16766 = vst [vmem:[#allocation67_spill] sm:$0xff] %v12395_v47 }
 0x6d2   : > { %v3923_v14 = vsub.f32 1.0, %v3922_v13  ;;  %v2747_v2 = vmul.f32 1.442695, %v2560_v40  ;;  %3001 = vadd.xlane.f32.xlu0 %v12384_v42  ;;  %v12391_v0 = vadd.f32 %v11976_v10, %v5111_v54  ;;  %vm3927_vm12 = vweird.f32 %v8784_v56  ;;  %vm3913_vm15 = vmor %vm3911_vm11, %vm3912_vm10 }
 0x6d3   : > { %v2749_v60 = vmul.f32 1.442695, %v2561_v51  ;;  %v3909_v43 = vmul.f32 %v8782_v1, %v3908_v11  ;;  %5505 = vmatmul.f32.gmra.mxu1 %v5111_v54  ;;  %2375 = vmax.xlane.f32.xlu1 %v12376_v27  ;;  %vm12399_vm13 = vcmp.eq.f32.partialorder %v3915_v61, 8.507059e+37  ;;  %v3918_v54 = vor.u32 1.1754944e-38, %v3917_v57  ;;  %vm3928_vm2 = vmor %vm3926_vm14, %vm3927_vm12 }
 0x6d4   : > { %8789 = vpow2.f32 %v2747_v2  ;;  %v3924_v41 = vmul.f32 %v8784_v56, %v3923_v14  ;;  %vm3931_vm1 = vcmp.eq.f32.partialorder %v3930_v16, 8.507059e+37  ;;  %v3933_v61 = vor.u32 1.1754944e-38, %v3932_v34 }
 0x6d5   : > { %v8788_v5 = vpop.eup %8787  ;;  %8791 = vpow2.f32 %v2749_v60  ;;  %v3910_v10 = vadd.f32 %v8782_v1, %v3909_v43  ;;  %v3947_v2 = vand.u32 2147483648, %v12371_v36  ;;  %vm3941_vm4 = vweird.f32 %v12371_v36 }
 0x6d6   : > { %v3937_v51 = vmul.f32 %v8788_v5, %v12371_v36  ;;  %v2368_v13 = vpop.xlane.xlu2 %2367  ;;  %v3925_v40 = vadd.f32 %v8784_v56, %v3924_v41  ;;  %vm3942_vm3 = vweird.f32 %v8788_v5 }
 0x6d7   : > { %v2562_v32 = vsub.f32 %v12285_v25, %v2368_v13  ;;  %v12407_v11 = vpop.xlane.xlu1 %2993  ;;  %v3914_v14 = vsel %vm3913_vm15, %v8782_v1, %v3910_v10  ;;  %vm3943_vm5 = vmor %vm3941_vm4, %vm3942_vm3 }
 0x6d8   : > { %v3938_v60 = vsub.f32 1.0, %v3937_v51  ;;  %8793 = vrcp.f32 %v12407_v11  ;;  %v12412_v4 = vpop.xlane.xlu0 %2995  ;;  %v3919_v57 = vsel %vm12399_vm13, %v3918_v54, %v3914_v14  ;;  %v3929_v43 = vsel %vm3928_vm2, %v8784_v56, %v3925_v40 }
 0x6d9   : > { %v2751_v16 = vmul.f32 1.442695, %v2562_v32  ;;  %8795 = vrcp.f32 %v12412_v4  ;;  %v5112_v25 = vmul.f32 %v12229_v39, %v3919_v57  ;;  %v3934_v1 = vsel %vm3931_vm1, %v3933_v61, %v3929_v43  ;;  %v12437_v32 = vpop.f32.mrf.mxu1 }
 0x6da   : > { %v12418_v41 = vpop.eup %8789  ;;  %2377 = vmax.xlane.f32.xlu0 %v12382_v30  ;;  %v5113_v34 = vmul.f32 %v12234_v12, %v3934_v1  ;;  %v3939_v10 = vmul.f32 %v8788_v5, %v3938_v60  ;;  %v3945_v51 = vand.u32 2147483647, %v12371_v36  ;;  %v1351_v12 = vld [vmem:[%s16540_s15 + $0x218] sm:$0xff]  ;;  %v3948_v54 = vor.u32 1.1754944e-38, %v3947_v2  ;;  %16769 = vst [vmem:[#allocation69_spill] sm:$0xff] %v12437_v32 }
 0x6db   : > { %v12423_v13 = vpop.eup %8791  ;;  %8797 = vpow2.f32 %v2751_v16  ;;  %3003 = vadd.xlane.f32.xlu2 %v12418_v41  ;;  %v12427_v56 = vadd.f32 %v12017_v46, %v5112_v25  ;;  %5508 = vmatmul.f32.gmra.mxu1 %v5112_v25  ;;  %v1352_v46 = vld [vmem:[%s16540_s15 + $0x220] sm:$0xff]  ;;  %vm3956_vm9 = vweird.f32 %v12407_v11  ;;  %vm3971_vm11 = vweird.f32 %v12412_v4 }
 0x6dc   : > { %3005 = vadd.xlane.f32.xlu1 %v12423_v13  ;;  %v12431_v39 = vadd.f32 %v12027_v52, %v5113_v34  ;;  %v3940_v37 = vadd.f32 %v8788_v5, %v3939_v10  ;;  %vm3946_vm6 = vcmp.eq.f32.partialorder %v3945_v51, 8.507059e+37  ;;  %v16770_v2 = vld [vmem:[#allocation81_spill] sm:$0xff]  ;;  %v16771_v51 = vld [vmem:[#allocation82_spill] sm:$0xff] }
 0x6dd   : > { %v12446_v25 = vadd.f32 %v16770_v2, %v1351_v12  ;;  %v3962_v12 = vand.u32 2147483648, %v12407_v11 }
 0x6de   : > { %v8794_v40 = vpop.eup %8793  ;;  %v3944_v14 = vsel %vm3943_vm5, %v8788_v5, %v3940_v37  ;;  %v12453_v37 = vadd.f32 %v16771_v51, %v1352_v46 }
 0x6df   : > { %v8796_v52 = vpop.eup %8795  ;;  %v3952_v61 = vmul.f32 %v8794_v40, %v12407_v11  ;;  %v2370_v60 = vpop.xlane.xlu1 %2369  ;;  %v3949_v36 = vsel %vm3946_vm6, %v3948_v54, %v3944_v14  ;;  %v3960_v54 = vand.u32 2147483647, %v12407_v11  ;;  %vm3957_vm7 = vweird.f32 %v8794_v40 }
 0x6e0   : > { %v3967_v57 = vmul.f32 %v8796_v52, %v12412_v4  ;;  %v2563_v43 = vsub.f32 %v12311_v29, %v2370_v60  ;;  %v2372_v16 = vpop.xlane.xlu0 %2371  ;;  %v5114_v1 = vmul.f32 %v12262_v17, %v3949_v36  ;;  %vm3972_vm8 = vweird.f32 %v8796_v52  ;;  %vm3958_vm10 = vmor %vm3956_vm9, %vm3957_vm7 }
 0x6e1   : > { %v12449_v10 = vpop.eup %8797  ;;  %v3953_v32 = vsub.f32 1.0, %v3952_v61  ;;  %v2564_v5 = vsub.f32 %v12316_v49, %v2372_v16  ;;  %v3977_v49 = vand.u32 2147483648, %v12412_v4  ;;  %v3975_v60 = vand.u32 2147483647, %v12412_v4  ;;  %vm3973_vm13 = vmor %vm3971_vm11, %vm3972_vm8  ;;  %v16773_v16 = vld [vmem:[#allocation83_spill] sm:$0xff] }
 0x6e2   : > { %v3968_v14 = vsub.f32 1.0, %v3967_v57  ;;  %v2753_v47 = vmul.f32 1.442695, %v2563_v43  ;;  %3007 = vadd.xlane.f32.xlu0 %v12449_v10  ;;  %v12458_v29 = vadd.f32 %v12056_v58, %v5114_v1  ;;  %v1353_v58 = vld [vmem:[%s16540_s15 + $0x228] sm:$0xff]  ;;  %vm3961_vm12 = vcmp.eq.f32.partialorder %v3960_v54, 8.507059e+37  ;;  %v12470_v43 = vpop.f32.mrf.mxu1 }
 0x6e3   : > { %v2755_v17 = vmul.f32 1.442695, %v2564_v5  ;;  %2379 = vmax.xlane.f32.xlu2 %v12446_v25  ;;  %v3954_v61 = vmul.f32 %v8794_v40, %v3953_v32  ;;  %5511 = vmatmul.f32.gmra.mxu1 %v5113_v34  ;;  %v3963_v32 = vor.u32 1.1754944e-38, %v3962_v12  ;;  %v3978_v34 = vor.u32 1.1754944e-38, %v3977_v49  ;;  %16772 = vst [vmem:[#allocation66_spill] sm:$0xff] %v12470_v43  ;;  %v16774_v12 = vld [vmem:[#allocation84_spill] sm:$0xff] }
 0x6e4   : > { %8799 = vpow2.f32 %v2753_v47  ;;  %2381 = vmax.xlane.f32.xlu1 %v12453_v37  ;;  %v3969_v46 = vmul.f32 %v8796_v52, %v3968_v14  ;;  %v12473_v2 = vadd.f32 %v16773_v16, %v1353_v58  ;;  %vm3976_vm14 = vcmp.eq.f32.partialorder %v3975_v60, 8.507059e+37 }
 0x6e5   : > { %8801 = vpow2.f32 %v2755_v17  ;;  %v3955_v36 = vadd.f32 %v8794_v40, %v3954_v61 }
 0x6e6   : > { %v3970_v57 = vadd.f32 %v8796_v52, %v3969_v46 }
 0x6e7   : > { %v3959_v47 = vsel %vm3958_vm10, %v8794_v40, %v3955_v36 }
 0x6e8   : > { %v3964_v5 = vsel %vm3961_vm12, %v3963_v32, %v3959_v47  ;;  %v3974_v51 = vsel %vm3973_vm13, %v8796_v52, %v3970_v57 }
 0x6e9   : > { %v5115_v14 = vmul.f32 %v12290_v24, %v3964_v5  ;;  %v3979_v11 = vsel %vm3976_vm14, %v3978_v34, %v3974_v51  ;;  %v1354_v24 = vld [vmem:[%s16540_s15 + $0x230] sm:$0xff] }
 0x6ea   : > { %v12476_v17 = vpop.eup %8799  ;;  %2383 = vmax.xlane.f32.xlu0 %v12473_v2  ;;  %v5116_v4 = vmul.f32 %v12296_v3, %v3979_v11  ;;  %v1355_v3 = vld [vmem:[%s16540_s15 + $0x238] sm:$0xff]  ;;  %v12497_v61 = vadd.f32 %v16774_v12, %v1354_v24  ;;  %v12499_v49 = vpop.f32.mrf.mxu1 }
 0x6eb   : > { %v12480_v40 = vpop.eup %8801  ;;  %3009 = vadd.xlane.f32.xlu2 %v12476_v17  ;;  %v12484_v54 = vadd.f32 %v12092_v53, %v5115_v14  ;;  %5514 = vmatmul.f32.gmra.mxu1 %v5114_v1  ;;  %16775 = vst [vmem:[#allocation100_spill] sm:$0xff] %v12499_v49  ;;  %v16776_v53 = vld [vmem:[#allocation85_spill] sm:$0xff] }
 0x6ec   : > { %3011 = vadd.xlane.f32.xlu1 %v12480_v40  ;;  %v12488_v52 = vadd.f32 %v12095_v21, %v5116_v4  ;;  %v12502_v1 = vadd.f32 %v16776_v53, %v1355_v3 }
 0x6f2   : > { %v12506_v21 = vpop.f32.mrf.mxu1 }
 0x6f3   : > { %2385 = vmax.xlane.f32.xlu2 %v12497_v61  ;;  %5517 = vmatmul.f32.gmra.mxu1 %v5115_v14  ;;  %16777 = vst [vmem:[#allocation70_spill] sm:$0xff] %v12506_v21 }
 0x6f4   : > { %2387 = vmax.xlane.f32.xlu1 %v12502_v1 }
 0x6fa   : > { %v12508_v58 = vpop.f32.mrf.mxu1 }
 0x6fb   : > { %5520 = vmatmul.f32.gmra.mxu1 %v5116_v4  ;;  %16778 = vst [vmem:[#allocation68_spill] sm:$0xff] %v12508_v58 }
 0x735   : > { %v2998_v46 = vpop.xlane.xlu2 %2997 }
 0x736   : > { %8803 = vrcp.f32 %v2998_v46  ;;  %v3992_v5 = vand.u32 2147483648, %v2998_v46  ;;  %v3990_v14 = vand.u32 2147483647, %v2998_v46  ;;  %vm3986_vm1 = vweird.f32 %v2998_v46 }
 0x738   : > { %v3993_v24 = vor.u32 1.1754944e-38, %v3992_v5  ;;  %vm3991_vm3 = vcmp.eq.f32.partialorder %v3990_v14, 8.507059e+37  ;;  %v1356_v14 = vld [vmem:[%s16540_s15 + $0x240] sm:$0xff] }
 0x73c   : > { %v8804_v60 = vpop.eup %8803 }
 0x73d   : > { %v3982_v36 = vmul.f32 %v8804_v60, %v2998_v46  ;;  %v2374_v32 = vpop.xlane.xlu2 %2373  ;;  %vm3987_vm15 = vweird.f32 %v8804_v60 }
 0x73e   : > { %v2565_v57 = vsub.f32 %v12346_v50, %v2374_v32  ;;  %v3000_v47 = vpop.xlane.xlu1 %2999  ;;  %vm3988_vm2 = vmor %vm3986_vm1, %vm3987_vm15  ;;  %v12514_v50 = vpop.f32.mrf.mxu1 }
 0x73f   : > { %v3983_v34 = vsub.f32 1.0, %v3982_v36  ;;  %8805 = vrcp.f32 %v3000_v47  ;;  %16779 = vst [vmem:[#allocation103_spill] sm:$0xff] %v12514_v50  ;;  %vm4001_vm5 = vweird.f32 %v3000_v47 }
 0x740   : > { %v2757_v16 = vmul.f32 1.442695, %v2565_v57 }
 0x741   : > { %v3984_v51 = vmul.f32 %v8804_v60, %v3983_v34 }
 0x742   : > { %8807 = vpow2.f32 %v2757_v16 }
 0x743   : > { %v3985_v11 = vadd.f32 %v8804_v60, %v3984_v51 }
 0x745   : > { %v12511_v4 = vpop.xlane.xlu0 %3001  ;;  %v8806_v3 = vpop.eup %8805  ;;  %v3989_v12 = vsel %vm3988_vm2, %v8804_v60, %v3985_v11  ;;  %v4007_v60 = vand.u32 2147483648, %v3000_v47 }
 0x746   : > { %8809 = vrcp.f32 %v12511_v4  ;;  %v3997_v53 = vmul.f32 %v8806_v3, %v3000_v47  ;;  %v2376_v36 = vpop.xlane.xlu1 %2375  ;;  %v3994_v32 = vsel %vm3991_vm3, %v3993_v24, %v3989_v12  ;;  %vm4002_vm4 = vweird.f32 %v8806_v3  ;;  %v12539_v43 = vpop.f32.mrf.mxu1 }
 0x747   : > { %v2566_v57 = vsub.f32 %v12376_v27, %v2376_v36  ;;  %v5117_v34 = vmul.f32 %v12332_v18, %v3994_v32  ;;  %v4005_v27 = vand.u32 2147483647, %v3000_v47  ;;  %v16780_v32 = vld [vmem:[#allocation40_spill] sm:$0xff]  ;;  %vm4003_vm6 = vmor %vm4001_vm5, %vm4002_vm4  ;;  %v4022_v49 = vand.u32 2147483648, %v12511_v4  ;;  %16781 = vst [vmem:[#allocation71_spill] sm:$0xff] %v12539_v43 }
 0x748   : > { %v12518_v16 = vpop.eup %8807  ;;  %v3998_v46 = vsub.f32 1.0, %v3997_v53  ;;  %vm4016_vm9 = vweird.f32 %v12511_v4 }
 0x749   : > { %v2759_v51 = vmul.f32 1.442695, %v2566_v57  ;;  %3013 = vadd.xlane.f32.xlu0 %v12518_v16  ;;  %v12522_v5 = vadd.f32 %v12136_v31, %v5117_v34  ;;  %5523 = vmatmul.f32.gmra.mxu1 %v5117_v34  ;;  %v12532_v57 = vadd.f32 %v16780_v32, %v1356_v14  ;;  %v4008_v34 = vor.u32 1.1754944e-38, %v4007_v60 }
 0x74a   : > { %v3999_v11 = vmul.f32 %v8806_v3, %v3998_v46  ;;  %vm4006_vm7 = vcmp.eq.f32.partialorder %v4005_v27, 8.507059e+37  ;;  %v4020_v60 = vand.u32 2147483647, %v12511_v4  ;;  %v1357_v27 = vld [vmem:[%s16540_s15 + $0x248] sm:$0xff] }
 0x74b   : > { %8811 = vpow2.f32 %v2759_v51 }
 0x74c   : > { %v8810_v24 = vpop.eup %8809  ;;  %v4000_v53 = vadd.f32 %v8806_v3, %v3999_v11  ;;  %vm4021_vm11 = vcmp.eq.f32.partialorder %v4020_v60, 8.507059e+37 }
 0x74d   : > { %v4012_v18 = vmul.f32 %v8810_v24, %v12511_v4  ;;  %v2378_v12 = vpop.xlane.xlu0 %2377  ;;  %vm4017_vm8 = vweird.f32 %v8810_v24 }
 0x74e   : > { %v12528_v36 = vpop.xlane.xlu2 %3003  ;;  %v2567_v31 = vsub.f32 %v12382_v30, %v2378_v12  ;;  %v4004_v51 = vsel %vm4003_vm6, %v8806_v3, %v4000_v53  ;;  %vm4018_vm10 = vmor %vm4016_vm9, %vm4017_vm8  ;;  %v1358_v12 = vld [vmem:[%s16540_s15 + $0x250] sm:$0xff] }
 0x74f   : > { %v4013_v21 = vsub.f32 1.0, %v4012_v18  ;;  %8813 = vrcp.f32 %v12528_v36  ;;  %v12535_v46 = vpop.xlane.xlu1 %3005  ;;  %v4009_v47 = vsel %vm4006_vm7, %v4008_v34, %v4004_v51  ;;  %v4035_v50 = vand.u32 2147483647, %v12528_v36 }
 0x750   : > { %8815 = vrcp.f32 %v12535_v46  ;;  %v2761_v11 = vmul.f32 1.442695, %v2567_v31  ;;  %v5118_v30 = vmul.f32 %v12357_v8, %v4009_v47  ;;  %vm4031_vm13 = vweird.f32 %v12528_v36 }
 0x751   : > { %v4014_v14 = vmul.f32 %v8810_v24, %v4013_v21  ;;  %v12543_v18 = vpop.eup %8811  ;;  %2389 = vmax.xlane.f32.xlu0 %v12532_v57  ;;  %v4023_v21 = vor.u32 1.1754944e-38, %v4022_v49  ;;  %vm12585_vm15 = vcmp.eq.f32.partialorder %v4035_v50, 8.507059e+37  ;;  %vm4046_vm1 = vweird.f32 %v12535_v46 }
 0x752   : > { %8817 = vpow2.f32 %v2761_v11  ;;  %3015 = vadd.xlane.f32.xlu2 %v12543_v18  ;;  %v12548_v3 = vadd.f32 %v12170_v45, %v5118_v30  ;;  %5526 = vmatmul.f32.gmra.mxu1 %v5118_v30  ;;  %v16782_v11 = vld [vmem:[#allocation41_spill] sm:$0xff] }
 0x753   : > { %v4015_v8 = vadd.f32 %v8810_v24, %v4014_v14  ;;  %v12562_v47 = vadd.f32 %v16782_v11, %v1357_v27  ;;  %v4037_v27 = vand.u32 2147483648, %v12528_v36 }
 0x755   : > { %v8814_v53 = vpop.eup %8813  ;;  %v12557_v31 = vpop.xlane.xlu0 %3007  ;;  %v4019_v32 = vsel %vm4018_vm10, %v8810_v24, %v4015_v8  ;;  %v12568_v24 = vadd.f32 %v16783_v48, %v1358_v12  ;;  %v4052_v12 = vand.u32 2147483648, %v12535_v46 }
 0x756   : > { %v8816_v45 = vpop.eup %8815  ;;  %v4027_v34 = vmul.f32 %v8814_v53, %v12528_v36  ;;  %v2380_v51 = vpop.xlane.xlu2 %2379  ;;  %8819 = vrcp.f32 %v12557_v31  ;;  %v4024_v4 = vsel %vm4021_vm11, %v4023_v21, %v4019_v32  ;;  %vm4032_vm12 = vweird.f32 %v8814_v53 }
 0x757   : > { %v4042_v49 = vmul.f32 %v8816_v45, %v12535_v46  ;;  %v2568_v30 = vsub.f32 %v12446_v25, %v2380_v51  ;;  %v2382_v14 = vpop.xlane.xlu1 %2381  ;;  %v5119_v58 = vmul.f32 %v12384_v42, %v4024_v4  ;;  %v4050_v42 = vand.u32 2147483647, %v12535_v46  ;;  %vm4033_vm2 = vmor %vm4031_vm13, %vm4032_vm12 }
 0x758   : > { %v12570_v60 = vpop.eup %8817  ;;  %v4028_v8 = vsub.f32 1.0, %v4027_v34  ;;  %v2569_v43 = vsub.f32 %v12453_v37, %v2382_v14  ;;  %v12581_v34 = vpop.f32.mrf.mxu1  ;;  %vm4047_vm14 = vweird.f32 %v8816_v45  ;;  %v4053_v50 = vor.u32 1.1754944e-38, %v4052_v12 }
 0x759   : > { %v4043_v21 = vsub.f32 1.0, %v4042_v49  ;;  %v2763_v32 = vmul.f32 1.442695, %v2568_v30  ;;  %v12576_v11 = vadd.f32 %v12202_v59, %v5119_v58  ;;  %3017 = vadd.xlane.f32.xlu1 %v12570_v60  ;;  %16784 = vst [vmem:[#allocation72_spill] sm:$0xff] %v12581_v34  ;;  %v4038_v30 = vor.u32 1.1754944e-38, %v4037_v27  ;;  %vm4048_vm4 = vmor %vm4046_vm1, %vm4047_vm14 }
 0x75a   : > { %v2765_v48 = vmul.f32 1.442695, %v2569_v43  ;;  %v4029_v25 = vmul.f32 %v8814_v53, %v4028_v8  ;;  %2391 = vmax.xlane.f32.xlu2 %v12562_v47  ;;  %5529 = vmatmul.f32.gmra.mxu1 %v5119_v58  ;;  %vm4051_vm3 = vcmp.eq.f32.partialorder %v4050_v42, 8.507059e+37  ;;  %vm4061_vm6 = vweird.f32 %v12557_v31 }
 0x75b   : > { %8821 = vpow2.f32 %v2763_v32  ;;  %v4044_v37 = vmul.f32 %v8816_v45, %v4043_v21  ;;  %v4067_v21 = vand.u32 2147483648, %v12557_v31 }
 0x75c   : > { %v8820_v59 = vpop.eup %8819  ;;  %8823 = vpow2.f32 %v2765_v48  ;;  %v4030_v51 = vadd.f32 %v8814_v53, %v4029_v25 }
 0x75d   : > { %v4057_v43 = vmul.f32 %v8820_v59, %v12557_v31  ;;  %v2384_v49 = vpop.xlane.xlu0 %2383  ;;  %v4045_v58 = vadd.f32 %v8816_v45, %v4044_v37  ;;  %vm4062_vm5 = vweird.f32 %v8820_v59 }
 0x75e   : > { %v12592_v36 = vpop.xlane.xlu2 %3009  ;;  %v2570_v14 = vsub.f32 %v12473_v2, %v2384_v49  ;;  %v4034_v8 = vsel %vm4033_vm2, %v8814_v53, %v4030_v51  ;;  %v4065_v51 = vand.u32 2147483647, %v12557_v31  ;;  %vm4063_vm7 = vmor %vm4061_vm6, %vm4062_vm5  ;;  %v4068_v49 = vor.u32 1.1754944e-38, %v4067_v21  ;;  %v16788_v21 = vld [vmem:[#allocation43_spill] sm:$0xff] }
 0x75f   : > { %v4058_v32 = vsub.f32 1.0, %v4057_v43  ;;  %8825 = vrcp.f32 %v12592_v36  ;;  %v12598_v46 = vpop.xlane.xlu1 %3011  ;;  %v4039_v27 = vsel %vm12585_vm15, %v4038_v30, %v4034_v8  ;;  %v4049_v48 = vsel %vm4048_vm4, %v8816_v45, %v4045_v58 }
 0x760   : > { %8827 = vrcp.f32 %v12598_v46  ;;  %v2767_v42 = vmul.f32 1.442695, %v2570_v14  ;;  %v5120_v2 = vmul.f32 %v12418_v41, %v4039_v27  ;;  %v4054_v53 = vsel %vm4051_vm3, %v4053_v50, %v4049_v48  ;;  %v12623_v58 = vpop.f32.mrf.mxu1 }
 0x761   : > { %v12604_v25 = vpop.eup %8821  ;;  %2393 = vmax.xlane.f32.xlu1 %v12568_v24  ;;  %v5121_v12 = vmul.f32 %v12423_v13, %v4054_v53  ;;  %v4059_v37 = vmul.f32 %v8820_v59, %v4058_v32  ;;  %v1359_v13 = vld [vmem:[%s16540_s15 + $0x258] sm:$0xff]  ;;  %16787 = vst [vmem:[#allocation73_spill] sm:$0xff] %v12623_v58  ;;  %vm4066_vm8 = vcmp.eq.f32.partialorder %v4065_v51, 8.507059e+37  ;;  %vm4076_vm11 = vweird.f32 %v12592_v36 }
 0x762   : > { %v12609_v43 = vpop.eup %8823  ;;  %8829 = vpow2.f32 %v2767_v42  ;;  %3019 = vadd.xlane.f32.xlu0 %v12604_v25  ;;  %v12613_v45 = vadd.f32 %v12237_v38, %v5120_v2  ;;  %5532 = vmatmul.f32.gmra.mxu1 %v5120_v2  ;;  %v1360_v38 = vld [vmem:[%s16540_s15 + $0x260] sm:$0xff]  ;;  %v12632_v42 = vadd.f32 %v16788_v21, %v1359_v13  ;;  %v16789_v51 = vld [vmem:[#allocation44_spill] sm:$0xff]  ;;  %v4082_v13 = vand.u32 2147483648, %v12592_v36 }
 0x763   : > { %3021 = vadd.xlane.f32.xlu2 %v12609_v43  ;;  %v12617_v41 = vadd.f32 %v12242_v19, %v5121_v12  ;;  %v4060_v4 = vadd.f32 %v8820_v59, %v4059_v37  ;;  %vm4091_vm13 = vweird.f32 %v12598_v46 }
 0x765   : > { %v8826_v30 = vpop.eup %8825  ;;  %v4064_v14 = vsel %vm4063_vm7, %v8820_v59, %v4060_v4  ;;  %v12639_v4 = vadd.f32 %v16789_v51, %v1360_v38 }
 0x766   : > { %v8828_v19 = vpop.eup %8827  ;;  %v4072_v8 = vmul.f32 %v8826_v30, %v12592_v36  ;;  %v2386_v50 = vpop.xlane.xlu2 %2385  ;;  %v4069_v31 = vsel %vm4066_vm8, %v4068_v49, %v4064_v14  ;;  %v4080_v49 = vand.u32 2147483647, %v12592_v36  ;;  %vm4077_vm9 = vweird.f32 %v8826_v30 }
 0x767   : > { %v4087_v32 = vmul.f32 %v8828_v19, %v12598_v46  ;;  %v2571_v27 = vsub.f32 %v12497_v61, %v2386_v50  ;;  %v2388_v48 = vpop.xlane.xlu1 %2387  ;;  %v5122_v2 = vmul.f32 %v12449_v10, %v4069_v31  ;;  %vm4092_vm10 = vweird.f32 %v8828_v19  ;;  %vm4078_vm12 = vmor %vm4076_vm11, %vm4077_vm9 }
 0x768   : > { %v12635_v53 = vpop.eup %8829  ;;  %v4073_v37 = vsub.f32 1.0, %v4072_v8  ;;  %v2572_v59 = vsub.f32 %v12502_v1, %v2388_v48  ;;  %v4097_v1 = vand.u32 2147483648, %v12598_v46  ;;  %v4095_v50 = vand.u32 2147483647, %v12598_v46  ;;  %vm4093_vm15 = vmor %vm4091_vm13, %vm4092_vm10  ;;  %v16790_v48 = vld [vmem:[#allocation46_spill] sm:$0xff] }
 0x769   : > { %v4088_v14 = vsub.f32 1.0, %v4087_v32  ;;  %v2769_v58 = vmul.f32 1.442695, %v2571_v27  ;;  %3023 = vadd.xlane.f32.xlu1 %v12635_v53  ;;  %v12644_v61 = vadd.f32 %v12270_v63, %v5122_v2  ;;  %v1361_v63 = vld [vmem:[%s16540_s15 + $0x268] sm:$0xff]  ;;  %v4083_v32 = vor.u32 1.1754944e-38, %v4082_v13  ;;  %v16792_v13 = vld [vmem:[#allocation49_spill] sm:$0xff] }
 0x76a   : > { %v2771_v10 = vmul.f32 1.442695, %v2572_v59  ;;  %2395 = vmax.xlane.f32.xlu0 %v12632_v42  ;;  %v4074_v8 = vmul.f32 %v8826_v30, %v4073_v37  ;;  %5535 = vmatmul.f32.gmra.mxu1 %v5121_v12  ;;  %vm4081_vm14 = vcmp.eq.f32.partialorder %v4080_v49, 8.507059e+37  ;;  %v4098_v12 = vor.u32 1.1754944e-38, %v4097_v1  ;;  %v12659_v37 = vpop.f32.mrf.mxu1  ;;  %v16793_v1 = vld [vmem:[#allocation88_spill] sm:$0xff] }
 0x76b   : > { %8831 = vpow2.f32 %v2769_v58  ;;  %2397 = vmax.xlane.f32.xlu2 %v12639_v4  ;;  %v4089_v38 = vmul.f32 %v8828_v19, %v4088_v14  ;;  %v12657_v21 = vadd.f32 %v16790_v48, %v1361_v63  ;;  %16791 = vst [vmem:[#allocation38_spill] sm:$0xff] %v12659_v37  ;;  %vm4096_vm1 = vcmp.eq.f32.partialorder %v4095_v50, 8.507059e+37 }
 0x76c   : > { %8833 = vpow2.f32 %v2771_v10  ;;  %v4075_v31 = vadd.f32 %v8826_v30, %v4074_v8 }
 0x76d   : > { %v4090_v27 = vadd.f32 %v8828_v19, %v4089_v38 }
 0x76e   : > { %v4079_v58 = vsel %vm4078_vm12, %v8826_v30, %v4075_v31 }
 0x76f   : > { %v4084_v59 = vsel %vm4081_vm14, %v4083_v32, %v4079_v58  ;;  %v4094_v51 = vsel %vm4093_vm15, %v8828_v19, %v4090_v27 }
 0x770   : > { %v5123_v14 = vmul.f32 %v12476_v17, %v4084_v59  ;;  %v4099_v36 = vsel %vm4096_vm1, %v4098_v12, %v4094_v51  ;;  %v1362_v17 = vld [vmem:[%s16540_s15 + $0x270] sm:$0xff] }
 0x771   : > { %v12662_v10 = vpop.eup %8831  ;;  %2399 = vmax.xlane.f32.xlu1 %v12657_v21  ;;  %v5124_v46 = vmul.f32 %v12480_v40, %v4099_v36  ;;  %v1363_v40 = vld [vmem:[%s16540_s15 + $0x278] sm:$0xff]  ;;  %v12683_v8 = vadd.f32 %v16792_v13, %v1362_v17 }
 0x772   : > { %v12666_v30 = vpop.eup %8833  ;;  %3025 = vadd.xlane.f32.xlu0 %v12662_v10  ;;  %v12670_v49 = vadd.f32 %v12299_v44, %v5123_v14  ;;  %5538 = vmatmul.f32.gmra.mxu1 %v5122_v2  ;;  %v12686_v44 = vadd.f32 %v16793_v1, %v1363_v40  ;;  %v12688_v38 = vpop.f32.mrf.mxu1 }
 0x773   : > { %3027 = vadd.xlane.f32.xlu2 %v12666_v30  ;;  %v12674_v19 = vadd.f32 %v12302_v15, %v5124_v46  ;;  %16794 = vst [vmem:[#allocation74_spill] sm:$0xff] %v12688_v38 }
 0x77a   : > { %2401 = vmax.xlane.f32.xlu0 %v12683_v8  ;;  %5541 = vmatmul.f32.gmra.mxu1 %v5123_v14  ;;  %v12692_v15 = vpop.f32.mrf.mxu1 }
 0x77b   : > { %2403 = vmax.xlane.f32.xlu2 %v12686_v44  ;;  %16795 = vst [vmem:[#allocation39_spill] sm:$0xff] %v12692_v15 }
 0x782   : > { %5544 = vmatmul.f32.gmra.mxu1 %v5124_v46  ;;  %v12694_v63 = vpop.f32.mrf.mxu1 }
 0x783   : > { %16796 = vst [vmem:[#allocation75_spill] sm:$0xff] %v12694_v63 }
 0x7bc   : > { %v3014_v2 = vpop.xlane.xlu0 %3013 }
 0x7bd   : > { %8835 = vrcp.f32 %v3014_v2  ;;  %v4112_v59 = vand.u32 2147483648, %v3014_v2  ;;  %v4110_v14 = vand.u32 2147483647, %v3014_v2  ;;  %vm4106_vm3 = vweird.f32 %v3014_v2 }
 0x7bf   : > { %v4113_v17 = vor.u32 1.1754944e-38, %v4112_v59  ;;  %vm4111_vm5 = vcmp.eq.f32.partialorder %v4110_v14, 8.507059e+37 }
 0x7c3   : > { %v8836_v50 = vpop.eup %8835 }
 0x7c4   : > { %v4102_v31 = vmul.f32 %v8836_v50, %v3014_v2  ;;  %v2390_v32 = vpop.xlane.xlu0 %2389  ;;  %vm4107_vm2 = vweird.f32 %v8836_v50 }
 0x7c5   : > { %v3016_v27 = vpop.xlane.xlu2 %3015  ;;  %v2573_v58 = vsub.f32 %v12532_v57, %v2390_v32  ;;  %vm4108_vm4 = vmor %vm4106_vm3, %vm4107_vm2  ;;  %v12700_v32 = vpop.f32.mrf.mxu1 }
 0x7c6   : > { %v4103_v12 = vsub.f32 1.0, %v4102_v31  ;;  %8837 = vrcp.f32 %v3016_v27  ;;  %16797 = vst [vmem:[#allocation76_spill] sm:$0xff] %v12700_v32  ;;  %v4127_v14 = vand.u32 2147483648, %v3016_v27  ;;  %vm4121_vm7 = vweird.f32 %v3016_v27 }
 0x7c7   : > { %v2773_v48 = vmul.f32 1.442695, %v2573_v58 }
 0x7c8   : > { %v4104_v51 = vmul.f32 %v8836_v50, %v4103_v12 }
 0x7c9   : > { %8839 = vpow2.f32 %v2773_v48 }
 0x7ca   : > { %v4105_v36 = vadd.f32 %v8836_v50, %v4104_v51 }
 0x7cc   : > { %v12697_v46 = vpop.xlane.xlu1 %3017  ;;  %v8838_v40 = vpop.eup %8837  ;;  %v4109_v13 = vsel %vm4108_vm4, %v8836_v50, %v4105_v36 }
 0x7cd   : > { %8841 = vrcp.f32 %v12697_v46  ;;  %v4117_v57 = vmul.f32 %v8838_v40, %v3016_v27  ;;  %v2392_v1 = vpop.xlane.xlu2 %2391  ;;  %v4114_v31 = vsel %vm4111_vm5, %v4113_v17, %v4109_v13  ;;  %vm4122_vm6 = vweird.f32 %v8838_v40 }
 0x7ce   : > { %v2574_v58 = vsub.f32 %v12562_v47, %v2392_v1  ;;  %v5125_v12 = vmul.f32 %v12518_v16, %v4114_v31  ;;  %v4125_v17 = vand.u32 2147483647, %v3016_v27  ;;  %v1364_v16 = vld [vmem:[%s16540_s15 + $0x280] sm:$0xff]  ;;  %vm4123_vm8 = vmor %vm4121_vm7, %vm4122_vm6  ;;  %vm4136_vm11 = vweird.f32 %v12697_v46 }
 0x7cf   : > { %v12704_v48 = vpop.eup %8839  ;;  %v4118_v2 = vsub.f32 1.0, %v4117_v57 }
 0x7d0   : > { %v2775_v51 = vmul.f32 1.442695, %v2574_v58  ;;  %v12707_v59 = vadd.f32 %v12336_v35, %v5125_v12  ;;  %5547 = vmatmul.f32.gmra.mxu1 %v5125_v12  ;;  %3029 = vadd.xlane.f32.xlu1 %v12704_v48  ;;  %vm4126_vm9 = vcmp.eq.f32.partialorder %v4125_v17, 8.507059e+37 }
 0x7d1   : > { %v4119_v50 = vmul.f32 %v8838_v40, %v4118_v2  ;;  %v4128_v2 = vor.u32 1.1754944e-38, %v4127_v14  ;;  %v4140_v14 = vand.u32 2147483647, %v12697_v46 }
 0x7d2   : > { %8843 = vpow2.f32 %v2775_v51  ;;  %v16798_v51 = vld [vmem:[#allocation89_spill] sm:$0xff] }
 0x7d3   : > { %v8842_v36 = vpop.eup %8841  ;;  %v4120_v57 = vadd.f32 %v8838_v40, %v4119_v50  ;;  %v12721_v32 = vadd.f32 %v16798_v51, %v1364_v16  ;;  %vm4141_vm13 = vcmp.eq.f32.partialorder %v4140_v14, 8.507059e+37  ;;  %v1366_v14 = vld [vmem:[%s16540_s15 + $0x290] sm:$0xff] }
 0x7d4   : > { %v4132_v47 = vmul.f32 %v8842_v36, %v12697_v46  ;;  %v2394_v13 = vpop.xlane.xlu1 %2393  ;;  %vm4137_vm10 = vweird.f32 %v8842_v36 }
 0x7d5   : > { %v2575_v35 = vsub.f32 %v12568_v24, %v2394_v13  ;;  %v12715_v1 = vpop.xlane.xlu0 %3019  ;;  %v4124_v12 = vsel %vm4123_vm8, %v8838_v40, %v4120_v57  ;;  %v4142_v24 = vand.u32 2147483648, %v12697_v46  ;;  %vm4138_vm12 = vmor %vm4136_vm11, %vm4137_vm10 }
 0x7d6   : > { %v4133_v31 = vsub.f32 1.0, %v4132_v47  ;;  %v12717_v58 = vpop.xlane.xlu2 %3021  ;;  %8845 = vrcp.f32 %v12715_v1  ;;  %v4129_v27 = vsel %vm4126_vm9, %v4128_v2, %v4124_v12  ;;  %v12727_v47 = vpop.f32.mrf.mxu1  ;;  %v1365_v12 = vld [vmem:[%s16540_s15 + $0x288] sm:$0xff]  ;;  %vm4151_vm15 = vweird.f32 %v12715_v1 }
 0x7d7   : > { %8847 = vrcp.f32 %v12717_v58  ;;  %v2777_v63 = vmul.f32 1.442695, %v2575_v35  ;;  %16799 = vst [vmem:[#allocation77_spill] sm:$0xff] %v12727_v47  ;;  %v5126_v40 = vmul.f32 %v12543_v18, %v4129_v27  ;;  %v4143_v18 = vor.u32 1.1754944e-38, %v4142_v24  ;;  %v16800_v47 = vld [vmem:[#allocation90_spill] sm:$0xff] }
 0x7d8   : > { %v4134_v50 = vmul.f32 %v8842_v36, %v4133_v31  ;;  %v12725_v13 = vpop.eup %8843  ;;  %2405 = vmax.xlane.f32.xlu1 %v12721_v32  ;;  %v12757_v15 = vadd.f32 %v16800_v47, %v1365_v12  ;;  %v4172_v37 = vand.u32 2147483648, %v12717_v58  ;;  %v4155_v47 = vand.u32 2147483647, %v12715_v1 }
 0x7d9   : > { %8849 = vpow2.f32 %v2777_v63  ;;  %3031 = vadd.xlane.f32.xlu0 %v12725_v13  ;;  %v12735_v17 = vadd.f32 %v12361_v28, %v5126_v40  ;;  %5550 = vmatmul.f32.gmra.mxu1 %v5126_v40  ;;  %vm4166_vm1 = vweird.f32 %v12717_v58 }
 0x7da   : > { %v4135_v16 = vadd.f32 %v8842_v36, %v4134_v50  ;;  %vm4156_vm4 = vcmp.eq.f32.partialorder %v4155_v47, 8.507059e+37 }
 0x7dc   : > { %v12737_v57 = vpop.eup %8845  ;;  %v12739_v35 = vpop.xlane.xlu1 %3023  ;;  %v4139_v63 = vsel %vm4138_vm12, %v8842_v36, %v4135_v16 }
 0x7dd   : > { %v12741_v31 = vpop.eup %8847  ;;  %v4147_v46 = vmul.f32 %v12737_v57, %v12715_v1  ;;  %8851 = vrcp.f32 %v12739_v35  ;;  %v2396_v28 = vpop.xlane.xlu0 %2395  ;;  %v4144_v27 = vsel %vm4141_vm13, %v4143_v18, %v4139_v63  ;;  %vm4152_vm14 = vweird.f32 %v12737_v57 }
 0x7de   : > { %v4162_v2 = vmul.f32 %v12741_v31, %v12717_v58  ;;  %v2398_v51 = vpop.xlane.xlu2 %2397  ;;  %v2576_v36 = vsub.f32 %v12632_v42, %v2396_v28  ;;  %v5127_v16 = vmul.f32 %v12570_v60, %v4144_v27  ;;  %v4157_v18 = vand.u32 2147483648, %v12715_v1  ;;  %vm12784_vm2 = vmor %vm4151_vm15, %vm4152_vm14 }
 0x7df   : > { %v12752_v50 = vpop.eup %8849  ;;  %v4148_v24 = vsub.f32 1.0, %v4147_v46  ;;  %v2577_v40 = vsub.f32 %v12639_v4, %v2398_v51  ;;  %v16801_v46 = vld [vmem:[#allocation91_spill] sm:$0xff]  ;;  %vm4167_vm3 = vweird.f32 %v12741_v31  ;;  %v4173_v27 = vor.u32 1.1754944e-38, %v4172_v37 }
 0x7e0   : > { %v4163_v38 = vsub.f32 1.0, %v4162_v2  ;;  %v2779_v34 = vmul.f32 1.442695, %v2576_v36  ;;  %3033 = vadd.xlane.f32.xlu2 %v12752_v50  ;;  %v12765_v63 = vadd.f32 %v12391_v0, %v5127_v16  ;;  %v12774_v28 = vadd.f32 %v16801_v46, %v1366_v14  ;;  %v12776_v2 = vpop.f32.mrf.mxu1  ;;  %vm12804_vm5 = vmor %vm4166_vm1, %vm4167_vm3 }
 0x7e1   : > { %v2781_v42 = vmul.f32 1.442695, %v2577_v40  ;;  %v4149_v4 = vmul.f32 %v12737_v57, %v4148_v24  ;;  %2407 = vmax.xlane.f32.xlu0 %v12757_v15  ;;  %16802 = vst [vmem:[#allocation78_spill] sm:$0xff] %v12776_v2  ;;  %5553 = vmatmul.f32.gmra.mxu1 %v5127_v16  ;;  %v4170_v16 = vand.u32 2147483647, %v12717_v58  ;;  %vm4181_vm8 = vweird.f32 %v12739_v35 }
 0x7e2   : > { %v4164_v60 = vmul.f32 %v12741_v31, %v4163_v38  ;;  %8853 = vpow2.f32 %v2779_v34 }
 0x7e3   : > { %v8852_v12 = vpop.eup %8851  ;;  %8855 = vpow2.f32 %v2781_v42  ;;  %v4150_v0 = vadd.f32 %v12737_v57, %v4149_v4  ;;  %v4158_v4 = vor.u32 1.1754944e-38, %v4157_v18  ;;  %vm4171_vm7 = vcmp.eq.f32.partialorder %v4170_v16, 8.507059e+37 }
 0x7e4   : > { %v4177_v34 = vmul.f32 %v8852_v12, %v12739_v35  ;;  %v2400_v38 = vpop.xlane.xlu1 %2399  ;;  %v4165_v36 = vadd.f32 %v12741_v31, %v4164_v60  ;;  %v4187_v60 = vand.u32 2147483648, %v12739_v35  ;;  %vm4182_vm6 = vweird.f32 %v8852_v12 }
 0x7e5   : > { %v2578_v24 = vsub.f32 %v12657_v21, %v2400_v38  ;;  %v12791_v40 = vpop.xlane.xlu0 %3025  ;;  %v4154_v1 = vsel %vm12784_vm2, %v12737_v57, %v4150_v0  ;;  %v4185_v57 = vand.u32 2147483647, %v12739_v35  ;;  %vm4183_vm9 = vmor %vm4181_vm8, %vm4182_vm6  ;;  %v1368_v35 = vld [vmem:[%s16540_s15 + $0x2a0] sm:$0xff] }
 0x7e6   : > { %v4178_v14 = vsub.f32 1.0, %v4177_v34  ;;  %v12797_v42 = vpop.xlane.xlu2 %3027  ;;  %8857 = vrcp.f32 %v12791_v40  ;;  %v4159_v47 = vsel %vm4156_vm4, %v4158_v4, %v4154_v1  ;;  %v4169_v18 = vsel %vm12804_vm5, %v12741_v31, %v4165_v36 }
 0x7e7   : > { %8859 = vrcp.f32 %v12797_v42  ;;  %v2783_v21 = vmul.f32 1.442695, %v2578_v24  ;;  %v5128_v58 = vmul.f32 %v12604_v25, %v4159_v47  ;;  %v4174_v38 = vsel %vm4171_vm7, %v4173_v27, %v4169_v18  ;;  %v1367_v24 = vld [vmem:[%s16540_s15 + $0x298] sm:$0xff] }
 0x7e8   : > { %v12809_v46 = vpop.eup %8853  ;;  %v4179_v0 = vmul.f32 %v8852_v12, %v4178_v14  ;;  %2409 = vmax.xlane.f32.xlu2 %v12774_v28  ;;  %v4188_v31 = vor.u32 1.1754944e-38, %v4187_v60  ;;  %v5129_v25 = vmul.f32 %v12609_v43, %v4174_v38  ;;  %vm4186_vm10 = vcmp.eq.f32.partialorder %v4185_v57, 8.507059e+37  ;;  %v12832_v14 = vpop.f32.mrf.mxu1  ;;  %v16808_v43 = vld [vmem:[#allocation92_spill] sm:$0xff] }
 0x7e9   : > { %v12815_v34 = vpop.eup %8855  ;;  %8861 = vpow2.f32 %v2783_v21  ;;  %3035 = vadd.xlane.f32.xlu1 %v12809_v46  ;;  %v12825_v36 = vadd.f32 %v12427_v56, %v5128_v58  ;;  %5556 = vmatmul.f32.gmra.mxu1 %v5128_v58  ;;  %16807 = vst [vmem:[#allocation79_spill] sm:$0xff] %v12832_v14  ;;  %v12839_v37 = vadd.f32 %v16808_v43, %v1367_v24  ;;  %v16809_v58 = vld [vmem:[#allocation94_spill] sm:$0xff]  ;;  %v4217_v24 = vand.u32 2147483648, %v12797_v42 }
 0x7ea   : > { %3037 = vadd.xlane.f32.xlu0 %v12815_v34  ;;  %v4180_v51 = vadd.f32 %v8852_v12, %v4179_v0  ;;  %v12836_v56 = vadd.f32 %v12431_v39, %v5129_v25  ;;  %v12847_v38 = vadd.f32 %v16809_v58, %v1368_v35  ;;  %v4202_v39 = vand.u32 2147483648, %v12791_v40 }
 0x7eb   : > { %v4200_v35 = vand.u32 2147483647, %v12791_v40  ;;  %vm4196_vm13 = vweird.f32 %v12791_v40  ;;  %vm4211_vm14 = vweird.f32 %v12797_v42 }
 0x7ec   : > { %v8858_v1 = vpop.eup %8857  ;;  %v4184_v27 = vsel %vm4183_vm9, %v8852_v12, %v4180_v51 }
 0x7ed   : > { %v8860_v16 = vpop.eup %8859  ;;  %v4192_v4 = vmul.f32 %v8858_v1, %v12791_v40  ;;  %v2402_v60 = vpop.xlane.xlu0 %2401  ;;  %v4189_v21 = vsel %vm4186_vm10, %v4188_v31, %v4184_v27  ;;  %vm4197_vm11 = vweird.f32 %v8858_v1  ;;  %vm4201_vm1 = vcmp.eq.f32.partialorder %v4200_v35, 8.507059e+37  ;;  %v16813_v35 = vld [vmem:[#allocation102_spill] sm:$0xff] }
 0x7ee   : > { %v4207_v0 = vmul.f32 %v8860_v16, %v12797_v42  ;;  %v2404_v47 = vpop.xlane.xlu2 %2403  ;;  %v2579_v18 = vsub.f32 %v12683_v8, %v2402_v60  ;;  %v5130_v12 = vmul.f32 %v12635_v53, %v4189_v21  ;;  %vm4212_vm12 = vweird.f32 %v8860_v16  ;;  %v1369_v21 = vld [vmem:[%s16540_s15 + $0x2a8] sm:$0xff]  ;;  %vm4198_vm15 = vmor %vm4196_vm13, %vm4197_vm11 }
 0x7ef   : > { %v12844_v57 = vpop.eup %8861  ;;  %v4193_v51 = vsub.f32 1.0, %v4192_v4  ;;  %v2580_v31 = vsub.f32 %v12686_v44, %v2404_v47  ;;  %v4215_v44 = vand.u32 2147483647, %v12797_v42  ;;  %vm4213_vm2 = vmor %vm4211_vm14, %vm4212_vm12 }
 0x7f0   : > { %v4208_v27 = vsub.f32 1.0, %v4207_v0  ;;  %v2785_v43 = vmul.f32 1.442695, %v2579_v18  ;;  %3039 = vadd.xlane.f32.xlu2 %v12844_v57  ;;  %v12854_v8 = vadd.f32 %v12458_v29, %v5130_v12  ;;  %v4203_v0 = vor.u32 1.1754944e-38, %v4202_v39  ;;  %v12868_v14 = vpop.f32.mrf.mxu1 }
 0x7f1   : > { %v4194_v53 = vmul.f32 %v8858_v1, %v4193_v51  ;;  %v2787_v60 = vmul.f32 1.442695, %v2580_v31  ;;  %2411 = vmax.xlane.f32.xlu1 %v12839_v37  ;;  %5559 = vmatmul.f32.gmra.mxu1 %v5129_v25  ;;  %v4218_v18 = vor.u32 1.1754944e-38, %v4217_v24  ;;  %v16810_v51 = vld [vmem:[#allocation97_spill] sm:$0xff]  ;;  %vm4216_vm3 = vcmp.eq.f32.partialorder %v4215_v44, 8.507059e+37  ;;  %16811 = vst [vmem:[#allocation80_spill] sm:$0xff] %v12868_v14 }
 0x7f2   : > { %v4209_v4 = vmul.f32 %v8860_v16, %v4208_v27  ;;  %8863 = vpow2.f32 %v2785_v43  ;;  %2413 = vmax.xlane.f32.xlu0 %v12847_v38  ;;  %v12866_v31 = vadd.f32 %v16810_v51, %v1369_v21  ;;  %v16812_v24 = vld [vmem:[#allocation99_spill] sm:$0xff] }
 0x7f3   : > { %8865 = vpow2.f32 %v2787_v60  ;;  %v4195_v29 = vadd.f32 %v8858_v1, %v4194_v53 }
 0x7f4   : > { %v4210_v47 = vadd.f32 %v8860_v16, %v4209_v4 }
 0x7f5   : > { %v4199_v58 = vsel %vm4198_vm15, %v8858_v1, %v4195_v29 }
 0x7f6   : > { %v4204_v27 = vsel %vm4201_vm1, %v4203_v0, %v4199_v58  ;;  %v4214_v43 = vsel %vm4213_vm2, %v8860_v16, %v4210_v47 }
 0x7f7   : > { %v5131_v40 = vmul.f32 %v12662_v10, %v4204_v27  ;;  %v4219_v25 = vsel %vm4216_vm3, %v4218_v18, %v4214_v43  ;;  %v1370_v10 = vld [vmem:[%s16540_s15 + $0x2b0] sm:$0xff] }
 0x7f8   : > { %v12871_v53 = vpop.eup %8863  ;;  %2415 = vmax.xlane.f32.xlu2 %v12866_v31  ;;  %v5132_v42 = vmul.f32 %v12666_v30, %v4219_v25  ;;  %v1371_v30 = vld [vmem:[%s16540_s15 + $0x2b8] sm:$0xff]  ;;  %v12892_v60 = vadd.f32 %v16812_v24, %v1370_v10  ;;  %v12897_v4 = vpop.f32.mrf.mxu1 }
 0x7f9   : > { %v12875_v1 = vpop.eup %8865  ;;  %3041 = vadd.xlane.f32.xlu1 %v12871_v53  ;;  %v12879_v39 = vadd.f32 %v12484_v54, %v5131_v40  ;;  %5562 = vmatmul.f32.gmra.mxu1 %v5130_v12  ;;  %v12895_v54 = vadd.f32 %v16813_v35, %v1371_v30  ;;  %16814 = vst [vmem:[#allocation81_spill] sm:$0xff] %v12897_v4 }
 0x7fa   : > { %3043 = vadd.xlane.f32.xlu0 %v12875_v1  ;;  %v12883_v16 = vadd.f32 %v12488_v52, %v5132_v42 }
 0x800   : > { %v12901_v52 = vpop.f32.mrf.mxu1 }
 0x801   : > { %2417 = vmax.xlane.f32.xlu1 %v12892_v60  ;;  %5565 = vmatmul.f32.gmra.mxu1 %v5131_v40  ;;  %16815 = vst [vmem:[#allocation82_spill] sm:$0xff] %v12901_v52 }
 0x802   : > { %2419 = vmax.xlane.f32.xlu0 %v12895_v54 }
 0x808   : > { %v12903_v0 = vpop.f32.mrf.mxu1 }
 0x809   : > { %5568 = vmatmul.f32.gmra.mxu1 %v5132_v42  ;;  %16816 = vst [vmem:[#allocation83_spill] sm:$0xff] %v12903_v0 }
 0x843   : > { %v3030_v12 = vpop.xlane.xlu1 %3029 }
 0x844   : > { %8867 = vrcp.f32 %v3030_v12  ;;  %v4232_v51 = vand.u32 2147483648, %v3030_v12  ;;  %v4230_v40 = vand.u32 2147483647, %v3030_v12  ;;  %vm4226_vm5 = vweird.f32 %v3030_v12 }
 0x846   : > { %v4233_v42 = vor.u32 1.1754944e-38, %v4232_v51  ;;  %vm4231_vm7 = vcmp.eq.f32.partialorder %v4230_v40, 8.507059e+37 }
 0x84a   : > { %v8868_v44 = vpop.eup %8867 }
 0x84b   : > { %v4222_v21 = vmul.f32 %v8868_v44, %v3030_v12  ;;  %v2406_v29 = vpop.xlane.xlu1 %2405  ;;  %vm4227_vm4 = vweird.f32 %v8868_v44  ;;  %v12913_v12 = vpop.f32.mrf.mxu1 }
 0x84c   : > { %v2581_v47 = vsub.f32 %v12721_v32, %v2406_v29  ;;  %v3032_v18 = vpop.xlane.xlu0 %3031  ;;  %vm4228_vm6 = vmor %vm4226_vm5, %vm4227_vm4 }
 0x84d   : > { %v4223_v58 = vsub.f32 1.0, %v4222_v21  ;;  %8869 = vrcp.f32 %v3032_v18  ;;  %vm4241_vm9 = vweird.f32 %v3032_v18 }
 0x84e   : > { %v2789_v27 = vmul.f32 1.442695, %v2581_v47 }
 0x84f   : > { %v4224_v43 = vmul.f32 %v8868_v44, %v4223_v58 }
 0x850   : > { %8871 = vpow2.f32 %v2789_v27 }
 0x851   : > { %v4225_v25 = vadd.f32 %v8868_v44, %v4224_v43 }
 0x853   : > { %v12906_v10 = vpop.xlane.xlu2 %3033  ;;  %v8870_v30 = vpop.eup %8869  ;;  %v4229_v24 = vsel %vm4228_vm6, %v8868_v44, %v4225_v25  ;;  %v4247_v25 = vand.u32 2147483648, %v3032_v18 }
 0x854   : > { %8873 = vrcp.f32 %v12906_v10  ;;  %v4237_v32 = vmul.f32 %v8870_v30, %v3032_v18  ;;  %v2408_v35 = vpop.xlane.xlu0 %2407  ;;  %v4234_v21 = vsel %vm4231_vm7, %v4233_v42, %v4229_v24  ;;  %vm4242_vm8 = vweird.f32 %v8870_v30 }
 0x855   : > { %v2582_v29 = vsub.f32 %v12757_v15, %v2408_v35  ;;  %v5133_v47 = vmul.f32 %v12704_v48, %v4234_v21  ;;  %v1372_v15 = vld [vmem:[%s16540_s15 + $0x2c0] sm:$0xff]  ;;  %v4245_v48 = vand.u32 2147483647, %v3032_v18  ;;  %vm4243_vm10 = vmor %vm4241_vm9, %vm4242_vm8  ;;  %v4260_v18 = vand.u32 2147483647, %v12906_v10 }
 0x856   : > { %v12911_v58 = vpop.eup %8871  ;;  %v4238_v51 = vsub.f32 1.0, %v4237_v32  ;;  %vm4256_vm13 = vweird.f32 %v12906_v10 }
 0x857   : > { %v2791_v27 = vmul.f32 1.442695, %v2582_v29  ;;  %3045 = vadd.xlane.f32.xlu2 %v12911_v58  ;;  %v12917_v43 = vadd.f32 %v12522_v5, %v5133_v47  ;;  %5571 = vmatmul.f32.gmra.mxu1 %v5133_v47  ;;  %v12927_v5 = vadd.f32 %v11725_v62, %v1372_v15  ;;  %vm4246_vm11 = vcmp.eq.f32.partialorder %v4245_v48, 8.507059e+37  ;;  %v12938_v15 = vpop.f32.mrf.mxu1 }
 0x858   : > { %v4239_v44 = vmul.f32 %v8870_v30, %v4238_v51  ;;  %v4248_v51 = vor.u32 1.1754944e-38, %v4247_v25  ;;  %vm4261_vm15 = vcmp.eq.f32.partialorder %v4260_v18, 8.507059e+37  ;;  %v1374_v18 = vld [vmem:[%s16540_s15 + $0x2d0] sm:$0xff] }
 0x859   : > { %8875 = vpow2.f32 %v2791_v27 }
 0x85a   : > { %v8874_v40 = vpop.eup %8873  ;;  %v4240_v32 = vadd.f32 %v8870_v30, %v4239_v44 }
 0x85b   : > { %v4252_v42 = vmul.f32 %v8874_v40, %v12906_v10  ;;  %v2410_v24 = vpop.xlane.xlu2 %2409  ;;  %vm4257_vm12 = vweird.f32 %v8874_v40 }
 0x85c   : > { %v2583_v35 = vsub.f32 %v12774_v28, %v2410_v24  ;;  %v12924_v21 = vpop.xlane.xlu1 %3035  ;;  %v4262_v28 = vand.u32 2147483648, %v12906_v10  ;;  %v4244_v24 = vsel %vm4243_vm10, %v8870_v30, %v4240_v32  ;;  %vm12943_vm14 = vmor %vm4256_vm13, %vm4257_vm12  ;;  %v1373_v32 = vld [vmem:[%s16540_s15 + $0x2c8] sm:$0xff] }
 0x85d   : > { %v4253_v29 = vsub.f32 1.0, %v4252_v42  ;;  %8877 = vrcp.f32 %v12924_v21  ;;  %v12930_v47 = vpop.xlane.xlu0 %3037  ;;  %v4249_v62 = vsel %vm4246_vm11, %v4248_v51, %v4244_v24  ;;  %v4277_v14 = vand.u32 2147483648, %v12924_v21 }
 0x85e   : > { %v2793_v27 = vmul.f32 1.442695, %v2583_v35  ;;  %8879 = vrcp.f32 %v12930_v47  ;;  %v5134_v25 = vmul.f32 %v12725_v13, %v4249_v62  ;;  %v4263_v35 = vor.u32 1.1754944e-38, %v4262_v28 }
 0x85f   : > { %v4254_v44 = vmul.f32 %v8874_v40, %v4253_v29  ;;  %v12934_v52 = vpop.eup %8875  ;;  %2421 = vmax.xlane.f32.xlu2 %v12927_v5  ;;  %vm4271_vm2 = vweird.f32 %v12924_v21  ;;  %vm4286_vm3 = vweird.f32 %v12930_v47 }
 0x860   : > { %8881 = vpow2.f32 %v2793_v27  ;;  %3047 = vadd.xlane.f32.xlu1 %v12934_v52  ;;  %v12953_v29 = vadd.f32 %v12548_v3, %v5134_v25  ;;  %5574 = vmatmul.f32.gmra.mxu1 %v5134_v25 }
 0x861   : > { %v4255_v48 = vadd.f32 %v8874_v40, %v4254_v44 }
 0x863   : > { %v12947_v42 = vpop.eup %8877  ;;  %v12955_v10 = vpop.xlane.xlu2 %3039  ;;  %v4259_v13 = vsel %vm12943_vm14, %v8874_v40, %v4255_v48  ;;  %v12970_v40 = vadd.f32 %v11770_v22, %v1373_v32 }
 0x864   : > { %v12959_v51 = vpop.eup %8879  ;;  %v4267_v27 = vmul.f32 %v12947_v42, %v12924_v21  ;;  %8883 = vrcp.f32 %v12955_v10  ;;  %v2412_v44 = vpop.xlane.xlu1 %2411  ;;  %v4264_v62 = vsel %vm4261_vm15, %v4263_v35, %v4259_v13  ;;  %vm4272_vm1 = vweird.f32 %v12947_v42 }
 0x865   : > { %v4282_v28 = vmul.f32 %v12959_v51, %v12930_v47  ;;  %v2584_v3 = vsub.f32 %v12839_v37, %v2412_v44  ;;  %v2414_v24 = vpop.xlane.xlu0 %2413  ;;  %v5135_v4 = vmul.f32 %v12752_v50, %v4264_v62  ;;  %v4292_v37 = vand.u32 2147483648, %v12930_v47  ;;  %vm13000_vm4 = vmor %vm4271_vm2, %vm4272_vm1 }
 0x866   : > { %v12967_v25 = vpop.eup %8881  ;;  %v4268_v48 = vsub.f32 1.0, %v4267_v27  ;;  %v2585_v30 = vsub.f32 %v12847_v38, %v2414_v24  ;;  %v4275_v38 = vand.u32 2147483647, %v12924_v21  ;;  %v4290_v27 = vand.u32 2147483647, %v12930_v47 }
 0x867   : > { %v4283_v2 = vsub.f32 1.0, %v4282_v28  ;;  %v2795_v35 = vmul.f32 1.442695, %v2584_v3  ;;  %3049 = vadd.xlane.f32.xlu0 %v12967_v25  ;;  %v12982_v13 = vadd.f32 %v12576_v11, %v5135_v4  ;;  %v12990_v28 = vadd.f32 %v11803_v6, %v1374_v18  ;;  %v12994_v3 = vpop.f32.mrf.mxu1 }
 0x868   : > { %v4269_v22 = vmul.f32 %v12947_v42, %v4268_v48  ;;  %v2797_v32 = vmul.f32 1.442695, %v2585_v30  ;;  %2423 = vmax.xlane.f32.xlu1 %v12970_v40  ;;  %5577 = vmatmul.f32.gmra.mxu1 %v5135_v4  ;;  %vm4287_vm5 = vweird.f32 %v12959_v51  ;;  %v4278_v21 = vor.u32 1.1754944e-38, %v4277_v14 }
 0x869   : > { %v4284_v50 = vmul.f32 %v12959_v51, %v4283_v2  ;;  %8885 = vpow2.f32 %v2795_v35  ;;  %v4293_v48 = vor.u32 1.1754944e-38, %v4292_v37  ;;  %vm4276_vm6 = vcmp.eq.f32.partialorder %v4275_v38, 8.507059e+37  ;;  %vm4288_vm8 = vmor %vm4286_vm3, %vm4287_vm5 }
 0x86a   : > { %v8884_v44 = vpop.eup %8883  ;;  %8887 = vpow2.f32 %v2797_v32  ;;  %v4270_v11 = vadd.f32 %v12947_v42, %v4269_v22  ;;  %vm13015_vm7 = vcmp.eq.f32.partialorder %v4290_v27, 8.507059e+37  ;;  %v4307_v14 = vand.u32 2147483648, %v12955_v10 }
 0x86b   : > { %v4297_v2 = vmul.f32 %v8884_v44, %v12955_v10  ;;  %v2416_v24 = vpop.xlane.xlu2 %2415  ;;  %v4285_v6 = vadd.f32 %v12959_v51, %v4284_v50  ;;  %vm4302_vm9 = vweird.f32 %v8884_v44  ;;  %vm4301_vm10 = vweird.f32 %v12955_v10 }
 0x86c   : > { %v2586_v30 = vsub.f32 %v12866_v31, %v2416_v24  ;;  %v13007_v18 = vpop.xlane.xlu1 %3041  ;;  %v4274_v4 = vsel %vm13000_vm4, %v12947_v42, %v4270_v11  ;;  %v4305_v31 = vand.u32 2147483647, %v12955_v10  ;;  %vm4303_vm11 = vmor %vm4301_vm10, %vm4302_vm9 }
 0x86d   : > { %v4298_v35 = vsub.f32 1.0, %v4297_v2  ;;  %8889 = vrcp.f32 %v13007_v18  ;;  %v13013_v22 = vpop.xlane.xlu0 %3043  ;;  %v4279_v38 = vsel %vm4276_vm6, %v4278_v21, %v4274_v4  ;;  %v4289_v27 = vsel %vm4288_vm8, %v12959_v51, %v4285_v6  ;;  %v1375_v51 = vld [vmem:[%s16540_s15 + $0x2d8] sm:$0xff] }
 0x86e   : > { %v2799_v37 = vmul.f32 1.442695, %v2586_v30  ;;  %8891 = vrcp.f32 %v13013_v22  ;;  %v5136_v2 = vmul.f32 %v12809_v46, %v4279_v38  ;;  %v4294_v47 = vsel %vm13015_vm7, %v4293_v48, %v4289_v27  ;;  %v1376_v48 = vld [vmem:[%s16540_s15 + $0x2e0] sm:$0xff] }
 0x86f   : > { %v13024_v42 = vpop.eup %8885  ;;  %v4299_v50 = vmul.f32 %v8884_v44, %v4298_v35  ;;  %2425 = vmax.xlane.f32.xlu0 %v12990_v28  ;;  %v5137_v24 = vmul.f32 %v12815_v34, %v4294_v47  ;;  %v4308_v6 = vor.u32 1.1754944e-38, %v4307_v14  ;;  %vm4306_vm12 = vcmp.eq.f32.partialorder %v4305_v31, 8.507059e+37  ;;  %v13053_v14 = vpop.f32.mrf.mxu1 }
 0x870   : > { %v13028_v11 = vpop.eup %8887  ;;  %8893 = vpow2.f32 %v2799_v37  ;;  %3051 = vadd.xlane.f32.xlu2 %v13024_v42  ;;  %v13041_v21 = vadd.f32 %v12613_v45, %v5136_v2  ;;  %5580 = vmatmul.f32.gmra.mxu1 %v5136_v2  ;;  %v13051_v45 = vadd.f32 %v11817_v23, %v1375_v51  ;;  %16823 = vst [vmem:[#allocation84_spill] sm:$0xff] %v13053_v14  ;;  %v4322_v2 = vand.u32 2147483648, %v13007_v18 }
 0x871   : > { %3053 = vadd.xlane.f32.xlu1 %v13028_v11  ;;  %v4300_v62 = vadd.f32 %v8884_v44, %v4299_v50  ;;  %v13047_v10 = vadd.f32 %v12617_v41, %v5137_v24  ;;  %vm4316_vm15 = vweird.f32 %v13007_v18  ;;  %vm4331_vm1 = vweird.f32 %v13013_v22 }
 0x873   : > { %v8890_v46 = vpop.eup %8889  ;;  %v4304_v34 = vsel %vm4303_vm11, %v8884_v44, %v4300_v62  ;;  %v13061_v44 = vadd.f32 %v11825_v20, %v1376_v48  ;;  %v4337_v62 = vand.u32 2147483648, %v13013_v22  ;;  %v4320_v20 = vand.u32 2147483647, %v13007_v18 }
 0x874   : > { %v8892_v30 = vpop.eup %8891  ;;  %v4312_v4 = vmul.f32 %v8890_v46, %v13007_v18  ;;  %v2418_v35 = vpop.xlane.xlu1 %2417  ;;  %v4309_v32 = vsel %vm4306_vm12, %v4308_v6, %v4304_v34  ;;  %vm4317_vm13 = vweird.f32 %v8890_v46  ;;  %v1377_v34 = vld [vmem:[%s16540_s15 + $0x2e8] sm:$0xff] }
 0x875   : > { %v4327_v37 = vmul.f32 %v8892_v30, %v13013_v22  ;;  %v2587_v50 = vsub.f32 %v12892_v60, %v2418_v35  ;;  %v2420_v38 = vpop.xlane.xlu0 %2419  ;;  %v5138_v41 = vmul.f32 %v12844_v57, %v4309_v32  ;;  %vm4332_vm14 = vweird.f32 %v8892_v30  ;;  %vm4318_vm2 = vmor %vm4316_vm15, %vm4317_vm13 }
 0x876   : > { %v13058_v27 = vpop.eup %8893  ;;  %v4313_v31 = vsub.f32 1.0, %v4312_v4  ;;  %v2588_v23 = vsub.f32 %v12895_v54, %v2420_v38  ;;  %v4335_v54 = vand.u32 2147483647, %v13013_v22  ;;  %v4323_v4 = vor.u32 1.1754944e-38, %v4322_v2  ;;  %vm4333_vm4 = vmor %vm4331_vm1, %vm4332_vm14 }
 0x877   : > { %v4328_v47 = vsub.f32 1.0, %v4327_v37  ;;  %v2801_v51 = vmul.f32 1.442695, %v2587_v50  ;;  %3055 = vadd.xlane.f32.xlu0 %v13058_v27  ;;  %v13068_v60 = vadd.f32 %v12644_v61, %v5138_v41  ;;  %v4338_v32 = vor.u32 1.1754944e-38, %v4337_v62  ;;  %v13085_v2 = vpop.f32.mrf.mxu1 }
 0x878   : > { %v4314_v57 = vmul.f32 %v8890_v46, %v4313_v31  ;;  %v2803_v6 = vmul.f32 1.442695, %v2588_v23  ;;  %2427 = vmax.xlane.f32.xlu2 %v13051_v45  ;;  %5583 = vmatmul.f32.gmra.mxu1 %v5137_v24  ;;  %vm4321_vm3 = vcmp.eq.f32.partialorder %v4320_v20, 8.507059e+37  ;;  %v13080_v50 = vadd.f32 %v11835_v9, %v1377_v34  ;;  %16824 = vst [vmem:[#allocation85_spill] sm:$0xff] %v13085_v2 }
 0x879   : > { %v4329_v48 = vmul.f32 %v8892_v30, %v4328_v47  ;;  %8895 = vpow2.f32 %v2801_v51  ;;  %2429 = vmax.xlane.f32.xlu1 %v13061_v44  ;;  %vm4336_vm5 = vcmp.eq.f32.partialorder %v4335_v54, 8.507059e+37 }
 0x87a   : > { %8897 = vpow2.f32 %v2803_v6  ;;  %v4315_v61 = vadd.f32 %v8890_v46, %v4314_v57 }
 0x87b   : > { %v4330_v35 = vadd.f32 %v8892_v30, %v4329_v48 }
 0x87c   : > { %v4319_v37 = vsel %vm4318_vm2, %v8890_v46, %v4315_v61  ;;  %v1378_v46 = vld [vmem:[%s16540_s15 + $0x2f0] sm:$0xff] }
 0x87d   : > { %v4324_v38 = vsel %vm4321_vm3, %v4323_v4, %v4319_v37  ;;  %v4334_v31 = vsel %vm4333_vm4, %v8892_v30, %v4330_v35  ;;  %v13106_v30 = vadd.f32 %v11842_v7, %v1378_v46 }
 0x87e   : > { %v5139_v18 = vmul.f32 %v12871_v53, %v4324_v38  ;;  %v4339_v23 = vsel %vm4336_vm5, %v4338_v32, %v4334_v31 }
 0x87f   : > { %v13083_v47 = vpop.eup %8895  ;;  %2431 = vmax.xlane.f32.xlu0 %v13080_v50  ;;  %v5140_v22 = vmul.f32 %v12875_v1, %v4339_v23  ;;  %v1379_v1 = vld [vmem:[%s16540_s15 + $0x2f8] sm:$0xff]  ;;  %v13112_v62 = vpop.f32.mrf.mxu1 }
 0x880   : > { %v13089_v24 = vpop.eup %8897  ;;  %3057 = vadd.xlane.f32.xlu2 %v13083_v47  ;;  %v13093_v9 = vadd.f32 %v12670_v49, %v5139_v18  ;;  %5586 = vmatmul.f32.gmra.mxu1 %v5138_v41  ;;  %v13109_v49 = vadd.f32 %v11850_v26, %v1379_v1  ;;  %16825 = vst [vmem:[#allocation40_spill] sm:$0xff] %v13112_v62 }
 0x881   : > { %3059 = vadd.xlane.f32.xlu1 %v13089_v24  ;;  %v13097_v53 = vadd.f32 %v12674_v19, %v5140_v22 }
 0x887   : > { %v13115_v19 = vpop.f32.mrf.mxu1 }
 0x888   : > { %2433 = vmax.xlane.f32.xlu2 %v13106_v30  ;;  %5589 = vmatmul.f32.gmra.mxu1 %v5139_v18  ;;  %16826 = vst [vmem:[#allocation41_spill] sm:$0xff] %v13115_v19 }
 0x889   : > { %2435 = vmax.xlane.f32.xlu1 %v13109_v49 }
 0x88f   : > { %v13117_v7 = vpop.f32.mrf.mxu1 }
 0x890   : > { %5592 = vmatmul.f32.gmra.mxu1 %v5140_v22  ;;  %16827 = vst [vmem:[#allocation87_spill] sm:$0xff] %v13117_v7 }
 0x8ca   : > { %v3046_v41 = vpop.xlane.xlu2 %3045 }
 0x8cb   : > { %8899 = vrcp.f32 %v3046_v41  ;;  %v4352_v54 = vand.u32 2147483648, %v3046_v41  ;;  %v4350_v4 = vand.u32 2147483647, %v3046_v41  ;;  %vm4346_vm7 = vweird.f32 %v3046_v41 }
 0x8cd   : > { %v4353_v32 = vor.u32 1.1754944e-38, %v4352_v54  ;;  %vm4351_vm9 = vcmp.eq.f32.partialorder %v4350_v4, 8.507059e+37 }
 0x8d1   : > { %v8900_v51 = vpop.eup %8899 }
 0x8d2   : > { %v4342_v57 = vmul.f32 %v8900_v51, %v3046_v41  ;;  %v2422_v6 = vpop.xlane.xlu2 %2421  ;;  %vm4347_vm6 = vweird.f32 %v8900_v51  ;;  %v13127_v41 = vpop.f32.mrf.mxu1 }
 0x8d3   : > { %v2589_v26 = vsub.f32 %v12927_v5, %v2422_v6  ;;  %v3048_v20 = vpop.xlane.xlu1 %3047  ;;  %vm4348_vm8 = vmor %vm4346_vm7, %vm4347_vm6  ;;  %16828 = vst [vmem:[#allocation43_spill] sm:$0xff] %v13127_v41 }
 0x8d4   : > { %v4343_v48 = vsub.f32 1.0, %v4342_v57  ;;  %8901 = vrcp.f32 %v3048_v20  ;;  %v4367_v54 = vand.u32 2147483648, %v3048_v20  ;;  %vm4361_vm11 = vweird.f32 %v3048_v20 }
 0x8d5   : > { %v2805_v34 = vmul.f32 1.442695, %v2589_v26 }
 0x8d6   : > { %v4344_v61 = vmul.f32 %v8900_v51, %v4343_v48 }
 0x8d7   : > { %8903 = vpow2.f32 %v2805_v34  ;;  %v4365_v34 = vand.u32 2147483647, %v3048_v20 }
 0x8d8   : > { %v4345_v35 = vadd.f32 %v8900_v51, %v4344_v61 }
 0x8d9   : > { %vm4366_vm13 = vcmp.eq.f32.partialorder %v4365_v34, 8.507059e+37 }
 0x8da   : > { %v13120_v37 = vpop.xlane.xlu0 %3049  ;;  %v8902_v38 = vpop.eup %8901  ;;  %v4349_v31 = vsel %vm4348_vm8, %v8900_v51, %v4345_v35 }
 0x8db   : > { %8905 = vrcp.f32 %v13120_v37  ;;  %v4357_v5 = vmul.f32 %v8902_v38, %v3048_v20  ;;  %v2424_v18 = vpop.xlane.xlu1 %2423  ;;  %v4354_v23 = vsel %vm4351_vm9, %v4353_v32, %v4349_v31  ;;  %vm4362_vm10 = vweird.f32 %v8902_v38 }
 0x8dc   : > { %v2590_v22 = vsub.f32 %v12970_v40, %v2424_v18  ;;  %v5141_v46 = vmul.f32 %v12911_v58, %v4354_v23  ;;  %v1380_v58 = vld [vmem:[%s16540_s15 + $0x300] sm:$0xff]  ;;  %v4368_v18 = vor.u32 1.1754944e-38, %v4367_v54  ;;  %vm4363_vm12 = vmor %vm4361_vm11, %vm4362_vm10  ;;  %vm4376_vm15 = vweird.f32 %v13120_v37  ;;  %v1381_v54 = vld [vmem:[%s16540_s15 + $0x308] sm:$0xff] }
 0x8dd   : > { %v13125_v1 = vpop.eup %8903  ;;  %v4358_v57 = vsub.f32 1.0, %v4357_v5  ;;  %v13144_v5 = vadd.f32 %v11858_v33, %v1380_v58  ;;  %v13152_v33 = vpop.f32.mrf.mxu1 }
 0x8de   : > { %v2807_v6 = vmul.f32 1.442695, %v2590_v22  ;;  %3061 = vadd.xlane.f32.xlu0 %v13125_v1  ;;  %v13131_v26 = vadd.f32 %v12707_v59, %v5141_v46  ;;  %5595 = vmatmul.f32.gmra.mxu1 %v5141_v46  ;;  %16829 = vst [vmem:[#allocation44_spill] sm:$0xff] %v13152_v33 }
 0x8df   : > { %v4359_v51 = vmul.f32 %v8902_v38, %v4358_v57 }
 0x8e0   : > { %8907 = vpow2.f32 %v2807_v6 }
 0x8e1   : > { %v8906_v48 = vpop.eup %8905  ;;  %v4360_v4 = vadd.f32 %v8902_v38, %v4359_v51 }
 0x8e2   : > { %v4372_v40 = vmul.f32 %v8906_v48, %v13120_v37  ;;  %v2426_v61 = vpop.xlane.xlu0 %2425  ;;  %vm4377_vm14 = vweird.f32 %v8906_v48 }
 0x8e3   : > { %v13137_v35 = vpop.xlane.xlu2 %3051  ;;  %v2591_v59 = vsub.f32 %v12990_v28, %v2426_v61  ;;  %v4364_v46 = vsel %vm4363_vm12, %v8902_v38, %v4360_v4  ;;  %v4382_v28 = vand.u32 2147483648, %v13120_v37  ;;  %v4380_v38 = vand.u32 2147483647, %v13120_v37  ;;  %vm13160_vm1 = vmor %vm4376_vm15, %vm4377_vm14 }
 0x8e4   : > { %v4373_v32 = vsub.f32 1.0, %v4372_v40  ;;  %8909 = vrcp.f32 %v13137_v35  ;;  %v13141_v31 = vpop.xlane.xlu1 %3053  ;;  %v4369_v20 = vsel %vm4366_vm13, %v4368_v18, %v4364_v46  ;;  %v13179_v18 = vadd.f32 %v11870_v55, %v1381_v54  ;;  %v1382_v55 = vld [vmem:[%s16540_s15 + $0x310] sm:$0xff] }
 0x8e5   : > { %8911 = vrcp.f32 %v13141_v31  ;;  %v2809_v22 = vmul.f32 1.442695, %v2591_v59  ;;  %v5142_v6 = vmul.f32 %v12934_v52, %v4369_v20  ;;  %v4383_v4 = vor.u32 1.1754944e-38, %v4382_v28 }
 0x8e6   : > { %v4374_v23 = vmul.f32 %v8906_v48, %v4373_v32  ;;  %v13147_v57 = vpop.eup %8907  ;;  %2437 = vmax.xlane.f32.xlu0 %v13144_v5  ;;  %vm4381_vm2 = vcmp.eq.f32.partialorder %v4380_v38, 8.507059e+37  ;;  %v4397_v46 = vand.u32 2147483648, %v13137_v35  ;;  %v4412_v54 = vand.u32 2147483648, %v13141_v31 }
 0x8e7   : > { %8913 = vpow2.f32 %v2809_v22  ;;  %3063 = vadd.xlane.f32.xlu2 %v13147_v57  ;;  %v13167_v40 = vadd.f32 %v12735_v17, %v5142_v6  ;;  %5598 = vmatmul.f32.gmra.mxu1 %v5142_v6  ;;  %vm4391_vm4 = vweird.f32 %v13137_v35  ;;  %vm4406_vm5 = vweird.f32 %v13141_v31 }
 0x8e8   : > { %v4375_v51 = vadd.f32 %v8906_v48, %v4374_v23 }
 0x8ea   : > { %v13164_v58 = vpop.eup %8909  ;;  %v13169_v61 = vpop.xlane.xlu0 %3055  ;;  %v4379_v52 = vsel %vm13160_vm1, %v8906_v48, %v4375_v51 }
 0x8eb   : > { %v13173_v37 = vpop.eup %8911  ;;  %v4387_v59 = vmul.f32 %v13164_v58, %v13137_v35  ;;  %v2428_v32 = vpop.xlane.xlu2 %2427  ;;  %8915 = vrcp.f32 %v13169_v61  ;;  %v4384_v20 = vsel %vm4381_vm2, %v4383_v4, %v4379_v52  ;;  %vm4392_vm3 = vweird.f32 %v13164_v58 }
 0x8ec   : > { %v4402_v17 = vmul.f32 %v13173_v37, %v13141_v31  ;;  %v2592_v23 = vsub.f32 %v13051_v45, %v2428_v32  ;;  %v2430_v22 = vpop.xlane.xlu1 %2429  ;;  %v5143_v45 = vmul.f32 %v12967_v25, %v4384_v20  ;;  %v4410_v32 = vand.u32 2147483647, %v13141_v31  ;;  %vm13214_vm6 = vmor %vm4391_vm4, %vm4392_vm3 }
 0x8ed   : > { %v4388_v48 = vsub.f32 1.0, %v4387_v59  ;;  %v2593_v28 = vsub.f32 %v13061_v44, %v2430_v22  ;;  %v13186_v6 = vpop.eup %8913  ;;  %v4395_v44 = vand.u32 2147483647, %v13137_v35  ;;  %vm4407_vm7 = vweird.f32 %v13173_v37 }
 0x8ee   : > { %v4403_v51 = vsub.f32 1.0, %v4402_v17  ;;  %v2811_v34 = vmul.f32 1.442695, %v2592_v23  ;;  %3065 = vadd.xlane.f32.xlu1 %v13186_v6  ;;  %v13200_v4 = vadd.f32 %v12765_v63, %v5143_v45  ;;  %v16832_v17 = vld [vmem:[#allocation110_spill] sm:$0xff]  ;;  %v4398_v35 = vor.u32 1.1754944e-38, %v4397_v46  ;;  %vm4408_vm10 = vmor %vm4406_vm5, %vm4407_vm7 }
 0x8ef   : > { %v4389_v38 = vmul.f32 %v13164_v58, %v4388_v48  ;;  %v2813_v59 = vmul.f32 1.442695, %v2593_v28  ;;  %2439 = vmax.xlane.f32.xlu2 %v13179_v18  ;;  %v13204_v23 = vadd.f32 %v16832_v17, %v1382_v55  ;;  %v13208_v48 = vpop.f32.mrf.mxu1  ;;  %5601 = vmatmul.f32.gmra.mxu1 %v5143_v45  ;;  %vm4396_vm8 = vcmp.eq.f32.partialorder %v4395_v44, 8.507059e+37 }
 0x8f0   : > { %v4404_v52 = vmul.f32 %v13173_v37, %v4403_v51  ;;  %8917 = vpow2.f32 %v2811_v34  ;;  %16833 = vst [vmem:[#allocation46_spill] sm:$0xff] %v13208_v48  ;;  %v4413_v51 = vor.u32 1.1754944e-38, %v4412_v54  ;;  %vm4411_vm9 = vcmp.eq.f32.partialorder %v4410_v32, 8.507059e+37 }
 0x8f1   : > { %v8916_v25 = vpop.eup %8915  ;;  %8919 = vpow2.f32 %v2813_v59  ;;  %v4390_v22 = vadd.f32 %v13164_v58, %v4389_v38  ;;  %vm4421_vm12 = vweird.f32 %v13169_v61 }
 0x8f2   : > { %v4417_v28 = vmul.f32 %v8916_v25, %v13169_v61  ;;  %v2432_v63 = vpop.xlane.xlu0 %2431  ;;  %v4405_v55 = vadd.f32 %v13173_v37, %v4404_v52  ;;  %v4427_v52 = vand.u32 2147483648, %v13169_v61  ;;  %vm4422_vm11 = vweird.f32 %v8916_v25 }
 0x8f3   : > { %v13220_v34 = vpop.xlane.xlu2 %3057  ;;  %v2594_v38 = vsub.f32 %v13080_v50, %v2432_v63  ;;  %v4394_v45 = vsel %vm13214_vm6, %v13164_v58, %v4390_v22  ;;  %v4425_v50 = vand.u32 2147483647, %v13169_v61  ;;  %vm4423_vm13 = vmor %vm4421_vm12, %vm4422_vm11  ;;  %v1384_v61 = vld [vmem:[%s16540_s15 + $0x320] sm:$0xff] }
 0x8f4   : > { %v4418_v59 = vsub.f32 1.0, %v4417_v28  ;;  %8921 = vrcp.f32 %v13220_v34  ;;  %v13227_v17 = vpop.xlane.xlu1 %3059  ;;  %v4399_v22 = vsel %vm4396_vm8, %v4398_v35, %v4394_v45  ;;  %v4409_v28 = vsel %vm4408_vm10, %v13173_v37, %v4405_v55  ;;  %v1383_v37 = vld [vmem:[%s16540_s15 + $0x318] sm:$0xff] }
 0x8f5   : > { %8923 = vrcp.f32 %v13227_v17  ;;  %v2815_v54 = vmul.f32 1.442695, %v2594_v38  ;;  %v5144_v44 = vmul.f32 %v13024_v42, %v4399_v22  ;;  %v4414_v31 = vsel %vm4411_vm9, %v4413_v51, %v4409_v28 }
 0x8f6   : > { %v13234_v46 = vpop.eup %8917  ;;  %v4419_v58 = vmul.f32 %v8916_v25, %v4418_v59  ;;  %2441 = vmax.xlane.f32.xlu1 %v13204_v23  ;;  %v5145_v32 = vmul.f32 %v13028_v11, %v4414_v31  ;;  %v4428_v55 = vor.u32 1.1754944e-38, %v4427_v52  ;;  %vm4426_vm14 = vcmp.eq.f32.partialorder %v4425_v50, 8.507059e+37  ;;  %v16838_v31 = vld [vmem:[#allocation57_spill] sm:$0xff] }
 0x8f7   : > { %v13237_v63 = vpop.eup %8919  ;;  %3067 = vadd.xlane.f32.xlu0 %v13234_v46  ;;  %8925 = vpow2.f32 %v2815_v54  ;;  %v13249_v35 = vadd.f32 %v12825_v36, %v5144_v44  ;;  %5604 = vmatmul.f32.gmra.mxu1 %v5144_v44  ;;  %v16836_v36 = vld [vmem:[#allocation47_spill] sm:$0xff]  ;;  %v13262_v54 = vpop.f32.mrf.mxu1  ;;  %vm4436_vm2 = vweird.f32 %v13220_v34  ;;  %vm4451_vm3 = vweird.f32 %v13227_v17 }
 0x8f8   : > { %3069 = vadd.xlane.f32.xlu2 %v13237_v63  ;;  %v4420_v20 = vadd.f32 %v8916_v25, %v4419_v58  ;;  %v13256_v51 = vadd.f32 %v12836_v56, %v5145_v32  ;;  %v13260_v58 = vadd.f32 %v16836_v36, %v1383_v37  ;;  %16837 = vst [vmem:[#allocation49_spill] sm:$0xff] %v13262_v54  ;;  %v4457_v36 = vand.u32 2147483648, %v13227_v17 }
 0x8fa   : > { %v8922_v42 = vpop.eup %8921  ;;  %v4424_v11 = vsel %vm4423_vm13, %v8916_v25, %v4420_v20  ;;  %v13268_v25 = vadd.f32 %v16838_v31, %v1384_v61  ;;  %v4442_v20 = vand.u32 2147483648, %v13220_v34 }
 0x8fb   : > { %v8924_v38 = vpop.eup %8923  ;;  %v4432_v45 = vmul.f32 %v8922_v42, %v13220_v34  ;;  %v2434_v59 = vpop.xlane.xlu2 %2433  ;;  %v4429_v52 = vsel %vm4426_vm14, %v4428_v55, %v4424_v11  ;;  %vm4437_vm15 = vweird.f32 %v8922_v42 }
 0x8fc   : > { %v4447_v22 = vmul.f32 %v8924_v38, %v13227_v17  ;;  %v2595_v28 = vsub.f32 %v13106_v30, %v2434_v59  ;;  %v2436_v44 = vpop.xlane.xlu1 %2435  ;;  %v5146_v56 = vmul.f32 %v13058_v27, %v4429_v52  ;;  %v4440_v27 = vand.u32 2147483647, %v13220_v34  ;;  %vm4438_vm4 = vmor %vm4436_vm2, %vm4437_vm15  ;;  %v16839_v34 = vld [vmem:[#allocation86_spill] sm:$0xff] }
 0x8fd   : > { %v4433_v50 = vsub.f32 1.0, %v4432_v45  ;;  %v2596_v55 = vsub.f32 %v13109_v49, %v2436_v44  ;;  %v13272_v11 = vpop.eup %8925  ;;  %vm4452_vm1 = vweird.f32 %v8924_v38  ;;  %v4455_v49 = vand.u32 2147483647, %v13227_v17  ;;  %v1385_v45 = vld [vmem:[%s16540_s15 + $0x328] sm:$0xff] }
 0x8fe   : > { %v4448_v37 = vsub.f32 1.0, %v4447_v22  ;;  %v2817_v54 = vmul.f32 1.442695, %v2595_v28  ;;  %v13276_v48 = vadd.f32 %v12854_v8, %v5146_v56  ;;  %3071 = vadd.xlane.f32.xlu1 %v13272_v11  ;;  %v4443_v52 = vor.u32 1.1754944e-38, %v4442_v20  ;;  %vm4453_vm6 = vmor %vm4451_vm3, %vm4452_vm1 }
 0x8ff   : > { %v4434_v30 = vmul.f32 %v8922_v42, %v4433_v50  ;;  %v2819_v59 = vmul.f32 1.442695, %v2596_v55  ;;  %2443 = vmax.xlane.f32.xlu0 %v13260_v58  ;;  %5607 = vmatmul.f32.gmra.mxu1 %v5145_v32  ;;  %vm4441_vm5 = vcmp.eq.f32.partialorder %v4440_v27, 8.507059e+37  ;;  %vm4456_vm7 = vcmp.eq.f32.partialorder %v4455_v49, 8.507059e+37  ;;  %v13294_v20 = vpop.f32.mrf.mxu1  ;;  %v16842_v27 = vld [vmem:[#allocation52_spill] sm:$0xff] }
 0x900   : > { %v4449_v61 = vmul.f32 %v8924_v38, %v4448_v37  ;;  %8927 = vpow2.f32 %v2817_v54  ;;  %2445 = vmax.xlane.f32.xlu2 %v13268_v25  ;;  %v4458_v54 = vor.u32 1.1754944e-38, %v4457_v36  ;;  %v13289_v50 = vadd.f32 %v16839_v34, %v1385_v45  ;;  %16840 = vst [vmem:[#allocation88_spill] sm:$0xff] %v13294_v20  ;;  %v16841_v36 = vld [vmem:[#allocation51_spill] sm:$0xff] }
 0x901   : > { %8929 = vpow2.f32 %v2819_v59  ;;  %v4435_v8 = vadd.f32 %v8922_v42, %v4434_v30 }
 0x902   : > { %v4450_v22 = vadd.f32 %v8924_v38, %v4449_v61 }
 0x903   : > { %v4439_v28 = vsel %vm4438_vm4, %v8922_v42, %v4435_v8 }
 0x904   : > { %v4444_v44 = vsel %vm4441_vm5, %v4443_v52, %v4439_v28  ;;  %v4454_v31 = vsel %vm4453_vm6, %v8924_v38, %v4450_v22  ;;  %v1386_v38 = vld [vmem:[%s16540_s15 + $0x330] sm:$0xff] }
 0x905   : > { %v5147_v55 = vmul.f32 %v13083_v47, %v4444_v44  ;;  %v4459_v37 = vsel %vm4456_vm7, %v4458_v54, %v4454_v31  ;;  %v13315_v59 = vadd.f32 %v16841_v36, %v1386_v38 }
 0x906   : > { %v13292_v30 = vpop.eup %8927  ;;  %v5148_v17 = vmul.f32 %v13089_v24, %v4459_v37  ;;  %2447 = vmax.xlane.f32.xlu1 %v13289_v50  ;;  %v1387_v24 = vld [vmem:[%s16540_s15 + $0x338] sm:$0xff] }
 0x907   : > { %v13297_v32 = vpop.eup %8929  ;;  %3073 = vadd.xlane.f32.xlu0 %v13292_v30  ;;  %v13302_v42 = vadd.f32 %v12879_v39, %v5147_v55  ;;  %5610 = vmatmul.f32.gmra.mxu1 %v5146_v56  ;;  %v13318_v39 = vadd.f32 %v16842_v27, %v1387_v24  ;;  %v13321_v61 = vpop.f32.mrf.mxu1 }
 0x908   : > { %3075 = vadd.xlane.f32.xlu2 %v13297_v32  ;;  %v13306_v47 = vadd.f32 %v12883_v16, %v5148_v17  ;;  %16843 = vst [vmem:[#allocation89_spill] sm:$0xff] %v13321_v61  ;;  %v2173_v56 = vpop.f32.mrf.mxu3 }
 0x90f   : > { %2449 = vmax.xlane.f32.xlu0 %v13315_v59  ;;  %5613 = vmatmul.f32.gmra.mxu1 %v5147_v55  ;;  %v13324_v16 = vpop.f32.mrf.mxu1 }
 0x910   : > { %2451 = vmax.xlane.f32.xlu2 %v13318_v39  ;;  %16844 = vst [vmem:[#allocation90_spill] sm:$0xff] %v13324_v16  ;;  %v13326_v8 = vpop.f32.mrf.mxu3 }
 0x917   : > { %5616 = vmatmul.f32.gmra.mxu1 %v5148_v17  ;;  %v13328_v54 = vpop.f32.mrf.mxu1 }
 0x918   : > { %16845 = vst [vmem:[#allocation91_spill] sm:$0xff] %v13328_v54  ;;  %v13331_v17 = vpop.f32.mrf.mxu3 }
 0x951   : > { %v3062_v49 = vpop.xlane.xlu0 %3061 }
 0x952   : > { %8931 = vrcp.f32 %v3062_v49  ;;  %v4472_v37 = vand.u32 2147483648, %v3062_v49  ;;  %v4470_v38 = vand.u32 2147483647, %v3062_v49  ;;  %vm4466_vm9 = vweird.f32 %v3062_v49 }
 0x954   : > { %v4473_v27 = vor.u32 1.1754944e-38, %v4472_v37  ;;  %vm4471_vm11 = vcmp.eq.f32.partialorder %v4470_v38, 8.507059e+37 }
 0x958   : > { %v8932_v45 = vpop.eup %8931 }
 0x959   : > { %v4462_v52 = vmul.f32 %v8932_v45, %v3062_v49  ;;  %v2438_v22 = vpop.xlane.xlu0 %2437  ;;  %vm4467_vm8 = vweird.f32 %v8932_v45 }
 0x95a   : > { %v3064_v28 = vpop.xlane.xlu2 %3063  ;;  %v2597_v44 = vsub.f32 %v13144_v5, %v2438_v22  ;;  %vm4468_vm10 = vmor %vm4466_vm9, %vm4467_vm8 }
 0x95b   : > { %v4463_v31 = vsub.f32 1.0, %v4462_v52  ;;  %8933 = vrcp.f32 %v3064_v28  ;;  %vm4481_vm13 = vweird.f32 %v3064_v28 }
 0x95c   : > { %v2821_v34 = vmul.f32 1.442695, %v2597_v44 }
 0x95d   : > { %v4464_v55 = vmul.f32 %v8932_v45, %v4463_v31  ;;  %v13339_v31 = vpop.f32.mrf.mxu1 }
 0x95e   : > { %8935 = vpow2.f32 %v2821_v34 }
 0x95f   : > { %v4465_v24 = vadd.f32 %v8932_v45, %v4464_v55 }
 0x961   : > { %v8934_v36 = vpop.eup %8933  ;;  %v13333_v16 = vpop.xlane.xlu1 %3065  ;;  %v4469_v61 = vsel %vm4468_vm10, %v8932_v45, %v4465_v24  ;;  %v4487_v24 = vand.u32 2147483648, %v3064_v28 }
 0x962   : > { %v4477_v20 = vmul.f32 %v8934_v36, %v3064_v28  ;;  %v2440_v5 = vpop.xlane.xlu2 %2439  ;;  %8937 = vrcp.f32 %v13333_v16  ;;  %v4474_v22 = vsel %vm4471_vm11, %v4473_v27, %v4469_v61  ;;  %v13349_v61 = vpop.f32.mrf.mxu3  ;;  %vm4482_vm12 = vweird.f32 %v8934_v36 }
 0x963   : > { %v2598_v52 = vsub.f32 %v13179_v18, %v2440_v5  ;;  %v5149_v34 = vmul.f32 %v13125_v1, %v4474_v22  ;;  %v1388_v18 = vld [vmem:[%s16540_s15 + $0x340] sm:$0xff]  ;;  %v4485_v1 = vand.u32 2147483647, %v3064_v28  ;;  %vm4483_vm14 = vmor %vm4481_vm13, %vm4482_vm12  ;;  %vm4496_vm2 = vweird.f32 %v13333_v16 }
 0x964   : > { %v13337_v44 = vpop.eup %8935  ;;  %v4478_v49 = vsub.f32 1.0, %v4477_v20 }
 0x965   : > { %v2823_v55 = vmul.f32 1.442695, %v2598_v52  ;;  %3077 = vadd.xlane.f32.xlu1 %v13337_v44  ;;  %v13344_v45 = vadd.f32 %v12917_v43, %v5149_v34  ;;  %5619 = vmatmul.f32.gmra.mxu1 %v5149_v34  ;;  %v4488_v34 = vor.u32 1.1754944e-38, %v4487_v24  ;;  %vm4486_vm15 = vcmp.eq.f32.partialorder %v4485_v1, 8.507059e+37 }
 0x966   : > { %v4479_v37 = vmul.f32 %v8934_v36, %v4478_v49  ;;  %v13358_v49 = vadd.f32 %v2173_v56, %v1388_v18  ;;  %v4502_v56 = vand.u32 2147483648, %v13333_v16 }
 0x967   : > { %8939 = vpow2.f32 %v2823_v55 }
 0x968   : > { %v8938_v38 = vpop.eup %8937  ;;  %v4480_v20 = vadd.f32 %v8934_v36, %v4479_v37 }
 0x969   : > { %v4492_v27 = vmul.f32 %v8938_v38, %v13333_v16  ;;  %v2442_v5 = vpop.xlane.xlu1 %2441  ;;  %vm4497_vm1 = vweird.f32 %v8938_v38 }
 0x96a   : > { %v13352_v52 = vpop.xlane.xlu0 %3067  ;;  %v2599_v22 = vsub.f32 %v13204_v23, %v2442_v5  ;;  %v4484_v33 = vsel %vm4483_vm14, %v8934_v36, %v4480_v20  ;;  %v13364_v23 = vpop.f32.mrf.mxu1  ;;  %v1389_v36 = vld [vmem:[%s16540_s15 + $0x348] sm:$0xff]  ;;  %vm13379_vm3 = vmor %vm4496_vm2, %vm4497_vm1  ;;  %v1390_v5 = vld [vmem:[%s16540_s15 + $0x350] sm:$0xff] }
 0x96b   : > { %v13354_v43 = vpop.xlane.xlu2 %3069  ;;  %8941 = vrcp.f32 %v13352_v52  ;;  %v4493_v55 = vsub.f32 1.0, %v4492_v27  ;;  %v4489_v28 = vsel %vm4486_vm15, %v4488_v34, %v4484_v33  ;;  %16846 = vst [vmem:[#allocation92_spill] sm:$0xff] %v13364_v23  ;;  %v4500_v33 = vand.u32 2147483647, %v13333_v16 }
 0x96c   : > { %8943 = vrcp.f32 %v13354_v43  ;;  %v2825_v37 = vmul.f32 1.442695, %v2599_v22  ;;  %v5150_v24 = vmul.f32 %v13147_v57, %v4489_v28  ;;  %v13395_v34 = vadd.f32 %v13326_v8, %v1389_v36 }
 0x96d   : > { %v13361_v41 = vpop.eup %8939  ;;  %v4494_v54 = vmul.f32 %v8938_v38, %v4493_v55  ;;  %2453 = vmax.xlane.f32.xlu1 %v13358_v49  ;;  %v4503_v55 = vor.u32 1.1754944e-38, %v4502_v56  ;;  %vm4501_vm4 = vcmp.eq.f32.partialorder %v4500_v33, 8.507059e+37  ;;  %v13407_v8 = vadd.f32 %v13331_v17, %v1390_v5 }
 0x96e   : > { %8945 = vpow2.f32 %v2825_v37  ;;  %3079 = vadd.xlane.f32.xlu0 %v13361_v41  ;;  %v13377_v1 = vadd.f32 %v12953_v29, %v5150_v24  ;;  %5622 = vmatmul.f32.gmra.mxu1 %v5150_v24  ;;  %v13400_v24 = vpop.f32.mrf.mxu3  ;;  %v4532_v56 = vand.u32 2147483648, %v13354_v43  ;;  %v4515_v33 = vand.u32 2147483647, %v13352_v52 }
 0x96f   : > { %v4495_v18 = vadd.f32 %v8938_v38, %v4494_v54  ;;  %vm4511_vm6 = vweird.f32 %v13352_v52  ;;  %vm4526_vm9 = vweird.f32 %v13354_v43 }
 0x970   : > { %vm4516_vm10 = vcmp.eq.f32.partialorder %v4515_v33, 8.507059e+37 }
 0x971   : > { %v13374_v20 = vpop.eup %8941  ;;  %v13390_v16 = vpop.xlane.xlu1 %3071  ;;  %v4499_v29 = vsel %vm13379_vm3, %v8938_v38, %v4495_v18 }
 0x972   : > { %v13383_v57 = vpop.eup %8943  ;;  %v4507_v54 = vmul.f32 %v13374_v20, %v13352_v52  ;;  %v2444_v22 = vpop.xlane.xlu0 %2443  ;;  %8947 = vrcp.f32 %v13390_v16  ;;  %v4504_v36 = vsel %vm4501_vm4, %v4503_v55, %v4499_v29  ;;  %vm4512_vm5 = vweird.f32 %v13374_v20 }
 0x973   : > { %v4522_v37 = vmul.f32 %v13383_v57, %v13354_v43  ;;  %v2446_v28 = vpop.xlane.xlu2 %2445  ;;  %v2600_v19 = vsub.f32 %v13260_v58, %v2444_v22  ;;  %v5151_v17 = vmul.f32 %v13186_v6, %v4504_v36  ;;  %v13423_v5 = vpop.f32.mrf.mxu1  ;;  %vm13430_vm7 = vmor %vm4511_vm6, %vm4512_vm5  ;;  %vm4527_vm8 = vweird.f32 %v13383_v57  ;;  %v1392_v6 = vld [vmem:[%s16540_s15 + $0x360] sm:$0xff] }
 0x974   : > { %v4508_v0 = vsub.f32 1.0, %v4507_v54  ;;  %v2601_v7 = vsub.f32 %v13268_v25, %v2446_v28  ;;  %v13404_v27 = vpop.eup %8945  ;;  %v4517_v25 = vand.u32 2147483648, %v13352_v52  ;;  %16849 = vst [vmem:[#allocation94_spill] sm:$0xff] %v13423_v5  ;;  %v4533_v52 = vor.u32 1.1754944e-38, %v4532_v56  ;;  %vm4528_vm11 = vmor %vm4526_vm9, %vm4527_vm8 }
 0x975   : > { %v4523_v38 = vsub.f32 1.0, %v4522_v37  ;;  %v2827_v2 = vmul.f32 1.442695, %v2600_v19  ;;  %3081 = vadd.xlane.f32.xlu2 %v13404_v27  ;;  %v4530_v19 = vand.u32 2147483647, %v13354_v43  ;;  %v13426_v54 = vadd.f32 %v12982_v13, %v5151_v17 }
 0x976   : > { %v4509_v18 = vmul.f32 %v13374_v20, %v4508_v0  ;;  %v2829_v62 = vmul.f32 1.442695, %v2601_v7  ;;  %2455 = vmax.xlane.f32.xlu0 %v13395_v34  ;;  %5625 = vmatmul.f32.gmra.mxu1 %v5151_v17  ;;  %v4518_v55 = vor.u32 1.1754944e-38, %v4517_v25  ;;  %vm4541_vm14 = vweird.f32 %v13390_v16 }
 0x977   : > { %v4524_v58 = vmul.f32 %v13383_v57, %v4523_v38  ;;  %v4547_v38 = vand.u32 2147483648, %v13390_v16  ;;  %vm4531_vm12 = vcmp.eq.f32.partialorder %v4530_v19, 8.507059e+37 }
 0x978   : > { %8949 = vpow2.f32 %v2829_v62  ;;  %v4510_v0 = vadd.f32 %v13374_v20, %v4509_v18  ;;  %v13421_v7 = vpop.eup %8947  ;;  %v4545_v18 = vand.u32 2147483647, %v13390_v16 }
 0x979   : > { %8951 = vpow2.f32 %v2827_v2  ;;  %v4525_v62 = vadd.f32 %v13383_v57, %v4524_v58  ;;  %v4537_v2 = vmul.f32 %v13421_v7, %v13390_v16  ;;  %v2448_v22 = vpop.xlane.xlu1 %2447  ;;  %vm4542_vm13 = vweird.f32 %v13421_v7 }
 0x97a   : > { %v13439_v13 = vpop.xlane.xlu0 %3073  ;;  %v4514_v29 = vsel %vm13430_vm7, %v13374_v20, %v4510_v0  ;;  %v2602_v28 = vsub.f32 %v13289_v50, %v2448_v22  ;;  %v13456_v50 = vpop.f32.mrf.mxu3  ;;  %vm4543_vm15 = vmor %vm4541_vm14, %vm4542_vm13  ;;  %vm4546_vm1 = vcmp.eq.f32.partialorder %v4545_v18, 8.507059e+37 }
 0x97b   : > { %v13444_v37 = vpop.xlane.xlu2 %3075  ;;  %8953 = vrcp.f32 %v13439_v13  ;;  %v4538_v43 = vsub.f32 1.0, %v4537_v2  ;;  %v4519_v36 = vsel %vm4516_vm10, %v4518_v55, %v4514_v29  ;;  %v4529_v20 = vsel %vm4528_vm11, %v13383_v57, %v4525_v62  ;;  %v1391_v57 = vld [vmem:[%s16540_s15 + $0x358] sm:$0xff] }
 0x97c   : > { %8955 = vrcp.f32 %v13444_v37  ;;  %v2831_v56 = vmul.f32 1.442695, %v2602_v28  ;;  %v5152_v17 = vmul.f32 %v13234_v46, %v4519_v36  ;;  %v4534_v33 = vsel %vm4531_vm12, %v4533_v52, %v4529_v20 }
 0x97d   : > { %v4539_v25 = vmul.f32 %v13421_v7, %v4538_v43  ;;  %2457 = vmax.xlane.f32.xlu2 %v13407_v8  ;;  %v5153_v19 = vmul.f32 %v13237_v63, %v4534_v33  ;;  %v4548_v2 = vor.u32 1.1754944e-38, %v4547_v38  ;;  %v13484_v29 = vadd.f32 %v13349_v61, %v1391_v57  ;;  %v13491_v43 = vpop.f32.mrf.mxu1 }
 0x97e   : > { %v13454_v58 = vpop.eup %8949  ;;  %8957 = vpow2.f32 %v2831_v56  ;;  %v13474_v46 = vadd.f32 %v13041_v21, %v5152_v17  ;;  %5628 = vmatmul.f32.gmra.mxu1 %v5152_v17  ;;  %v13489_v28 = vadd.f32 %v13400_v24, %v1392_v6  ;;  %16852 = vst [vmem:[#allocation97_spill] sm:$0xff] %v13491_v43  ;;  %v4577_v61 = vand.u32 2147483648, %v13444_v37 }
 0x97f   : > { %v13462_v0 = vpop.eup %8951  ;;  %3085 = vadd.xlane.f32.xlu0 %v13454_v58  ;;  %v4540_v62 = vadd.f32 %v13421_v7, %v4539_v25  ;;  %v13479_v22 = vadd.f32 %v13047_v10, %v5153_v19  ;;  %v4562_v24 = vand.u32 2147483648, %v13439_v13  ;;  %v4560_v57 = vand.u32 2147483647, %v13439_v13 }
 0x980   : > { %3083 = vadd.xlane.f32.xlu1 %v13462_v0  ;;  %vm4556_vm4 = vweird.f32 %v13439_v13  ;;  %vm4571_vm5 = vweird.f32 %v13444_v37 }
 0x981   : > { %v8954_v52 = vpop.eup %8953  ;;  %v4544_v55 = vsel %vm4543_vm15, %v13421_v7, %v4540_v62  ;;  %vm4561_vm7 = vcmp.eq.f32.partialorder %v4560_v57, 8.507059e+37 }
 0x982   : > { %v8956_v63 = vpop.eup %8955  ;;  %v4552_v21 = vmul.f32 %v8954_v52, %v13439_v13  ;;  %v2450_v16 = vpop.xlane.xlu0 %2449  ;;  %v4549_v36 = vsel %vm4546_vm1, %v4548_v2, %v4544_v55  ;;  %vm4557_vm2 = vweird.f32 %v8954_v52 }
 0x983   : > { %v4567_v10 = vmul.f32 %v8956_v63, %v13444_v37  ;;  %v2452_v38 = vpop.xlane.xlu2 %2451  ;;  %v2603_v56 = vsub.f32 %v13315_v59, %v2450_v16  ;;  %v5154_v17 = vmul.f32 %v13272_v11, %v4549_v36  ;;  %vm4572_vm3 = vweird.f32 %v8956_v63  ;;  %vm4558_vm6 = vmor %vm4556_vm4, %vm4557_vm2 }
 0x984   : > { %v4553_v20 = vsub.f32 1.0, %v4552_v21  ;;  %v2604_v25 = vsub.f32 %v13318_v39, %v2452_v38  ;;  %v13498_v7 = vpop.eup %8957  ;;  %v4575_v11 = vand.u32 2147483647, %v13444_v37  ;;  %v2191_v39 = vpop.f32.mrf.mxu3  ;;  %v4563_v16 = vor.u32 1.1754944e-38, %v4562_v24  ;;  %vm4573_vm8 = vmor %vm4571_vm5, %vm4572_vm3 }
 0x985   : > { %v4568_v18 = vsub.f32 1.0, %v4567_v10  ;;  %v2833_v33 = vmul.f32 1.442695, %v2603_v56  ;;  %3087 = vadd.xlane.f32.xlu2 %v13498_v7  ;;  %v13504_v59 = vadd.f32 %v13068_v60, %v5154_v17  ;;  %v1393_v60 = vld [vmem:[%s16540_s15 + $0x368] sm:$0xff]  ;;  %v4578_v10 = vor.u32 1.1754944e-38, %v4577_v61 }
 0x986   : > { %v4554_v6 = vmul.f32 %v8954_v52, %v4553_v20  ;;  %v2835_v62 = vmul.f32 1.442695, %v2604_v25  ;;  %5631 = vmatmul.f32.gmra.mxu1 %v5153_v19  ;;  %vm4576_vm9 = vcmp.eq.f32.partialorder %v4575_v11, 8.507059e+37  ;;  %v13517_v36 = vadd.f32 %v13456_v50, %v1393_v60  ;;  %v13522_v19 = vpop.f32.mrf.mxu1 }
 0x987   : > { %v4569_v2 = vmul.f32 %v8956_v63, %v4568_v18  ;;  %8959 = vpow2.f32 %v2833_v33  ;;  %2461 = vmax.xlane.f32.xlu0 %v13489_v28  ;;  %16853 = vst [vmem:[#allocation99_spill] sm:$0xff] %v13522_v19 }
 0x988   : > { %8961 = vpow2.f32 %v2835_v62  ;;  %2459 = vmax.xlane.f32.xlu1 %v13484_v29  ;;  %v4555_v21 = vadd.f32 %v8954_v52, %v4554_v6 }
 0x989   : > { %v4570_v55 = vadd.f32 %v8956_v63, %v4569_v2 }
 0x98a   : > { %v4559_v38 = vsel %vm4558_vm6, %v8954_v52, %v4555_v21 }
 0x98b   : > { %v4564_v13 = vsel %vm4561_vm7, %v4563_v16, %v4559_v38  ;;  %v4574_v56 = vsel %vm4573_vm8, %v8956_v63, %v4570_v55  ;;  %v1394_v63 = vld [vmem:[%s16540_s15 + $0x370] sm:$0xff] }
 0x98c   : > { %v5155_v20 = vmul.f32 %v13292_v30, %v4564_v13  ;;  %v4579_v25 = vsel %vm4576_vm9, %v4578_v10, %v4574_v56  ;;  %v1395_v30 = vld [vmem:[%s16540_s15 + $0x378] sm:$0xff] }
 0x98d   : > { %v13520_v37 = vpop.eup %8959  ;;  %v5156_v18 = vmul.f32 %v13297_v32, %v4579_v25  ;;  %2463 = vmax.xlane.f32.xlu2 %v13517_v36  ;;  %v2194_v32 = vpop.f32.mrf.mxu3 }
 0x98e   : > { %v13525_v61 = vpop.eup %8961  ;;  %v13529_v52 = vadd.f32 %v13093_v9, %v5155_v20  ;;  %5634 = vmatmul.f32.gmra.mxu1 %v5154_v17  ;;  %v13542_v24 = vadd.f32 %v2194_v32, %v1395_v30  ;;  %v13544_v9 = vadd.f32 %v2191_v39, %v1394_v63  ;;  %v13546_v33 = vpop.f32.mrf.mxu1 }
 0x98f   : > { %3091 = vadd.xlane.f32.xlu0 %v13525_v61  ;;  %v13533_v50 = vadd.f32 %v13097_v53, %v5156_v18  ;;  %16854 = vst [vmem:[#allocation102_spill] sm:$0xff] %v13546_v33 }
 0x990   : > { %3089 = vadd.xlane.f32.xlu1 %v13520_v37 }
 0x995   : > { %v2197_v17 = vpop.f32.mrf.mxu3 }
 0x996   : > { %5637 = vmatmul.f32.gmra.mxu1 %v5155_v20  ;;  %v13550_v53 = vpop.f32.mrf.mxu1 }
 0x997   : > { %2467 = vmax.xlane.f32.xlu0 %v13542_v24  ;;  %16855 = vst [vmem:[#allocation110_spill] sm:$0xff] %v13550_v53 }
 0x998   : > { %2465 = vmax.xlane.f32.xlu1 %v13544_v9 }
 0x99d   : > { %v13552_v57 = vpop.f32.mrf.mxu3 }
 0x99e   : > { %5640 = vmatmul.f32.gmra.mxu1 %v5156_v18  ;;  %v13565_v13 = vpop.f32.mrf.mxu1 }
 0x99f   : > { %16856 = vst [vmem:[#allocation47_spill] sm:$0xff] %v13565_v13 }
 0x9a5   : > { %v13554_v6 = vpop.f32.mrf.mxu3 }
 0x9a6   : > { %v13576_v13 = vpop.f32.mrf.mxu1 }
 0x9a7   : > { %16857 = vst [vmem:[#allocation57_spill] sm:$0xff] %v13576_v13 }
 0x9ad   : > { %v13556_v62 = vpop.f32.mrf.mxu3 }
 0x9b5   : > { %v13558_v2 = vpop.f32.mrf.mxu3 }
 0x9bd   : > { %v13560_v11 = vpop.f32.mrf.mxu3 }
 0x9c5   : > { %v13562_v55 = vpop.f32.mrf.mxu3 }
 0x9d8   : > { %v3078_v39 = vpop.xlane.xlu1 %3077 }
 0x9d9   : > { %8963 = vrcp.f32 %v3078_v39  ;;  %v4592_v18 = vand.u32 2147483648, %v3078_v39  ;;  %v4590_v30 = vand.u32 2147483647, %v3078_v39  ;;  %vm4586_vm11 = vweird.f32 %v3078_v39 }
 0x9db   : > { %v4593_v53 = vor.u32 1.1754944e-38, %v4592_v18  ;;  %vm4591_vm13 = vcmp.eq.f32.partialorder %v4590_v30, 8.507059e+37 }
 0x9df   : > { %v8964_v21 = vpop.eup %8963 }
 0x9e0   : > { %v4582_v60 = vmul.f32 %v8964_v21, %v3078_v39  ;;  %v2454_v16 = vpop.xlane.xlu1 %2453  ;;  %vm4587_vm10 = vweird.f32 %v8964_v21 }
 0x9e1   : > { %v2605_v10 = vsub.f32 %v13358_v49, %v2454_v16  ;;  %v3080_v38 = vpop.xlane.xlu0 %3079  ;;  %vm4588_vm12 = vmor %vm4586_vm11, %vm4587_vm10 }
 0x9e2   : > { %v4583_v56 = vsub.f32 1.0, %v4582_v60  ;;  %8965 = vrcp.f32 %v3080_v38  ;;  %vm4601_vm15 = vweird.f32 %v3080_v38  ;;  %v4605_v30 = vand.u32 2147483647, %v3080_v38 }
 0x9e3   : > { %v2837_v20 = vmul.f32 1.442695, %v2605_v10 }
 0x9e4   : > { %v4584_v25 = vmul.f32 %v8964_v21, %v4583_v56  ;;  %vm4606_vm2 = vcmp.eq.f32.partialorder %v4605_v30, 8.507059e+37 }
 0x9e5   : > { %8967 = vpow2.f32 %v2837_v20  ;;  %v13573_v20 = vpop.f32.mrf.mxu3 }
 0x9e6   : > { %v4585_v32 = vadd.f32 %v8964_v21, %v4584_v25 }
 0x9e8   : > { %v8966_v63 = vpop.eup %8965  ;;  %v13567_v33 = vpop.xlane.xlu2 %3081  ;;  %v4589_v19 = vsel %vm4588_vm12, %v8964_v21, %v4585_v32 }
 0x9e9   : > { %v4597_v49 = vmul.f32 %v8966_v63, %v3080_v38  ;;  %8969 = vrcp.f32 %v13567_v33  ;;  %v2456_v16 = vpop.xlane.xlu0 %2455  ;;  %v4594_v10 = vsel %vm4591_vm13, %v4593_v53, %v4589_v19  ;;  %vm4602_vm14 = vweird.f32 %v8966_v63  ;;  %v1396_v53 = vld [vmem:[%s16540_s15 + $0x380] sm:$0xff] }
 0x9ea   : > { %v2606_v60 = vsub.f32 %v13395_v34, %v2456_v16  ;;  %v5157_v25 = vmul.f32 %v13337_v44, %v4594_v10  ;;  %v4607_v34 = vand.u32 2147483648, %v3080_v38  ;;  %vm13586_vm1 = vmor %vm4601_vm15, %vm4602_vm14  ;;  %vm4616_vm4 = vweird.f32 %v13567_v33 }
 0x9eb   : > { %v13571_v56 = vpop.eup %8967  ;;  %v4598_v39 = vsub.f32 1.0, %v4597_v49 }
 0x9ec   : > { %v2839_v18 = vmul.f32 1.442695, %v2606_v60  ;;  %3093 = vadd.xlane.f32.xlu2 %v13571_v56  ;;  %v13580_v32 = vadd.f32 %v13131_v26, %v5157_v25  ;;  %5643 = vmatmul.f32.gmra.mxu1 %v5157_v25  ;;  %v13595_v25 = vadd.f32 %v2197_v17, %v1396_v53  ;;  %v4620_v53 = vand.u32 2147483647, %v13567_v33 }
 0x9ed   : > { %v4599_v21 = vmul.f32 %v8966_v63, %v4598_v39  ;;  %v13605_v17 = vpop.f32.mrf.mxu3 }
 0x9ee   : > { %8971 = vpow2.f32 %v2839_v18  ;;  %v4608_v18 = vor.u32 1.1754944e-38, %v4607_v34  ;;  %vm4621_vm6 = vcmp.eq.f32.partialorder %v4620_v53, 8.507059e+37  ;;  %v1398_v53 = vld [vmem:[%s16540_s15 + $0x390] sm:$0xff] }
 0x9ef   : > { %v8970_v19 = vpop.eup %8969  ;;  %v4600_v44 = vadd.f32 %v8966_v63, %v4599_v21 }
 0x9f0   : > { %v4612_v49 = vmul.f32 %v8970_v19, %v13567_v33  ;;  %v2458_v16 = vpop.xlane.xlu2 %2457  ;;  %vm4617_vm3 = vweird.f32 %v8970_v19 }
 0x9f1   : > { %v2607_v26 = vsub.f32 %v13407_v8, %v2458_v16  ;;  %v4604_v39 = vsel %vm13586_vm1, %v8966_v63, %v4600_v44  ;;  %v4622_v16 = vand.u32 2147483648, %v13567_v33  ;;  %v13610_v44 = vpop.f32.mrf.mxu1  ;;  %vm4618_vm5 = vmor %vm4616_vm4, %vm4617_vm3 }
 0x9f2   : > { %v13591_v10 = vpop.xlane.xlu0 %3085  ;;  %v4613_v13 = vsub.f32 1.0, %v4612_v49  ;;  %v4609_v63 = vsel %vm4606_vm2, %v4608_v18, %v4604_v39  ;;  %16860 = vst [vmem:[#allocation86_spill] sm:$0xff] %v13610_v44 }
 0x9f3   : > { %v13597_v21 = vpop.xlane.xlu1 %3083  ;;  %8973 = vrcp.f32 %v13591_v10  ;;  %v2841_v38 = vmul.f32 1.442695, %v2607_v26  ;;  %v5158_v34 = vmul.f32 %v13361_v41, %v4609_v63  ;;  %v1397_v41 = vld [vmem:[%s16540_s15 + $0x388] sm:$0xff]  ;;  %v4623_v60 = vor.u32 1.1754944e-38, %v4622_v16 }
 0x9f4   : > { %8975 = vrcp.f32 %v13597_v21  ;;  %v13601_v43 = vpop.eup %8971  ;;  %v4614_v8 = vmul.f32 %v8970_v19, %v4613_v13  ;;  %2469 = vmax.xlane.f32.xlu2 %v13595_v25  ;;  %v4637_v23 = vand.u32 2147483648, %v13597_v21  ;;  %vm4646_vm8 = vweird.f32 %v13591_v10 }
 0x9f5   : > { %8977 = vpow2.f32 %v2841_v38  ;;  %3095 = vadd.xlane.f32.xlu1 %v13601_v43  ;;  %v13614_v30 = vadd.f32 %v13167_v40, %v5158_v34  ;;  %5646 = vmatmul.f32.gmra.mxu1 %v5158_v34  ;;  %vm4631_vm9 = vweird.f32 %v13597_v21 }
 0x9f6   : > { %v4615_v13 = vadd.f32 %v8970_v19, %v4614_v8 }
 0x9f8   : > { %v13621_v26 = vpop.xlane.xlu2 %3087  ;;  %v4619_v39 = vsel %vm4618_vm5, %v8970_v19, %v4615_v13  ;;  %v13634_v19 = vadd.f32 %v13552_v57, %v1397_v41 }
 0x9f9   : > { %v13616_v49 = vpop.eup %8973  ;;  %8979 = vrcp.f32 %v13621_v26  ;;  %v4624_v34 = vsel %vm4621_vm6, %v4623_v60, %v4619_v39  ;;  %vm4661_vm1 = vweird.f32 %v13621_v26 }
 0x9fa   : > { %v13623_v18 = vpop.eup %8975  ;;  %v4642_v33 = vmul.f32 %v13616_v49, %v13591_v10  ;;  %v2462_v40 = vpop.xlane.xlu0 %2461  ;;  %v5159_v14 = vmul.f32 %v13404_v27, %v4624_v34  ;;  %vm4647_vm7 = vweird.f32 %v13616_v49 }
 0x9fb   : > { %v4627_v38 = vmul.f32 %v13623_v18, %v13597_v21  ;;  %v2460_v8 = vpop.xlane.xlu1 %2459  ;;  %v2609_v63 = vsub.f32 %v13489_v28, %v2462_v40  ;;  %v13631_v16 = vpop.eup %8977  ;;  %v4652_v28 = vand.u32 2147483648, %v13591_v10  ;;  %vm4632_vm10 = vweird.f32 %v13623_v18  ;;  %vm13668_vm11 = vmor %vm4646_vm8, %vm4647_vm7 }
 0x9fc   : > { %v4643_v13 = vsub.f32 1.0, %v4642_v33  ;;  %v2608_v44 = vsub.f32 %v13484_v29, %v2460_v8  ;;  %3097 = vadd.xlane.f32.xlu0 %v13631_v16  ;;  %v13646_v39 = vadd.f32 %v13200_v4, %v5159_v14  ;;  %v4635_v29 = vand.u32 2147483647, %v13597_v21  ;;  %v13656_v8 = vpop.f32.mrf.mxu3  ;;  %vm4633_vm14 = vmor %vm4631_vm9, %vm4632_vm10 }
 0x9fd   : > { %v4628_v5 = vsub.f32 1.0, %v4627_v38  ;;  %v2845_v60 = vmul.f32 1.442695, %v2609_v63  ;;  %2471 = vmax.xlane.f32.xlu1 %v13634_v19  ;;  %v4650_v33 = vand.u32 2147483647, %v13591_v10  ;;  %v13654_v38 = vadd.f32 %v13554_v6, %v1398_v53  ;;  %5649 = vmatmul.f32.gmra.mxu1 %v5159_v14 }
 0x9fe   : > { %v4644_v57 = vmul.f32 %v13616_v49, %v4643_v13  ;;  %v2843_v41 = vmul.f32 1.442695, %v2608_v44  ;;  %v13660_v44 = vpop.f32.mrf.mxu1  ;;  %v4638_v14 = vor.u32 1.1754944e-38, %v4637_v23  ;;  %v4653_v10 = vor.u32 1.1754944e-38, %v4652_v28 }
 0x9ff   : > { %v4629_v27 = vmul.f32 %v13623_v18, %v4628_v5  ;;  %8981 = vpow2.f32 %v2845_v60  ;;  %v8980_v40 = vpop.eup %8979  ;;  %16861 = vst [vmem:[#allocation51_spill] sm:$0xff] %v13660_v44  ;;  %vm4636_vm12 = vcmp.eq.f32.partialorder %v4635_v29, 8.507059e+37  ;;  %vm4651_vm13 = vcmp.eq.f32.partialorder %v4650_v33, 8.507059e+37 }
 0xa00   : > { %8983 = vpow2.f32 %v2843_v41  ;;  %v4645_v4 = vadd.f32 %v13616_v49, %v4644_v57  ;;  %v4657_v5 = vmul.f32 %v8980_v40, %v13621_v26  ;;  %v2464_v63 = vpop.xlane.xlu2 %2463  ;;  %v4665_v23 = vand.u32 2147483647, %v13621_v26 }
 0xa01   : > { %v4630_v34 = vadd.f32 %v13623_v18, %v4629_v27  ;;  %v2610_v13 = vsub.f32 %v13517_v36, %v2464_v63  ;;  %v4667_v27 = vand.u32 2147483648, %v13621_v26  ;;  %vm4662_vm15 = vweird.f32 %v8980_v40 }
 0xa02   : > { %v13673_v53 = vpop.xlane.xlu0 %3091  ;;  %v4649_v60 = vsel %vm13668_vm11, %v13616_v49, %v4645_v4  ;;  %v4658_v57 = vsub.f32 1.0, %v4657_v5  ;;  %vm4663_vm2 = vmor %vm4661_vm1, %vm4662_vm15  ;;  %vm4666_vm3 = vcmp.eq.f32.partialorder %v4665_v23, 8.507059e+37 }
 0xa03   : > { %v13678_v41 = vpop.xlane.xlu1 %3089  ;;  %8985 = vrcp.f32 %v13673_v53  ;;  %v2847_v44 = vmul.f32 1.442695, %v2610_v13  ;;  %v4634_v28 = vsel %vm4633_vm14, %v13623_v18, %v4630_v34  ;;  %v4654_v29 = vsel %vm4651_vm13, %v4653_v10, %v4649_v60  ;;  %v1399_v18 = vld [vmem:[%s16540_s15 + $0x398] sm:$0xff] }
 0xa04   : > { %8987 = vrcp.f32 %v13678_v41  ;;  %v4659_v49 = vmul.f32 %v8980_v40, %v4658_v57  ;;  %2473 = vmax.xlane.f32.xlu0 %v13654_v38  ;;  %v4639_v4 = vsel %vm4636_vm12, %v4638_v14, %v4634_v28  ;;  %v5161_v21 = vmul.f32 %v13454_v58, %v4654_v29  ;;  %v1400_v58 = vld [vmem:[%s16540_s15 + $0x3a0] sm:$0xff]  ;;  %v13711_v10 = vpop.f32.mrf.mxu3 }
 0xa05   : > { %v13688_v36 = vpop.eup %8981  ;;  %8989 = vpow2.f32 %v2847_v44  ;;  %v5160_v5 = vmul.f32 %v13462_v0, %v4639_v4  ;;  %v4668_v34 = vor.u32 1.1754944e-38, %v4667_v27  ;;  %v13715_v57 = vadd.f32 %v13556_v62, %v1399_v18 }
 0xa06   : > { %v13692_v33 = vpop.eup %8983  ;;  %3101 = vadd.xlane.f32.xlu1 %v13688_v36  ;;  %v4660_v63 = vadd.f32 %v8980_v40, %v4659_v49  ;;  %v13703_v6 = vadd.f32 %v13256_v51, %v5161_v21  ;;  %v13717_v27 = vpop.f32.mrf.mxu1  ;;  %v13725_v29 = vadd.f32 %v13558_v2, %v1400_v58  ;;  %v4682_v18 = vand.u32 2147483648, %v13678_v41 }
 0xa07   : > { %3099 = vadd.xlane.f32.xlu2 %v13692_v33  ;;  %v13709_v26 = vadd.f32 %v13249_v35, %v5160_v5  ;;  %5652 = vmatmul.f32.gmra.mxu1 %v5160_v5  ;;  %16864 = vst [vmem:[#allocation52_spill] sm:$0xff] %v13717_v27  ;;  %v4697_v5 = vand.u32 2147483648, %v13673_v53  ;;  %v4695_v2 = vand.u32 2147483647, %v13673_v53  ;;  %vm4691_vm6 = vweird.f32 %v13673_v53 }
 0xa08   : > { %v4664_v0 = vsel %vm4663_vm2, %v8980_v40, %v4660_v63  ;;  %vm4676_vm7 = vweird.f32 %v13678_v41 }
 0xa09   : > { %v8986_v44 = vpop.eup %8985  ;;  %v4669_v51 = vsel %vm4666_vm3, %v4668_v34, %v4664_v0  ;;  %vm4696_vm10 = vcmp.eq.f32.partialorder %v4695_v2, 8.507059e+37 }
 0xa0a   : > { %v8988_v14 = vpop.eup %8987  ;;  %v4687_v13 = vmul.f32 %v8986_v44, %v13673_v53  ;;  %v2468_v60 = vpop.xlane.xlu0 %2467  ;;  %v5162_v40 = vmul.f32 %v13498_v7, %v4669_v51  ;;  %vm4692_vm4 = vweird.f32 %v8986_v44 }
 0xa0b   : > { %v4672_v49 = vmul.f32 %v8988_v14, %v13678_v41  ;;  %v2466_v28 = vpop.xlane.xlu1 %2465  ;;  %v2612_v35 = vsub.f32 %v13542_v24, %v2468_v60  ;;  %v13722_v23 = vpop.eup %8989  ;;  %vm4677_vm5 = vweird.f32 %v8988_v14  ;;  %v4698_v60 = vor.u32 1.1754944e-38, %v4697_v5  ;;  %vm4693_vm8 = vmor %vm4691_vm6, %vm4692_vm4 }
 0xa0c   : > { %v4688_v4 = vsub.f32 1.0, %v4687_v13  ;;  %v2611_v62 = vsub.f32 %v13544_v9, %v2466_v28  ;;  %3103 = vadd.xlane.f32.xlu0 %v13722_v23  ;;  %v13732_v24 = vadd.f32 %v13276_v48, %v5162_v40  ;;  %v4680_v9 = vand.u32 2147483647, %v13678_v41  ;;  %v1401_v13 = vld [vmem:[%s16540_s15 + $0x3a8] sm:$0xff]  ;;  %vm4678_vm9 = vmor %vm4676_vm7, %vm4677_vm5  ;;  %v13750_v41 = vpop.f32.mrf.mxu3 }
 0xa0d   : > { %v4673_v63 = vsub.f32 1.0, %v4672_v49  ;;  %v2851_v34 = vmul.f32 1.442695, %v2612_v35  ;;  %v4683_v49 = vor.u32 1.1754944e-38, %v4682_v18  ;;  %v13745_v35 = vadd.f32 %v13560_v11, %v1401_v13 }
 0xa0e   : > { %v4689_v7 = vmul.f32 %v8986_v44, %v4688_v4  ;;  %v2849_v0 = vmul.f32 1.442695, %v2611_v62  ;;  %2477 = vmax.xlane.f32.xlu1 %v13725_v29  ;;  %vm4681_vm11 = vcmp.eq.f32.partialorder %v4680_v9, 8.507059e+37 }
 0xa0f   : > { %v4674_v58 = vmul.f32 %v8988_v14, %v4673_v63  ;;  %8991 = vpow2.f32 %v2851_v34  ;;  %2475 = vmax.xlane.f32.xlu2 %v13715_v57  ;;  %5655 = vmatmul.f32.gmra.mxu1 %v5161_v21  ;;  %v13752_v21 = vpop.f32.mrf.mxu1 }
 0xa10   : > { %8993 = vpow2.f32 %v2849_v0  ;;  %v4690_v48 = vadd.f32 %v8986_v44, %v4689_v7  ;;  %16865 = vst [vmem:[#allocation111_spill] sm:$0xff] %v13752_v21 }
 0xa11   : > { %v4675_v51 = vadd.f32 %v8988_v14, %v4674_v58 }
 0xa12   : > { %v4694_v28 = vsel %vm4693_vm8, %v8986_v44, %v4690_v48 }
 0xa13   : > { %v4679_v4 = vsel %vm4678_vm9, %v8988_v14, %v4675_v51  ;;  %v4699_v62 = vsel %vm4696_vm10, %v4698_v60, %v4694_v28  ;;  %v1403_v14 = vld [vmem:[%s16540_s15 + $0x3b8] sm:$0xff] }
 0xa14   : > { %v4684_v53 = vsel %vm4681_vm11, %v4683_v49, %v4679_v4  ;;  %v5164_v63 = vmul.f32 %v13525_v61, %v4699_v62  ;;  %2479 = vmax.xlane.f32.xlu0 %v13745_v35  ;;  %v13773_v18 = vadd.f32 %v13573_v20, %v1403_v14  ;;  %v13779_v7 = vpop.f32.mrf.mxu3 }
 0xa15   : > { %v13748_v34 = vpop.eup %8991  ;;  %v5163_v44 = vmul.f32 %v13520_v37, %v4684_v53  ;;  %v1402_v37 = vld [vmem:[%s16540_s15 + $0x3b0] sm:$0xff] }
 0xa16   : > { %v13756_v5 = vpop.eup %8993  ;;  %3107 = vadd.xlane.f32.xlu1 %v13748_v34  ;;  %v13760_v11 = vadd.f32 %v13306_v47, %v5164_v63  ;;  %v13776_v47 = vadd.f32 %v13562_v55, %v1402_v37  ;;  %v1409_v55 = vld [vmem:[%s16540_s15 + $0x3e8] sm:$0xff] }
 0xa17   : > { %3105 = vadd.xlane.f32.xlu2 %v13756_v5  ;;  %v13764_v61 = vadd.f32 %v13302_v42, %v5163_v44  ;;  %5658 = vmatmul.f32.gmra.mxu1 %v5162_v40  ;;  %v13781_v42 = vpop.f32.mrf.mxu1  ;;  %v1404_v40 = vld [vmem:[%s16540_s15 + $0x3c0] sm:$0xff] }
 0xa18   : > { %16866 = vst [vmem:[#allocation112_spill] sm:$0xff] %v13781_v42  ;;  %v13788_v0 = vadd.f32 %v13605_v17, %v1404_v40 }
 0xa1c   : > { %v2236_v20 = vpop.f32.mrf.mxu3 }
 0xa1d   : > { %v13796_v58 = vadd.f32 %v2236_v20, %v1409_v55 }
 0xa1e   : > { %2483 = vmax.xlane.f32.xlu1 %v13773_v18 }
 0xa1f   : > { %2481 = vmax.xlane.f32.xlu2 %v13776_v47  ;;  %5661 = vmatmul.f32.gmra.mxu1 %v5163_v44  ;;  %v13794_v2 = vpop.f32.mrf.mxu1 }
 0xa20   : > { %16867 = vst [vmem:[#allocation113_spill] sm:$0xff] %v13794_v2 }
 0xa24   : > { %v13810_v40 = vpop.f32.mrf.mxu3 }
 0xa26   : > { %2485 = vmax.xlane.f32.xlu1 %v13788_v0 }
 0xa27   : > { %5664 = vmatmul.f32.gmra.mxu1 %v5164_v63  ;;  %v13799_v9 = vpop.f32.mrf.mxu1 }
 0xa28   : > { %16868 = vst [vmem:[#allocation114_spill] sm:$0xff] %v13799_v9 }
 0xa2e   : > { %2495 = vmax.xlane.f32.xlu1 %v13796_v58 }
 0xa2f   : > { %v13801_v13 = vpop.f32.mrf.mxu1 }
 0xa30   : > { %16869 = vst [vmem:[#allocation115_spill] sm:$0xff] %v13801_v13 }
 0xa37   : > { %v13803_v17 = vpop.f32.mrf.mxu1 }
 0xa38   : > { %16870 = vst [vmem:[#allocation116_spill] sm:$0xff] %v13803_v17 }
 0xa3f   : > { %v13805_v48 = vpop.f32.mrf.mxu1 }
 0xa40   : > { %16871 = vst [vmem:[#allocation117_spill] sm:$0xff] %v13805_v48 }
 0xa47   : > { %v13807_v4 = vpop.f32.mrf.mxu1 }
 0xa48   : > { %16872 = vst [vmem:[#allocation118_spill] sm:$0xff] %v13807_v4 }
 0xa5f   : > { %v3094_v60 = vpop.xlane.xlu2 %3093 }
 0xa60   : > { %8995 = vrcp.f32 %v3094_v60  ;;  %v4712_v37 = vand.u32 2147483648, %v3094_v60  ;;  %v4710_v55 = vand.u32 2147483647, %v3094_v60  ;;  %vm4706_vm13 = vweird.f32 %v3094_v60 }
 0xa62   : > { %v4713_v42 = vor.u32 1.1754944e-38, %v4712_v37  ;;  %vm4711_vm15 = vcmp.eq.f32.partialorder %v4710_v55, 8.507059e+37 }
 0xa66   : > { %v8996_v51 = vpop.eup %8995 }
 0xa67   : > { %v4702_v49 = vmul.f32 %v8996_v51, %v3094_v60  ;;  %v2470_v28 = vpop.xlane.xlu2 %2469  ;;  %vm4707_vm12 = vweird.f32 %v8996_v51 }
 0xa68   : > { %v2613_v62 = vsub.f32 %v13595_v25, %v2470_v28  ;;  %v3096_v53 = vpop.xlane.xlu1 %3095  ;;  %vm4708_vm14 = vmor %vm4706_vm13, %vm4707_vm12 }
 0xa69   : > { %v4703_v63 = vsub.f32 1.0, %v4702_v49  ;;  %8997 = vrcp.f32 %v3096_v53  ;;  %v4727_v55 = vand.u32 2147483648, %v3096_v53  ;;  %vm4721_vm2 = vweird.f32 %v3096_v53 }
 0xa6a   : > { %v2853_v44 = vmul.f32 1.442695, %v2613_v62 }
 0xa6b   : > { %v4704_v14 = vmul.f32 %v8996_v51, %v4703_v63 }
 0xa6c   : > { %8999 = vpow2.f32 %v2853_v44  ;;  %v13818_v44 = vpop.f32.mrf.mxu1 }
 0xa6d   : > { %v4705_v20 = vadd.f32 %v8996_v51, %v4704_v14  ;;  %16873 = vst [vmem:[#allocation119_spill] sm:$0xff] %v13818_v44 }
 0xa6f   : > { %v8998_v2 = vpop.eup %8997  ;;  %v13812_v21 = vpop.xlane.xlu0 %3097  ;;  %v4709_v27 = vsel %vm4708_vm14, %v8996_v51, %v4705_v20 }
 0xa70   : > { %v4717_v25 = vmul.f32 %v8998_v2, %v3096_v53  ;;  %v2472_v28 = vpop.xlane.xlu1 %2471  ;;  %9001 = vrcp.f32 %v13812_v21  ;;  %v4714_v62 = vsel %vm4711_vm15, %v4713_v42, %v4709_v27  ;;  %vm4722_vm1 = vweird.f32 %v8998_v2  ;;  %v1411_v27 = vld [vmem:[%s16540_s15 + $0x3f8] sm:$0xff]  ;;  %v2242_v42 = vpop.f32.mrf.mxu3 }
 0xa71   : > { %v2614_v49 = vsub.f32 %v13634_v19, %v2472_v28  ;;  %v5165_v14 = vmul.f32 %v13571_v56, %v4714_v62  ;;  %v4725_v56 = vand.u32 2147483647, %v3096_v53  ;;  %vm13829_vm3 = vmor %vm4721_vm2, %vm4722_vm1  ;;  %vm4736_vm6 = vweird.f32 %v13812_v21 }
 0xa72   : > { %v13816_v63 = vpop.eup %8999  ;;  %v4718_v60 = vsub.f32 1.0, %v4717_v25 }
 0xa73   : > { %v2855_v9 = vmul.f32 1.442695, %v2614_v49  ;;  %3109 = vadd.xlane.f32.xlu0 %v13816_v63  ;;  %v13823_v51 = vadd.f32 %v13344_v45, %v5165_v14  ;;  %5667 = vmatmul.f32.gmra.mxu1 %v5165_v14  ;;  %v4728_v14 = vor.u32 1.1754944e-38, %v4727_v55  ;;  %vm4726_vm4 = vcmp.eq.f32.partialorder %v4725_v56, 8.507059e+37 }
 0xa74   : > { %v4719_v37 = vmul.f32 %v8998_v2, %v4718_v60  ;;  %v13838_v60 = vadd.f32 %v2242_v42, %v1411_v27  ;;  %v13848_v27 = vpop.f32.mrf.mxu1  ;;  %v4740_v42 = vand.u32 2147483647, %v13812_v21 }
 0xa75   : > { %9003 = vpow2.f32 %v2855_v9  ;;  %16876 = vst [vmem:[#allocation120_spill] sm:$0xff] %v13848_v27 }
 0xa76   : > { %v9002_v19 = vpop.eup %9001  ;;  %v4720_v20 = vadd.f32 %v8998_v2, %v4719_v37  ;;  %vm4741_vm8 = vcmp.eq.f32.partialorder %v4740_v42, 8.507059e+37 }
 0xa77   : > { %v4732_v25 = vmul.f32 %v9002_v19, %v13812_v21  ;;  %v2474_v28 = vpop.xlane.xlu0 %2473  ;;  %vm4737_vm5 = vweird.f32 %v9002_v19 }
 0xa78   : > { %v2615_v9 = vsub.f32 %v13654_v38, %v2474_v28  ;;  %v4724_v62 = vsel %vm13829_vm3, %v8998_v2, %v4720_v20  ;;  %v4742_v38 = vand.u32 2147483648, %v13812_v21  ;;  %vm4738_vm7 = vmor %vm4736_vm6, %vm4737_vm5 }
 0xa79   : > { %v13833_v45 = vpop.xlane.xlu1 %3101  ;;  %v4733_v44 = vsub.f32 1.0, %v4732_v25  ;;  %v4729_v2 = vsel %vm4726_vm4, %v4728_v14, %v4724_v62  ;;  %v1410_v25 = vld [vmem:[%s16540_s15 + $0x3f0] sm:$0xff] }
 0xa7a   : > { %v13840_v37 = vpop.xlane.xlu2 %3099  ;;  %9005 = vrcp.f32 %v13833_v45  ;;  %v2857_v53 = vmul.f32 1.442695, %v2615_v9  ;;  %v5166_v55 = vmul.f32 %v13601_v43, %v4729_v2  ;;  %v4743_v28 = vor.u32 1.1754944e-38, %v4742_v38  ;;  %v1408_v38 = vld [vmem:[%s16540_s15 + $0x3e0] sm:$0xff] }
 0xa7b   : > { %9007 = vrcp.f32 %v13840_v37  ;;  %v13844_v4 = vpop.eup %9003  ;;  %v4734_v48 = vmul.f32 %v9002_v19, %v4733_v44  ;;  %2499 = vmax.xlane.f32.xlu0 %v13838_v60  ;;  %v13880_v2 = vadd.f32 %v13810_v40, %v1410_v25  ;;  %vm4766_vm10 = vweird.f32 %v13833_v45 }
 0xa7c   : > { %9009 = vpow2.f32 %v2857_v53  ;;  %3111 = vadd.xlane.f32.xlu2 %v13844_v4  ;;  %v13855_v44 = vadd.f32 %v13377_v1, %v5166_v55  ;;  %5670 = vmatmul.f32.gmra.mxu1 %v5166_v55  ;;  %vm4751_vm11 = vweird.f32 %v13840_v37 }
 0xa7d   : > { %v4735_v20 = vadd.f32 %v9002_v19, %v4734_v48 }
 0xa7e   : > { %16877 = vst [vmem:[#allocation121_spill] sm:$0xff] %v13855_v44  ;;  %v4755_v44 = vand.u32 2147483647, %v13840_v37 }
 0xa7f   : > { %v13862_v49 = vpop.xlane.xlu0 %3103  ;;  %v4739_v43 = vsel %vm4738_vm7, %v9002_v19, %v4735_v20  ;;  %v1405_v19 = vld [vmem:[%s16540_s15 + $0x3c8] sm:$0xff] }
 0xa80   : > { %v13857_v56 = vpop.eup %9005  ;;  %9011 = vrcp.f32 %v13862_v49  ;;  %v4744_v14 = vsel %vm4741_vm8, %v4743_v28, %v4739_v43  ;;  %v4757_v28 = vand.u32 2147483648, %v13840_v37  ;;  %v4772_v43 = vand.u32 2147483648, %v13833_v45 }
 0xa81   : > { %v13864_v9 = vpop.eup %9007  ;;  %v4762_v21 = vmul.f32 %v13857_v56, %v13833_v45  ;;  %v2478_v48 = vpop.xlane.xlu1 %2477  ;;  %v5167_v20 = vmul.f32 %v13631_v16, %v4744_v14  ;;  %vm4767_vm9 = vweird.f32 %v13857_v56  ;;  %v13895_v16 = vadd.f32 %v13656_v8, %v1405_v19 }
 0xa82   : > { %v4747_v1 = vmul.f32 %v13864_v9, %v13840_v37  ;;  %v2476_v62 = vpop.xlane.xlu2 %2475  ;;  %v13871_v53 = vpop.eup %9009  ;;  %vm4752_vm12 = vweird.f32 %v13864_v9  ;;  %vm13913_vm13 = vmor %vm4766_vm10, %vm4767_vm9  ;;  %vm13919_vm14 = vcmp.eq.f32.partialorder %v4755_v44, 8.507059e+37  ;;  %v4785_v44 = vand.u32 2147483647, %v13862_v49 }
 0xa83   : > { %v4763_v55 = vsub.f32 1.0, %v4762_v21  ;;  %v2616_v42 = vsub.f32 %v13715_v57, %v2476_v62  ;;  %3113 = vadd.xlane.f32.xlu0 %v13871_v53  ;;  %v13891_v40 = vadd.f32 %v13426_v54, %v5167_v20  ;;  %v13898_v57 = vadd.f32 %v13779_v7, %v1408_v38  ;;  %v13902_v62 = vpop.f32.mrf.mxu1  ;;  %vm4753_vm1 = vmor %vm4751_vm11, %vm4752_vm12 }
 0xa84   : > { %v4748_v27 = vsub.f32 1.0, %v4747_v1  ;;  %2497 = vmax.xlane.f32.xlu2 %v13880_v2  ;;  %v4770_v21 = vand.u32 2147483647, %v13833_v45  ;;  %v2617_v54 = vsub.f32 %v13725_v29, %v2478_v48  ;;  %5673 = vmatmul.f32.gmra.mxu1 %v5167_v20  ;;  %v4773_v45 = vor.u32 1.1754944e-38, %v4772_v43 }
 0xa85   : > { %v4764_v17 = vmul.f32 %v13857_v56, %v4763_v55  ;;  %v2859_v13 = vmul.f32 1.442695, %v2616_v42  ;;  %v4787_v55 = vand.u32 2147483648, %v13862_v49  ;;  %vm4781_vm3 = vweird.f32 %v13862_v49 }
 0xa86   : > { %v4749_v25 = vmul.f32 %v13864_v9, %v4748_v27  ;;  %v9012_v1 = vpop.eup %9011  ;;  %vm4771_vm15 = vcmp.eq.f32.partialorder %v4770_v21, 8.507059e+37  ;;  %v2861_v20 = vmul.f32 1.442695, %v2617_v54  ;;  %vm4786_vm5 = vcmp.eq.f32.partialorder %v4785_v44, 8.507059e+37 }
 0xa87   : > { %9013 = vpow2.f32 %v2859_v13  ;;  %v4765_v14 = vadd.f32 %v13857_v56, %v4764_v17  ;;  %v4777_v8 = vmul.f32 %v9012_v1, %v13862_v49  ;;  %v4758_v13 = vor.u32 1.1754944e-38, %v4757_v28  ;;  %v2480_v48 = vpop.xlane.xlu0 %2479 }
 0xa88   : > { %v4750_v7 = vadd.f32 %v13864_v9, %v4749_v25  ;;  %vm4782_vm2 = vweird.f32 %v9012_v1  ;;  %v2618_v28 = vsub.f32 %v13745_v35, %v2480_v48  ;;  %v4788_v27 = vor.u32 1.1754944e-38, %v4787_v55 }
 0xa89   : > { %v13917_v29 = vpop.xlane.xlu1 %3107  ;;  %v4769_v19 = vsel %vm13913_vm13, %v13857_v56, %v4765_v14  ;;  %v4778_v38 = vsub.f32 1.0, %v4777_v8  ;;  %v1406_v14 = vld [vmem:[%s16540_s15 + $0x3d0] sm:$0xff]  ;;  %v1407_v8 = vld [vmem:[%s16540_s15 + $0x3d8] sm:$0xff]  ;;  %vm4783_vm4 = vmor %vm4781_vm3, %vm4782_vm2 }
 0xa8a   : > { %v13927_v42 = vpop.xlane.xlu2 %3105  ;;  %9015 = vrcp.f32 %v13917_v29  ;;  %v4754_v43 = vsel %vm4753_vm1, %v13864_v9, %v4750_v7  ;;  %v4774_v25 = vsel %vm4771_vm15, %v4773_v45, %v4769_v19  ;;  %v2863_v49 = vmul.f32 1.442695, %v2618_v28 }
 0xa8b   : > { %9017 = vrcp.f32 %v13927_v42  ;;  %v4779_v56 = vmul.f32 %v9012_v1, %v4778_v38  ;;  %2493 = vmax.xlane.f32.xlu0 %v13898_v57  ;;  %v4759_v54 = vsel %vm13919_vm14, %v4758_v13, %v4754_v43  ;;  %v5169_v37 = vmul.f32 %v13688_v36, %v4774_v25  ;;  %v13954_v7 = vpop.f32.mrf.mxu1 }
 0xa8c   : > { %2487 = vmax.xlane.f32.xlu2 %v13895_v16  ;;  %v5168_v35 = vmul.f32 %v13692_v33, %v4759_v54  ;;  %9019 = vpow2.f32 %v2861_v20  ;;  %v13964_v17 = vadd.f32 %v13711_v10, %v1406_v14  ;;  %v4817_v10 = vand.u32 2147483648, %v13917_v29 }
 0xa8d   : > { %v13939_v21 = vpop.eup %9013  ;;  %v4780_v9 = vadd.f32 %v9012_v1, %v4779_v56  ;;  %v13957_v36 = vadd.f32 %v13479_v22, %v5169_v37  ;;  %v13968_v22 = vadd.f32 %v13750_v41, %v1407_v8  ;;  %9021 = vpow2.f32 %v2863_v49 }
 0xa8e   : > { %3115 = vadd.xlane.f32.xlu1 %v13939_v21  ;;  %v13961_v45 = vadd.f32 %v13474_v46, %v5168_v35  ;;  %5676 = vmatmul.f32.gmra.mxu1 %v5168_v35  ;;  %vm4811_vm8 = vweird.f32 %v13917_v29  ;;  %vm4796_vm9 = vweird.f32 %v13927_v42  ;;  %v4818_v8 = vor.u32 1.1754944e-38, %v4817_v10 }
 0xa8f   : > { %v4784_v33 = vsel %vm4783_vm4, %v9012_v1, %v4780_v9  ;;  %v4802_v1 = vand.u32 2147483648, %v13927_v42 }
 0xa90   : > { %v9016_v13 = vpop.eup %9015  ;;  %v4789_v55 = vsel %vm4786_vm5, %v4788_v27, %v4784_v33 }
 0xa91   : > { %v9018_v48 = vpop.eup %9017  ;;  %v4807_v19 = vmul.f32 %v9016_v13, %v13917_v29  ;;  %v2484_v38 = vpop.xlane.xlu1 %2483  ;;  %v5170_v28 = vmul.f32 %v13722_v23, %v4789_v55  ;;  %vm4812_vm6 = vweird.f32 %v9016_v13  ;;  %v4815_v23 = vand.u32 2147483647, %v13917_v29 }
 0xa92   : > { %v4792_v20 = vmul.f32 %v9018_v48, %v13927_v42  ;;  %v2482_v56 = vpop.xlane.xlu2 %2481  ;;  %v2620_v46 = vsub.f32 %v13773_v18, %v2484_v38  ;;  %v13980_v14 = vpop.eup %9019  ;;  %vm4797_vm7 = vweird.f32 %v9018_v48  ;;  %vm4813_vm10 = vmor %vm4811_vm8, %vm4812_vm6  ;;  %v4803_v33 = vor.u32 1.1754944e-38, %v4802_v1 }
 0xa93   : > { %v4808_v44 = vsub.f32 1.0, %v4807_v19  ;;  %v2619_v43 = vsub.f32 %v13776_v47, %v2482_v56  ;;  %2489 = vmax.xlane.f32.xlu0 %v13964_v17  ;;  %v13978_v41 = vadd.f32 %v13504_v59, %v5170_v28  ;;  %v4800_v47 = vand.u32 2147483647, %v13927_v42  ;;  %v13988_v49 = vpop.f32.mrf.mxu1  ;;  %vm4798_vm11 = vmor %vm4796_vm9, %vm4797_vm7  ;;  %v13990_v55 = vpop.eup %9021 }
 0xa94   : > { %v4793_v25 = vsub.f32 1.0, %v4792_v20  ;;  %v2867_v54 = vmul.f32 1.442695, %v2620_v46  ;;  %2491 = vmax.xlane.f32.xlu2 %v13968_v22  ;;  %16882 = vst [vmem:[#allocation122_spill] sm:$0xff] %v13988_v49  ;;  %vm4816_vm12 = vcmp.eq.f32.partialorder %v4815_v23, 8.507059e+37 }
 0xa95   : > { %v4809_v18 = vmul.f32 %v9016_v13, %v4808_v44  ;;  %v2865_v35 = vmul.f32 1.442695, %v2619_v43  ;;  %vm4801_vm13 = vcmp.eq.f32.partialorder %v4800_v47, 8.507059e+37 }
 0xa96   : > { %v4794_v9 = vmul.f32 %v9018_v48, %v4793_v25  ;;  %9023 = vpow2.f32 %v2867_v54  ;;  %3117 = vadd.xlane.f32.xlu1 %v13980_v14  ;;  %5679 = vmatmul.f32.gmra.mxu1 %v5169_v37 }
 0xa97   : > { %9025 = vpow2.f32 %v2865_v35  ;;  %v4810_v59 = vadd.f32 %v9016_v13, %v4809_v18 }
 0xa98   : > { %v4795_v27 = vadd.f32 %v9018_v48, %v4794_v9 }
 0xa99   : > { %v2486_v19 = vpop.xlane.xlu1 %2485  ;;  %v4814_v38 = vsel %vm4813_vm10, %v9016_v13, %v4810_v59 }
 0xa9a   : > { %v2621_v20 = vsub.f32 %v13788_v0, %v2486_v19  ;;  %v4799_v29 = vsel %vm4798_vm11, %v9018_v48, %v4795_v27  ;;  %v4819_v56 = vsel %vm4816_vm12, %v4818_v8, %v4814_v38 }
 0xa9b   : > { %v4804_v46 = vsel %vm4801_vm13, %v4803_v33, %v4799_v29  ;;  %v5172_v42 = vmul.f32 %v13748_v34, %v4819_v56  ;;  %v14008_v34 = vpop.f32.mrf.mxu1 }
 0xa9c   : > { %v13994_v37 = vpop.eup %9023  ;;  %v2869_v44 = vmul.f32 1.442695, %v2621_v20  ;;  %v5171_v10 = vmul.f32 %v13756_v5, %v4804_v46  ;;  %3119 = vadd.xlane.f32.xlu2 %v13990_v55  ;;  %16883 = vst [vmem:[#allocation123_spill] sm:$0xff] %v14008_v34 }
 0xa9d   : > { %v13997_v1 = vpop.eup %9025  ;;  %v14001_v13 = vadd.f32 %v13533_v50, %v5172_v42 }
 0xa9e   : > { %9027 = vpow2.f32 %v2869_v44  ;;  %3123 = vadd.xlane.f32.xlu1 %v13994_v37  ;;  %3121 = vadd.xlane.f32.xlu0 %v13997_v1  ;;  %v14006_v0 = vadd.f32 %v13529_v52, %v5171_v10 }
 0xa9f   : > { %5682 = vmatmul.f32.gmra.mxu1 %v5170_v28 }
 0xaa1   : > { %v2496_v47 = vpop.xlane.xlu1 %2495 }
 0xaa2   : > { %v2626_v38 = vsub.f32 %v13796_v58, %v2496_v47 }
 0xaa3   : > { %v14013_v5 = vpop.f32.mrf.mxu1 }
 0xaa4   : > { %v14010_v48 = vpop.eup %9027  ;;  %16884 = vst [vmem:[#allocation124_spill] sm:$0xff] %v14013_v5  ;;  %v2879_v44 = vmul.f32 1.442695, %v2626_v38 }
 0xaa6   : > { %3125 = vadd.xlane.f32.xlu0 %v14010_v48 }
 0xaa7   : > { %5685 = vmatmul.f32.gmra.mxu1 %v5171_v10 }
 0xaab   : > { %v14015_v50 = vpop.f32.mrf.mxu1 }
 0xaac   : > { %16885 = vst [vmem:[#allocation125_spill] sm:$0xff] %v14015_v50 }
 0xaaf   : > { %5688 = vmatmul.f32.gmra.mxu1 %v5172_v42 }
 0xab3   : > { %v14017_v43 = vpop.f32.mrf.mxu1 }
 0xab4   : > { %16886 = vst [vmem:[#allocation126_spill] sm:$0xff] %v14017_v43 }
 0xabb   : > { %v14019_v25 = vpop.f32.mrf.mxu1 }
 0xabc   : > { %16887 = vst [vmem:[#allocation127_spill] sm:$0xff] %v14019_v25 }
 0xac3   : > { %v14021_v54 = vpop.f32.mrf.mxu1 }
 0xac4   : > { %16888 = vst [vmem:[#allocation128_spill] sm:$0xff] %v14021_v54 }
 0xacb   : > { %v14023_v52 = vpop.f32.mrf.mxu1 }
 0xacc   : > { %16889 = vst [vmem:[#allocation129_spill] sm:$0xff] %v14023_v52 }
 0xad3   : > { %v14025_v28 = vpop.f32.mrf.mxu1 }
 0xadb   : > { %v14028_v27 = vpop.f32.mrf.mxu1 }
 0xae6   : > { %v3110_v18 = vpop.xlane.xlu0 %3109 }
 0xae7   : > { %9029 = vrcp.f32 %v3110_v18  ;;  %v4832_v29 = vand.u32 2147483648, %v3110_v18  ;;  %v4830_v56 = vand.u32 2147483647, %v3110_v18  ;;  %vm4826_vm15 = vweird.f32 %v3110_v18 }
 0xae9   : > { %v4833_v10 = vor.u32 1.1754944e-38, %v4832_v29  ;;  %vm4831_vm2 = vcmp.eq.f32.partialorder %v4830_v56, 8.507059e+37 }
 0xaed   : > { %v9030_v35 = vpop.eup %9029 }
 0xaee   : > { %v4822_v23 = vmul.f32 %v9030_v35, %v3110_v18  ;;  %v2500_v9 = vpop.xlane.xlu0 %2499  ;;  %vm4827_vm14 = vweird.f32 %v9030_v35  ;;  %v14035_v18 = vpop.f32.mrf.mxu1 }
 0xaef   : > { %v3112_v59 = vpop.xlane.xlu2 %3111  ;;  %v2628_v8 = vsub.f32 %v13838_v60, %v2500_v9  ;;  %vm4828_vm1 = vmor %vm4826_vm15, %vm4827_vm14 }
 0xaf0   : > { %v4823_v33 = vsub.f32 1.0, %v4822_v23  ;;  %9031 = vrcp.f32 %v3112_v59  ;;  %vm4841_vm4 = vweird.f32 %v3112_v59 }
 0xaf1   : > { %v2883_v19 = vmul.f32 1.442695, %v2628_v8 }
 0xaf2   : > { %v4824_v20 = vmul.f32 %v9030_v35, %v4823_v33 }
 0xaf3   : > { %9033 = vpow2.f32 %v2883_v19  ;;  %v4847_v19 = vand.u32 2147483648, %v3112_v59 }
 0xaf4   : > { %v4825_v46 = vadd.f32 %v9030_v35, %v4824_v20  ;;  %v4845_v20 = vand.u32 2147483647, %v3112_v59 }
 0xaf5   : > { %v4848_v56 = vor.u32 1.1754944e-38, %v4847_v19 }
 0xaf6   : > { %v9032_v42 = vpop.eup %9031  ;;  %v3114_v54 = vpop.xlane.xlu0 %3113  ;;  %v4829_v60 = vsel %vm4828_vm1, %v9030_v35, %v4825_v46  ;;  %vm4846_vm6 = vcmp.eq.f32.partialorder %v4845_v20, 8.507059e+37 }
 0xaf7   : > { %v4837_v9 = vmul.f32 %v9032_v42, %v3112_v59  ;;  %v2498_v25 = vpop.xlane.xlu2 %2497  ;;  %9035 = vrcp.f32 %v3114_v54  ;;  %v4834_v58 = vsel %vm4831_vm2, %v4833_v10, %v4829_v60  ;;  %vm4842_vm3 = vweird.f32 %v9032_v42 }
 0xaf8   : > { %v2627_v23 = vsub.f32 %v13880_v2, %v2498_v25  ;;  %v5173_v33 = vmul.f32 %v13816_v63, %v4834_v58  ;;  %9037 = vpow2.f32 %v2879_v44  ;;  %vm4843_vm5 = vmor %vm4841_vm4, %vm4842_vm3  ;;  %v4860_v19 = vand.u32 2147483647, %v3114_v54 }
 0xaf9   : > { %v14032_v47 = vpop.eup %9033  ;;  %v4838_v8 = vsub.f32 1.0, %v4837_v9  ;;  %vm4856_vm8 = vweird.f32 %v3114_v54 }
 0xafa   : > { %v2881_v38 = vmul.f32 1.442695, %v2627_v23  ;;  %3139 = vadd.xlane.f32.xlu2 %v14032_v47  ;;  %5691 = vmatmul.f32.gmra.mxu1 %v5173_v33  ;;  %v14039_v29 = vadd.f32 %v13580_v32, %v5173_v33  ;;  %v4862_v33 = vand.u32 2147483648, %v3114_v54  ;;  %vm4861_vm10 = vcmp.eq.f32.partialorder %v4860_v19, 8.507059e+37 }
 0xafb   : > { %v4839_v35 = vmul.f32 %v9032_v42, %v4838_v8 }
 0xafc   : > { %16890 = vst [vmem:[#allocation130_spill] sm:$0xff] %v14039_v29  ;;  %9039 = vpow2.f32 %v2881_v38  ;;  %v4863_v20 = vor.u32 1.1754944e-38, %v4862_v33 }
 0xafd   : > { %v9036_v2 = vpop.eup %9035  ;;  %v4840_v25 = vadd.f32 %v9032_v42, %v4839_v35 }
 0xafe   : > { %v4852_v63 = vmul.f32 %v9036_v2, %v3114_v54  ;;  %v2494_v46 = vpop.xlane.xlu0 %2493  ;;  %v14042_v9 = vpop.eup %9037  ;;  %vm4857_vm7 = vweird.f32 %v9036_v2 }
 0xaff   : > { %v2488_v44 = vpop.xlane.xlu2 %2487  ;;  %v2625_v10 = vsub.f32 %v13898_v57, %v2494_v46  ;;  %v4844_v60 = vsel %vm4843_vm5, %v9032_v42, %v4840_v25  ;;  %vm4858_vm9 = vmor %vm4856_vm8, %vm4857_vm7 }
 0xb00   : > { %v4853_v23 = vsub.f32 1.0, %v4852_v63  ;;  %v2622_v58 = vsub.f32 %v13895_v16, %v2488_v44  ;;  %v4849_v8 = vsel %vm4846_vm6, %v4848_v56, %v4844_v60  ;;  %v14053_v16 = vpop.f32.mrf.mxu1 }
 0xb01   : > { %v14045_v32 = vpop.xlane.xlu1 %3115  ;;  %v2877_v59 = vmul.f32 1.442695, %v2625_v10  ;;  %v5174_v57 = vmul.f32 %v13844_v4, %v4849_v8 }
 0xb02   : > { %9041 = vrcp.f32 %v14045_v32  ;;  %v14048_v38 = vpop.eup %9039  ;;  %v4854_v35 = vmul.f32 %v9036_v2, %v4853_v23  ;;  %v2871_v43 = vmul.f32 1.442695, %v2622_v58  ;;  %3135 = vadd.xlane.f32.xlu2 %v14042_v9  ;;  %vm4871_vm12 = vweird.f32 %v14045_v32 }
 0xb03   : > { %9043 = vpow2.f32 %v2877_v59  ;;  %3137 = vadd.xlane.f32.xlu1 %v14048_v38  ;;  %5694 = vmatmul.f32.gmra.mxu1 %v5174_v57  ;;  %v14056_v25 = vadd.f32 %v13614_v30, %v5174_v57 }
 0xb04   : > { %9045 = vpow2.f32 %v2871_v43  ;;  %v4855_v42 = vadd.f32 %v9036_v2, %v4854_v35 }
 0xb05   : > { %16891 = vst [vmem:[#allocation131_spill] sm:$0xff] %v14056_v25 }
 0xb06   : > { %v2490_v56 = vpop.xlane.xlu0 %2489  ;;  %v4859_v63 = vsel %vm4858_vm9, %v9036_v2, %v4855_v42 }
 0xb07   : > { %v2492_v46 = vpop.xlane.xlu2 %2491  ;;  %v2623_v44 = vsub.f32 %v13964_v17, %v2490_v56  ;;  %v4864_v10 = vsel %vm4861_vm10, %v4863_v20, %v4859_v63 }
 0xb08   : > { %v9042_v4 = vpop.eup %9041  ;;  %v2624_v54 = vsub.f32 %v13968_v22, %v2492_v46  ;;  %v5175_v23 = vmul.f32 %v13871_v53, %v4864_v10  ;;  %v14071_v53 = vpop.f32.mrf.mxu1  ;;  %v4877_v22 = vand.u32 2147483648, %v14045_v32 }
 0xb09   : > { %v4867_v60 = vmul.f32 %v9042_v4, %v14045_v32  ;;  %v3118_v43 = vpop.xlane.xlu1 %3117  ;;  %v14062_v58 = vpop.eup %9043  ;;  %v2873_v30 = vmul.f32 1.442695, %v2623_v44  ;;  %vm4872_vm11 = vweird.f32 %v9042_v4 }
 0xb0a   : > { %9047 = vrcp.f32 %v3118_v43  ;;  %v14064_v8 = vpop.eup %9045  ;;  %v2875_v33 = vmul.f32 1.442695, %v2624_v54  ;;  %v14067_v59 = vadd.f32 %v13646_v39, %v5175_v23  ;;  %v4875_v39 = vand.u32 2147483647, %v14045_v32  ;;  %vm4873_vm13 = vmor %vm4871_vm12, %vm4872_vm11 }
 0xb0b   : > { %v4868_v2 = vsub.f32 1.0, %v4867_v60  ;;  %9049 = vpow2.f32 %v2873_v30  ;;  %3127 = vadd.xlane.f32.xlu0 %v14064_v8  ;;  %3133 = vadd.xlane.f32.xlu1 %v14062_v58  ;;  %v4878_v44 = vor.u32 1.1754944e-38, %v4877_v22  ;;  %v4892_v60 = vand.u32 2147483648, %v3118_v43 }
 0xb0c   : > { %16892 = vst [vmem:[#allocation132_spill] sm:$0xff] %v14067_v59  ;;  %9051 = vpow2.f32 %v2875_v33  ;;  %5697 = vmatmul.f32.gmra.mxu1 %v5175_v23  ;;  %vm4876_vm14 = vcmp.eq.f32.partialorder %v4875_v39, 8.507059e+37  ;;  %v4890_v23 = vand.u32 2147483647, %v3118_v43  ;;  %vm4886_vm1 = vweird.f32 %v3118_v43 }
 0xb0d   : > { %v4869_v17 = vmul.f32 %v9042_v4, %v4868_v2 }
 0xb0e   : > { %vm4891_vm5 = vcmp.eq.f32.partialorder %v4890_v23, 8.507059e+37 }
 0xb0f   : > { %v14074_v35 = vpop.xlane.xlu2 %3119  ;;  %v4870_v57 = vadd.f32 %v9042_v4, %v4869_v17  ;;  %v4893_v17 = vor.u32 1.1754944e-38, %v4892_v60 }
 0xb10   : > { %v9048_v19 = vpop.eup %9047  ;;  %9053 = vrcp.f32 %v14074_v35  ;;  %vm4901_vm3 = vweird.f32 %v14074_v35  ;;  %v4905_v23 = vand.u32 2147483647, %v14074_v35 }
 0xb11   : > { %v4882_v42 = vmul.f32 %v9048_v19, %v3118_v43  ;;  %v14077_v20 = vpop.xlane.xlu1 %3123  ;;  %v14080_v56 = vpop.xlane.xlu0 %3121  ;;  %v4874_v54 = vsel %vm4873_vm13, %v9042_v4, %v4870_v57  ;;  %vm4887_vm15 = vweird.f32 %v9048_v19  ;;  %v4907_v43 = vand.u32 2147483648, %v14074_v35 }
 0xb12   : > { %v14082_v63 = vpop.eup %9049  ;;  %9055 = vrcp.f32 %v14077_v20  ;;  %v4879_v2 = vsel %vm4876_vm14, %v4878_v44, %v4874_v54  ;;  %vm4931_vm2 = vweird.f32 %v14077_v20  ;;  %vm4888_vm4 = vmor %vm4886_vm1, %vm4887_vm15  ;;  %v14095_v57 = vpop.f32.mrf.mxu1  ;;  %v4920_v34 = vand.u32 2147483647, %v14080_v56 }
 0xb13   : > { %v14086_v46 = vpop.eup %9051  ;;  %v4883_v10 = vsub.f32 1.0, %v4882_v42  ;;  %9057 = vrcp.f32 %v14080_v56  ;;  %3129 = vadd.xlane.f32.xlu0 %v14082_v63  ;;  %v5176_v32 = vmul.f32 %v13939_v21, %v4879_v2  ;;  %v4937_v21 = vand.u32 2147483648, %v14077_v20 }
 0xb14   : > { %3131 = vadd.xlane.f32.xlu2 %v14086_v46  ;;  %vm4916_vm9 = vweird.f32 %v14080_v56  ;;  %vm4906_vm11 = vcmp.eq.f32.partialorder %v4905_v23, 8.507059e+37  ;;  %vm4921_vm15 = vcmp.eq.f32.partialorder %v4920_v34, 8.507059e+37 }
 0xb15   : > { %v4884_v30 = vmul.f32 %v9048_v19, %v4883_v10  ;;  %5700 = vmatmul.f32.gmra.mxu1 %v5176_v32 }
 0xb16   : > { %v9054_v33 = vpop.eup %9053 }
 0xb17   : > { %v4885_v22 = vadd.f32 %v9048_v19, %v4884_v30  ;;  %v4897_v50 = vmul.f32 %v9054_v33, %v14074_v35  ;;  %v4922_v30 = vand.u32 2147483648, %v14080_v56  ;;  %vm4902_vm6 = vweird.f32 %v9054_v33 }
 0xb18   : > { %v9056_v42 = vpop.eup %9055  ;;  %vm4903_vm10 = vmor %vm4901_vm3, %vm4902_vm6 }
 0xb19   : > { %v9058_v4 = vpop.eup %9057  ;;  %v4927_v39 = vmul.f32 %v9056_v42, %v14077_v20  ;;  %v3126_v44 = vpop.xlane.xlu0 %3125  ;;  %v4889_v10 = vsel %vm4888_vm4, %v9048_v19, %v4885_v22  ;;  %v4898_v60 = vsub.f32 1.0, %v4897_v50  ;;  %vm4932_vm7 = vweird.f32 %v9056_v42 }
 0xb1a   : > { %v4912_v54 = vmul.f32 %v9058_v4, %v14080_v56  ;;  %9059 = vrcp.f32 %v3126_v44  ;;  %v4894_v5 = vsel %vm4891_vm5, %v4893_v17, %v4889_v10  ;;  %v4935_v50 = vand.u32 2147483647, %v14077_v20  ;;  %vm4933_vm12 = vmor %vm4931_vm2, %vm4932_vm7 }
 0xb1b   : > { %v4928_v2 = vsub.f32 1.0, %v4927_v39  ;;  %v4899_v49 = vmul.f32 %v9054_v33, %v4898_v60  ;;  %v5177_v29 = vmul.f32 %v13980_v14, %v4894_v5  ;;  %v14107_v19 = vadd.f32 %v13709_v26, %v5176_v32  ;;  %v14120_v32 = vpop.f32.mrf.mxu1 }
 0xb1c   : > { %v4913_v52 = vsub.f32 1.0, %v4912_v54  ;;  %vm4917_vm8 = vweird.f32 %v9058_v4  ;;  %v4938_v39 = vor.u32 1.1754944e-38, %v4937_v21  ;;  %v4908_v10 = vor.u32 1.1754944e-38, %v4907_v43 }
 0xb1d   : > { %v4929_v25 = vmul.f32 %v9056_v42, %v4928_v2  ;;  %v4900_v59 = vadd.f32 %v9054_v33, %v4899_v49  ;;  %v14110_v17 = vadd.f32 %v13703_v6, %v5177_v29  ;;  %v4923_v60 = vor.u32 1.1754944e-38, %v4922_v30  ;;  %5703 = vmatmul.f32.gmra.mxu1 %v5177_v29  ;;  %vm4918_vm13 = vmor %vm4916_vm9, %vm4917_vm8 }
 0xb1e   : > { %v4914_v22 = vmul.f32 %v9058_v4, %v4913_v52  ;;  %vm4936_vm14 = vcmp.eq.f32.partialorder %v4935_v50, 8.507059e+37  ;;  %v4952_v21 = vand.u32 2147483648, %v3126_v44  ;;  %vm4946_vm2 = vweird.f32 %v3126_v44 }
 0xb1f   : > { %v4930_v14 = vadd.f32 %v9056_v42, %v4929_v25  ;;  %v4904_v54 = vsel %vm4903_vm10, %v9054_v33, %v4900_v59 }
 0xb20   : > { %v9060_v5 = vpop.eup %9059  ;;  %v4915_v26 = vadd.f32 %v9058_v4, %v4914_v22  ;;  %v4909_v49 = vsel %vm4906_vm11, %v4908_v10, %v4904_v54  ;;  %v4953_v2 = vor.u32 1.1754944e-38, %v4952_v21  ;;  %v9122_v21 = vld [vmem:[%s16539_s14 + $0xa0] sm:$0xff] }
 0xb21   : > { %v4942_v6 = vmul.f32 %v9060_v5, %v3126_v44  ;;  %v4934_v52 = vsel %vm4933_vm12, %v9056_v42, %v4930_v14  ;;  %v5178_v35 = vmul.f32 %v13990_v55, %v4909_v49  ;;  %vm4947_vm1 = vweird.f32 %v9060_v5  ;;  %v16901_v49 = vld [vmem:[#allocation60_spill] sm:$0xff] }
 0xb22   : > { %v4919_v56 = vsel %vm4918_vm13, %v9058_v4, %v4915_v26  ;;  %v4939_v25 = vsel %vm4936_vm14, %v4938_v39, %v4934_v52  ;;  %v4950_v42 = vand.u32 2147483647, %v3126_v44  ;;  %vm4948_vm3 = vmor %vm4946_vm2, %vm4947_vm1  ;;  %v14159_v26 = vld [vmem:[#allocation9 + $0x18] sm:$0xff] }
 0xb23   : > { %v4943_v29 = vsub.f32 1.0, %v4942_v6  ;;  %v4924_v59 = vsel %vm4921_vm15, %v4923_v60, %v4919_v56  ;;  %v5180_v33 = vmul.f32 %v13994_v37, %v4939_v25  ;;  %v14125_v43 = vadd.f32 %v13732_v24, %v5178_v35  ;;  %v14133_v23 = vpop.f32.mrf.mxu1  ;;  %v16900_v60 = vld [vmem:[#allocation50_spill] sm:$0xff]  ;;  %v16902_v56 = vld [vmem:[#allocation61_spill] sm:$0xff]  ;;  %8393 = vmatpush.msra.mxu2 %v14159_v26 }
 0xb24   : > { %v5179_v20 = vmul.f32 %v13997_v1, %v4924_v59  ;;  %vm4951_vm4 = vcmp.eq.f32.partialorder %v4950_v42, 8.507059e+37  ;;  %v9119_v6 = vld [vmem:[%s16539_s14 + $0x88] sm:$0xff]  ;;  %v14178_v42 = vld [vmem:[#allocation9 + $0x10] sm:$0xff] }
 0xb25   : > { %v4944_v30 = vmul.f32 %v9060_v5, %v4943_v29  ;;  %v14128_v55 = vadd.f32 %v13760_v11, %v5180_v33  ;;  %5706 = vmatmul.f32.gmra.mxu1 %v5178_v35  ;;  %v5757_v52 = vmul.f32 %v9119_v6, %v16901_v49  ;;  %v9120_v35 = vld [vmem:[%s16539_s14 + $0x90] sm:$0xff]  ;;  %v9121_v29 = vld [vmem:[%s16539_s14 + $0x98] sm:$0xff]  ;;  %v16903_v59 = vld [vmem:[#allocation54_spill] sm:$0xff]  ;;  %8394 = vmatpush.msra.mxu2 %v14178_v42 }
 0xb26   : > { %v14131_v34 = vadd.f32 %v13764_v61, %v5179_v20  ;;  %v5758_v25 = vmul.f32 %v9120_v35, %v16902_v56  ;;  %v16908_v6 = vld [vmem:[#allocation104_spill] sm:$0xff]  ;;  %v16909_v56 = vld [vmem:[#allocation71_spill] sm:$0xff] }
 0xb27   : > { %v4945_v4 = vadd.f32 %v9060_v5, %v4944_v30  ;;  %v9126_v35 = vld [vmem:[%s16539_s14 + $0x110] sm:$0xff] }
 0xb29   : > { %v4949_v37 = vsel %vm4948_vm3, %v9060_v5, %v4945_v4  ;;  %v9118_v5 = vld [vmem:[%s16539_s14 + $0x10] sm:$0xff]  ;;  %v9123_v4 = vld [vmem:[%s16539_s14 + $0x18] sm:$0xff] }
 0xb2a   : > { %v4954_v1 = vsel %vm4951_vm4, %v4953_v2, %v4949_v37  ;;  %v5742_v54 = vmul.f32 %v9118_v5, %v16900_v60  ;;  %v16906_v2 = vld [vmem:[#allocation101_spill] sm:$0xff] }
 0xb2b   : > { %v5181_v24 = vmul.f32 %v14010_v48, %v4954_v1  ;;  %v14139_v11 = vpop.f32.mrf.mxu1  ;;  %v16899_v48 = vld [vmem:[#allocation95_spill] sm:$0xff]  ;;  %v5743_v37 = vmul.f32 %v9123_v4, %v16906_v2  ;;  %v9125_v60 = vld [vmem:[%s16539_s14 + $0x20] sm:$0xff] }
 0xb2c   : > { %16893 = vst [vmem:[#allocation133_spill] sm:$0xff] %v14139_v11  ;;  %v9124_v1 = vld [vmem:[%s16539_s14 + $0x108] sm:$0xff]  ;;  %v5898_v5 = vsel %vm776_vm0, %v5742_v54, 0.0  ;;  %v5744_v49 = vmul.f32 %v9125_v60, %v16908_v6  ;;  %v9127_v54 = vld [vmem:[%s16539_s14 + $0x118] sm:$0xff]  ;;  %v9128_v2 = vld [vmem:[%s16539_s14 + $0x120] sm:$0xff] }
 0xb2d   : > { %v14137_v50 = vadd.f32 %v13823_v51, %v5181_v24  ;;  %5709 = vmatmul.f32.gmra.mxu1 %v5179_v20  ;;  %v9117_v51 = vld [vmem:[%s16539_s14 + $0x8] sm:$0xff]  ;;  %16905 = vst [vmem:[#allocation95_spill] sm:$0xff] %v14178_v42 }
 0xb2e   : > { %v5741_v14 = vmul.f32 %v9117_v51, %v16899_v48  ;;  %v16904_v20 = vld [vmem:[#allocation55_spill] sm:$0xff]  ;;  %v14212_v60 = vld [vmem:[#allocation9] sm:$0xff] }
 0xb2f   : > { %v5760_v30 = vmul.f32 %v9122_v21, %v16904_v20  ;;  %v5884_v21 = vsel %vm776_vm0, %v5757_v52, 0.0  ;;  %v16911_v20 = vld [vmem:[#allocation72_spill] sm:$0xff]  ;;  %16913 = vst [vmem:[#allocation60_spill] sm:$0xff] %v14212_v60  ;;  %v9129_v6 = vld [vmem:[%s16539_s14 + $0x188] sm:$0xff] }
 0xb30   : > { %v5883_v48 = vsel %vm776_vm0, %v5741_v14, 0.0  ;;  %v5899_v14 = vsel %vm776_vm0, %v5758_v25, 0.0  ;;  %v5775_v4 = vmul.f32 %v9127_v54, %v16911_v20 }
 0xb31   : > { %v5929_v25 = vsel %vm776_vm0, %v5760_v30, 0.0  ;;  %v9131_v30 = vld [vmem:[%s16539_s14 + $0x198] sm:$0xff] }
 0xb33   : > { %v14141_v61 = vpop.f32.mrf.mxu1 }
 0xb34   : > { %16894 = vst [vmem:[#allocation134_spill] sm:$0xff] %v14141_v61 }
 0xb35   : > { %5712 = vmatmul.f32.gmra.mxu1 %v5180_v33  ;;  %v5759_v33 = vmul.f32 %v9121_v29, %v16903_v59  ;;  %v5774_v29 = vmul.f32 %v9126_v35, %v16909_v56  ;;  %v14199_v59 = vld [vmem:[#allocation9 + $0x8] sm:$0xff]  ;;  %v5789_v35 = vmul.f32 %v9129_v6, %v12913_v12  ;;  %v5928_v12 = vsel %vm776_vm0, %v5744_v49, 0.0 }
 0xb36   : > { %16910 = vst [vmem:[#allocation50_spill] sm:$0xff] %v14199_v59  ;;  %8395 = vmatpush.msra.mxu2 %v14199_v59  ;;  %v9130_v56 = vld [vmem:[%s16539_s14 + $0x190] sm:$0xff]  ;;  %v5885_v6 = vadd.f32 %v5884_v21, %v5883_v48  ;;  %v9132_v48 = vld [vmem:[%s16539_s14 + $0x208] sm:$0xff] }
 0xb37   : > { %v5914_v52 = vsel %vm776_vm0, %v5759_v33, 0.0  ;;  %v5790_v54 = vmul.f32 %v9130_v56, %v12938_v15  ;;  %v5900_v15 = vadd.f32 %v5899_v14, %v5898_v5  ;;  %v5901_v56 = vsel %vm776_vm0, %v5774_v29, 0.0  ;;  %v9133_v21 = vld [vmem:[%s16539_s14 + $0x210] sm:$0xff] }
 0xb38   : > { %8396 = vmatpush.msra.mxu2 %v14212_v60  ;;  %v5805_v5 = vmul.f32 %v9132_v48, %v13339_v31  ;;  %v16915_v14 = vld [vmem:[#allocation92_spill] sm:$0xff]  ;;  %v16917_v31 = vld [vmem:[#allocation105_spill] sm:$0xff]  ;;  %v16919_v48 = vld [vmem:[#allocation38_spill] sm:$0xff] }
 0xb39   : > { %v5902_v49 = vadd.f32 %v5901_v56, %v5900_v15  ;;  %v9137_v56 = vld [vmem:[%s16539_s14 + $0x128] sm:$0xff] }
 0xb3b   : > { %v14143_v44 = vpop.f32.mrf.mxu1 }
 0xb3c   : > { %16895 = vst [vmem:[#allocation135_spill] sm:$0xff] %v14143_v44 }
 0xb3d   : > { %5715 = vmatmul.f32.gmra.mxu1 %v5181_v24  ;;  %v16907_v24 = vld [vmem:[#allocation103_spill] sm:$0xff] }
 0xb3e   : > { %v5773_v51 = vmul.f32 %v9124_v1, %v16907_v24  ;;  %v16912_v1 = vld [vmem:[#allocation73_spill] sm:$0xff] }
 0xb3f   : > { %v5776_v24 = vmul.f32 %v9128_v2, %v16912_v1  ;;  %v5913_v2 = vsel %vm776_vm0, %v5743_v37, 0.0  ;;  %v5791_v1 = vmul.f32 %v9131_v30, %v12994_v3  ;;  %v5930_v37 = vadd.f32 %v5929_v25, %v5928_v12 }
 0xb40   : > { %v5886_v33 = vsel %vm776_vm0, %v5773_v51, 0.0  ;;  %v5916_v51 = vsel %vm776_vm0, %v5775_v4, 0.0  ;;  %v5888_v3 = vsel %vm776_vm0, %v5789_v35, 0.0  ;;  %v5903_v30 = vsel %vm776_vm0, %v5790_v54, 0.0  ;;  %v9135_v35 = vld [vmem:[%s16539_s14 + $0x28] sm:$0xff] }
 0xb41   : > { %v5887_v44 = vadd.f32 %v5886_v33, %v5885_v6  ;;  %v5918_v29 = vsel %vm776_vm0, %v5791_v1, 0.0  ;;  %v5806_v4 = vmul.f32 %v9133_v21, %v16915_v14  ;;  %v14259_v54 = vmul.f32 %v9135_v35, %v16917_v31  ;;  %v16918_v33 = vld [vmem:[#allocation63_spill] sm:$0xff]  ;;  %v16920_v35 = vld [vmem:[#allocation84_spill] sm:$0xff] }
 0xb42   : > { %v14273_v21 = vmul.f32 %v9137_v56, %v16919_v48  ;;  %v16923_v48 = vld [vmem:[#allocation117_spill] sm:$0xff] }
 0xb43   : > { %v14145_v22 = vpop.f32.mrf.mxu1  ;;  %v5889_v14 = vadd.f32 %v5888_v3, %v5887_v44  ;;  %v5905_v44 = vsel %vm776_vm0, %v5806_v4, 0.0  ;;  %v9142_v4 = vld [vmem:[%s16539_s14 + $0x308] sm:$0xff] }
 0xb44   : > { %16896 = vst [vmem:[#allocation136_spill] sm:$0xff] %v14145_v22 }
 0xb4b   : > { %v14147_v39 = vpop.f32.mrf.mxu1 }
 0xb4c   : > { %16897 = vst [vmem:[#allocation137_spill] sm:$0xff] %v14147_v39  ;;  %v5931_v39 = vsel %vm776_vm0, %v5776_v24, 0.0  ;;  %v9134_v24 = vld [vmem:[%s16539_s14 + $0x218] sm:$0xff] }
 0xb4d   : > { %v14267_v6 = vadd.f32 %v5931_v39, %v5930_v37  ;;  %v5890_v39 = vsel %vm776_vm0, %v5805_v5, 0.0  ;;  %v16921_v37 = vld [vmem:[#allocation115_spill] sm:$0xff] }
 0xb4e   : > { %v5891_v61 = vadd.f32 %v5890_v39, %v5889_v14 }
 0xb53   : > { %v14149_v10 = vpop.f32.mrf.mxu1 }
 0xb54   : > { %16898 = vst [vmem:[#allocation138_spill] sm:$0xff] %v14149_v10  ;;  %v5915_v10 = vadd.f32 %v5914_v52, %v5913_v2  ;;  %v16916_v52 = vld [vmem:[#allocation94_spill] sm:$0xff] }
 0xb55   : > { %v5807_v25 = vmul.f32 %v9134_v24, %v16916_v52  ;;  %v9136_v2 = vld [vmem:[%s16539_s14 + $0xa8] sm:$0xff]  ;;  %v5904_v24 = vadd.f32 %v5903_v30, %v5902_v49  ;;  %v9138_v52 = vld [vmem:[%s16539_s14 + $0x1a0] sm:$0xff]  ;;  %v9140_v30 = vld [vmem:[%s16539_s14 + $0x290] sm:$0xff] }
 0xb56   : > { %v14265_v1 = vmul.f32 %v9136_v2, %v16918_v33  ;;  %v5917_v12 = vadd.f32 %v5916_v51, %v5915_v10  ;;  %v5792_v31 = vmul.f32 %v9138_v52, %v16920_v35  ;;  %v9139_v10 = vld [vmem:[%s16539_s14 + $0x288] sm:$0xff]  ;;  %v16922_v49 = vld [vmem:[#allocation116_spill] sm:$0xff] }
 0xb57   : > { %v5821_v51 = vmul.f32 %v9139_v10, %v16921_v37  ;;  %v5920_v3 = vsel %vm776_vm0, %v5807_v25, 0.0  ;;  %v5822_v5 = vmul.f32 %v9140_v30, %v16922_v49  ;;  %v5837_v25 = vmul.f32 %v9142_v4, %v14025_v28  ;;  %v9143_v37 = vld [vmem:[%s16539_s14 + $0x220] sm:$0xff] }
 0xb58   : > { %v5919_v2 = vadd.f32 %v5918_v29, %v5917_v12  ;;  %v9141_v12 = vld [vmem:[%s16539_s14 + $0x298] sm:$0xff]  ;;  %v14306_v10 = vsel %vm776_vm0, %v5792_v31, 0.0  ;;  %v5906_v11 = vadd.f32 %v5905_v44, %v5904_v24 }
 0xb59   : > { %v5823_v52 = vmul.f32 %v9141_v12, %v16923_v48  ;;  %v16924_v30 = vld [vmem:[#allocation97_spill] sm:$0xff]  ;;  %v9144_v12 = vld [vmem:[%s16539_s14 + $0x310] sm:$0xff]  ;;  %v5892_v4 = vsel %vm776_vm0, %v5821_v51, 0.0  ;;  %v5894_v59 = vsel %vm776_vm0, %v5837_v25, 0.0 }
 0xb5a   : > { %v5808_v49 = vmul.f32 %v9143_v37, %v16924_v30  ;;  %v5838_v48 = vmul.f32 %v9144_v12, %v14028_v27  ;;  %v5921_v60 = vadd.f32 %v5920_v3, %v5919_v2  ;;  %v5907_v37 = vsel %vm776_vm0, %v5822_v5, 0.0 }
 0xb5b   : > { %v14238_v22 = vpop.f32.mrf.mxu1  ;;  %v5922_v30 = vsel %vm776_vm0, %v5823_v52, 0.0  ;;  %v5908_v2 = vadd.f32 %v5907_v37, %v5906_v11  ;;  %v9145_v11 = vld [vmem:[%s16539_s14 + $0x318] sm:$0xff] }
 0xb5c   : > { %16914 = vst [vmem:[#allocation61_spill] sm:$0xff] %v14238_v22  ;;  %v14328_v51 = vsel %vm776_vm0, %v5808_v49, 0.0  ;;  %v5909_v42 = vsel %vm776_vm0, %v5838_v48, 0.0  ;;  %v14335_v3 = vadd.f32 %v5922_v30, %v5921_v60  ;;  %v9146_v30 = vld [vmem:[%s16539_s14 + $0x388] sm:$0xff] }
 0xb5d   : > { %v14343_v49 = vadd.f32 %v5909_v42, %v5908_v2 }
 0xb6d   : > { %v14224_v20 = vpop.xlane.xlu2 %3139 }
 0xb6e   : > { %9061 = vrcp.f32 %v14224_v20  ;;  %v5057_v28 = vand.u32 2147483648, %v14224_v20  ;;  %v5055_v22 = vand.u32 2147483647, %v14224_v20  ;;  %vm5051_vm6 = vweird.f32 %v14224_v20 }
 0xb70   : > { %v5058_v14 = vor.u32 1.1754944e-38, %v5057_v28  ;;  %vm5056_vm8 = vcmp.eq.f32.partialorder %v5055_v22, 8.507059e+37  ;;  %v5839_v22 = vmul.f32 %v9145_v11, %v14035_v18 }
 0xb74   : > { %v9062_v15 = vpop.eup %9061 }
 0xb75   : > { %v5047_v33 = vmul.f32 %v9062_v15, %v14224_v20  ;;  %v14285_v56 = vpop.xlane.xlu2 %3135  ;;  %vm5052_vm5 = vweird.f32 %v9062_v15 }
 0xb76   : > { %v14293_v29 = vpop.xlane.xlu1 %3137  ;;  %9063 = vrcp.f32 %v14285_v56  ;;  %vm5053_vm7 = vmor %vm5051_vm6, %vm5052_vm5  ;;  %v5025_v60 = vand.u32 2147483647, %v14285_v56  ;;  %v5027_v48 = vand.u32 2147483648, %v14285_v56  ;;  %vm5021_vm11 = vweird.f32 %v14285_v56 }
 0xb77   : > { %v5048_v35 = vsub.f32 1.0, %v5047_v33  ;;  %9065 = vrcp.f32 %v14293_v29  ;;  %v14317_v33 = vpop.f32.mrf.mxu1  ;;  %v5040_v28 = vand.u32 2147483647, %v14293_v29  ;;  %v5042_v37 = vand.u32 2147483648, %v14293_v29 }
 0xb78   : > { %vm5036_vm12 = vweird.f32 %v14293_v29  ;;  %vm14378_vm14 = vcmp.eq.f32.partialorder %v5025_v60, 8.507059e+37 }
 0xb79   : > { %v5049_v31 = vmul.f32 %v9062_v15, %v5048_v35  ;;  %v5893_v35 = vadd.f32 %v5892_v4, %v5891_v61  ;;  %vm14390_vm1 = vcmp.eq.f32.partialorder %v5040_v28, 8.507059e+37  ;;  %v5043_v60 = vor.u32 1.1754944e-38, %v5042_v37 }
 0xb7b   : > { %v5050_v27 = vadd.f32 %v9062_v15, %v5049_v31  ;;  %v5895_v20 = vadd.f32 %v5894_v59, %v5893_v35  ;;  %v14366_v35 = vsel %vm776_vm0, %v5839_v22, 0.0 }
 0xb7c   : > { %v14325_v12 = vpop.eup %9063 }
 0xb7d   : > { %v14331_v24 = vpop.eup %9065  ;;  %v5054_v39 = vsel %vm5053_vm7, %v9062_v15, %v5050_v27  ;;  %v5017_v44 = vmul.f32 %v14325_v12, %v14285_v56  ;;  %vm5022_vm9 = vweird.f32 %v14325_v12 }
 0xb7e   : > { %v5032_v5 = vmul.f32 %v14331_v24, %v14293_v29  ;;  %v14339_v52 = vpop.xlane.xlu1 %3133  ;;  %v14341_v61 = vpop.xlane.xlu0 %3127  ;;  %v5059_v25 = vsel %vm5056_vm8, %v5058_v14, %v5054_v39  ;;  %vm5037_vm10 = vweird.f32 %v14331_v24  ;;  %vm14374_vm13 = vmor %vm5021_vm11, %vm5022_vm9  ;;  %v9147_v39 = vld [vmem:[%s16539_s14 + $0x390] sm:$0xff] }
 0xb7f   : > { %v5018_v15 = vsub.f32 1.0, %v5017_v44  ;;  %9067 = vrcp.f32 %v14339_v52  ;;  %v14357_v31 = vmul.f32 %v14032_v47, %v5059_v25  ;;  %vm14383_vm15 = vmor %vm5036_vm12, %vm5037_vm10  ;;  %vm5006_vm2 = vweird.f32 %v14339_v52 }
 0xb80   : > { %v5033_v59 = vsub.f32 1.0, %v5032_v5  ;;  %9069 = vrcp.f32 %v14341_v61  ;;  %v5695_v4 = vpop.f32.mrf.mxu1  ;;  %v5012_v37 = vand.u32 2147483648, %v14339_v52  ;;  %vm4961_vm3 = vweird.f32 %v14341_v61 }
 0xb81   : > { %v5019_v42 = vmul.f32 %v14325_v12, %v5018_v15  ;;  %v5853_v27 = vmul.f32 %v9146_v30, %v5695_v4  ;;  %v5300_v47 = vadd.f32 %v14001_v13, %v14357_v31  ;;  %v5028_v13 = vor.u32 1.1754944e-38, %v5027_v48 }
 0xb82   : > { %v5034_v18 = vmul.f32 %v14331_v24, %v5033_v59 }
 0xb83   : > { %v5020_v14 = vadd.f32 %v14325_v12, %v5019_v42  ;;  %v5896_v5 = vsel %vm776_vm0, %v5853_v27, 0.0  ;;  %v5316_v22 = vmul.f32 0.125, %v5300_v47  ;;  %v4967_v27 = vand.u32 2147483648, %v14341_v61 }
 0xb84   : > { %v5035_v2 = vadd.f32 %v14331_v24, %v5034_v18  ;;  %v5897_v11 = vadd.f32 %v5896_v5, %v5895_v20 }
 0xb85   : > { %v9068_v25 = vpop.eup %9067  ;;  %v5024_v29 = vsel %vm14374_vm13, %v14325_v12, %v5020_v14  ;;  %v5010_v12 = vand.u32 2147483647, %v14339_v52  ;;  %5318 = vmatpush.xpose.msra.mxu0 %v5316_v22 }
 0xb86   : > { %v9070_v15 = vpop.eup %9069  ;;  %v5002_v42 = vmul.f32 %v9068_v25, %v14339_v52  ;;  %v14397_v18 = vpop.xlane.xlu0 %3129  ;;  %v5039_v20 = vsel %vm14383_vm15, %v14331_v24, %v5035_v2  ;;  %8227 = vmatmul.msk.f32.vlgmr.msra.gmra.mxu2 %vm776_vm0, %v5897_v11  ;;  %v5029_v30 = vsel %vm14378_vm14, %v5028_v13, %v5024_v29  ;;  %vm5007_vm4 = vweird.f32 %v9068_v25 }
 0xb87   : > { %v14395_v4 = vpop.xlane.xlu2 %3131  ;;  %v4957_v48 = vmul.f32 %v9070_v15, %v14341_v61  ;;  %v5044_v47 = vsel %vm14390_vm1, %v5043_v60, %v5039_v20  ;;  %v14422_v13 = vmul.f32 %v14042_v9, %v5029_v30  ;;  %vm4962_vm5 = vweird.f32 %v9070_v15  ;;  %vm14434_vm7 = vmor %vm5006_vm2, %vm5007_vm4 }
 0xb88   : > { %9071 = vrcp.f32 %v14395_v4  ;;  %v5003_v28 = vsub.f32 1.0, %v5002_v42  ;;  %v14419_v56 = vmul.f32 %v14048_v38, %v5044_v47  ;;  %v4965_v11 = vand.u32 2147483647, %v14341_v61  ;;  %vm4963_vm8 = vmor %vm4961_vm3, %vm4962_vm5 }
 0xb89   : > { %9073 = vrcp.f32 %v14397_v18  ;;  %v4958_v24 = vsub.f32 1.0, %v4957_v48  ;;  %v5698_v14 = vpop.f32.mrf.mxu1  ;;  %vm14425_vm6 = vcmp.eq.f32.partialorder %v5010_v12, 8.507059e+37  ;;  %v5013_v9 = vor.u32 1.1754944e-38, %v5012_v37 }
 0xb8a   : > { %v5004_v2 = vmul.f32 %v9068_v25, %v5003_v28  ;;  %v5854_v5 = vmul.f32 %v9147_v39, %v5698_v14  ;;  %v5293_v60 = vadd.f32 %v14006_v0, %v14419_v56  ;;  %v4968_v20 = vor.u32 1.1754944e-38, %v4967_v27 }
 0xb8b   : > { %v4959_v44 = vmul.f32 %v9070_v15, %v4958_v24  ;;  %v5286_v14 = vadd.f32 %v13978_v41, %v14422_v13  ;;  %vm4966_vm9 = vcmp.eq.f32.partialorder %v4965_v11, 8.507059e+37  ;;  %v4995_v47 = vand.u32 2147483647, %v14395_v4 }
 0xb8c   : > { %v5005_v22 = vadd.f32 %v9068_v25, %v5004_v2  ;;  %v5911_v59 = vsel %vm776_vm0, %v5854_v5, 0.0  ;;  %v5315_v24 = vmul.f32 0.125, %v5293_v60  ;;  %v4997_v2 = vand.u32 2147483648, %v14395_v4 }
 0xb8d   : > { %v5912_v48 = vadd.f32 %v5911_v59, %v14343_v49  ;;  %v4960_v12 = vadd.f32 %v9070_v15, %v4959_v44  ;;  %v4982_v39 = vand.u32 2147483648, %v14397_v18  ;;  %v5314_v44 = vmul.f32 0.125, %v5286_v14 }
 0xb8e   : > { %v9072_v42 = vpop.eup %9071  ;;  %v5009_v0 = vsel %vm14434_vm7, %v9068_v25, %v5005_v22  ;;  %5319 = vmatpush.xpose.msra.mxu0 %v5315_v24  ;;  %v9148_v22 = vld [vmem:[%s16539_s14 + $0x2a0] sm:$0xff]  ;;  %v4980_v60 = vand.u32 2147483647, %v14397_v18  ;;  %vm4991_vm12 = vweird.f32 %v14395_v4  ;;  %vm4976_vm14 = vweird.f32 %v14397_v18 }
 0xb8f   : > { %v9074_v28 = vpop.eup %9073  ;;  %v4987_v30 = vmul.f32 %v9072_v42, %v14395_v4  ;;  %8228 = vmatmul.msk.f32.gmra.mxu2 %vm776_vm0, %v5912_v48  ;;  %v4964_v49 = vsel %vm4963_vm8, %v9070_v15, %v4960_v12  ;;  %v5014_v37 = vsel %vm14425_vm6, %v5013_v9, %v5009_v0  ;;  %vm4992_vm10 = vweird.f32 %v9072_v42  ;;  %v9149_v12 = vld [vmem:[%s16539_s14 + $0x398] sm:$0xff] }
 0xb90   : > { %v4972_v52 = vmul.f32 %v9074_v28, %v14397_v18  ;;  %v4969_v41 = vsel %vm4966_vm9, %v4968_v20, %v4964_v49  ;;  %v14453_v61 = vmul.f32 %v14062_v58, %v5014_v37  ;;  %v16937_v58 = vld [vmem:[#allocation118_spill] sm:$0xff]  ;;  %vm4977_vm11 = vweird.f32 %v9074_v28  ;;  %vm14472_vm13 = vmor %vm4991_vm12, %vm4992_vm10 }
 0xb91   : > { %v4988_v27 = vsub.f32 1.0, %v4987_v30  ;;  %v14458_v5 = vmul.f32 %v14064_v8, %v4969_v41  ;;  %v5824_v29 = vmul.f32 %v9148_v22, %v16937_v58  ;;  %v5925_v8 = vadd.f32 %v14366_v35, %v14335_v3  ;;  %v9150_v35 = vld [vmem:[%s16539_s14 + $0x320] sm:$0xff]  ;;  %vm4978_vm1 = vmor %vm4976_vm14, %vm4977_vm11 }
 0xb92   : > { %v4973_v25 = vsub.f32 1.0, %v4972_v52  ;;  %v5279_v11 = vadd.f32 %v13957_v36, %v14453_v61  ;;  %v5701_v9 = vpop.f32.mrf.mxu1  ;;  %5320 = vmatpush.xpose.msra.mxu0 %v5314_v44  ;;  %v4998_v48 = vor.u32 1.1754944e-38, %v4997_v2  ;;  %v5840_v4 = vmul.f32 %v9150_v35, %v14053_v16  ;;  %v16940_v41 = vld [vmem:[#allocation85_spill] sm:$0xff]  ;;  %v16944_v20 = vld [vmem:[#allocation106_spill] sm:$0xff] }
 0xb93   : > { %v4989_v15 = vmul.f32 %v9072_v42, %v4988_v27  ;;  %5718 = vmatmul.f32.gmra.mxu1 %v14458_v5  ;;  %v5855_v30 = vmul.f32 %v9149_v12, %v5701_v9  ;;  %vm4996_vm15 = vcmp.eq.f32.partialorder %v4995_v47, 8.507059e+37  ;;  %v4983_v24 = vor.u32 1.1754944e-38, %v4982_v39  ;;  %v9152_v39 = vld [vmem:[%s16539_s14 + $0x228] sm:$0xff]  ;;  %v9155_v9 = vld [vmem:[%s16539_s14 + $0x3a0] sm:$0xff] }
 0xb94   : > { %v4974_v59 = vmul.f32 %v9074_v28, %v4973_v25  ;;  %v5313_v36 = vmul.f32 0.125, %v5279_v11  ;;  %vm4981_vm2 = vcmp.eq.f32.partialorder %v4980_v60, 8.507059e+37  ;;  %v5934_v49 = vadd.f32 %v14306_v10, %v14267_v6  ;;  %v9154_v60 = vld [vmem:[%s16539_s14 + $0x2a8] sm:$0xff] }
 0xb95   : > { %v4990_v38 = vadd.f32 %v9072_v42, %v4989_v15  ;;  %v5926_v18 = vsel %vm776_vm0, %v5855_v30, 0.0  ;;  %v5944_v47 = vsel %vm776_vm0, %v14265_v1, 0.0  ;;  %v5946_v1 = vsel %vm776_vm0, %v14273_v21, 0.0  ;;  %v16941_v15 = vld [vmem:[#allocation99_spill] sm:$0xff]  ;;  %v16942_v21 = vld [vmem:[#allocation64_spill] sm:$0xff]  ;;  %v16945_v35 = vld [vmem:[#allocation74_spill] sm:$0xff] }
 0xb96   : > { %v4975_v3 = vadd.f32 %v9074_v28, %v4974_v59  ;;  %v5927_v37 = vadd.f32 %v5926_v18, %v5925_v8  ;;  %5321 = vmatpush.xpose.msra.mxu0 %v5313_v36  ;;  %v5936_v6 = vadd.f32 %v14328_v51, %v5934_v49  ;;  %v5809_v44 = vmul.f32 %v9152_v39, %v16941_v15  ;;  %v16943_v8 = vld [vmem:[#allocation119_spill] sm:$0xff] }
 0xb97   : > { %v4994_v14 = vsel %vm14472_vm13, %v9072_v42, %v4990_v38  ;;  %v9151_v42 = vld [vmem:[%s16539_s14 + $0x1a8] sm:$0xff]  ;;  %v5825_v38 = vmul.f32 %v9154_v60, %v16943_v8  ;;  %v9164_v60 = vld [vmem:[%s16539_s14 + $0x38] sm:$0xff] }
 0xb98   : > { %v4979_v0 = vsel %vm4978_vm1, %v9074_v28, %v4975_v3  ;;  %v4999_v52 = vsel %vm4996_vm15, %v4998_v48, %v4994_v14  ;;  %v5793_v2 = vmul.f32 %v9151_v42, %v16940_v41  ;;  %v5937_v28 = vsel %vm776_vm0, %v5824_v29, 0.0  ;;  %8229 = vmatmul.msk.f32.gmra.mxu2 %vm776_vm0, %v5927_v37  ;;  %v9157_v3 = vld [vmem:[%s16539_s14 + $0x130] sm:$0xff]  ;;  %v9158_v14 = vld [vmem:[%s16539_s14 + $0x328] sm:$0xff] }
 0xb99   : > { %v4984_v27 = vsel %vm4981_vm2, %v4983_v24, %v4979_v0  ;;  %v5184_v16 = vmul.f32 %v14086_v46, %v4999_v52  ;;  %v5943_v46 = vsel %vm776_vm0, %v14259_v54, 0.0  ;;  %v5938_v11 = vadd.f32 %v5937_v28, %v5936_v6  ;;  %v9153_v54 = vld [vmem:[%s16539_s14 + $0xb0] sm:$0xff] }
 0xb9a   : > { %v5183_v25 = vmul.f32 %v14082_v63, %v4984_v27  ;;  %v5939_v63 = vsel %vm776_vm0, %v5840_v4, 0.0  ;;  %v5945_v51 = vadd.f32 %v5944_v47, %v5943_v46  ;;  %v5704_v22 = vpop.f32.mrf.mxu1  ;;  %v5762_v29 = vmul.f32 %v9153_v54, %v16942_v21  ;;  %v16946_v27 = vld [vmem:[#allocation121_spill] sm:$0xff]  ;;  %v9159_v41 = vld [vmem:[%s16539_s14 + $0x1b0] sm:$0xff]  ;;  %v16948_v46 = vld [vmem:[#allocation102_spill] sm:$0xff] }
 0xb9b   : > { %v5272_v10 = vadd.f32 %v13961_v45, %v5184_v16  ;;  %v5948_v59 = vsel %vm776_vm0, %v5793_v2, 0.0  ;;  %v5856_v36 = vmul.f32 %v9155_v9, %v5704_v22  ;;  %v5940_v30 = vadd.f32 %v5939_v63, %v5938_v11  ;;  %v16947_v2 = vld [vmem:[#allocation40_spill] sm:$0xff]  ;;  %v16949_v22 = vld [vmem:[#allocation62_spill] sm:$0xff]  ;;  %v16951_v8 = vld [vmem:[#allocation107_spill] sm:$0xff] }
 0xb9c   : > { %5721 = vmatmul.f32.gmra.mxu1 %v5183_v25  ;;  %v5265_v45 = vadd.f32 %v13891_v40, %v5183_v25  ;;  %v9156_v40 = vld [vmem:[%s16539_s14 + $0x30] sm:$0xff]  ;;  %v5947_v12 = vadd.f32 %v5946_v1, %v5945_v51  ;;  %v5778_v4 = vmul.f32 %v9157_v3, %v16945_v35  ;;  %v5950_v24 = vsel %vm776_vm0, %v5809_v44, 0.0  ;;  %v9161_v11 = vld [vmem:[%s16539_s14 + $0xb8] sm:$0xff] }
 0xb9d   : > { %v5312_v58 = vmul.f32 0.125, %v5272_v10  ;;  %v5746_v48 = vmul.f32 %v9156_v40, %v16944_v20  ;;  %v5841_v18 = vmul.f32 %v9158_v14, %v14071_v53  ;;  %v5941_v0 = vsel %vm776_vm0, %v5856_v36, 0.0  ;;  %v9162_v54 = vld [vmem:[%s16539_s14 + $0x2b0] sm:$0xff]  ;;  %v9165_v40 = vld [vmem:[%s16539_s14 + $0x138] sm:$0xff] }
 0xb9e   : > { %v5949_v52 = vadd.f32 %v5948_v59, %v5947_v12  ;;  %v5942_v49 = vadd.f32 %v5941_v0, %v5940_v30  ;;  %v5311_v37 = vmul.f32 0.125, %v5265_v45  ;;  %v5258_v47 = vadd.f32 %v16946_v27, %v14458_v5  ;;  %v9160_v5 = vld [vmem:[%s16539_s14 + $0x230] sm:$0xff]  ;;  %v9167_v0 = vld [vmem:[%s16539_s14 + $0x1b8] sm:$0xff] }
 0xb9f   : > { %5322 = vmatpush.xpose.msra.mxu0 %v5312_v58  ;;  %v5959_v42 = vsel %vm776_vm0, %v5762_v29, 0.0  ;;  %v5794_v28 = vmul.f32 %v9159_v41, %v16947_v2  ;;  %v5952_v25 = vsel %vm776_vm0, %v5825_v38, 0.0  ;;  %v5958_v53 = vsel %vm776_vm0, %v5746_v48, 0.0  ;;  %v16950_v21 = vld [vmem:[#allocation120_spill] sm:$0xff]  ;;  %v16952_v20 = vld [vmem:[#allocation39_spill] sm:$0xff] }
 0xba0   : > { %v5951_v6 = vadd.f32 %v5950_v24, %v5949_v52  ;;  %8230 = vmatmul.msk.f32.gmra.mxu2 %vm776_vm0, %v5942_v49  ;;  %v5961_v10 = vsel %vm776_vm0, %v5778_v4, 0.0  ;;  %v5810_v1 = vmul.f32 %v9160_v5, %v16948_v46  ;;  %v5954_v39 = vsel %vm776_vm0, %v5841_v18, 0.0  ;;  %v9166_v30 = vld [vmem:[%s16539_s14 + $0x330] sm:$0xff]  ;;  %v16953_v52 = vld [vmem:[#allocation41_spill] sm:$0xff] }
 0xba1   : > { %v5960_v15 = vadd.f32 %v5959_v42, %v5958_v53  ;;  %v5310_v51 = vmul.f32 0.125, %v5258_v47  ;;  %v5763_v58 = vmul.f32 %v9161_v11, %v16949_v22  ;;  %v5963_v45 = vsel %vm776_vm0, %v5794_v28, 0.0  ;;  %v16954_v42 = vld [vmem:[#allocation110_spill] sm:$0xff]  ;;  %v16955_v5 = vld [vmem:[#allocation96_spill] sm:$0xff] }
 0xba2   : > { %v5953_v44 = vadd.f32 %v5952_v25, %v5951_v6  ;;  %v5707_v63 = vpop.f32.mrf.mxu1  ;;  %v5826_v29 = vmul.f32 %v9162_v54, %v16950_v21  ;;  %v5747_v38 = vmul.f32 %v9164_v60, %v16951_v8  ;;  %v5779_v48 = vmul.f32 %v9165_v40, %v16952_v20  ;;  %v9174_v21 = vld [vmem:[%s16539_s14 + $0x338] sm:$0xff] }
 0xba3   : > { %5323 = vmatpush.xpose.msra.mxu0 %v5311_v37  ;;  %v5962_v9 = vadd.f32 %v5961_v10, %v5960_v15  ;;  %v5965_v12 = vsel %vm776_vm0, %v5810_v1, 0.0  ;;  %v5842_v3 = vmul.f32 %v9166_v30, %v14095_v57  ;;  %v5309_v14 = vmul.f32 0.125, %v14137_v50  ;;  %v9168_v50 = vld [vmem:[%s16539_s14 + $0x238] sm:$0xff]  ;;  %v9169_v10 = vld [vmem:[%s16539_s14 + $0xc0] sm:$0xff]  ;;  %v16959_v30 = vld [vmem:[#allocation47_spill] sm:$0xff] }
 0xba4   : > { %5724 = vmatmul.f32.gmra.mxu1 %v5184_v16  ;;  %v9163_v16 = vld [vmem:[%s16539_s14 + $0x3a8] sm:$0xff]  ;;  %v5955_v36 = vadd.f32 %v5954_v39, %v5953_v44  ;;  %v5974_v18 = vsel %vm776_vm0, %v5763_v58, 0.0  ;;  %v5795_v49 = vmul.f32 %v9167_v0, %v16953_v52  ;;  %v5967_v37 = vsel %vm776_vm0, %v5826_v29, 0.0  ;;  %v9170_v39 = vld [vmem:[%s16539_s14 + $0x2b8] sm:$0xff]  ;;  %v9173_v58 = vld [vmem:[%s16539_s14 + $0x140] sm:$0xff] }
 0xba5   : > { %v5857_v59 = vmul.f32 %v9163_v16, %v5707_v63  ;;  %v5964_v4 = vadd.f32 %v5963_v45, %v5962_v9  ;;  %v5973_v57 = vsel %vm776_vm0, %v5747_v38, 0.0  ;;  %v5976_v47 = vsel %vm776_vm0, %v5779_v48, 0.0  ;;  %v16956_v63 = vld [vmem:[#allocation108_spill] sm:$0xff]  ;;  %v16957_v45 = vld [vmem:[#allocation75_spill] sm:$0xff]  ;;  %v9175_v9 = vld [vmem:[%s16539_s14 + $0x1c0] sm:$0xff] }
 0xba6   : > { %v5811_v41 = vmul.f32 %v9168_v50, %v16954_v42  ;;  %v5969_v2 = vsel %vm776_vm0, %v5842_v3, 0.0  ;;  %v5975_v28 = vadd.f32 %v5974_v18, %v5973_v57  ;;  %v5308_v53 = vmul.f32 0.125, %v14128_v55  ;;  %v9172_v55 = vld [vmem:[%s16539_s14 + $0x40] sm:$0xff] }
 0xba7   : > { %5324 = vmatpush.xpose.msra.mxu0 %v5310_v51  ;;  %v5956_v35 = vsel %vm776_vm0, %v5857_v59, 0.0  ;;  %v5966_v27 = vadd.f32 %v5965_v12, %v5964_v4  ;;  %v5764_v46 = vmul.f32 %v9169_v10, %v16955_v5  ;;  %v5978_v1 = vsel %vm776_vm0, %v5795_v49, 0.0  ;;  %v9177_v52 = vld [vmem:[%s16539_s14 + $0x2c0] sm:$0xff] }
 0xba8   : > { %v5957_v24 = vadd.f32 %v5956_v35, %v5955_v36  ;;  %v5827_v15 = vmul.f32 %v9170_v39, %v13902_v62  ;;  %v5748_v51 = vmul.f32 %v9172_v55, %v16956_v63  ;;  %v5977_v11 = vadd.f32 %v5976_v47, %v5975_v28  ;;  %v16958_v36 = vld [vmem:[#allocation87_spill] sm:$0xff]  ;;  %v9180_v5 = vld [vmem:[%s16539_s14 + $0x3c0] sm:$0xff] }
 0xba9   : > { %v5968_v25 = vadd.f32 %v5967_v37, %v5966_v27  ;;  %v5780_v62 = vmul.f32 %v9173_v58, %v16957_v45  ;;  %v5980_v54 = vsel %vm776_vm0, %v5811_v41, 0.0  ;;  %v5843_v29 = vmul.f32 %v9174_v21, %v14120_v32  ;;  %v9178_v37 = vld [vmem:[%s16539_s14 + $0x3b8] sm:$0xff]  ;;  %v9181_v39 = vld [vmem:[%s16539_s14 + $0x80] sm:$0xff] }
 0xbaa   : > { %8231 = vmatmul.msk.f32.gmra.mxu2 %vm776_vm0, %v5957_v24  ;;  %v5710_v6 = vpop.f32.mrf.mxu1  ;;  %v5979_v59 = vadd.f32 %v5978_v1, %v5977_v11  ;;  %v5307_v8 = vmul.f32 0.125, %v14131_v34  ;;  %v5989_v38 = vsel %vm776_vm0, %v5764_v46, 0.0  ;;  %v5796_v40 = vmul.f32 %v9175_v9, %v16958_v36  ;;  %v9176_v34 = vld [vmem:[%s16539_s14 + $0x240] sm:$0xff] }
 0xbab   : > { %5325 = vmatpush.xpose.msra.mxu0 %v5309_v14  ;;  %v5970_v22 = vadd.f32 %v5969_v2, %v5968_v25  ;;  %v5982_v20 = vsel %vm776_vm0, %v5827_v15, 0.0  ;;  %v5988_v32 = vsel %vm776_vm0, %v5748_v51, 0.0  ;;  %v5991_v12 = vsel %vm776_vm0, %v5780_v62, 0.0  ;;  %v16960_v15 = vld [vmem:[#allocation53_spill] sm:$0xff] }
 0xbac   : > { %5727 = vmatmul.f32.gmra.mxu1 %v14453_v61  ;;  %v9171_v61 = vld [vmem:[%s16539_s14 + $0x3b0] sm:$0xff]  ;;  %v5981_v48 = vadd.f32 %v5980_v54, %v5979_v59  ;;  %v5812_v3 = vmul.f32 %v9176_v34, %v16959_v30  ;;  %v5984_v35 = vsel %vm776_vm0, %v5843_v29, 0.0  ;;  %v5990_v4 = vadd.f32 %v5989_v38, %v5988_v32  ;;  %v16962_v63 = vld [vmem:[#allocation93_spill] sm:$0xff]  ;;  %v16968_v32 = vld [vmem:[#allocation130_spill] sm:$0xff] }
 0xbad   : > { %v5858_v44 = vmul.f32 %v9171_v61, %v5710_v6  ;;  %v5306_v18 = vmul.f32 0.125, %v14125_v43  ;;  %v5993_v0 = vsel %vm776_vm0, %v5796_v40, 0.0  ;;  %v5828_v49 = vmul.f32 %v9177_v52, %v13954_v7  ;;  %v9179_v43 = vld [vmem:[%s16539_s14 + $0x340] sm:$0xff]  ;;  %v16964_v54 = vld [vmem:[#allocation83_spill] sm:$0xff] }
 0xbae   : > { %v5983_v24 = vadd.f32 %v5982_v20, %v5981_v48  ;;  %v5992_v57 = vadd.f32 %v5991_v12, %v5990_v4  ;;  %v5995_v47 = vsel %vm776_vm0, %v5812_v3, 0.0  ;;  %v5844_v50 = vmul.f32 %v9179_v43, %v14133_v23  ;;  %v9183_v11 = vld [vmem:[%s16539_s14 + $0x100] sm:$0xff]  ;;  %v16965_v29 = vld [vmem:[#allocation131_spill] sm:$0xff]  ;;  %v16972_v43 = vld [vmem:[#allocation60_spill] sm:$0xff] }
 0xbaf   : > { %5326 = vmatpush.xpose.msra.mxu0 %v5308_v53  ;;  %v5971_v16 = vsel %vm776_vm0, %v5858_v44, 0.0  ;;  %v5305_v2 = vmul.f32 0.125, %v14110_v17  ;;  %v5997_v28 = vsel %vm776_vm0, %v5828_v49, 0.0  ;;  %v5304_v23 = vmul.f32 0.125, %v14107_v19  ;;  %v16961_v44 = vld [vmem:[#allocation132_spill] sm:$0xff]  ;;  %v9182_v19 = vld [vmem:[%s16539_s14] sm:$0xff] }
 0xbb0   : > { %v5972_v60 = vadd.f32 %v5971_v16, %v5970_v22  ;;  %v5994_v41 = vadd.f32 %v5993_v0, %v5992_v57  ;;  %v5999_v6 = vsel %vm776_vm0, %v5844_v50, 0.0  ;;  %v5756_v61 = vmul.f32 %v9181_v39, %v16960_v15  ;;  %v16963_v22 = vld [vmem:[#allocation68_spill] sm:$0xff]  ;;  %v9184_v62 = vld [vmem:[%s16539_s14 + $0x180] sm:$0xff]  ;;  %v16966_v38 = vld [vmem:[#allocation91_spill] sm:$0xff] }
 0xbb1   : > { %v5303_v55 = vmul.f32 0.125, %v16961_v44  ;;  %v5740_v51 = vmul.f32 %v9182_v19, %v16962_v63  ;;  %v5772_v58 = vmul.f32 %v9183_v11, %v16963_v22  ;;  %v5788_v21 = vmul.f32 %v9184_v62, %v16964_v54  ;;  %v9186_v40 = vld [vmem:[%s16539_s14 + $0x280] sm:$0xff]  ;;  %v9193_v39 = vld [vmem:[%s16539_s14 + $0x248] sm:$0xff]  ;;  %v9194_v44 = vld [vmem:[%s16539_s14 + $0xd0] sm:$0xff] }
 0xbb2   : > { %8232 = vmatmul.msk.f32.gmra.mxu2 %vm776_vm0, %v5972_v60  ;;  %v5713_v14 = vpop.f32.mrf.mxu1  ;;  %v5996_v25 = vadd.f32 %v5995_v47, %v5994_v41  ;;  %v5869_v45 = vsel %vm776_vm0, %v5756_v61, 0.0  ;;  %v5302_v16 = vmul.f32 0.125, %v16965_v29  ;;  %v16967_v20 = vld [vmem:[#allocation114_spill] sm:$0xff]  ;;  %v5301_v12 = vmul.f32 0.125, %v16968_v32  ;;  %v16977_v15 = vld [vmem:[#allocation57_spill] sm:$0xff]  ;;  %v9197_v29 = vld [vmem:[%s16539_s14 + $0x150] sm:$0xff] }
 0xbb3   : > { %5327 = vmatpush.xpose.msra.mxu0 %v5307_v8  ;;  %v5859_v27 = vmul.f32 %v9178_v37, %v5713_v14  ;;  %v5868_v59 = vsel %vm776_vm0, %v5740_v51, 0.0  ;;  %v5871_v60 = vsel %vm776_vm0, %v5772_v58, 0.0  ;;  %v9185_v8 = vld [vmem:[%s16539_s14 + $0x200] sm:$0xff]  ;;  %v5873_v36 = vsel %vm776_vm0, %v5788_v21, 0.0  ;;  %v9195_v51 = vld [vmem:[%s16539_s14 + $0x2c8] sm:$0xff]  ;;  %v9196_v58 = vld [vmem:[%s16539_s14 + $0x50] sm:$0xff] }
 0xbb4   : > { %5730 = vmatmul.f32.gmra.mxu1 %v14422_v13  ;;  %v5985_v13 = vadd.f32 %v5984_v35, %v5983_v24  ;;  %v5998_v53 = vadd.f32 %v5997_v28, %v5996_v25  ;;  %v5870_v9 = vadd.f32 %v5869_v45, %v5868_v59  ;;  %v5820_v48 = vmul.f32 %v9186_v40, %v16967_v20  ;;  %v9187_v3 = vld [vmem:[%s16539_s14 + $0x300] sm:$0xff]  ;;  %v5317_v24 = vld [vmem:[#allocation20] sm:$0xff]  ;;  %v16983_v32 = vld [vmem:[#allocation44_spill] sm:$0xff] }
 0xbb5   : > { %v5986_v42 = vsel %vm776_vm0, %v5859_v27, 0.0  ;;  %v16969_v35 = vld [vmem:[#allocation129_spill] sm:$0xff]  ;;  %v16970_v27 = vld [vmem:[#allocation95_spill] sm:$0xff]  ;;  %v16971_v47 = vld [vmem:[#allocation50_spill] sm:$0xff]  ;;  %v5813_v61 = vmul.f32 %v9193_v39, %v16977_v15 }
 0xbb6   : > { %v5987_v7 = vadd.f32 %v5986_v42, %v5985_v13  ;;  %v6000_v17 = vadd.f32 %v5999_v6, %v5998_v53  ;;  %v5872_v34 = vadd.f32 %v5871_v60, %v5870_v9  ;;  %v5836_v4 = vmul.f32 %v9187_v3, %v16969_v35  ;;  %v9188_v0 = vld [vmem:[%s16539_s14 + $0x380] sm:$0xff]  ;;  %v9191_v25 = vld [vmem:[%s16539_s14 + $0x148] sm:$0xff]  ;;  %v16975_v6 = vld [vmem:[#allocation76_spill] sm:$0xff] }
 0xbb7   : > { %5328 = vmatpush.xpose.msra.mxu0 %v5306_v18  ;;  %v5877_v18 = vsel %vm776_vm0, %v5820_v48, 0.0  ;;  %v5852_v52 = vmul.f32 %v9188_v0, %v14317_v33  ;;  %v9189_v33 = vld [vmem:[%s16539_s14 + $0xc8] sm:$0xff]  ;;  %v16973_v42 = vld [vmem:[#allocation65_spill] sm:$0xff]  ;;  %v5781_v53 = vmul.f32 %v9191_v25, %v16975_v6  ;;  %v6010_v60 = vsel %vm776_vm0, %v5813_v61, 0.0  ;;  %v9200_v48 = vld [vmem:[%s16539_s14 + $0x1d0] sm:$0xff] }
 0xbb8   : > { %v5874_v14 = vadd.f32 %v5873_v36, %v5872_v34  ;;  %v5879_v37 = vsel %vm776_vm0, %v5836_v4, 0.0  ;;  %v5765_v41 = vmul.f32 %v9189_v33, %v16973_v42  ;;  %v16979_v11 = vld [vmem:[#allocation122_spill] sm:$0xff]  ;;  %v16980_v45 = vld [vmem:[#allocation45_spill] sm:$0xff]  ;;  %v9208_v15 = vld [vmem:[%s10002_s1 + $0x10] sm:$0xff] }
 0xbb9   : > { %v5881_v13 = vsel %vm776_vm0, %v5852_v52, 0.0  ;;  %v5829_v22 = vmul.f32 %v9195_v51, %v16979_v11  ;;  %v5750_v62 = vmul.f32 %v9196_v58, %v16980_v45  ;;  %v9199_v9 = vld [vmem:[%s10002_s1 + $0x8] sm:$0xff]  ;;  %v9206_v25 = vld [vmem:[%s16539_s14 + $0x158] sm:$0xff] }
 0xbba   : > { %8233 = vmatmul.msk.f32.gmra.mxu2 %vm776_vm0, %v5987_v7  ;;  %v5716_v10 = vpop.f32.mrf.mxu1  ;;  %v9190_v7 = vld [vmem:[%s16539_s14 + $0x48] sm:$0xff] }
 0xbbb   : > { %5329 = vmatpush.xpose.msra.mxu0 %v5305_v2  ;;  %v5860_v46 = vmul.f32 %v9180_v5, %v5716_v10  ;;  %v16974_v2 = vld [vmem:[#allocation109_spill] sm:$0xff]  ;;  %v6004_v10 = vsel %vm776_vm0, %v5765_v41, 0.0  ;;  %v16976_v5 = vld [vmem:[#allocation43_spill] sm:$0xff]  ;;  %v6012_v34 = vsel %vm776_vm0, %v5829_v22, 0.0  ;;  %v6018_v35 = vsel %vm776_vm0, %v5750_v62, 0.0  ;;  %v16988_v6 = vld [vmem:[#allocation78_spill] sm:$0xff] }
 0xbbc   : > { %5733 = vmatmul.f32.gmra.mxu1 %v14419_v56  ;;  %v5749_v28 = vmul.f32 %v9190_v7, %v16974_v2  ;;  %v9204_v33 = vld [vmem:[%s16539_s14 + $0x3c8] sm:$0xff]  ;;  %v9205_v41 = vld [vmem:[%s16539_s14 + $0x58] sm:$0xff] }
 0xbbd   : > { %v6001_v1 = vsel %vm776_vm0, %v5860_v46, 0.0  ;;  %v16987_v7 = vld [vmem:[#allocation56_spill] sm:$0xff] }
 0xbbe   : > { %v6002_v56 = vadd.f32 %v6001_v1, %v6000_v17  ;;  %v6003_v17 = vsel %vm776_vm0, %v5749_v28, 0.0  ;;  %v6006_v1 = vsel %vm776_vm0, %v5781_v53, 0.0  ;;  %v5751_v2 = vmul.f32 %v9205_v41, %v16987_v7 }
 0xbbf   : > { %5330 = vmatpush.xpose.msra.mxu0 %v5304_v23  ;;  %v9192_v23 = vld [vmem:[%s16539_s14 + $0x1c8] sm:$0xff]  ;;  %v5783_v53 = vmul.f32 %v9206_v25, %v16988_v6  ;;  %v9218_v25 = vld [vmem:[%s16539_s14 + $0x260] sm:$0xff]  ;;  %v16998_v6 = vld [vmem:[#allocation52_spill] sm:$0xff] }
 0xbc0   : > { %v5797_v46 = vmul.f32 %v9192_v23, %v16976_v5  ;;  %v6033_v45 = vsel %vm776_vm0, %v5751_v2, 0.0 }
 0xbc1   : > { %v6036_v62 = vsel %vm776_vm0, %v5783_v53, 0.0  ;;  %v5816_v53 = vmul.f32 %v9218_v25, %v16998_v6 }
 0xbc2   : > { %8234 = vmatmul.msk.f32.gmra.mxu2 %vm776_vm0, %v6002_v56  ;;  %v6005_v56 = vadd.f32 %v6004_v10, %v6003_v17  ;;  %v6008_v63 = vsel %vm776_vm0, %v5797_v46, 0.0  ;;  %v9207_v46 = vld [vmem:[%s16539_s14 + $0x350] sm:$0xff]  ;;  %v16989_v17 = vld [vmem:[#allocation134_spill] sm:$0xff] }
 0xbc3   : > { %5331 = vmatpush.xpose.msra.mxu0 %v5303_v55  ;;  %v16978_v55 = vld [vmem:[#allocation98_spill] sm:$0xff] }
 0xbc4   : > { %5736 = vmatmul.f32.gmra.mxu1 %v14357_v31  ;;  %v5804_v31 = vmul.f32 %v9185_v8, %v16966_v38  ;;  %v5766_v19 = vmul.f32 %v9194_v44, %v16978_v55  ;;  %v6007_v54 = vadd.f32 %v6006_v1, %v6005_v56  ;;  %v9198_v8 = vld [vmem:[%s16539_s14 + $0x348] sm:$0xff]  ;;  %v16982_v38 = vld [vmem:[#allocation133_spill] sm:$0xff]  ;;  %v5846_v1 = vmul.f32 %v9207_v46, %v16989_v17 }
 0xbc5   : > { %v9219_v17 = vld [vmem:[%s16539_s14 + $0xe8] sm:$0xff] }
 0xbc6   : > { %v5875_v30 = vsel %vm776_vm0, %v5804_v31, 0.0  ;;  %v5845_v31 = vmul.f32 %v9198_v8, %v16982_v38  ;;  %v6009_v40 = vadd.f32 %v6008_v63, %v6007_v54  ;;  %v6019_v20 = vsel %vm776_vm0, %v5766_v19, 0.0  ;;  %v9209_v19 = vld [vmem:[%s16539_s14 + $0x1d8] sm:$0xff]  ;;  %v16990_v63 = vld [vmem:[#allocation46_spill] sm:$0xff] }
 0xbc7   : > { %5332 = vmatpush.xpose.msra.mxu0 %v5302_v16  ;;  %v5876_v49 = vadd.f32 %v5875_v30, %v5874_v14  ;;  %v16981_v16 = vld [vmem:[#allocation77_spill] sm:$0xff]  ;;  %v16984_v14 = vld [vmem:[#allocation86_spill] sm:$0xff]  ;;  %v6020_v52 = vadd.f32 %v6019_v20, %v6018_v35  ;;  %v5799_v51 = vmul.f32 %v9209_v19, %v16990_v63 }
 0xbc8   : > { %v5782_v59 = vmul.f32 %v9197_v29, %v16981_v16  ;;  %v6011_v3 = vadd.f32 %v6010_v60, %v6009_v40  ;;  %v6014_v0 = vsel %vm776_vm0, %v5845_v31, 0.0  ;;  %v9210_v54 = vld [vmem:[%s16539_s14 + $0x258] sm:$0xff]  ;;  %v6029_v16 = vsel %vm776_vm0, %v5846_v1, 0.0  ;;  %v9211_v38 = vld [vmem:[%s16539_s14 + $0xe0] sm:$0xff] }
 0xbc9   : > { %v5878_v57 = vadd.f32 %v5877_v18, %v5876_v49  ;;  %v16992_v31 = vld [vmem:[#allocation69_spill] sm:$0xff]  ;;  %v6038_v40 = vsel %vm776_vm0, %v5799_v51, 0.0  ;;  %v16999_v1 = vld [vmem:[#allocation66_spill] sm:$0xff] }
 0xbca   : > { %v6021_v4 = vsel %vm776_vm0, %v5782_v59, 0.0  ;;  %v6013_v49 = vadd.f32 %v6012_v34, %v6011_v3  ;;  %v9212_v20 = vld [vmem:[%s16539_s14 + $0x2d8] sm:$0xff]  ;;  %v9222_v51 = vld [vmem:[%s16539_s14 + $0x68] sm:$0xff] }
 0xbcb   : > { %5333 = vmatpush.xpose.msra.mxu0 %v5301_v12  ;;  %v5798_v12 = vmul.f32 %v9200_v48, %v16983_v32  ;;  %v6022_v28 = vadd.f32 %v6021_v4, %v6020_v52  ;;  %v16993_v48 = vld [vmem:[#allocation124_spill] sm:$0xff] }
 0xbcc   : > { %v6015_v10 = vadd.f32 %v6014_v0, %v6013_v49  ;;  %v5831_v32 = vmul.f32 %v9212_v20, %v16993_v48  ;;  %v16994_v3 = vld [vmem:[#allocation48_spill] sm:$0xff] }
 0xbcd   : > { %v9216_v49 = vld [vmem:[%s16539_s14 + $0x358] sm:$0xff] }
 0xbce   : > { %5334 = vmatmul.f32.vlgmr.msra.gmra.mxu0 %v5317_v24  ;;  %v9201_v24 = vld [vmem:[%s16539_s14 + $0x250] sm:$0xff]  ;;  %v9221_v19 = vld [vmem:[%s16539_s14 + $0x3d8] sm:$0xff] }
 0xbcf   : > { %6172 = vmatpush.msrb.mxu0 %v14159_v26  ;;  %v5880_v26 = vadd.f32 %v5879_v37, %v5878_v57  ;;  %v5814_v18 = vmul.f32 %v9201_v24, %v16984_v14  ;;  %v16985_v57 = vld [vmem:[#allocation67_spill] sm:$0xff]  ;;  %v9215_v14 = vld [vmem:[%s16539_s14 + $0x160] sm:$0xff]  ;;  %v17004_v20 = vld [vmem:[#allocation88_spill] sm:$0xff] }
 0xbd1   : > { %6173 = vmatpush.msrb.mxu0 %v16970_v27  ;;  %v5882_v50 = vadd.f32 %v5881_v13, %v5880_v26  ;;  %v9202_v27 = vld [vmem:[%s16539_s14 + $0xd8] sm:$0xff]  ;;  %v9203_v26 = vld [vmem:[%s16539_s14 + $0x2d0] sm:$0xff]  ;;  %v6025_v5 = vsel %vm776_vm0, %v5814_v18, 0.0 }
 0xbd2   : > { %v5767_v13 = vmul.f32 %v9202_v27, %v16985_v57  ;;  %v16995_v18 = vld [vmem:[#allocation79_spill] sm:$0xff] }
 0xbd3   : > { %6174 = vmatpush.msrb.mxu0 %v16971_v47  ;;  %v6023_v47 = vsel %vm776_vm0, %v5798_v12, 0.0  ;;  %v9213_v12 = vld [vmem:[%s16539_s14 + $0x3d0] sm:$0xff]  ;;  %v5784_v0 = vmul.f32 %v9215_v14, %v16995_v18 }
 0xbd4   : > { %v6024_v56 = vadd.f32 %v6023_v47, %v6022_v28  ;;  %v6034_v55 = vsel %vm776_vm0, %v5767_v13, 0.0  ;;  %v17005_v14 = vld [vmem:[#allocation111_spill] sm:$0xff] }
 0xbd5   : > { %6175 = vmatpush.msrb.mxu0 %v16972_v43  ;;  %v16986_v43 = vld [vmem:[#allocation123_spill] sm:$0xff]  ;;  %v6035_v59 = vadd.f32 %v6034_v55, %v6033_v45  ;;  %v6051_v28 = vsel %vm776_vm0, %v5784_v0, 0.0 }
 0xbd6   : > { %8226 = vmatmul.msk.f32.vlgmr.msrb.gmra.mxu0 %vm776_vm0, %v5882_v50  ;;  %v5830_v50 = vmul.f32 %v9203_v26, %v16986_v43  ;;  %v6026_v58 = vadd.f32 %v6025_v5, %v6024_v56  ;;  %v9217_v43 = vld [vmem:[%s16539_s14 + $0x1e0] sm:$0xff] }
 0xbd7   : > { %v6037_v4 = vadd.f32 %v6036_v62, %v6035_v59  ;;  %v9220_v56 = vld [vmem:[%s16539_s14 + $0x2e0] sm:$0xff]  ;;  %v9223_v62 = vld [vmem:[%s16539_s14 + $0x168] sm:$0xff]  ;;  %v17003_v59 = vld [vmem:[#allocation136_spill] sm:$0xff] }
 0xbd8   : > { %v6027_v11 = vsel %vm776_vm0, %v5830_v50, 0.0  ;;  %v16997_v50 = vld [vmem:[#allocation49_spill] sm:$0xff] }
 0xbd9   : > { %v6028_v60 = vadd.f32 %v6027_v11, %v6026_v58  ;;  %v6039_v13 = vadd.f32 %v6038_v40, %v6037_v4  ;;  %v17001_v11 = vld [vmem:[#allocation58_spill] sm:$0xff] }
 0xbda   : > { %v9225_v40 = vld [vmem:[%s16539_s14 + $0x1e8] sm:$0xff] }
 0xbdb   : > { %v6030_v24 = vadd.f32 %v6029_v16, %v6028_v60  ;;  %v9224_v16 = vld [vmem:[%s16539_s14 + $0x360] sm:$0xff]  ;;  %v5801_v48 = vmul.f32 %v9225_v40, %v17004_v20  ;;  %v9237_v40 = vld [vmem:[%s16539_s14 + $0xf8] sm:$0xff] }
 0xbdc   : > { %v5848_v60 = vmul.f32 %v9224_v16, %v17003_v59  ;;  %v17012_v16 = vld [vmem:[#allocation112_spill] sm:$0xff]  ;;  %v17013_v20 = vld [vmem:[#allocation70_spill] sm:$0xff] }
 0xbde   : > { %v6059_v0 = vsel %vm776_vm0, %v5848_v60, 0.0 }
 0xc09   : > { %v6180_v21 = vpop.f32.mrf.mxu2 }
 0xc0a   : > { %v14760_v36 = vadd.f32 %v9199_v9, %v6180_v21  ;;  %v16991_v21 = vld [vmem:[#allocation51_spill] sm:$0xff]  ;;  %v5768_v9 = vmul.f32 %v9211_v38, %v16992_v31 }
 0xc0b   : > { %v5815_v29 = vmul.f32 %v9210_v54, %v16991_v21  ;;  %v17002_v54 = vld [vmem:[#allocation80_spill] sm:$0xff] }
 0xc0c   : > { %v6228_v30 = vsel %vm776_vm0, %v14760_v36, 0.0  ;;  %v6049_v26 = vsel %vm776_vm0, %v5768_v9, 0.0  ;;  %v5785_v21 = vmul.f32 %v9223_v62, %v17002_v54 }
 0xc0d   : > { %6229 = vadd.xlane.f32.xlu2 %v6228_v30  ;;  %v9214_v30 = vld [vmem:[%s16539_s14 + $0x60] sm:$0xff]  ;;  %v6040_v52 = vsel %vm776_vm0, %v5815_v29, 0.0  ;;  %v6055_v29 = vsel %vm776_vm0, %v5816_v53, 0.0 }
 0xc0e   : > { %v5752_v35 = vmul.f32 %v9214_v30, %v16994_v3  ;;  %v6041_v7 = vadd.f32 %v6040_v52, %v6039_v13  ;;  %v9226_v30 = vld [vmem:[%s10002_s1 + $0x20] sm:$0xff]  ;;  %v6066_v4 = vsel %vm776_vm0, %v5785_v21, 0.0  ;;  %v17006_v13 = vld [vmem:[#allocation100_spill] sm:$0xff] }
 0xc10   : > { %v5719_v37 = vpop.f32.mrf.mxu1  ;;  %v6048_v2 = vsel %vm776_vm0, %v5752_v35, 0.0 }
 0xc11   : > { %v5861_v42 = vmul.f32 %v9204_v33, %v5719_v37  ;;  %v16996_v37 = vld [vmem:[#allocation135_spill] sm:$0xff]  ;;  %v5800_v33 = vmul.f32 %v9217_v43, %v16997_v50  ;;  %v17007_v50 = vld [vmem:[#allocation126_spill] sm:$0xff] }
 0xc12   : > { %v6183_v23 = vpop.f32.mrf.mxu2  ;;  %v5847_v27 = vmul.f32 %v9216_v49, %v16996_v37  ;;  %v9229_v43 = vld [vmem:[%s16539_s14 + $0x2e8] sm:$0xff] }
 0xc13   : > { %v6016_v39 = vsel %vm776_vm0, %v5861_v42, 0.0  ;;  %v14804_v61 = vadd.f32 %v9208_v15, %v6183_v23  ;;  %v6042_v42 = vsel %vm776_vm0, %v5831_v32, 0.0  ;;  %v6050_v23 = vadd.f32 %v6049_v26, %v6048_v2  ;;  %v9231_v2 = vld [vmem:[%s16539_s14 + $0x70] sm:$0xff] }
 0xc14   : > { %v6017_v44 = vadd.f32 %v6016_v39, %v6015_v10  ;;  %v6044_v10 = vsel %vm776_vm0, %v5847_v27, 0.0  ;;  %v6043_v5 = vadd.f32 %v6042_v42, %v6041_v7  ;;  %v5769_v39 = vmul.f32 %v9219_v17, %v16999_v1  ;;  %v9230_v42 = vld [vmem:[%s16539_s14 + $0x3e0] sm:$0xff]  ;;  %v9233_v17 = vld [vmem:[%s16539_s14 + $0x368] sm:$0xff] }
 0xc15   : > { %v6231_v22 = vsel %vm776_vm0, %v14804_v61, 0.0  ;;  %v6053_v15 = vsel %vm776_vm0, %v5800_v33, 0.0  ;;  %v6052_v58 = vadd.f32 %v6051_v28, %v6050_v23  ;;  %v6068_v26 = vsel %vm776_vm0, %v5801_v48, 0.0  ;;  %v17008_v28 = vld [vmem:[#allocation42_spill] sm:$0xff]  ;;  %v17009_v23 = vld [vmem:[#allocation81_spill] sm:$0xff] }
 0xc16   : > { %6232 = vadd.xlane.f32.xlu0 %v6231_v22  ;;  %8235 = vmatmul.msk.f32.gmra.mxu2 %vm776_vm0, %v6017_v44  ;;  %v17000_v44 = vld [vmem:[#allocation125_spill] sm:$0xff]  ;;  %v5753_v22 = vmul.f32 %v9222_v51, %v17001_v11  ;;  %v6045_v45 = vadd.f32 %v6044_v10, %v6043_v5  ;;  %v6064_v9 = vsel %vm776_vm0, %v5769_v39, 0.0  ;;  %v5833_v33 = vmul.f32 %v9229_v43, %v17007_v50  ;;  %v9232_v10 = vld [vmem:[%s16539_s14 + $0x170] sm:$0xff] }
 0xc17   : > { %v5832_v55 = vmul.f32 %v9220_v56, %v17000_v44  ;;  %v6054_v38 = vadd.f32 %v6053_v15, %v6052_v58  ;;  %v5754_v25 = vmul.f32 %v9231_v2, %v17008_v28  ;;  %v5786_v5 = vmul.f32 %v9232_v10, %v17009_v23  ;;  %v17010_v1 = vld [vmem:[#allocation137_spill] sm:$0xff]  ;;  %v17018_v2 = vld [vmem:[#allocation90_spill] sm:$0xff]  ;;  %v9244_v10 = vld [vmem:[%s10002_s1 + $0x30] sm:$0xff] }
 0xc18   : > { %v6063_v35 = vsel %vm776_vm0, %v5753_v22, 0.0  ;;  %v5849_v39 = vmul.f32 %v9233_v17, %v17010_v1  ;;  %v6072_v11 = vsel %vm776_vm0, %v5833_v33, 0.0  ;;  %v5771_v48 = vmul.f32 %v9237_v40, %v17013_v20  ;;  %v9245_v17 = vld [vmem:[%s16539_s14 + $0x278] sm:$0xff] }
 0xc19   : > { %v5722_v8 = vpop.f32.mrf.mxu1  ;;  %v6057_v32 = vsel %vm776_vm0, %v5832_v55, 0.0  ;;  %v6065_v52 = vadd.f32 %v6064_v9, %v6063_v35  ;;  %v6078_v54 = vsel %vm776_vm0, %v5754_v25, 0.0  ;;  %v6081_v21 = vsel %vm776_vm0, %v5786_v5, 0.0  ;;  %v9239_v35 = vld [vmem:[%s16539_s14 + $0x3e8] sm:$0xff]  ;;  %v17019_v1 = vld [vmem:[#allocation113_spill] sm:$0xff] }
 0xc1a   : > { %v5862_v34 = vmul.f32 %v9213_v12, %v5722_v8  ;;  %v6074_v60 = vsel %vm776_vm0, %v5849_v39, 0.0  ;;  %v5819_v39 = vmul.f32 %v9245_v17, %v17019_v1 }
 0xc1b   : > { %v14854_v41 = vpop.f32.mrf.mxu2  ;;  %v6067_v6 = vadd.f32 %v6066_v4, %v6065_v52 }
 0xc1c   : > { %v6031_v57 = vsel %vm776_vm0, %v5862_v34, 0.0  ;;  %v6056_v34 = vadd.f32 %v6055_v29, %v6054_v38  ;;  %v9236_v29 = vld [vmem:[%s16539_s14 + $0x270] sm:$0xff] }
 0xc1d   : > { %v6032_v47 = vadd.f32 %v6031_v57, %v6030_v24  ;;  %v9227_v24 = vld [vmem:[%s16539_s14 + $0x268] sm:$0xff]  ;;  %v9228_v57 = vld [vmem:[%s16539_s14 + $0xf0] sm:$0xff]  ;;  %v6069_v56 = vadd.f32 %v6068_v26, %v6067_v6  ;;  %v5818_v59 = vmul.f32 %v9236_v29, %v17012_v16  ;;  %v6100_v29 = vsel %vm776_vm0, %v5819_v39, 0.0  ;;  %v9248_v16 = vld [vmem:[%s16539_s14 + $0x378] sm:$0xff] }
 0xc1e   : > { %v5817_v18 = vmul.f32 %v9227_v24, %v17005_v14  ;;  %v6058_v49 = vadd.f32 %v6057_v32, %v6056_v34  ;;  %v17014_v34 = vld [vmem:[#allocation127_spill] sm:$0xff]  ;;  %v9240_v24 = vld [vmem:[%s16539_s14 + $0x78] sm:$0xff] }
 0xc1f   : > { %8236 = vmatmul.msk.f32.gmra.mxu2 %vm776_vm0, %v6032_v47  ;;  %v5770_v47 = vmul.f32 %v9228_v57, %v17006_v13  ;;  %v17015_v14 = vld [vmem:[#allocation59_spill] sm:$0xff]  ;;  %v6085_v57 = vsel %vm776_vm0, %v5818_v59, 0.0  ;;  %v17021_v59 = vld [vmem:[#allocation61_spill] sm:$0xff] }
 0xc20   : > { %v6060_v53 = vadd.f32 %v6059_v0, %v6058_v49  ;;  %v9241_v49 = vld [vmem:[%s16539_s14 + $0x178] sm:$0xff]  ;;  %v9242_v13 = vld [vmem:[%s16539_s14 + $0x370] sm:$0xff] }
 0xc21   : > { %v5725_v46 = vpop.f32.mrf.mxu1  ;;  %v6079_v55 = vsel %vm776_vm0, %v5770_v47, 0.0  ;;  %v17017_v47 = vld [vmem:[#allocation138_spill] sm:$0xff] }
 0xc22   : > { %v5863_v63 = vmul.f32 %v9221_v19, %v5725_v46  ;;  %v6070_v46 = vsel %vm776_vm0, %v5817_v18, 0.0  ;;  %v9234_v19 = vld [vmem:[%s16539_s14 + $0x1f0] sm:$0xff]  ;;  %v5755_v18 = vmul.f32 %v9240_v24, %v17015_v14  ;;  %v5850_v26 = vmul.f32 %v9242_v13, %v17017_v47 }
 0xc23   : > { %v6189_v12 = vpop.f32.mrf.mxu2  ;;  %v6071_v58 = vadd.f32 %v6070_v46, %v6069_v56 }
 0xc24   : > { %v6046_v8 = vsel %vm776_vm0, %v5863_v63, 0.0  ;;  %v14897_v3 = vadd.f32 %v9226_v30, %v6189_v12  ;;  %v17011_v63 = vld [vmem:[#allocation89_spill] sm:$0xff]  ;;  %v9238_v12 = vld [vmem:[%s16539_s14 + $0x2f0] sm:$0xff]  ;;  %v6093_v5 = vsel %vm776_vm0, %v5755_v18, 0.0 }
 0xc25   : > { %v6047_v31 = vadd.f32 %v6046_v8, %v6045_v45  ;;  %v5802_v51 = vmul.f32 %v9234_v19, %v17011_v63  ;;  %v9235_v45 = vld [vmem:[%s10002_s1 + $0x28] sm:$0xff]  ;;  %v6080_v8 = vadd.f32 %v6079_v55, %v6078_v54  ;;  %v6073_v38 = vadd.f32 %v6072_v11, %v6071_v58  ;;  %v17020_v11 = vld [vmem:[#allocation128_spill] sm:$0xff]  ;;  %v9250_v18 = vld [vmem:[%s10002_s1] sm:$0xff] }
 0xc26   : > { %v6237_v37 = vsel %vm776_vm0, %v14897_v3, 0.0  ;;  %v5834_v30 = vmul.f32 %v9238_v12, %v17014_v34  ;;  %v9247_v58 = vld [vmem:[%s16539_s14 + $0x3f0] sm:$0xff]  ;;  %v9249_v12 = vld [vmem:[%s16539_s14 + $0x3f8] sm:$0xff] }
 0xc27   : > { %8237 = vmatmul.msk.f32.gmra.mxu2 %vm776_vm0, %v6047_v31  ;;  %6238 = vadd.xlane.f32.xlu2 %v6237_v37  ;;  %v6083_v32 = vsel %vm776_vm0, %v5802_v51, 0.0  ;;  %v6082_v0 = vadd.f32 %v6081_v21, %v6080_v8  ;;  %v6075_v52 = vadd.f32 %v6074_v60, %v6073_v38  ;;  %v17016_v37 = vld [vmem:[#allocation82_spill] sm:$0xff]  ;;  %v9246_v51 = vld [vmem:[%s16539_s14 + $0x2f8] sm:$0xff]  ;;  %v5851_v60 = vmul.f32 %v9248_v16, %v17021_v59 }
 0xc28   : > { %v6087_v25 = vsel %vm776_vm0, %v5834_v30, 0.0 }
 0xc29   : > { %v5728_v27 = vpop.f32.mrf.mxu1  ;;  %v6084_v50 = vadd.f32 %v6083_v32, %v6082_v0  ;;  %v6104_v20 = vsel %vm776_vm0, %v5851_v60, 0.0 }
 0xc2a   : > { %v5864_v7 = vmul.f32 %v9230_v42, %v5728_v27  ;;  %v5787_v27 = vmul.f32 %v9241_v49, %v17016_v37  ;;  %v6094_v42 = vsel %vm776_vm0, %v5771_v48, 0.0  ;;  %v9251_v49 = vld [vmem:[%s10002_s1 + $0x18] sm:$0xff] }
 0xc2b   : > { %v6095_v56 = vadd.f32 %v6094_v42, %v6093_v5  ;;  %v15035_v37 = vadd.f32 %v9251_v49, %v14854_v41  ;;  %v9252_v5 = vld [vmem:[%s10002_s1 + $0x40] sm:$0xff] }
 0xc2c   : > { %v6061_v15 = vsel %vm776_vm0, %v5864_v7, 0.0  ;;  %v9243_v7 = vld [vmem:[%s16539_s14 + $0x1f8] sm:$0xff]  ;;  %v6096_v46 = vsel %vm776_vm0, %v5787_v27, 0.0 }
 0xc2d   : > { %v6062_v44 = vadd.f32 %v6061_v15, %v6060_v53  ;;  %v6192_v22 = vpop.f32.mrf.mxu2  ;;  %v5803_v28 = vmul.f32 %v9243_v7, %v17018_v2  ;;  %v6086_v53 = vadd.f32 %v6085_v57, %v6084_v50  ;;  %v6089_v15 = vsel %vm776_vm0, %v5850_v26, 0.0 }
 0xc2e   : > { %v14942_v62 = vadd.f32 %v9235_v45, %v6192_v22  ;;  %v5835_v22 = vmul.f32 %v9246_v51, %v17020_v11  ;;  %v6097_v54 = vadd.f32 %v6096_v46, %v6095_v56  ;;  %v6234_v27 = vsel %vm776_vm0, %v15035_v37, 0.0  ;;  %v9253_v56 = vld [vmem:[%s10002_s1 + $0x48] sm:$0xff] }
 0xc2f   : > { %8238 = vmatmul.msk.f32.gmra.mxu2 %vm776_vm0, %v6062_v44  ;;  %v6088_v44 = vadd.f32 %v6087_v25, %v6086_v53  ;;  %v6098_v63 = vsel %vm776_vm0, %v5803_v28, 0.0  ;;  %v9742_v57 = vmov 32.0  }
 0xc30   : > { %v6240_v31 = vsel %vm776_vm0, %v14942_v62, 0.0  ;;  %v6099_v38 = vadd.f32 %v6098_v63, %v6097_v54  ;;  %9075 = vrcp.f32 %v9742_v57 }
 0xc31   : > { %v5731_v9 = vpop.f32.mrf.mxu1  ;;  %6241 = vadd.xlane.f32.xlu0 %v6240_v31  ;;  %v6090_v21 = vadd.f32 %v6089_v15, %v6088_v44 }
 0xc32   : > { %v5865_v4 = vmul.f32 %v9239_v35, %v5731_v9  ;;  %v6102_v9 = vsel %vm776_vm0, %v5835_v22, 0.0  ;;  %v6101_v40 = vadd.f32 %v6100_v29, %v6099_v38  ;;  %v9255_v38 = vld [vmem:[%s10002_s1 + $0x60] sm:$0xff] }
 0xc34   : > { %v6076_v43 = vsel %vm776_vm0, %v5865_v4, 0.0  ;;  %v6103_v48 = vadd.f32 %v6102_v9, %v6101_v40 }
 0xc35   : > { %v6077_v33 = vadd.f32 %v6076_v43, %v6075_v52  ;;  %v6195_v6 = vpop.f32.mrf.mxu2 }
 0xc36   : > { %v14987_v23 = vadd.f32 %v9244_v10, %v6195_v6  ;;  %v6105_v30 = vadd.f32 %v6104_v20, %v6103_v48  ;;  %v9076_v13 = vpop.eup %9075 }
 0xc37   : > { %8239 = vmatmul.msk.f32.gmra.mxu2 %vm776_vm0, %v6077_v33  ;;  %v6274_v47 = vmul.f32 32.0, %v9076_v13  ;;  %vm6278_vm3 = vweird.f32 %v9076_v13 }
 0xc38   : > { %v6243_v55 = vsel %vm776_vm0, %v14987_v23, 0.0 }
 0xc39   : > { %v5734_v19 = vpop.f32.mrf.mxu1  ;;  %6244 = vadd.xlane.f32.xlu2 %v6243_v55  ;;  %v6275_v26 = vsub.f32 1.0, %v6274_v47 }
 0xc3a   : > { %v5866_v45 = vmul.f32 %v9247_v58, %v5734_v19 }
 0xc3b   : > { %v6276_v43 = vmul.f32 %v9076_v13, %v6275_v26 }
 0xc3c   : > { %v6091_v8 = vsel %vm776_vm0, %v5866_v45, 0.0 }
 0xc3d   : > { %v6092_v31 = vadd.f32 %v6091_v8, %v6090_v21  ;;  %v6277_v50 = vadd.f32 %v9076_v13, %v6276_v43  ;;  %v6198_v33 = vpop.f32.mrf.mxu2  ;;  %v9258_v43 = vld [vmem:[%s10002_s1 + $0x68] sm:$0xff] }
 0xc3f   : > { %8240 = vmatmul.msk.f32.gmra.mxu2 %vm776_vm0, %v6092_v31  ;;  %v15039_v42 = vsel %vm6278_vm3, %v9076_v13, %v6277_v50 }
 0xc41   : > { %v5737_v32 = vpop.f32.mrf.mxu1 }
 0xc42   : > { %v5867_v34 = vmul.f32 %v9249_v12, %v5737_v32 }
 0xc44   : > { %v6106_v35 = vsel %vm776_vm0, %v5867_v34, 0.0  ;;  %v9256_v34 = vld [vmem:[%s10002_s1 + $0x38] sm:$0xff] }
 0xc45   : > { %v6107_v4 = vadd.f32 %v6106_v35, %v6105_v30  ;;  %v6201_v6 = vpop.f32.mrf.mxu2  ;;  %v15097_v30 = vadd.f32 %v9256_v34, %v6198_v33 }
 0xc46   : > { %v15050_v46 = vadd.f32 %v9252_v5, %v6201_v6 }
 0xc47   : > { %8241 = vmatmul.msk.f32.gmra.mxu2 %vm776_vm0, %v6107_v4 }
 0xc48   : > { %v6249_v1 = vsel %vm776_vm0, %v15050_v46, 0.0 }
 0xc4b   : > { %v5335_v24 = vpop.f32.mrf.mxu0 }
 0xc4c   : > { %5338 = vst [vmem:[%s15025_s27] sm:$0xff] %v5335_v24  ;;  %v6246_v24 = vsel %vm776_vm0, %v15097_v30, 0.0  ;;  %s9627_s27 = scalar_lea.hbm %s17106_s2, 32 }
 0xc4d   : > { %p9629_p4 = scmp.lt.s32.totalorder %s9627_s27, %s9623_s24 }
 0xc4f   : > { %p9630_p7 = por %p9629_p4, %p9628_p3 }
 0xc51   : > { %p9631_p8 = pnand %p9630_p7, %p9626_p2 }
 0xc53   : > { %v6177_v14 = vpop.f32.mrf.mxu0 }
 0xc54   : > { %v15029_v0 = vadd.f32 %v9250_v18, %v6177_v14 }
 0xc56   : > { %v6225_v52 = vsel %vm776_vm0, %v15029_v0, 0.0 }
 0xc57   : > { %6226 = vadd.xlane.f32.xlu1 %v6225_v52  ;;  %v9257_v52 = vld [vmem:[%s10002_s1 + $0x50] sm:$0xff] }
 0xc5f   : > { %6235 = vadd.xlane.f32.xlu1 %v6234_v27 }
 0xc80   : > { %v6230_v7 = vpop.xlane.xlu2 %6229 }
 0xc81   : > { %v6281_v41 = vmul.f32 %v15039_v42, %v6230_v7 }
 0xc83   : > { %v15043_v2 = vsub.f32 %v14760_v36, %v6281_v41 }
 0xc85   : > { %v6313_v28 = vmul.f32 %v15043_v2, %v15043_v2 }
 0xc87   : > { %v6331_v25 = vsel %vm776_vm0, %v6313_v28, 0.0 }
 0xc88   : > { %6332 = vadd.xlane.f32.xlu0 %v6331_v25 }
 0xc89   : > { %v6233_v53 = vpop.xlane.xlu0 %6232 }
 0xc8a   : > { %v6282_v10 = vmul.f32 %v15039_v42, %v6233_v53 }
 0xc8c   : > { %v15053_v17 = vsub.f32 %v14804_v61, %v6282_v10 }
 0xc8e   : > { %v6314_v36 = vmul.f32 %v15053_v17, %v15053_v17 }
 0xc90   : > { %v6334_v39 = vsel %vm776_vm0, %v6314_v36, 0.0  ;;  %6250 = vadd.xlane.f32.xlu0 %v6249_v1  ;;  %v9259_v36 = vld [vmem:[%s10002_s1 + $0x78] sm:$0xff] }
 0xc91   : > { %6335 = vadd.xlane.f32.xlu2 %v6334_v39 }
 0xc99   : > { %v6204_v15 = vpop.f32.mrf.mxu2 }
 0xc9a   : > { %v15061_v44 = vadd.f32 %v9253_v56, %v6204_v15  ;;  %v6239_v55 = vpop.xlane.xlu2 %6238 }
 0xc9b   : > { %v6284_v19 = vmul.f32 %v15039_v42, %v6239_v55 }
 0xc9c   : > { %v6252_v61 = vsel %vm776_vm0, %v15061_v44, 0.0 }
 0xc9d   : > { %6253 = vadd.xlane.f32.xlu2 %v6252_v61  ;;  %v15067_v63 = vsub.f32 %v14897_v3, %v6284_v19  ;;  %v9254_v3 = vld [vmem:[%s10002_s1 + $0x58] sm:$0xff] }
 0xc9f   : > { %v6316_v51 = vmul.f32 %v15067_v63, %v15067_v63 }
 0xca1   : > { %v6340_v22 = vsel %vm776_vm0, %v6316_v51, 0.0 }
 0xca2   : > { %v6207_v11 = vpop.f32.mrf.mxu2  ;;  %6341 = vadd.xlane.f32.xlu0 %v6340_v22 }
 0xca3   : > { %v15109_v49 = vadd.f32 %v9257_v52, %v6207_v11  ;;  %v6641_v52 = vld [vmem:[#allocation14 + $0x8] sm:$0xff] }
 0xca4   : > { %v6242_v58 = vpop.xlane.xlu0 %6241 }
 0xca5   : > { %v6285_v45 = vmul.f32 %v15039_v42, %v6242_v58  ;;  %v6255_v57 = vsel %vm776_vm0, %v15109_v49, 0.0 }
 0xca7   : > { %v15074_v54 = vsub.f32 %v14942_v62, %v6285_v45 }
 0xca9   : > { %v6317_v29 = vmul.f32 %v15074_v54, %v15074_v54 }
 0xcaa   : > { %v6210_v21 = vpop.f32.mrf.mxu2 }
 0xcab   : > { %v15079_v16 = vadd.f32 %v9254_v3, %v6210_v21  ;;  %v6343_v59 = vsel %vm776_vm0, %v6317_v29, 0.0 }
 0xcac   : > { %6344 = vadd.xlane.f32.xlu2 %v6343_v59 }
 0xcad   : > { %v6258_v60 = vsel %vm776_vm0, %v15079_v16, 0.0 }
 0xcae   : > { %6259 = vadd.xlane.f32.xlu0 %v6258_v60 }
 0xcb2   : > { %v6213_v8 = vpop.f32.mrf.mxu2 }
 0xcb3   : > { %v15085_v31 = vadd.f32 %v9255_v38, %v6213_v8 }
 0xcb5   : > { %v6261_v62 = vsel %vm776_vm0, %v15085_v31, 0.0 }
 0xcb6   : > { %6262 = vadd.xlane.f32.xlu2 %v6261_v62  ;;  %v6652_v62 = vld [vmem:[#allocation14 + $0x60] sm:$0xff] }
 0xcb7   : > { %6716 = vmatpush.msra.mxu0 %v6652_v62 }
 0xcba   : > { %v6216_v26 = vpop.f32.mrf.mxu2 }
 0xcbb   : > { %v15121_v50 = vadd.f32 %v9258_v43, %v6216_v26 }
 0xcbd   : > { %v6264_v33 = vsel %vm776_vm0, %v15121_v50, 0.0 }
 0xcc2   : > { %v15125_v7 = vpop.f32.mrf.mxu2 }
 0xcca   : > { %v6227_v9 = vpop.xlane.xlu1 %6226  ;;  %v6222_v5 = vpop.f32.mrf.mxu2 }
 0xccb   : > { %v6280_v40 = vmul.f32 %v15039_v42, %v6227_v9  ;;  %v15135_v1 = vadd.f32 %v9259_v36, %v6222_v5  ;;  %v6653_v9 = vld [vmem:[#allocation14 + $0x68] sm:$0xff] }
 0xccc   : > { %6781 = vmatpush.msrb.mxu2 %v6653_v9 }
 0xccd   : > { %v15091_v20 = vsub.f32 %v15029_v0, %v6280_v40  ;;  %v6245_v0 = vpop.xlane.xlu2 %6244 }
 0xcce   : > { %v6286_v27 = vmul.f32 %v15039_v42, %v6245_v0  ;;  %v6640_v0 = vld [vmem:[#allocation14] sm:$0xff] }
 0xccf   : > { %v6312_v48 = vmul.f32 %v15091_v20, %v15091_v20 }
 0xcd1   : > { %v6328_v32 = vsel %vm776_vm0, %v6312_v48, 0.0  ;;  %v6648_v48 = vld [vmem:[#allocation14 + $0x40] sm:$0xff] }
 0xcd2   : > { %6329 = vadd.xlane.f32.xlu1 %v6328_v32  ;;  %v6236_v12 = vpop.xlane.xlu1 %6235  ;;  %v6649_v32 = vld [vmem:[#allocation14 + $0x48] sm:$0xff]  ;;  %6717 = vmatpush.msra.mxu0 %v6648_v48 }
 0xcd3   : > { %v6283_v35 = vmul.f32 %v15039_v42, %v6236_v12  ;;  %6782 = vmatpush.msrb.mxu2 %v6649_v32 }
 0xcd5   : > { %v15101_v4 = vsub.f32 %v15035_v37, %v6283_v35  ;;  %v15113_v37 = vsub.f32 %v14987_v23, %v6286_v27  ;;  %v6644_v35 = vld [vmem:[#allocation14 + $0x20] sm:$0xff] }
 0xcd6   : > { %6718 = vmatpush.msra.mxu0 %v6644_v35 }
 0xcd7   : > { %v6315_v14 = vmul.f32 %v15101_v4, %v15101_v4  ;;  %v6318_v13 = vmul.f32 %v15113_v37, %v15113_v37 }
 0xcd8   : > { %6719 = vmatpush.msra.mxu0 %v6640_v0 }
 0xcd9   : > { %v6337_v18 = vsel %vm776_vm0, %v6315_v14, 0.0  ;;  %v6346_v47 = vsel %vm776_vm0, %v6318_v13, 0.0 }
 0xcda   : > { %6247 = vadd.xlane.f32.xlu1 %v6246_v24  ;;  %v6645_v24 = vld [vmem:[#allocation14 + $0x28] sm:$0xff] }
 0xcdb   : > { %6783 = vmatpush.msrb.mxu2 %v6645_v24 }
 0xcdd   : > { %6784 = vmatpush.msrb.mxu2 %v6641_v52 }
 0xce2   : > { %6338 = vadd.xlane.f32.xlu1 %v6337_v18 }
 0xcea   : > { %6256 = vadd.xlane.f32.xlu1 %v6255_v57 }
 0xcf2   : > { %6347 = vadd.xlane.f32.xlu1 %v6346_v47 }
 0xcfa   : > { %6265 = vadd.xlane.f32.xlu1 %v6264_v33 }
 0xcfb   : > { %v6333_v23 = vpop.xlane.xlu0 %6332 }
 0xd03   : > { %v6251_v41 = vpop.xlane.xlu0 %6250 }
 0xd04   : > { %v6288_v28 = vmul.f32 %v15039_v42, %v6251_v41  ;;  %v6336_v6 = vpop.xlane.xlu2 %6335 }
 0xd05   : > { %v6378_v38 = vmul.f32 %v6336_v6, %v15039_v42 }
 0xd06   : > { %v15129_v25 = vsub.f32 %v15050_v46, %v6288_v28  ;;  %v6270_v46 = vsel %vm776_vm0, %v15135_v1, 0.0 }
 0xd07   : > { %v15167_v40 = vadd.f32 1e-05, %v6378_v38 }
 0xd08   : > { %v6320_v53 = vmul.f32 %v15129_v25, %v15129_v25 }
 0xd09   : > { %vm6434_vm11 = vweird.f32 %v15167_v40 }
 0xd0a   : > { %v6352_v10 = vsel %vm776_vm0, %v6320_v53, 0.0 }
 0xd0b   : > { %6353 = vadd.xlane.f32.xlu2 %v6352_v10 }
 0xd10   : > { %v6254_v39 = vpop.xlane.xlu2 %6253 }
 0xd11   : > { %v6289_v15 = vmul.f32 %v15039_v42, %v6254_v39 }
 0xd13   : > { %v15139_v56 = vsub.f32 %v15061_v44, %v6289_v15  ;;  %6271 = vadd.xlane.f32.xlu2 %v6270_v46 }
 0xd15   : > { %v6321_v55 = vmul.f32 %v15139_v56, %v15139_v56  ;;  %v6342_v19 = vpop.xlane.xlu0 %6341 }
 0xd16   : > { %v6380_v43 = vmul.f32 %v6342_v19, %v15039_v42 }
 0xd17   : > { %v6355_v61 = vsel %vm776_vm0, %v6321_v55, 0.0  ;;  %v15193_v55 = vld [vmem:[%s10002_s1 + $0x70] sm:$0xff] }
 0xd18   : > { %6356 = vadd.xlane.f32.xlu1 %v6355_v61  ;;  %v15187_v10 = vadd.f32 1e-05, %v6380_v43  ;;  %v15197_v61 = vadd.f32 %v15193_v55, %v15125_v7 }
 0xd1a   : > { %vm6454_vm2 = vweird.f32 %v15187_v10 }
 0xd1f   : > { %v15146_v51 = vpop.xlane.xlu2 %6344 }
 0xd21   : > { %v6260_v11 = vpop.xlane.xlu0 %6259 }
 0xd22   : > { %v6291_v22 = vmul.f32 %v15039_v42, %v6260_v11  ;;  %v6381_v11 = vmul.f32 %v15146_v51, %v15039_v42  ;;  %v6267_v51 = vsel %vm776_vm0, %v15197_v61, 0.0 }
 0xd24   : > { %v15150_v58 = vsub.f32 %v15079_v16, %v6291_v22  ;;  %v6377_v16 = vmul.f32 %v6333_v23, %v15039_v42 }
 0xd26   : > { %v6323_v44 = vmul.f32 %v15150_v58, %v15150_v58  ;;  %v15163_v8 = vadd.f32 1e-05, %v6377_v16 }
 0xd28   : > { %v6361_v45 = vsel %vm776_vm0, %v6323_v44, 0.0  ;;  %9077 = vrsqrt.f32 %v15163_v8  ;;  %vm6424_vm8 = vweird.f32 %v15163_v8 }
 0xd29   : > { %v6263_v21 = vpop.xlane.xlu2 %6262  ;;  %6362 = vadd.xlane.f32.xlu1 %v6361_v45  ;;  %9079 = vrsqrt.f32 %v15167_v40 }
 0xd2a   : > { %v6292_v29 = vmul.f32 %v15039_v42, %v6263_v21 }
 0xd2c   : > { %v15157_v3 = vsub.f32 %v15085_v31, %v6292_v29  ;;  %v15205_v29 = vadd.f32 1e-05, %v6381_v11 }
 0xd2e   : > { %v6324_v59 = vmul.f32 %v15157_v3, %v15157_v3  ;;  %v15169_v12 = vpop.eup %9077 }
 0xd2f   : > { %v6419_v18 = vmul.f32 %v15169_v12, %v15163_v8  ;;  %v15176_v13 = vpop.eup %9079  ;;  %vm6425_vm5 = vweird.f32 %v15169_v12 }
 0xd30   : > { %v6364_v60 = vsel %vm776_vm0, %v6324_v59, 0.0  ;;  %v6429_v41 = vmul.f32 %v15176_v13, %v15167_v40  ;;  %vm6426_vm9 = vmor %vm6424_vm8, %vm6425_vm5  ;;  %v15207_v59 = vld [vmem:[#allocation11] ss:$0 sm:$0xff]  ;;  %vm6435_vm10 = vweird.f32 %v15176_v13  ;;  %vm6464_vm5 = vweird.f32 %v15205_v29 }
 0xd31   : > { %6365 = vadd.xlane.f32.xlu2 %v6364_v60  ;;  %v6420_v27 = vmul.f32 %v15169_v12, %v6419_v18  ;;  %vm6436_vm12 = vmor %vm6434_vm11, %vm6435_vm10 }
 0xd32   : > { %v6430_v39 = vmul.f32 %v15176_v13, %v6429_v41 }
 0xd33   : > { %v6421_v23 = vmul.f32 0.5, %v6420_v27 }
 0xd34   : > { %v6431_v45 = vmul.f32 0.5, %v6430_v39 }
 0xd35   : > { %v6422_v36 = vsub.f32 1.5, %v6421_v23 }
 0xd36   : > { %v6432_v38 = vsub.f32 1.5, %v6431_v45 }
 0xd37   : > { %v6423_v44 = vmul.f32 %v15169_v12, %v6422_v36 }
 0xd38   : > { %v6433_v35 = vmul.f32 %v15176_v13, %v6432_v38 }
 0xd39   : > { %v6427_v16 = vsel %vm6426_vm9, %v15169_v12, %v6423_v44 }
 0xd3a   : > { %v6437_v52 = vsel %vm6436_vm12, %v15176_v13, %v6433_v35 }
 0xd3b   : > { %v6570_v41 = vmul.f32 %v6437_v52, %v15053_v17 }
 0xd3d   : > { %v6590_v17 = vmul.f32 %v15207_v59, %v6570_v41 }
 0xd45   : > { %v6330_v31 = vpop.xlane.xlu1 %6329 }
 0xd46   : > { %v6376_v34 = vmul.f32 %v6330_v31, %v15039_v42  ;;  %v15215_v31 = vld [vmem:[#allocation12] ss:$0 sm:$0xff] }
 0xd47   : > { %v15259_v44 = vadd.f32 %v15215_v31, %v6590_v17 }
 0xd48   : > { %v6392_v14 = vadd.f32 1e-05, %v6376_v34  ;;  %v6569_v34 = vmul.f32 %v6427_v16, %v15043_v2 }
 0xd4a   : > { %9081 = vrsqrt.f32 %v6392_v14  ;;  %vm6414_vm6 = vweird.f32 %v6392_v14  ;;  %v6589_v0 = vmul.f32 %v15207_v59, %v6569_v34 }
 0xd4b   : > { %9083 = vrsqrt.f32 %v15187_v10 }
 0xd4d   : > { %v6248_v57 = vpop.xlane.xlu1 %6247 }
 0xd4e   : > { %v6287_v47 = vmul.f32 %v15039_v42, %v6248_v57 }
 0xd50   : > { %v9082_v26 = vpop.eup %9081  ;;  %v15181_v33 = vsub.f32 %v15097_v30, %v6287_v47 }
 0xd51   : > { %v6409_v28 = vmul.f32 %v9082_v26, %v6392_v14  ;;  %vm6415_vm4 = vweird.f32 %v9082_v26  ;;  %v15213_v9 = vpop.eup %9083 }
 0xd52   : > { %v6319_v6 = vmul.f32 %v15181_v33, %v15181_v33  ;;  %vm6416_vm7 = vmor %vm6414_vm6, %vm6415_vm4  ;;  %v6449_v24 = vmul.f32 %v15213_v9, %v15187_v10  ;;  %vm6455_vm1 = vweird.f32 %v15213_v9 }
 0xd53   : > { %v6410_v53 = vmul.f32 %v9082_v26, %v6409_v28  ;;  %v15245_v28 = vadd.f32 %v15215_v31, %v6589_v0  ;;  %vm6456_vm3 = vmor %vm6454_vm2, %vm6455_vm1 }
 0xd54   : > { %v6349_v5 = vsel %vm776_vm0, %v6319_v6, 0.0  ;;  %v6450_v27 = vmul.f32 %v15213_v9, %v6449_v24 }
 0xd55   : > { %v6411_v15 = vmul.f32 0.5, %v6410_v53  ;;  %6350 = vadd.xlane.f32.xlu0 %v6349_v5  ;;  %v6339_v30 = vpop.xlane.xlu1 %6338 }
 0xd56   : > { %v6379_v46 = vmul.f32 %v6339_v30, %v15039_v42  ;;  %v6451_v6 = vmul.f32 0.5, %v6450_v27 }
 0xd57   : > { %v6412_v19 = vsub.f32 1.5, %v6411_v15 }
 0xd58   : > { %v6395_v22 = vadd.f32 1e-05, %v6379_v46  ;;  %v6452_v13 = vsub.f32 1.5, %v6451_v6 }
 0xd59   : > { %v6413_v21 = vmul.f32 %v9082_v26, %v6412_v19 }
 0xd5a   : > { %9085 = vrsqrt.f32 %v6395_v22  ;;  %vm6444_vm14 = vweird.f32 %v6395_v22 }
 0xd5b   : > { %v6417_v7 = vsel %vm6416_vm7, %v9082_v26, %v6413_v21  ;;  %9087 = vrsqrt.f32 %v15205_v29 }
 0xd5c   : > { %v6568_v60 = vmul.f32 %v6417_v7, %v15091_v20 }
 0xd5d   : > { %6268 = vadd.xlane.f32.xlu0 %v6267_v51  ;;  %v6257_v62 = vpop.xlane.xlu1 %6256 }
 0xd5e   : > { %v6588_v8 = vmul.f32 %v15207_v59, %v6568_v60  ;;  %v6290_v48 = vmul.f32 %v15039_v42, %v6257_v62 }
 0xd60   : > { %v9086_v32 = vpop.eup %9085  ;;  %v15222_v20 = vadd.f32 %v15215_v31, %v6588_v8  ;;  %v15225_v12 = vsub.f32 %v15109_v49, %v6290_v48 }
 0xd61   : > { %v6439_v14 = vmul.f32 %v9086_v32, %v6395_v22  ;;  %v9088_v26 = vpop.eup %9087  ;;  %vm6445_vm13 = vweird.f32 %v9086_v32  ;;  %v6453_v22 = vmul.f32 %v15213_v9, %v6452_v13 }
 0xd62   : > { %8242 = vmatmul.msk.f32.vlgmr.msra.gmra.mxu0 %vm776_vm0, %v15222_v20  ;;  %8258 = vmatmul.msk.f32.vlgmr.msrb.gmra.mxu2 %vm776_vm0, %v15222_v20  ;;  %v6322_v2 = vmul.f32 %v15225_v12, %v15225_v12  ;;  %v6459_v53 = vmul.f32 %v9088_v26, %v15205_v29  ;;  %vm6446_vm15 = vmor %vm6444_vm14, %vm6445_vm13  ;;  %vm6465_vm4 = vweird.f32 %v9088_v26 }
 0xd63   : > { %v6440_v49 = vmul.f32 %v9086_v32, %v6439_v14  ;;  %v6457_v60 = vsel %vm6456_vm3, %v15213_v9, %v6453_v22  ;;  %vm6466_vm6 = vmor %vm6464_vm5, %vm6465_vm4 }
 0xd64   : > { %v6358_v18 = vsel %vm776_vm0, %v6322_v2, 0.0  ;;  %v6460_v36 = vmul.f32 %v9088_v26, %v6459_v53  ;;  %v6572_v38 = vmul.f32 %v6457_v60, %v15067_v63 }
 0xd65   : > { %v6441_v57 = vmul.f32 0.5, %v6440_v49  ;;  %6359 = vadd.xlane.f32.xlu0 %v6358_v18  ;;  %v6348_v47 = vpop.xlane.xlu1 %6347 }
 0xd66   : > { %v6382_v43 = vmul.f32 %v6348_v47, %v15039_v42  ;;  %v6461_v45 = vmul.f32 0.5, %v6460_v36  ;;  %v6592_v10 = vmul.f32 %v15207_v59, %v6572_v38 }
 0xd67   : > { %v6442_v23 = vsub.f32 1.5, %v6441_v57 }
 0xd68   : > { %v6398_v40 = vadd.f32 1e-05, %v6382_v43  ;;  %v6462_v51 = vsub.f32 1.5, %v6461_v45  ;;  %v15285_v35 = vadd.f32 %v15215_v31, %v6592_v10 }
 0xd69   : > { %v6443_v5 = vmul.f32 %v9086_v32, %v6442_v23 }
 0xd6a   : > { %9089 = vrsqrt.f32 %v6398_v40  ;;  %8243 = vmatmul.msk.f32.gmra.mxu0 %vm776_vm0, %v15245_v28  ;;  %8259 = vmatmul.msk.f32.gmra.mxu2 %vm776_vm0, %v15245_v28  ;;  %v6463_v8 = vmul.f32 %v9088_v26, %v6462_v51  ;;  %vm6474_vm8 = vweird.f32 %v6398_v40 }
 0xd6b   : > { %v6447_v39 = vsel %vm6446_vm15, %v9086_v32, %v6443_v5 }
 0xd6c   : > { %v6571_v19 = vmul.f32 %v6447_v39, %v15101_v4  ;;  %v6467_v9 = vsel %vm6466_vm6, %v9088_v26, %v6463_v8 }
 0xd6d   : > { %v6266_v15 = vpop.xlane.xlu1 %6265  ;;  %v6573_v63 = vmul.f32 %v6467_v9, %v15074_v54 }
 0xd6e   : > { %v6293_v30 = vmul.f32 %v15039_v42, %v6266_v15  ;;  %v6591_v7 = vmul.f32 %v15207_v59, %v6571_v19 }
 0xd6f   : > { %v6593_v29 = vmul.f32 %v15207_v59, %v6573_v63 }
 0xd70   : > { %v9090_v46 = vpop.eup %9089  ;;  %v15256_v11 = vsub.f32 %v15121_v50, %v6293_v30  ;;  %v15275_v62 = vadd.f32 %v15215_v31, %v6591_v7 }
 0xd71   : > { %v6469_v21 = vmul.f32 %v9090_v46, %v6398_v40  ;;  %vm6475_vm7 = vweird.f32 %v9090_v46  ;;  %v15294_v49 = vadd.f32 %v15215_v31, %v6593_v29 }
 0xd72   : > { %8244 = vmatmul.msk.f32.gmra.mxu0 %vm776_vm0, %v15259_v44  ;;  %8260 = vmatmul.msk.f32.gmra.mxu2 %vm776_vm0, %v15259_v44  ;;  %v6325_v4 = vmul.f32 %v15256_v11, %v15256_v11  ;;  %vm6476_vm9 = vmor %vm6474_vm8, %vm6475_vm7 }
 0xd73   : > { %v6470_v16 = vmul.f32 %v9090_v46, %v6469_v21 }
 0xd74   : > { %v6367_v50 = vsel %vm776_vm0, %v6325_v4, 0.0 }
 0xd75   : > { %6368 = vadd.xlane.f32.xlu0 %v6367_v50  ;;  %v6471_v48 = vmul.f32 0.5, %v6470_v16 }
 0xd77   : > { %v6472_v32 = vsub.f32 1.5, %v6471_v48 }
 0xd79   : > { %v6473_v24 = vmul.f32 %v9090_v46, %v6472_v32 }
 0xd7a   : > { %8245 = vmatmul.msk.f32.gmra.mxu0 %vm776_vm0, %v15275_v62  ;;  %8261 = vmatmul.msk.f32.gmra.mxu2 %vm776_vm0, %v15275_v62 }
 0xd7b   : > { %v6477_v14 = vsel %vm6476_vm9, %v9090_v46, %v6473_v24 }
 0xd7c   : > { %v6574_v2 = vmul.f32 %v6477_v14, %v15113_v37 }
 0xd7e   : > { %v6354_v34 = vpop.xlane.xlu2 %6353  ;;  %v6594_v52 = vmul.f32 %v15207_v59, %v6574_v2 }
 0xd80   : > { %v15309_v57 = vadd.f32 %v15215_v31, %v6594_v52 }
 0xd82   : > { %8246 = vmatmul.msk.f32.gmra.mxu0 %vm776_vm0, %v15285_v35  ;;  %8262 = vmatmul.msk.f32.gmra.mxu2 %vm776_vm0, %v15285_v35 }
 0xd86   : > { %v6272_v54 = vpop.xlane.xlu2 %6271 }
 0xd87   : > { %v6295_v18 = vmul.f32 %v15039_v42, %v6272_v54 }
 0xd89   : > { %v15302_v0 = vsub.f32 %v15135_v1, %v6295_v18  ;;  %v6384_v1 = vmul.f32 %v6354_v34, %v15039_v42 }
 0xd8a   : > { %8247 = vmatmul.msk.f32.gmra.mxu0 %vm776_vm0, %v15294_v49  ;;  %8263 = vmatmul.msk.f32.gmra.mxu2 %vm776_vm0, %v15294_v49 }
 0xd8b   : > { %v6327_v37 = vmul.f32 %v15302_v0, %v15302_v0  ;;  %v6400_v47 = vadd.f32 1e-05, %v6384_v1  ;;  %v6357_v26 = vpop.xlane.xlu1 %6356 }
 0xd8c   : > { %v6385_v43 = vmul.f32 %v6357_v26, %v15039_v42 }
 0xd8d   : > { %v6373_v27 = vsel %vm776_vm0, %v6327_v37, 0.0  ;;  %9091 = vrsqrt.f32 %v6400_v47  ;;  %vm6494_vm14 = vweird.f32 %v6400_v47 }
 0xd8e   : > { %6374 = vadd.xlane.f32.xlu2 %v6373_v27  ;;  %v15317_v23 = vadd.f32 1e-05, %v6385_v43 }
 0xd90   : > { %9093 = vrsqrt.f32 %v15317_v23  ;;  %vm6504_vm2 = vweird.f32 %v15317_v23 }
 0xd92   : > { %8248 = vmatmul.msk.f32.gmra.mxu0 %vm776_vm0, %v15309_v57  ;;  %8264 = vmatmul.msk.f32.gmra.mxu2 %vm776_vm0, %v15309_v57 }
 0xd93   : > { %v9092_v40 = vpop.eup %9091 }
 0xd94   : > { %v6489_v5 = vmul.f32 %v9092_v40, %v6400_v47  ;;  %vm6495_vm11 = vweird.f32 %v9092_v40 }
 0xd95   : > { %vm6496_vm15 = vmor %vm6494_vm14, %vm6495_vm11 }
 0xd96   : > { %v6490_v17 = vmul.f32 %v9092_v40, %v6489_v5  ;;  %v9094_v39 = vpop.eup %9093 }
 0xd97   : > { %v6499_v45 = vmul.f32 %v9094_v39, %v15317_v23  ;;  %vm6505_vm1 = vweird.f32 %v9094_v39 }
 0xd98   : > { %v6491_v22 = vmul.f32 0.5, %v6490_v17  ;;  %vm6506_vm3 = vmor %vm6504_vm2, %vm6505_vm1 }
 0xd99   : > { %v6500_v16 = vmul.f32 %v9094_v39, %v6499_v45 }
 0xd9a   : > { %v6492_v51 = vsub.f32 1.5, %v6491_v22 }
 0xd9b   : > { %v6501_v34 = vmul.f32 0.5, %v6500_v16 }
 0xd9c   : > { %v6363_v13 = vpop.xlane.xlu1 %6362  ;;  %v6493_v63 = vmul.f32 %v9092_v40, %v6492_v51 }
 0xd9d   : > { %v6387_v46 = vmul.f32 %v6363_v13, %v15039_v42  ;;  %v6502_v18 = vsub.f32 1.5, %v6501_v34 }
 0xd9e   : > { %v6497_v54 = vsel %vm6496_vm15, %v9092_v40, %v6493_v63 }
 0xd9f   : > { %v15329_v7 = vadd.f32 1e-05, %v6387_v46  ;;  %v6576_v1 = vmul.f32 %v6497_v54, %v15129_v25  ;;  %v6503_v47 = vmul.f32 %v9094_v39, %v6502_v18 }
 0xda1   : > { %v6596_v25 = vmul.f32 %v15207_v59, %v6576_v1  ;;  %v6507_v40 = vsel %vm6506_vm3, %v9094_v39, %v6503_v47  ;;  %vm6524_vm8 = vweird.f32 %v15329_v7 }
 0xda3   : > { %v15354_v46 = vadd.f32 %v15215_v31, %v6596_v25  ;;  %v6650_v25 = vld [vmem:[#allocation14 + $0x50] sm:$0xff] }
 0xda4   : > { %v6366_v38 = vpop.xlane.xlu2 %6365 }
 0xda5   : > { %v6388_v9 = vmul.f32 %v6366_v38, %v15039_v42 }
 0xda7   : > { %v15335_v14 = vadd.f32 1e-05, %v6388_v9  ;;  %v6655_v9 = vld [vmem:[#allocation14 + $0x78] sm:$0xff] }
 0xda8   : > { %6911 = vmatpush.msra.mxu2 %v6655_v9 }
 0xda9   : > { %vm6534_vm11 = vweird.f32 %v15335_v14 }
 0xdc8   : > { %v6351_v41 = vpop.xlane.xlu0 %6350 }
 0xdc9   : > { %v6383_v6 = vmul.f32 %v6351_v41, %v15039_v42 }
 0xdcb   : > { %v6399_v53 = vadd.f32 1e-05, %v6383_v6 }
 0xdcd   : > { %9095 = vrsqrt.f32 %v6399_v53  ;;  %vm6484_vm12 = vweird.f32 %v6399_v53 }
 0xdce   : > { %9097 = vrsqrt.f32 %v15329_v7 }
 0xdd0   : > { %v6269_v36 = vpop.xlane.xlu0 %6268 }
 0xdd1   : > { %v6294_v15 = vmul.f32 %v15039_v42, %v6269_v36 }
 0xdd3   : > { %v9096_v30 = vpop.eup %9095  ;;  %v15324_v19 = vsub.f32 %v15197_v61, %v6294_v15  ;;  %v6577_v15 = vmul.f32 %v6507_v40, %v15139_v56 }
 0xdd4   : > { %v6479_v21 = vmul.f32 %v9096_v30, %v6399_v53  ;;  %vm6485_vm10 = vweird.f32 %v9096_v30  ;;  %v9098_v52 = vpop.eup %9097 }
 0xdd5   : > { %v6326_v4 = vmul.f32 %v15324_v19, %v15324_v19  ;;  %vm6486_vm13 = vmor %vm6484_vm12, %vm6485_vm10  ;;  %v6519_v43 = vmul.f32 %v9098_v52, %v15329_v7  ;;  %v6597_v56 = vmul.f32 %v15207_v59, %v6577_v15  ;;  %vm6525_vm7 = vweird.f32 %v9098_v52  ;;  %v6642_v15 = vld [vmem:[#allocation14 + $0x10] sm:$0xff] }
 0xdd6   : > { %v6480_v50 = vmul.f32 %v9096_v30, %v6479_v21  ;;  %vm6526_vm9 = vmor %vm6524_vm8, %vm6525_vm7 }
 0xdd7   : > { %v6370_v60 = vsel %vm776_vm0, %v6326_v4, 0.0  ;;  %v6520_v6 = vmul.f32 %v9098_v52, %v6519_v43  ;;  %v15364_v51 = vadd.f32 %v15215_v31, %v6597_v56 }
 0xdd8   : > { %v6481_v8 = vmul.f32 0.5, %v6480_v50  ;;  %6371 = vadd.xlane.f32.xlu1 %v6370_v60  ;;  %v6360_v48 = vpop.xlane.xlu0 %6359 }
 0xdd9   : > { %v6386_v61 = vmul.f32 %v6360_v48, %v15039_v42  ;;  %v6521_v22 = vmul.f32 0.5, %v6520_v6 }
 0xdda   : > { %v6482_v10 = vsub.f32 1.5, %v6481_v8 }
 0xddb   : > { %v6402_v32 = vadd.f32 1e-05, %v6386_v61  ;;  %v6522_v39 = vsub.f32 1.5, %v6521_v22  ;;  %v6643_v22 = vld [vmem:[#allocation14 + $0x18] sm:$0xff] }
 0xddc   : > { %v6483_v24 = vmul.f32 %v9096_v30, %v6482_v10 }
 0xddd   : > { %9099 = vrsqrt.f32 %v6402_v32  ;;  %vm6514_vm5 = vweird.f32 %v6402_v32  ;;  %v6523_v16 = vmul.f32 %v9098_v52, %v6522_v39 }
 0xdde   : > { %v6487_v29 = vsel %vm6486_vm13, %v9096_v30, %v6483_v24  ;;  %9101 = vrsqrt.f32 %v15335_v14 }
 0xddf   : > { %v6575_v2 = vmul.f32 %v6487_v29, %v15181_v33  ;;  %v6527_v61 = vsel %vm6526_vm9, %v9098_v52, %v6523_v16 }
 0xde0   : > { %v6579_v63 = vmul.f32 %v6527_v61, %v15150_v58 }
 0xde1   : > { %v6595_v37 = vmul.f32 %v15207_v59, %v6575_v2 }
 0xde2   : > { %v6599_v7 = vmul.f32 %v15207_v59, %v6579_v63 }
 0xde3   : > { %v9100_v27 = vpop.eup %9099  ;;  %v15342_v26 = vadd.f32 %v15215_v31, %v6595_v37 }
 0xde4   : > { %v6509_v41 = vmul.f32 %v9100_v27, %v6402_v32  ;;  %v9102_v17 = vpop.eup %9101  ;;  %vm6515_vm4 = vweird.f32 %v9100_v27  ;;  %v6654_v32 = vld [vmem:[#allocation14 + $0x70] sm:$0xff]  ;;  %v15384_v18 = vadd.f32 %v15215_v31, %v6599_v7 }
 0xde5   : > { %8249 = vmatmul.msk.f32.gmra.mxu0 %vm776_vm0, %v15342_v26  ;;  %8265 = vmatmul.msk.f32.gmra.mxu2 %vm776_vm0, %v15342_v26  ;;  %v6529_v23 = vmul.f32 %v9102_v17, %v15335_v14  ;;  %vm6516_vm6 = vmor %vm6514_vm5, %vm6515_vm4  ;;  %vm6535_vm10 = vweird.f32 %v9102_v17 }
 0xde6   : > { %v6510_v33 = vmul.f32 %v9100_v27, %v6509_v41  ;;  %6846 = vmatpush.msrb.mxu0 %v6654_v32  ;;  %vm6536_vm12 = vmor %vm6534_vm11, %vm6535_vm10 }
 0xde7   : > { %v6530_v21 = vmul.f32 %v9102_v17, %v6529_v23 }
 0xde8   : > { %v6511_v53 = vmul.f32 0.5, %v6510_v33  ;;  %v6369_v5 = vpop.xlane.xlu0 %6368  ;;  %v6651_v33 = vld [vmem:[#allocation14 + $0x58] sm:$0xff]  ;;  %6847 = vmatpush.msrb.mxu0 %v6650_v25 }
 0xde9   : > { %v6389_v13 = vmul.f32 %v6369_v5, %v15039_v42  ;;  %v6531_v38 = vmul.f32 0.5, %v6530_v21  ;;  %6912 = vmatpush.msra.mxu2 %v6651_v33  ;;  %v6624_v33 = vld [vmem:[%s16532_s7] sm:$0xff] }
 0xdea   : > { %v6512_v36 = vsub.f32 1.5, %v6511_v53 }
 0xdeb   : > { %v6405_v30 = vadd.f32 1e-05, %v6389_v13  ;;  %v6646_v13 = vld [vmem:[#allocation14 + $0x30] sm:$0xff] }
 0xdec   : > { %v6513_v45 = vmul.f32 %v9100_v27, %v6512_v36  ;;  %v6647_v36 = vld [vmem:[#allocation14 + $0x38] sm:$0xff]  ;;  %6848 = vmatpush.msrb.mxu0 %v6646_v13 }
 0xded   : > { %9103 = vrsqrt.f32 %v6405_v30  ;;  %8250 = vmatmul.msk.f32.gmra.mxu0 %vm776_vm0, %v15354_v46  ;;  %8266 = vmatmul.msk.f32.gmra.mxu2 %vm776_vm0, %v15354_v46  ;;  %vm6544_vm14 = vweird.f32 %v6405_v30  ;;  %v15582_v13 = vld [vmem:[%s10002_s1] sm:$0xff] }
 0xdee   : > { %v6517_v4 = vsel %vm6516_vm6, %v9100_v27, %v6513_v45  ;;  %6913 = vmatpush.msra.mxu2 %v6647_v36  ;;  %6849 = vmatpush.msrb.mxu0 %v6642_v15 }
 0xdef   : > { %v6578_v60 = vmul.f32 %v6517_v4, %v15225_v12  ;;  %v6532_v12 = vsub.f32 1.5, %v6531_v38 }
 0xdf0   : > { %6914 = vmatpush.msra.mxu2 %v6643_v22 }
 0xdf1   : > { %v6598_v48 = vmul.f32 %v15207_v59, %v6578_v60  ;;  %v6533_v24 = vmul.f32 %v9102_v17, %v6532_v12 }
 0xdf3   : > { %v9104_v50 = vpop.eup %9103  ;;  %v15374_v34 = vadd.f32 %v15215_v31, %v6598_v48  ;;  %v6537_v58 = vsel %vm6536_vm12, %v9102_v17, %v6533_v24  ;;  %v15412_v48 = vpop.f32.mrf.mxu2 }
 0xdf4   : > { %v6539_v8 = vmul.f32 %v9104_v50, %v6405_v30  ;;  %v6580_v54 = vmul.f32 %v6537_v58, %v15157_v3  ;;  %vm6545_vm13 = vweird.f32 %v9104_v50 }
 0xdf5   : > { %8251 = vmatmul.msk.f32.gmra.mxu0 %vm776_vm0, %v15364_v51  ;;  %8267 = vmatmul.msk.f32.gmra.mxu2 %vm776_vm0, %v15364_v51  ;;  %vm6546_vm15 = vmor %vm6544_vm14, %vm6545_vm13 }
 0xdf6   : > { %v6540_v10 = vmul.f32 %v9104_v50, %v6539_v8  ;;  %v6600_v14 = vmul.f32 %v15207_v59, %v6580_v54 }
 0xdf8   : > { %v6541_v29 = vmul.f32 0.5, %v6540_v10  ;;  %v15393_v3 = vadd.f32 %v15215_v31, %v6600_v14 }
 0xdfa   : > { %v6542_v2 = vsub.f32 1.5, %v6541_v29 }
 0xdfb   : > { %v15426_v63 = vpop.f32.mrf.mxu2 }
 0xdfc   : > { %v6543_v52 = vmul.f32 %v9104_v50, %v6542_v2  ;;  %v6636_v2 = vld [vmem:[%s16532_s7 + $0x60] sm:$0xff] }
 0xdfd   : > { %8252 = vmatmul.msk.f32.gmra.mxu0 %vm776_vm0, %v15374_v34  ;;  %8268 = vmatmul.msk.f32.gmra.mxu2 %vm776_vm0, %v15374_v34 }
 0xdfe   : > { %v6547_v37 = vsel %vm6546_vm15, %v9104_v50, %v6543_v52  ;;  %v15409_v50 = vpop.f32.mrf.mxu0  ;;  %6976 = vmatpush.msra.mxu0 %v6636_v2  ;;  %v15665_v2 = vld [vmem:[%s10002_s1 + $0x38] sm:$0xff] }
 0xdff   : > { %v6581_v27 = vmul.f32 %v6547_v37, %v15256_v11 }
 0xe01   : > { %v6601_v1 = vmul.f32 %v15207_v59, %v6581_v27  ;;  %v6375_v11 = vpop.xlane.xlu2 %6374  ;;  %v6632_v27 = vld [vmem:[%s16532_s7 + $0x40] sm:$0xff] }
 0xe02   : > { %v6391_v43 = vmul.f32 %v6375_v11, %v15039_v42  ;;  %6977 = vmatpush.msra.mxu0 %v6632_v27 }
 0xe03   : > { %v15401_v47 = vadd.f32 %v15215_v31, %v6601_v1  ;;  %v15437_v29 = vpop.f32.mrf.mxu2 }
 0xe04   : > { %v6407_v41 = vadd.f32 1e-05, %v6391_v43 }
 0xe05   : > { %8253 = vmatmul.msk.f32.gmra.mxu0 %vm776_vm0, %v15384_v18  ;;  %8269 = vmatmul.msk.f32.gmra.mxu2 %vm776_vm0, %v15384_v18 }
 0xe06   : > { %9105 = vrsqrt.f32 %v6407_v41  ;;  %vm6564_vm5 = vweird.f32 %v6407_v41  ;;  %v15419_v32 = vpop.f32.mrf.mxu0 }
 0xe0c   : > { %v9106_v6 = vpop.eup %9105 }
 0xe0d   : > { %8254 = vmatmul.msk.f32.gmra.mxu0 %vm776_vm0, %v15393_v3  ;;  %8270 = vmatmul.msk.f32.gmra.mxu2 %vm776_vm0, %v15393_v3  ;;  %v6559_v17 = vmul.f32 %v9106_v6, %v6407_v41  ;;  %vm6565_vm2 = vweird.f32 %v9106_v6 }
 0xe0e   : > { %vm6566_vm6 = vmor %vm6564_vm5, %vm6565_vm2 }
 0xe0f   : > { %v6560_v30 = vmul.f32 %v9106_v6, %v6559_v17 }
 0xe11   : > { %v6561_v45 = vmul.f32 0.5, %v6560_v30  ;;  %v15593_v30 = vld [vmem:[%s10002_s1 + $0x8] sm:$0xff] }
 0xe13   : > { %v6562_v21 = vsub.f32 1.5, %v6561_v45  ;;  %v15604_v45 = vld [vmem:[%s10002_s1 + $0x10] sm:$0xff] }
 0xe15   : > { %8255 = vmatmul.msk.f32.gmra.mxu0 %vm776_vm0, %v15401_v47  ;;  %8271 = vmatmul.msk.f32.gmra.mxu2 %vm776_vm0, %v15401_v47  ;;  %v6563_v60 = vmul.f32 %v9106_v6, %v6562_v21  ;;  %v15615_v21 = vld [vmem:[%s10002_s1 + $0x18] sm:$0xff] }
 0xe17   : > { %v6567_v61 = vsel %vm6566_vm6, %v9106_v6, %v6563_v60  ;;  %v15626_v60 = vld [vmem:[%s10002_s1 + $0x20] sm:$0xff] }
 0xe18   : > { %v6583_v10 = vmul.f32 %v6567_v61, %v15302_v0  ;;  %v15435_v0 = vpop.f32.mrf.mxu0  ;;  %v6638_v61 = vld [vmem:[%s16532_s7 + $0x70] sm:$0xff] }
 0xe4b   : > { %v6372_v40 = vpop.xlane.xlu1 %6371 }
 0xe4c   : > { %v6390_v53 = vmul.f32 %v6372_v40, %v15039_v42 }
 0xe4e   : > { %v6406_v5 = vadd.f32 1e-05, %v6390_v53 }
 0xe50   : > { %9107 = vrsqrt.f32 %v6406_v5  ;;  %vm6554_vm3 = vweird.f32 %v6406_v5 }
 0xe56   : > { %v9108_v23 = vpop.eup %9107 }
 0xe57   : > { %v6549_v56 = vmul.f32 %v9108_v23, %v6406_v5  ;;  %vm6555_vm1 = vweird.f32 %v9108_v23 }
 0xe58   : > { %vm6556_vm4 = vmor %vm6554_vm3, %vm6555_vm1 }
 0xe59   : > { %v6550_v39 = vmul.f32 %v9108_v23, %v6549_v56 }
 0xe5b   : > { %v6551_v4 = vmul.f32 0.5, %v6550_v39 }
 0xe5d   : > { %v6552_v42 = vsub.f32 1.5, %v6551_v4 }
 0xe5f   : > { %v6553_v16 = vmul.f32 %v9108_v23, %v6552_v42 }
 0xe61   : > { %v6557_v38 = vsel %vm6556_vm4, %v9108_v23, %v6553_v16  ;;  %v6639_v16 = vld [vmem:[%s16532_s7 + $0x78] sm:$0xff] }
 0xe62   : > { %v6582_v8 = vmul.f32 %v6557_v38, %v15324_v19  ;;  %v6603_v19 = vmul.f32 %v15207_v59, %v6583_v10 }
 0xe64   : > { %v6602_v12 = vmul.f32 %v15207_v59, %v6582_v8  ;;  %v15429_v24 = vadd.f32 %v15215_v31, %v6603_v19  ;;  %v15443_v59 = vpop.f32.mrf.mxu0  ;;  %v15654_v19 = vld [vmem:[%s10002_s1 + $0x30] sm:$0xff] }
 0xe66   : > { %v15417_v9 = vadd.f32 %v15215_v31, %v6602_v12  ;;  %v15449_v31 = vpop.f32.mrf.mxu2  ;;  %v15643_v12 = vld [vmem:[%s10002_s1 + $0x28] sm:$0xff] }
 0xe68   : > { %8256 = vmatmul.msk.f32.gmra.mxu0 %vm776_vm0, %v15417_v9  ;;  %8272 = vmatmul.msk.f32.gmra.mxu2 %vm776_vm0, %v15417_v9 }
 0xe6c   : > { %v15451_v7 = vpop.f32.mrf.mxu0 }
 0xe6e   : > { %v15457_v58 = vpop.f32.mrf.mxu2 }
 0xe70   : > { %8257 = vmatmul.msk.f32.gmra.mxu0 %vm776_vm0, %v15429_v24  ;;  %8273 = vmatmul.msk.f32.gmra.mxu2 %vm776_vm0, %v15429_v24 }
 0xe78   : > { %8274 = vmatmul.msk.f32.vlgmr.msrb.gmra.mxu0 %vm776_vm0, %v15222_v20  ;;  %8290 = vmatmul.msk.f32.vlgmr.msra.gmra.mxu2 %vm776_vm0, %v15222_v20  ;;  %v15459_v20 = vpop.f32.mrf.mxu0 }
 0xe80   : > { %8275 = vmatmul.msk.f32.gmra.mxu0 %vm776_vm0, %v15245_v28  ;;  %8291 = vmatmul.msk.f32.gmra.mxu2 %vm776_vm0, %v15245_v28  ;;  %v15465_v28 = vpop.f32.mrf.mxu2  ;;  %v15477_v54 = vpop.f32.mrf.mxu0 }
 0xe88   : > { %8276 = vmatmul.msk.f32.gmra.mxu0 %vm776_vm0, %v15259_v44  ;;  %8292 = vmatmul.msk.f32.gmra.mxu2 %vm776_vm0, %v15259_v44  ;;  %v6637_v44 = vld [vmem:[%s16532_s7 + $0x68] sm:$0xff] }
 0xe89   : > { %7041 = vmatpush.msrb.mxu2 %v6637_v44 }
 0xe90   : > { %8277 = vmatmul.msk.f32.gmra.mxu0 %vm776_vm0, %v15275_v62  ;;  %8293 = vmatmul.msk.f32.gmra.mxu2 %vm776_vm0, %v15275_v62  ;;  %v15479_v62 = vpop.f32.mrf.mxu2 }
 0xe98   : > { %8278 = vmatmul.msk.f32.gmra.mxu0 %vm776_vm0, %v15285_v35  ;;  %8294 = vmatmul.msk.f32.gmra.mxu2 %vm776_vm0, %v15285_v35  ;;  %v15485_v35 = vpop.f32.mrf.mxu0  ;;  %v15487_v52 = vpop.f32.mrf.mxu2 }
 0xea0   : > { %8279 = vmatmul.msk.f32.gmra.mxu0 %vm776_vm0, %v15294_v49  ;;  %8295 = vmatmul.msk.f32.gmra.mxu2 %vm776_vm0, %v15294_v49  ;;  %v15493_v14 = vpop.f32.mrf.mxu0  ;;  %v15499_v37 = vpop.f32.mrf.mxu2 }
 0xea8   : > { %8280 = vmatmul.msk.f32.gmra.mxu0 %vm776_vm0, %v15309_v57  ;;  %8296 = vmatmul.msk.f32.gmra.mxu2 %vm776_vm0, %v15309_v57  ;;  %v15501_v49 = vpop.f32.mrf.mxu0  ;;  %v6633_v57 = vld [vmem:[%s16532_s7 + $0x48] sm:$0xff] }
 0xea9   : > { %7042 = vmatpush.msrb.mxu2 %v6633_v57 }
 0xeb0   : > { %8281 = vmatmul.msk.f32.gmra.mxu0 %vm776_vm0, %v15342_v26  ;;  %8297 = vmatmul.msk.f32.gmra.mxu2 %vm776_vm0, %v15342_v26  ;;  %v15513_v26 = vpop.f32.mrf.mxu2  ;;  %v15515_v1 = vpop.f32.mrf.mxu0 }
 0xeb8   : > { %8282 = vmatmul.msk.f32.gmra.mxu0 %vm776_vm0, %v15354_v46  ;;  %8298 = vmatmul.msk.f32.gmra.mxu2 %vm776_vm0, %v15354_v46  ;;  %v15521_v46 = vpop.f32.mrf.mxu2  ;;  %v15527_v11 = vpop.f32.mrf.mxu0 }
 0xec0   : > { %8283 = vmatmul.msk.f32.gmra.mxu0 %vm776_vm0, %v15364_v51  ;;  %8299 = vmatmul.msk.f32.gmra.mxu2 %vm776_vm0, %v15364_v51  ;;  %v15529_v43 = vpop.f32.mrf.mxu2  ;;  %v15535_v41 = vpop.f32.mrf.mxu0  ;;  %v6628_v51 = vld [vmem:[%s16532_s7 + $0x20] sm:$0xff] }
 0xec1   : > { %6978 = vmatpush.msra.mxu0 %v6628_v51  ;;  %v15676_v51 = vld [vmem:[%s10002_s1 + $0x40] sm:$0xff] }
 0xec3   : > { %6979 = vmatpush.msra.mxu0 %v6624_v33 }
 0xec5   : > { %7106 = vmatpush.msrb.mxu0 %v6638_v61  ;;  %v15693_v61 = vld [vmem:[%s10002_s1 + $0x48] sm:$0xff] }
 0xec8   : > { %8284 = vmatmul.msk.f32.gmra.mxu0 %vm776_vm0, %v15374_v34  ;;  %8300 = vmatmul.msk.f32.gmra.mxu2 %vm776_vm0, %v15374_v34  ;;  %v6629_v34 = vld [vmem:[%s16532_s7 + $0x28] sm:$0xff]  ;;  %v15553_v25 = vpop.f32.mrf.mxu2  ;;  %v15555_v40 = vpop.f32.mrf.mxu0 }
 0xec9   : > { %7043 = vmatpush.msrb.mxu2 %v6629_v34  ;;  %v6635_v34 = vld [vmem:[%s16532_s7 + $0x58] sm:$0xff] }
 0xed0   : > { %8285 = vmatmul.msk.f32.gmra.mxu0 %vm776_vm0, %v15384_v18  ;;  %8301 = vmatmul.msk.f32.gmra.mxu2 %vm776_vm0, %v15384_v18  ;;  %v6625_v18 = vld [vmem:[%s16532_s7 + $0x8] sm:$0xff]  ;;  %v15561_v6 = vpop.f32.mrf.mxu2 }
 0xed1   : > { %7044 = vmatpush.msrb.mxu2 %v6625_v18  ;;  %17022 = vst [vmem:[#allocation54_spill] sm:$0xff] %v15561_v6 }
 0xed3   : > { %7171 = vmatpush.msra.mxu2 %v6639_v16  ;;  %v6634_v16 = vld [vmem:[%s16532_s7 + $0x50] sm:$0xff] }
 0xed4   : > { %7107 = vmatpush.msrb.mxu0 %v6634_v16 }
 0xed5   : > { %7172 = vmatpush.msra.mxu2 %v6635_v34 }
 0xed8   : > { %8286 = vmatmul.msk.f32.gmra.mxu0 %vm776_vm0, %v15393_v3  ;;  %8302 = vmatmul.msk.f32.gmra.mxu2 %vm776_vm0, %v15393_v3 }
 0xee0   : > { %8287 = vmatmul.msk.f32.gmra.mxu0 %vm776_vm0, %v15401_v47  ;;  %8303 = vmatmul.msk.f32.gmra.mxu2 %vm776_vm0, %v15401_v47 }
 0xee5   : > { %v15563_v53 = vpop.f32.mrf.mxu0 }
 0xee6   : > { %17023 = vst [vmem:[#allocation55_spill] sm:$0xff] %v15563_v53 }
 0xee8   : > { %8288 = vmatmul.msk.f32.gmra.mxu0 %vm776_vm0, %v15417_v9  ;;  %8304 = vmatmul.msk.f32.gmra.mxu2 %vm776_vm0, %v15417_v9 }
 0xeeb   : > { %v15569_v3 = vpop.f32.mrf.mxu2 }
 0xeec   : > { %17024 = vst [vmem:[#allocation101_spill] sm:$0xff] %v15569_v3 }
 0xeed   : > { %v15571_v5 = vpop.f32.mrf.mxu0 }
 0xeee   : > { %17025 = vst [vmem:[#allocation103_spill] sm:$0xff] %v15571_v5 }
 0xef0   : > { %8289 = vmatmul.msk.f32.gmra.mxu0 %vm776_vm0, %v15429_v24  ;;  %8305 = vmatmul.msk.f32.gmra.mxu2 %vm776_vm0, %v15429_v24 }
 0xef3   : > { %v15577_v47 = vpop.f32.mrf.mxu2 }
 0xef4   : > { %17026 = vst [vmem:[#allocation104_spill] sm:$0xff] %v15577_v47 }
 0xef5   : > { %v15579_v17 = vpop.f32.mrf.mxu0 }
 0xef6   : > { %17027 = vst [vmem:[#allocation71_spill] sm:$0xff] %v15579_v17 }
 0xef8   : > { %8306 = vmatmul.msk.f32.vlgmr.msra.gmra.mxu0 %vm776_vm0, %v15582_v13  ;;  %8322 = vmatmul.msk.f32.vlgmr.msrb.gmra.mxu2 %vm776_vm0, %v15582_v13 }
 0xefb   : > { %v15588_v36 = vpop.f32.mrf.mxu2 }
 0xefc   : > { %17028 = vst [vmem:[#allocation72_spill] sm:$0xff] %v15588_v36  ;;  %v7385_v36 = vld [vmem:[%s16535_s10 + $0xb8] sm:$0xff] }
 0xefd   : > { %v15590_v15 = vpop.f32.mrf.mxu0 }
 0xefe   : > { %17029 = vst [vmem:[#allocation73_spill] sm:$0xff] %v15590_v15  ;;  %v7372_v15 = vld [vmem:[%s16535_s10 + $0x50] sm:$0xff] }
 0xf00   : > { %8307 = vmatmul.msk.f32.gmra.mxu0 %vm776_vm0, %v15593_v30  ;;  %8323 = vmatmul.msk.f32.gmra.mxu2 %vm776_vm0, %v15593_v30 }
 0xf03   : > { %v15599_v22 = vpop.f32.mrf.mxu2 }
 0xf04   : > { %17030 = vst [vmem:[#allocation92_spill] sm:$0xff] %v15599_v22  ;;  %v7388_v22 = vld [vmem:[%s16535_s10 + $0xd0] sm:$0xff] }
 0xf05   : > { %v15601_v23 = vpop.f32.mrf.mxu0 }
 0xf06   : > { %17031 = vst [vmem:[#allocation94_spill] sm:$0xff] %v15601_v23  ;;  %v7389_v23 = vld [vmem:[%s16535_s10 + $0xd8] sm:$0xff] }
 0xf08   : > { %8308 = vmatmul.msk.f32.gmra.mxu0 %vm776_vm0, %v15604_v45  ;;  %8324 = vmatmul.msk.f32.gmra.mxu2 %vm776_vm0, %v15604_v45 }
 0xf0b   : > { %v15610_v56 = vpop.f32.mrf.mxu2 }
 0xf0c   : > { %17032 = vst [vmem:[#allocation105_spill] sm:$0xff] %v15610_v56  ;;  %v7390_v56 = vld [vmem:[%s16535_s10 + $0xe0] sm:$0xff] }
 0xf0d   : > { %v15612_v39 = vpop.f32.mrf.mxu0 }
 0xf0e   : > { %17033 = vst [vmem:[#allocation63_spill] sm:$0xff] %v15612_v39  ;;  %v7391_v39 = vld [vmem:[%s16535_s10 + $0xe8] sm:$0xff] }
 0xf10   : > { %8309 = vmatmul.msk.f32.gmra.mxu0 %vm776_vm0, %v15615_v21  ;;  %8325 = vmatmul.msk.f32.gmra.mxu2 %vm776_vm0, %v15615_v21 }
 0xf13   : > { %v15621_v4 = vpop.f32.mrf.mxu2 }
 0xf14   : > { %17034 = vst [vmem:[#allocation38_spill] sm:$0xff] %v15621_v4 }
 0xf15   : > { %v15623_v42 = vpop.f32.mrf.mxu0 }
 0xf16   : > { %17035 = vst [vmem:[#allocation84_spill] sm:$0xff] %v15623_v42 }
 0xf18   : > { %8310 = vmatmul.msk.f32.gmra.mxu0 %vm776_vm0, %v15626_v60  ;;  %8326 = vmatmul.msk.f32.gmra.mxu2 %vm776_vm0, %v15626_v60 }
 0xf1b   : > { %v15635_v38 = vpop.f32.mrf.mxu2 }
 0xf1c   : > { %17036 = vst [vmem:[#allocation115_spill] sm:$0xff] %v15635_v38 }
 0xf1d   : > { %v15637_v8 = vpop.f32.mrf.mxu0 }
 0xf1e   : > { %17037 = vst [vmem:[#allocation116_spill] sm:$0xff] %v15637_v8 }
 0xf20   : > { %8311 = vmatmul.msk.f32.gmra.mxu0 %vm776_vm0, %v15643_v12  ;;  %8327 = vmatmul.msk.f32.gmra.mxu2 %vm776_vm0, %v15643_v12 }
 0xf23   : > { %v15649_v10 = vpop.f32.mrf.mxu2 }
 0xf24   : > { %17038 = vst [vmem:[#allocation117_spill] sm:$0xff] %v15649_v10  ;;  %v15749_v10 = vld [vmem:[%s10002_s1 + $0x68] sm:$0xff] }
 0xf25   : > { %v15651_v9 = vpop.f32.mrf.mxu0 }
 0xf26   : > { %17039 = vst [vmem:[#allocation97_spill] sm:$0xff] %v15651_v9 }
 0xf28   : > { %8312 = vmatmul.msk.f32.gmra.mxu0 %vm776_vm0, %v15654_v19  ;;  %8328 = vmatmul.msk.f32.gmra.mxu2 %vm776_vm0, %v15654_v19 }
 0xf2b   : > { %v15660_v24 = vpop.f32.mrf.mxu2 }
 0xf2c   : > { %17040 = vst [vmem:[#allocation118_spill] sm:$0xff] %v15660_v24  ;;  %v6627_v24 = vld [vmem:[%s16532_s7 + $0x18] sm:$0xff] }
 0xf2d   : > { %v15662_v44 = vpop.f32.mrf.mxu0 }
 0xf2e   : > { %17041 = vst [vmem:[#allocation85_spill] sm:$0xff] %v15662_v44  ;;  %v15726_v44 = vld [vmem:[%s10002_s1 + $0x60] sm:$0xff] }
 0xf30   : > { %8313 = vmatmul.msk.f32.gmra.mxu0 %vm776_vm0, %v15665_v2  ;;  %8329 = vmatmul.msk.f32.gmra.mxu2 %vm776_vm0, %v15665_v2 }
 0xf33   : > { %v15671_v57 = vpop.f32.mrf.mxu2 }
 0xf34   : > { %17042 = vst [vmem:[#allocation99_spill] sm:$0xff] %v15671_v57  ;;  %v15715_v57 = vld [vmem:[%s10002_s1 + $0x58] sm:$0xff] }
 0xf35   : > { %v15673_v27 = vpop.f32.mrf.mxu0 }
 0xf36   : > { %17043 = vst [vmem:[#allocation64_spill] sm:$0xff] %v15673_v27 }
 0xf38   : > { %8314 = vmatmul.msk.f32.gmra.mxu0 %vm776_vm0, %v15676_v51  ;;  %8330 = vmatmul.msk.f32.gmra.mxu2 %vm776_vm0, %v15676_v51 }
 0xf3b   : > { %v15685_v33 = vpop.f32.mrf.mxu2 }
 0xf3c   : > { %17044 = vst [vmem:[#allocation119_spill] sm:$0xff] %v15685_v33  ;;  %v15704_v33 = vld [vmem:[%s10002_s1 + $0x50] sm:$0xff] }
 0xf3d   : > { %v15687_v18 = vpop.f32.mrf.mxu0 }
 0xf3e   : > { %17045 = vst [vmem:[#allocation106_spill] sm:$0xff] %v15687_v18 }
 0xf40   : > { %8315 = vmatmul.msk.f32.gmra.mxu0 %vm776_vm0, %v15693_v61  ;;  %8331 = vmatmul.msk.f32.gmra.mxu2 %vm776_vm0, %v15693_v61 }
 0xf43   : > { %v15699_v27 = vpop.f32.mrf.mxu2 }
 0xf44   : > { %17046 = vst [vmem:[#allocation74_spill] sm:$0xff] %v15699_v27 }
 0xf45   : > { %v15701_v34 = vpop.f32.mrf.mxu0 }
 0xf46   : > { %17047 = vst [vmem:[#allocation121_spill] sm:$0xff] %v15701_v34 }
 0xf48   : > { %8316 = vmatmul.msk.f32.gmra.mxu0 %vm776_vm0, %v15704_v33  ;;  %8332 = vmatmul.msk.f32.gmra.mxu2 %vm776_vm0, %v15704_v33 }
 0xf4b   : > { %v15710_v16 = vpop.f32.mrf.mxu2 }
 0xf4c   : > { %17048 = vst [vmem:[#allocation40_spill] sm:$0xff] %v15710_v16  ;;  %v6631_v16 = vld [vmem:[%s16532_s7 + $0x38] sm:$0xff] }
 0xf4d   : > { %v15712_v18 = vpop.f32.mrf.mxu0  ;;  %7173 = vmatpush.msra.mxu2 %v6631_v16  ;;  %v15768_v16 = vld [vmem:[%s10002_s1 + $0x78] sm:$0xff] }
 0xf4e   : > { %17049 = vst [vmem:[#allocation102_spill] sm:$0xff] %v15712_v18  ;;  %v6630_v18 = vld [vmem:[%s16532_s7 + $0x30] sm:$0xff] }
 0xf4f   : > { %7108 = vmatpush.msrb.mxu0 %v6630_v18  ;;  %7174 = vmatpush.msra.mxu2 %v6627_v24 }
 0xf50   : > { %8317 = vmatmul.msk.f32.gmra.mxu0 %vm776_vm0, %v15715_v57  ;;  %8333 = vmatmul.msk.f32.gmra.mxu2 %vm776_vm0, %v15715_v57 }
 0xf53   : > { %v15721_v34 = vpop.f32.mrf.mxu2 }
 0xf54   : > { %17050 = vst [vmem:[#allocation62_spill] sm:$0xff] %v15721_v34 }
 0xf55   : > { %v15723_v27 = vpop.f32.mrf.mxu0 }
 0xf56   : > { %17051 = vst [vmem:[#allocation120_spill] sm:$0xff] %v15723_v27  ;;  %v6626_v27 = vld [vmem:[%s16532_s7 + $0x10] sm:$0xff] }
 0xf57   : > { %7109 = vmatpush.msrb.mxu0 %v6626_v27 }
 0xf58   : > { %8318 = vmatmul.msk.f32.gmra.mxu0 %vm776_vm0, %v15726_v44  ;;  %8334 = vmatmul.msk.f32.gmra.mxu2 %vm776_vm0, %v15726_v44 }
 0xf5b   : > { %v15741_v34 = vpop.f32.mrf.mxu2 }
 0xf5c   : > { %17052 = vst [vmem:[#allocation107_spill] sm:$0xff] %v15741_v34 }
 0xf5d   : > { %v15746_v9 = vpop.f32.mrf.mxu0 }
 0xf5e   : > { %17053 = vst [vmem:[#allocation39_spill] sm:$0xff] %v15746_v9 }
 0xf60   : > { %8319 = vmatmul.msk.f32.gmra.mxu0 %vm776_vm0, %v15749_v10  ;;  %8335 = vmatmul.msk.f32.gmra.mxu2 %vm776_vm0, %v15749_v10 }
 0xf63   : > { %v15755_v34 = vpop.f32.mrf.mxu2 }
 0xf64   : > { %17054 = vst [vmem:[#allocation41_spill] sm:$0xff] %v15755_v34 }
 0xf65   : > { %v15757_v18 = vpop.f32.mrf.mxu0 }
 0xf66   : > { %17055 = vst [vmem:[#allocation110_spill] sm:$0xff] %v15757_v18 }
 0xf68   : > { %8320 = vmatmul.msk.f32.gmra.mxu0 %vm776_vm0, %v15193_v55  ;;  %8336 = vmatmul.msk.f32.gmra.mxu2 %vm776_vm0, %v15193_v55 }
 0xf6b   : > { %v15763_v27 = vpop.f32.mrf.mxu2 }
 0xf6c   : > { %17056 = vst [vmem:[#allocation96_spill] sm:$0xff] %v15763_v27 }
 0xf6d   : > { %v15765_v24 = vpop.f32.mrf.mxu0 }
 0xf6e   : > { %17057 = vst [vmem:[#allocation108_spill] sm:$0xff] %v15765_v24 }
 0xf70   : > { %8321 = vmatmul.msk.f32.gmra.mxu0 %vm776_vm0, %v15768_v16  ;;  %8337 = vmatmul.msk.f32.gmra.mxu2 %vm776_vm0, %v15768_v16 }
 0xf73   : > { %v15774_v34 = vpop.f32.mrf.mxu2 }
 0xf74   : > { %17058 = vst [vmem:[#allocation75_spill] sm:$0xff] %v15774_v34 }
 0xf75   : > { %v15776_v18 = vpop.f32.mrf.mxu0 }
 0xf78   : > { %8338 = vmatmul.msk.f32.vlgmr.msrb.gmra.mxu0 %vm776_vm0, %v15582_v13  ;;  %8354 = vmatmul.msk.f32.vlgmr.msra.gmra.mxu2 %vm776_vm0, %v15582_v13 }
 0xf7b   : > { %v15782_v55 = vpop.f32.mrf.mxu2 }
 0xf7d   : > { %v15784_v24 = vpop.f32.mrf.mxu0 }
 0xf80   : > { %8339 = vmatmul.msk.f32.gmra.mxu0 %vm776_vm0, %v15593_v30  ;;  %8355 = vmatmul.msk.f32.gmra.mxu2 %vm776_vm0, %v15593_v30 }
 0xf83   : > { %v15790_v27 = vpop.f32.mrf.mxu2 }
 0xf85   : > { %v15792_v34 = vpop.f32.mrf.mxu0 }
 0xf88   : > { %8340 = vmatmul.msk.f32.gmra.mxu0 %vm776_vm0, %v15604_v45  ;;  %8356 = vmatmul.msk.f32.gmra.mxu2 %vm776_vm0, %v15604_v45  ;;  %v7393_v45 = vld [vmem:[%s16535_s10 + $0xf8] sm:$0xff] }
 0xf89   : > { %7495 = vmatpush.msrb.mxu2 %v7393_v45 }
 0xf8b   : > { %v15798_v13 = vpop.f32.mrf.mxu2 }
 0xf8d   : > { %v15800_v9 = vpop.f32.mrf.mxu0 }
 0xf90   : > { %8341 = vmatmul.msk.f32.gmra.mxu0 %vm776_vm0, %v15615_v21  ;;  %8357 = vmatmul.msk.f32.gmra.mxu2 %vm776_vm0, %v15615_v21  ;;  %v7377_v21 = vld [vmem:[%s16535_s10 + $0x78] sm:$0xff] }
 0xf91   : > { %7430 = vmatpush.msra.mxu0 %v7377_v21 }
 0xf93   : > { %v15806_v30 = vpop.f32.mrf.mxu2 }
 0xf95   : > { %v15808_v8 = vpop.f32.mrf.mxu0 }
 0xf98   : > { %8342 = vmatmul.msk.f32.gmra.mxu0 %vm776_vm0, %v15626_v60  ;;  %8358 = vmatmul.msk.f32.gmra.mxu2 %vm776_vm0, %v15626_v60  ;;  %v7392_v60 = vld [vmem:[%s16535_s10 + $0xf0] sm:$0xff] }
 0xf99   : > { %7496 = vmatpush.msrb.mxu2 %v7392_v60 }
 0xf9b   : > { %v15817_v38 = vpop.f32.mrf.mxu2  ;;  %7497 = vmatpush.msrb.mxu2 %v7391_v39 }
 0xf9d   : > { %v15819_v42 = vpop.f32.mrf.mxu0  ;;  %7498 = vmatpush.msrb.mxu2 %v7390_v56 }
 0xf9f   : > { %7499 = vmatpush.msrb.mxu2 %v7389_v23 }
 0xfa0   : > { %8343 = vmatmul.msk.f32.gmra.mxu0 %vm776_vm0, %v15643_v12  ;;  %8359 = vmatmul.msk.f32.gmra.mxu2 %vm776_vm0, %v15643_v12  ;;  %v7376_v12 = vld [vmem:[%s16535_s10 + $0x70] sm:$0xff] }
 0xfa1   : > { %7431 = vmatpush.msra.mxu0 %v7376_v12  ;;  %7500 = vmatpush.msrb.mxu2 %v7388_v22  ;;  %v7387_v22 = vld [vmem:[%s16535_s10 + $0xc8] sm:$0xff] }
 0xfa3   : > { %v15831_v45 = vpop.f32.mrf.mxu2  ;;  %7501 = vmatpush.msrb.mxu2 %v7387_v22  ;;  %v7384_v22 = vld [vmem:[%s16535_s10 + $0xb0] sm:$0xff] }
 0xfa5   : > { %v15833_v4 = vpop.f32.mrf.mxu0 }
 0xfa8   : > { %8344 = vmatmul.msk.f32.gmra.mxu0 %vm776_vm0, %v15654_v19  ;;  %8360 = vmatmul.msk.f32.gmra.mxu2 %vm776_vm0, %v15654_v19  ;;  %v7375_v19 = vld [vmem:[%s16535_s10 + $0x68] sm:$0xff] }
 0xfa9   : > { %7432 = vmatpush.msra.mxu0 %v7375_v19 }
 0xfab   : > { %v15845_v21 = vpop.f32.mrf.mxu2 }
 0xfad   : > { %v15847_v60 = vpop.f32.mrf.mxu0 }
 0xfb0   : > { %8345 = vmatmul.msk.f32.gmra.mxu0 %vm776_vm0, %v15665_v2  ;;  %8361 = vmatmul.msk.f32.gmra.mxu2 %vm776_vm0, %v15665_v2  ;;  %v7374_v2 = vld [vmem:[%s16535_s10 + $0x60] sm:$0xff] }
 0xfb1   : > { %7433 = vmatpush.msra.mxu0 %v7374_v2 }
 0xfb3   : > { %v15859_v39 = vpop.f32.mrf.mxu2 }
 0xfb5   : > { %v15861_v12 = vpop.f32.mrf.mxu0 }
 0xfb8   : > { %8346 = vmatmul.msk.f32.gmra.mxu0 %vm776_vm0, %v15676_v51  ;;  %8362 = vmatmul.msk.f32.gmra.mxu2 %vm776_vm0, %v15676_v51  ;;  %v7373_v51 = vld [vmem:[%s16535_s10 + $0x58] sm:$0xff] }
 0xfb9   : > { %7434 = vmatpush.msra.mxu0 %v7373_v51  ;;  %v7370_v51 = vld [vmem:[%s16535_s10 + $0x40] sm:$0xff] }
 0xfbb   : > { %v15873_v56 = vpop.f32.mrf.mxu2  ;;  %7435 = vmatpush.msra.mxu0 %v7372_v15  ;;  %v7386_v15 = vld [vmem:[%s16535_s10 + $0xc0] sm:$0xff] }
 0xfbc   : > { %7502 = vmatpush.msrb.mxu2 %v7386_v15  ;;  %v7366_v15 = vld [vmem:[%s16535_s10 + $0x20] sm:$0xff] }
 0xfbd   : > { %v15875_v19 = vpop.f32.mrf.mxu0 }
 0xfbe   : > { %7503 = vmatpush.msrb.mxu2 %v7385_v36  ;;  %v7367_v36 = vld [vmem:[%s16535_s10 + $0x28] sm:$0xff] }
 0xfc0   : > { %8347 = vmatmul.msk.f32.gmra.mxu0 %vm776_vm0, %v15693_v61  ;;  %8363 = vmatmul.msk.f32.gmra.mxu2 %vm776_vm0, %v15693_v61  ;;  %v7371_v61 = vld [vmem:[%s16535_s10 + $0x48] sm:$0xff] }
 0xfc1   : > { %7436 = vmatpush.msra.mxu0 %v7371_v61  ;;  %v7368_v61 = vld [vmem:[%s16535_s10 + $0x30] sm:$0xff]  ;;  %7504 = vmatpush.msrb.mxu2 %v7384_v22 }
 0xfc3   : > { %v15887_v23 = vpop.f32.mrf.mxu2  ;;  %7437 = vmatpush.msra.mxu0 %v7370_v51  ;;  %v7383_v51 = vld [vmem:[%s16535_s10 + $0xa8] sm:$0xff] }
 0xfc4   : > { %7505 = vmatpush.msrb.mxu2 %v7383_v51  ;;  %v7380_v51 = vld [vmem:[%s16535_s10 + $0x90] sm:$0xff] }
 0xfc5   : > { %v15889_v2 = vpop.f32.mrf.mxu0 }
 0xfc8   : > { %8348 = vmatmul.msk.f32.gmra.mxu0 %vm776_vm0, %v15704_v33  ;;  %8364 = vmatmul.msk.f32.gmra.mxu2 %vm776_vm0, %v15704_v33  ;;  %v7369_v33 = vld [vmem:[%s16535_s10 + $0x38] sm:$0xff] }
 0xfc9   : > { %7438 = vmatpush.msra.mxu0 %v7369_v33  ;;  %v7382_v33 = vld [vmem:[%s16535_s10 + $0xa0] sm:$0xff] }
 0xfca   : > { %7506 = vmatpush.msrb.mxu2 %v7382_v33  ;;  %v7379_v33 = vld [vmem:[%s16535_s10 + $0x88] sm:$0xff] }
 0xfcb   : > { %v15916_v17 = vpop.f32.mrf.mxu2  ;;  %7439 = vmatpush.msra.mxu0 %v7368_v61  ;;  %v7381_v61 = vld [vmem:[%s16535_s10 + $0x98] sm:$0xff] }
 0xfcc   : > { %7507 = vmatpush.msrb.mxu2 %v7381_v61 }
 0xfcd   : > { %v15918_v47 = vpop.f32.mrf.mxu0  ;;  %7440 = vmatpush.msra.mxu0 %v7367_v36  ;;  %v7364_v36 = vld [vmem:[%s16535_s10 + $0x10] sm:$0xff] }
 0xfce   : > { %7508 = vmatpush.msrb.mxu2 %v7380_v51 }
 0xfcf   : > { %7441 = vmatpush.msra.mxu0 %v7366_v15  ;;  %v7363_v15 = vld [vmem:[%s16535_s10 + $0x8] sm:$0xff] }
 0xfd0   : > { %8349 = vmatmul.msk.f32.gmra.mxu0 %vm776_vm0, %v15715_v57  ;;  %8365 = vmatmul.msk.f32.gmra.mxu2 %vm776_vm0, %v15715_v57  ;;  %v7365_v57 = vld [vmem:[%s16535_s10 + $0x18] sm:$0xff] }
 0xfd1   : > { %7442 = vmatpush.msra.mxu0 %v7365_v57  ;;  %v7362_v57 = vld [vmem:[%s16535_s10] sm:$0xff]  ;;  %7509 = vmatpush.msrb.mxu2 %v7379_v33 }
 0xfd2   : > { %v15989_v33 = vld [vmem:[#allocation15] sm:$0xf] }
 0xfd3   : > { %v15948_v22 = vpop.f32.mrf.mxu2  ;;  %7443 = vmatpush.msra.mxu0 %v7364_v36  ;;  %17061 = vst [vmem:[#allocation53_spill] sm:$0xff] %v15989_v33 }
 0xfd5   : > { %v15950_v5 = vpop.f32.mrf.mxu0  ;;  %7444 = vmatpush.msra.mxu0 %v7363_v15  ;;  %v9276_v15 = vld [vmem:[%s10002_s1 + $0x70] sm:$0xff] }
 0xfd7   : > { %7445 = vmatpush.msra.mxu0 %v7362_v57 }
 0xfd8   : > { %8350 = vmatmul.msk.f32.gmra.mxu0 %vm776_vm0, %v15726_v44  ;;  %8366 = vmatmul.msk.f32.gmra.mxu2 %vm776_vm0, %v15726_v44  ;;  %v7378_v44 = vld [vmem:[%s16535_s10 + $0x80] sm:$0xff] }
 0xfd9   : > { %7510 = vmatpush.msrb.mxu2 %v7378_v44  ;;  %v6982_v44 = vadd.f32 %v15776_v18, %v15409_v50 }
 0xfdb   : > { %v15971_v61 = vpop.f32.mrf.mxu2 }
 0xfdd   : > { %v15976_v36 = vpop.f32.mrf.mxu0 }
 0xfe0   : > { %8351 = vmatmul.msk.f32.gmra.mxu0 %vm776_vm0, %v15749_v10  ;;  %8367 = vmatmul.msk.f32.gmra.mxu2 %vm776_vm0, %v15749_v10  ;;  %v15998_v10 = vperm.slane %v15989_v33, 0 }
 0xfe3   : > { %v15982_v51 = vpop.f32.mrf.mxu2 }
 0xfe4   : > { %17059 = vst [vmem:[#allocation87_spill] sm:$0xff] %v15982_v51  ;;  %v16003_v51 = vperm.slane %v15989_v33, 1 }
 0xfe5   : > { %v15984_v3 = vpop.f32.mrf.mxu0 }
 0xfe6   : > { %17060 = vst [vmem:[#allocation47_spill] sm:$0xff] %v15984_v3  ;;  %v7047_v3 = vadd.f32 %v15782_v55, %v15412_v48  ;;  %v6985_v48 = vadd.f32 %v15784_v24, %v15419_v32  ;;  %v7050_v55 = vadd.f32 %v15790_v27, %v15426_v63 }
 0xfe8   : > { %8352 = vmatmul.msk.f32.gmra.mxu0 %vm776_vm0, %v9276_v15  ;;  %8368 = vmatmul.msk.f32.gmra.mxu2 %vm776_vm0, %v9276_v15  ;;  %v7234_v15 = vadd.f32 %v15998_v10, %v6982_v44  ;;  %v7239_v44 = vadd.f32 %v16003_v51, %v7050_v55 }
 0xfea   : > { %v7303_v24 = vmax.f32 %v7239_v44, 0.0 }
 0xfeb   : > { %v15991_v53 = vpop.f32.mrf.mxu2 }
 0xfec   : > { %17062 = vst [vmem:[#allocation132_spill] sm:$0xff] %v15991_v53  ;;  %v7298_v53 = vmax.f32 %v7234_v15, 0.0  ;;  %v6988_v15 = vadd.f32 %v15792_v34, %v15435_v0  ;;  %v7056_v0 = vadd.f32 %v15806_v30, %v15449_v31 }
 0xfed   : > { %v15993_v57 = vpop.f32.mrf.mxu0 }
 0xfee   : > { %17063 = vst [vmem:[#allocation93_spill] sm:$0xff] %v15993_v57  ;;  %v7235_v57 = vadd.f32 %v16003_v51, %v7047_v3  ;;  %v7242_v63 = vadd.f32 %v15998_v10, %v6988_v15  ;;  %v7247_v55 = vadd.f32 %v16003_v51, %v7056_v0  ;;  %v6994_v15 = vadd.f32 %v15808_v8, %v15451_v7 }
 0xfef   : > { %v7062_v7 = vadd.f32 %v15831_v45, %v15465_v28  ;;  %v7065_v28 = vadd.f32 %v15845_v21, %v15479_v62  ;;  %v7003_v21 = vadd.f32 %v15847_v60, %v15485_v35 }
 0xff0   : > { %8353 = vmatmul.msk.f32.gmra.mxu0 %vm776_vm0, %v15768_v16  ;;  %8369 = vmatmul.msk.f32.gmra.mxu2 %vm776_vm0, %v15768_v16  ;;  %v7299_v6 = vmax.f32 %v7235_v57, 0.0  ;;  %v7238_v16 = vadd.f32 %v15998_v10, %v6985_v48  ;;  %v7053_v57 = vadd.f32 %v15798_v13, %v15437_v29  ;;  %v6991_v48 = vadd.f32 %v15800_v9, %v15443_v59 }
 0xff1   : > { %v7306_v34 = vmax.f32 %v7242_v63, 0.0  ;;  %v7059_v59 = vadd.f32 %v15817_v38, %v15457_v58  ;;  %v7311_v31 = vmax.f32 %v7247_v55, 0.0  ;;  %v7250_v30 = vadd.f32 %v15998_v10, %v6994_v15  ;;  %v7425_v38 = vld [vmem:[%s16535_s10 + $0x1f8] sm:$0xff] }
 0xff2   : > { %v7302_v32 = vmax.f32 %v7238_v16, 0.0  ;;  %v7246_v13 = vadd.f32 %v15998_v10, %v6991_v48  ;;  %v6997_v63 = vadd.f32 %v15819_v42, %v15459_v20  ;;  %7625 = vmatpush.msra.mxu2 %v7425_v38  ;;  %v7255_v48 = vadd.f32 %v16003_v51, %v7062_v7  ;;  %v7422_v38 = vld [vmem:[%s16535_s10 + $0x1e0] sm:$0xff] }
 0xff3   : > { %v16011_v50 = vpop.f32.mrf.mxu2  ;;  %v7314_v8 = vmax.f32 %v7250_v30, 0.0  ;;  %v7000_v20 = vadd.f32 %v15833_v4, %v15477_v54  ;;  %v7259_v54 = vadd.f32 %v16003_v51, %v7065_v28  ;;  %v7068_v15 = vadd.f32 %v15859_v39, %v15487_v52  ;;  %v7423_v30 = vld [vmem:[%s16535_s10 + $0x1e8] sm:$0xff] }
 0xff4   : > { %v7310_v9 = vmax.f32 %v7246_v13, 0.0  ;;  %v7319_v45 = vmax.f32 %v7255_v48, 0.0  ;;  %v7424_v13 = vld [vmem:[%s16535_s10 + $0x1f0] sm:$0xff]  ;;  %v7006_v39 = vadd.f32 %v15861_v12, %v15493_v14  ;;  %v7074_v48 = vadd.f32 %v15887_v23, %v15513_v26 }
 0xff5   : > { %v16013_v18 = vpop.f32.mrf.mxu0  ;;  %7626 = vmatpush.msra.mxu2 %v7424_v13  ;;  %v7258_v55 = vadd.f32 %v15998_v10, %v7000_v20  ;;  %v7263_v35 = vadd.f32 %v16003_v51, %v7068_v15  ;;  %v7012_v23 = vadd.f32 %v15889_v2, %v15515_v1  ;;  %v7077_v13 = vadd.f32 %v15916_v17, %v15521_v46  ;;  %v7420_v15 = vld [vmem:[%s16535_s10 + $0x1d0] sm:$0xff] }
 0xff6   : > { %v7015_v17 = vadd.f32 %v15918_v47, %v15527_v11  ;;  %v7419_v11 = vld [vmem:[%s16535_s10 + $0x1c8] sm:$0xff]  ;;  %v7418_v47 = vld [vmem:[%s16535_s10 + $0x1c0] sm:$0xff] }
 0xff7   : > { %7627 = vmatpush.msra.mxu2 %v7423_v30  ;;  %v7275_v1 = vadd.f32 %v16003_v51, %v7077_v13  ;;  %v7021_v13 = vadd.f32 %v15976_v36, %v15555_v40  ;;  %v7411_v40 = vld [vmem:[%s16535_s10 + $0x188] sm:$0xff]  ;;  %v7394_v36 = vld [vmem:[%s16535_s10 + $0x100] sm:$0xff] }
 0xff8   : > { %7446 = vmatmul.f32.vlgmr.msra.gmra.mxu0 %v7298_v53  ;;  %7511 = vmatmul.f32.vlgmr.msrb.gmra.mxu2 %v7299_v6  ;;  %v7243_v6 = vadd.f32 %v16003_v51, %v7053_v57  ;;  %v7251_v57 = vadd.f32 %v16003_v51, %v7059_v59  ;;  %v7322_v59 = vmax.f32 %v7258_v55, 0.0 }
 0xff9   : > { %7628 = vmatpush.msra.mxu2 %v7422_v38  ;;  %v7339_v30 = vmax.f32 %v7275_v1, 0.0  ;;  %v7018_v38 = vadd.f32 %v15950_v5, %v15535_v41  ;;  %v7399_v41 = vld [vmem:[%s16535_s10 + $0x128] sm:$0xff]  ;;  %v7398_v5 = vld [vmem:[%s16535_s10 + $0x120] sm:$0xff]  ;;  %v7396_v1 = vld [vmem:[%s16535_s10 + $0x110] sm:$0xff] }
 0xffa   : > { %v7307_v29 = vmax.f32 %v7243_v6, 0.0  ;;  %v7315_v58 = vmax.f32 %v7251_v57, 0.0  ;;  %v7254_v6 = vadd.f32 %v15998_v10, %v6997_v63  ;;  %v7262_v57 = vadd.f32 %v15998_v10, %v7003_v21  ;;  %v7405_v21 = vld [vmem:[%s16535_s10 + $0x158] sm:$0xff] }
 0xffb   : > { %v16021_v33 = vpop.f32.mrf.mxu2  ;;  %v7071_v63 = vadd.f32 %v15873_v56, %v15499_v37  ;;  %v7009_v56 = vadd.f32 %v15875_v19, %v15501_v49  ;;  %v7271_v49 = vadd.f32 %v16003_v51, %v7074_v48  ;;  %v7400_v48 = vld [vmem:[%s16535_s10 + $0x130] sm:$0xff] }
 0xffc   : > { %v7318_v42 = vmax.f32 %v7254_v6, 0.0  ;;  %v7326_v7 = vmax.f32 %v7262_v57, 0.0  ;;  %v7266_v6 = vadd.f32 %v15998_v10, %v7006_v39  ;;  %v7404_v57 = vld [vmem:[%s16535_s10 + $0x150] sm:$0xff] }
 0xffd   : > { %v16023_v3 = vpop.f32.mrf.mxu0  ;;  %v7267_v14 = vadd.f32 %v16003_v51, %v7071_v63  ;;  %v7401_v63 = vld [vmem:[%s16535_s10 + $0x138] sm:$0xff] }
 0xffe   : > { %v7330_v20 = vmax.f32 %v7266_v6, 0.0  ;;  %v7083_v6 = vadd.f32 %v15971_v61, %v15553_v25  ;;  %v7415_v25 = vld [vmem:[%s16535_s10 + $0x1a8] sm:$0xff]  ;;  %v7414_v61 = vld [vmem:[%s16535_s10 + $0x1a0] sm:$0xff] }
 0xfff   : > { %v7331_v28 = vmax.f32 %v7267_v14, 0.0 }
0x1000   : > { %7449 = vmatmul.f32.gmra.mxu0 %v7302_v32  ;;  %7514 = vmatmul.f32.gmra.mxu2 %v7303_v24 }
0x1003   : > { %v16031_v53 = vpop.f32.mrf.mxu2 }
0x1005   : > { %v16033_v27 = vpop.f32.mrf.mxu0 }
0x1008   : > { %7452 = vmatmul.f32.gmra.mxu0 %v7306_v34  ;;  %7517 = vmatmul.f32.gmra.mxu2 %v7307_v29  ;;  %v7409_v29 = vld [vmem:[%s16535_s10 + $0x178] sm:$0xff] }
0x1009   : > { %7560 = vmatpush.msrb.mxu0 %v7409_v29  ;;  %v7270_v29 = vadd.f32 %v15998_v10, %v7009_v56 }
0x100b   : > { %v16041_v16 = vpop.f32.mrf.mxu2  ;;  %v7334_v55 = vmax.f32 %v7270_v29, 0.0  ;;  %v7413_v29 = vld [vmem:[%s16535_s10 + $0x198] sm:$0xff] }
0x100d   : > { %v16043_v44 = vpop.f32.mrf.mxu0 }
0x1010   : > { %7455 = vmatmul.f32.gmra.mxu0 %v7310_v9  ;;  %7520 = vmatmul.f32.gmra.mxu2 %v7311_v31  ;;  %v7323_v9 = vmax.f32 %v7259_v54, 0.0  ;;  %v7408_v31 = vld [vmem:[%s16535_s10 + $0x170] sm:$0xff]  ;;  %v7335_v54 = vmax.f32 %v7271_v49, 0.0 }
0x1011   : > { %7561 = vmatpush.msrb.mxu0 %v7408_v31 }
0x1013   : > { %v16051_v32 = vpop.f32.mrf.mxu2 }
0x1015   : > { %v16053_v24 = vpop.f32.mrf.mxu0 }
0x1018   : > { %7458 = vmatmul.f32.gmra.mxu0 %v7314_v8  ;;  %7523 = vmatmul.f32.gmra.mxu2 %v7315_v58  ;;  %v7327_v8 = vmax.f32 %v7263_v35, 0.0  ;;  %v7407_v58 = vld [vmem:[%s16535_s10 + $0x168] sm:$0xff] }
0x1019   : > { %7562 = vmatpush.msrb.mxu0 %v7407_v58  ;;  %v7403_v35 = vld [vmem:[%s16535_s10 + $0x148] sm:$0xff] }
0x101b   : > { %v16064_v0 = vpop.f32.mrf.mxu2 }
0x101d   : > { %v16066_v34 = vpop.f32.mrf.mxu0 }
0x1020   : > { %7461 = vmatmul.f32.gmra.mxu0 %v7318_v42  ;;  %7526 = vmatmul.f32.gmra.mxu2 %v7319_v45  ;;  %v7406_v42 = vld [vmem:[%s16535_s10 + $0x160] sm:$0xff]  ;;  %v7421_v45 = vld [vmem:[%s16535_s10 + $0x1d8] sm:$0xff] }
0x1021   : > { %7563 = vmatpush.msrb.mxu0 %v7406_v42  ;;  %7629 = vmatpush.msra.mxu2 %v7421_v45  ;;  %v7283_v42 = vadd.f32 %v16003_v51, %v7083_v6  ;;  %v7397_v45 = vld [vmem:[%s16535_s10 + $0x118] sm:$0xff] }
0x1023   : > { %v16080_v4 = vpop.f32.mrf.mxu2  ;;  %7564 = vmatpush.msrb.mxu0 %v7405_v21  ;;  %7630 = vmatpush.msra.mxu2 %v7420_v15 }
0x1025   : > { %v16082_v62 = vpop.f32.mrf.mxu0  ;;  %7565 = vmatpush.msrb.mxu0 %v7404_v57  ;;  %7631 = vmatpush.msra.mxu2 %v7419_v11 }
0x1027   : > { %7566 = vmatpush.msrb.mxu0 %v7403_v35  ;;  %7632 = vmatpush.msra.mxu2 %v7418_v47  ;;  %v17067_v47 = vld [vmem:[#allocation47_spill] sm:$0xff] }
0x1028   : > { %7464 = vmatmul.f32.gmra.mxu0 %v7322_v59  ;;  %7529 = vmatmul.f32.gmra.mxu2 %v7323_v9  ;;  %v7274_v59 = vadd.f32 %v15998_v10, %v7012_v23  ;;  %v7080_v9 = vadd.f32 %v15948_v22, %v15529_v43  ;;  %v7402_v43 = vld [vmem:[%s16535_s10 + $0x140] sm:$0xff]  ;;  %v7278_v22 = vadd.f32 %v15998_v10, %v7015_v17  ;;  %v7412_v17 = vld [vmem:[%s16535_s10 + $0x190] sm:$0xff] }
0x1029   : > { %7567 = vmatpush.msrb.mxu0 %v7402_v43  ;;  %v17066_v43 = vld [vmem:[#allocation55_spill] sm:$0xff] }
0x102a   : > { %v7338_v31 = vmax.f32 %v7274_v59, 0.0  ;;  %v7279_v39 = vadd.f32 %v16003_v51, %v7080_v9  ;;  %v7342_v14 = vmax.f32 %v7278_v22, 0.0  ;;  %v7347_v59 = vmax.f32 %v7283_v42, 0.0  ;;  %v7395_v9 = vld [vmem:[%s16535_s10 + $0x108] sm:$0xff] }
0x102b   : > { %v16096_v60 = vpop.f32.mrf.mxu2  ;;  %7568 = vmatpush.msrb.mxu0 %v7401_v63  ;;  %v7024_v22 = vadd.f32 %v17067_v47, %v17066_v43  ;;  %v17069_v63 = vld [vmem:[#allocation132_spill] sm:$0xff]  ;;  %v17076_v47 = vld [vmem:[#allocation73_spill] sm:$0xff] }
0x102c   : > { %v7343_v56 = vmax.f32 %v7279_v39, 0.0  ;;  %v17068_v39 = vld [vmem:[#allocation101_spill] sm:$0xff] }
0x102d   : > { %v16098_v52 = vpop.f32.mrf.mxu0  ;;  %7569 = vmatpush.msrb.mxu0 %v7400_v48 }
0x102f   : > { %7570 = vmatpush.msrb.mxu0 %v7399_v41  ;;  %v17070_v41 = vld [vmem:[#allocation103_spill] sm:$0xff] }
0x1030   : > { %7467 = vmatmul.f32.gmra.mxu0 %v7326_v7  ;;  %7532 = vmatmul.f32.gmra.mxu2 %v7327_v8  ;;  %v7417_v7 = vld [vmem:[%s16535_s10 + $0x1b8] sm:$0xff] }
0x1031   : > { %7633 = vmatpush.msra.mxu2 %v7417_v7  ;;  %7571 = vmatpush.msrb.mxu0 %v7398_v5  ;;  %v7089_v7 = vadd.f32 %v17069_v63, %v17068_v39 }
0x1033   : > { %v16112_v12 = vpop.f32.mrf.mxu2  ;;  %7572 = vmatpush.msrb.mxu0 %v7397_v45 }
0x1035   : > { %v16114_v37 = vpop.f32.mrf.mxu0  ;;  %7573 = vmatpush.msrb.mxu0 %v7396_v1  ;;  %v17074_v1 = vld [vmem:[#allocation71_spill] sm:$0xff] }
0x1037   : > { %7574 = vmatpush.msrb.mxu0 %v7395_v9 }
0x1038   : > { %7470 = vmatmul.f32.gmra.mxu0 %v7330_v20  ;;  %7535 = vmatmul.f32.gmra.mxu2 %v7331_v28  ;;  %v7416_v20 = vld [vmem:[%s16535_s10 + $0x1b0] sm:$0xff]  ;;  %v7282_v28 = vadd.f32 %v15998_v10, %v7018_v38 }
0x1039   : > { %7634 = vmatpush.msra.mxu2 %v7416_v20  ;;  %7575 = vmatpush.msrb.mxu0 %v7394_v36 }
0x103a   : > { %v7346_v15 = vmax.f32 %v7282_v28, 0.0 }
0x103b   : > { %v16128_v19 = vpop.f32.mrf.mxu2  ;;  %7635 = vmatpush.msra.mxu2 %v7415_v25  ;;  %v17071_v25 = vld [vmem:[#allocation93_spill] sm:$0xff] }
0x103c   : > { %v7027_v5 = vadd.f32 %v17071_v25, %v17070_v41 }
0x103d   : > { %v16130_v26 = vpop.f32.mrf.mxu0  ;;  %7636 = vmatpush.msra.mxu2 %v7414_v61  ;;  %v17072_v61 = vld [vmem:[#allocation104_spill] sm:$0xff] }
0x103e   : > { %v7092_v28 = vadd.f32 %v16011_v50, %v17072_v61  ;;  %v7112_v50 = vadd.f32 %v16013_v18, %v17074_v1  ;;  %v7115_v18 = vadd.f32 %v16023_v3, %v17076_v47 }
0x103f   : > { %7637 = vmatpush.msra.mxu2 %v7413_v29  ;;  %v7294_v29 = vadd.f32 %v15998_v10, %v7027_v5 }
0x1040   : > { %7473 = vmatmul.f32.gmra.mxu0 %v7334_v55  ;;  %7538 = vmatmul.f32.gmra.mxu2 %v7335_v54  ;;  %v17064_v55 = vld [vmem:[#allocation54_spill] sm:$0xff]  ;;  %v17065_v54 = vld [vmem:[#allocation87_spill] sm:$0xff] }
0x1041   : > { %v7086_v21 = vadd.f32 %v17065_v54, %v17064_v55  ;;  %7638 = vmatpush.msra.mxu2 %v7412_v17  ;;  %v17073_v54 = vld [vmem:[#allocation53_spill] sm:$0xff]  ;;  %v17075_v17 = vld [vmem:[#allocation72_spill] sm:$0xff] }
0x1042   : > { %v7177_v9 = vadd.f32 %v16021_v33, %v17075_v17 }
0x1043   : > { %v16144_v2 = vpop.f32.mrf.mxu2  ;;  %7639 = vmatpush.msra.mxu2 %v7411_v40  ;;  %v7287_v57 = vadd.f32 %v16003_v51, %v7086_v21  ;;  %v16260_v21 = vperm.slane %v17073_v54, 2  ;;  %v7358_v40 = vmax.f32 %v7294_v29, 0.0  ;;  %v17081_v29 = vld [vmem:[#allocation38_spill] sm:$0xff] }
0x1045   : > { %v16146_v46 = vpop.f32.mrf.mxu0  ;;  %v7351_v6 = vmax.f32 %v7287_v57, 0.0  ;;  %v7240_v39 = vadd.f32 %v16260_v21, %v7115_v18  ;;  %v17084_v18 = vld [vmem:[#allocation116_spill] sm:$0xff] }
0x1047   : > { %v7304_v3 = vmax.f32 %v7240_v39, 0.0 }
0x1048   : > { %7476 = vmatmul.f32.gmra.mxu0 %v7338_v31  ;;  %7541 = vmatmul.f32.gmra.mxu2 %v7339_v30  ;;  %v7410_v31 = vld [vmem:[%s16535_s10 + $0x180] sm:$0xff]  ;;  %v7286_v30 = vadd.f32 %v15998_v10, %v7021_v13  ;;  %v7295_v13 = vadd.f32 %v16003_v51, %v7092_v28 }
0x1049   : > { %7640 = vmatpush.msra.mxu2 %v7410_v31 }
0x104a   : > { %v7350_v38 = vmax.f32 %v7286_v30, 0.0 }
0x104b   : > { %v16175_v8 = vpop.f32.mrf.mxu2 }
0x104d   : > { %v16177_v58 = vpop.f32.mrf.mxu0 }
0x1050   : > { %7479 = vmatmul.f32.gmra.mxu0 %v7342_v14  ;;  %7544 = vmatmul.f32.gmra.mxu2 %v7343_v56  ;;  %v7290_v14 = vadd.f32 %v15998_v10, %v7024_v22  ;;  %v7291_v56 = vadd.f32 %v16003_v51, %v7089_v7  ;;  %v7359_v10 = vmax.f32 %v7295_v13, 0.0  ;;  %v7236_v51 = vadd.f32 %v16260_v21, %v7112_v50  ;;  %v17077_v22 = vld [vmem:[#allocation92_spill] sm:$0xff] }
0x1051   : > { %v7180_v33 = vadd.f32 %v16031_v53, %v17077_v22  ;;  %v7127_v22 = vadd.f32 %v16066_v34, %v17084_v18 }
0x1052   : > { %v7354_v42 = vmax.f32 %v7290_v14, 0.0  ;;  %v7355_v45 = vmax.f32 %v7291_v56, 0.0  ;;  %v7300_v57 = vmax.f32 %v7236_v51, 0.0  ;;  %v17079_v56 = vld [vmem:[#allocation105_spill] sm:$0xff] }
0x1053   : > { %v16209_v49 = vpop.f32.mrf.mxu2  ;;  %v7183_v41 = vadd.f32 %v16041_v16, %v17079_v56 }
0x1055   : > { %v16211_v23 = vpop.f32.mrf.mxu0 }
0x1058   : > { %7482 = vmatmul.f32.gmra.mxu0 %v7346_v15  ;;  %7547 = vmatmul.f32.gmra.mxu2 %v7347_v59  ;;  %v16263_v15 = vperm.slane %v17073_v54, 3 }
0x105a   : > { %v7237_v36 = vadd.f32 %v16263_v15, %v7177_v9  ;;  %v7241_v63 = vadd.f32 %v16263_v15, %v7180_v33  ;;  %v7245_v5 = vadd.f32 %v16263_v15, %v7183_v41  ;;  %v17082_v9 = vld [vmem:[#allocation84_spill] sm:$0xff]  ;;  %v17085_v33 = vld [vmem:[#allocation117_spill] sm:$0xff] }
0x105b   : > { %v16237_v35 = vpop.f32.mrf.mxu2  ;;  %v17086_v41 = vld [vmem:[#allocation97_spill] sm:$0xff] }
0x105c   : > { %v7301_v43 = vmax.f32 %v7237_v36, 0.0  ;;  %v7305_v25 = vmax.f32 %v7241_v63, 0.0  ;;  %v7309_v16 = vmax.f32 %v7245_v5, 0.0  ;;  %v7256_v63 = vadd.f32 %v16260_v21, %v7127_v22 }
0x105d   : > { %v16239_v11 = vpop.f32.mrf.mxu0 }
0x1060   : > { %7485 = vmatmul.f32.gmra.mxu0 %v7350_v38  ;;  %7550 = vmatmul.f32.gmra.mxu2 %v7351_v6  ;;  %v17078_v6 = vld [vmem:[#allocation94_spill] sm:$0xff] }
0x1061   : > { %v7118_v14 = vadd.f32 %v16033_v27, %v17078_v6  ;;  %v7186_v27 = vadd.f32 %v16051_v32, %v17081_v29 }
0x1063   : > { %v16247_v48 = vpop.f32.mrf.mxu2  ;;  %v7244_v53 = vadd.f32 %v16260_v21, %v7118_v14  ;;  %v7249_v1 = vadd.f32 %v16263_v15, %v7186_v27  ;;  %v17088_v27 = vld [vmem:[#allocation85_spill] sm:$0xff] }
0x1065   : > { %v16249_v20 = vpop.f32.mrf.mxu0  ;;  %v7308_v13 = vmax.f32 %v7244_v53, 0.0  ;;  %v7313_v32 = vmax.f32 %v7249_v1, 0.0  ;;  %v7320_v53 = vmax.f32 %v7256_v63, 0.0 }
0x1068   : > { %7488 = vmatmul.f32.gmra.mxu0 %v7354_v42  ;;  %7553 = vmatmul.f32.gmra.mxu2 %v7355_v45  ;;  %v17080_v42 = vld [vmem:[#allocation63_spill] sm:$0xff] }
0x1069   : > { %v7121_v45 = vadd.f32 %v16043_v44, %v17080_v42 }
0x106b   : > { %v16257_v55 = vpop.f32.mrf.mxu2  ;;  %v7248_v54 = vadd.f32 %v16260_v21, %v7121_v45 }
0x106d   : > { %v16265_v59 = vpop.f32.mrf.mxu0  ;;  %v7312_v51 = vmax.f32 %v7248_v54, 0.0 }
0x1070   : > { %7491 = vmatmul.f32.gmra.mxu0 %v7358_v40  ;;  %7556 = vmatmul.f32.gmra.mxu2 %v7359_v10  ;;  %v7124_v40 = vadd.f32 %v16053_v24, %v17082_v9  ;;  %v17083_v10 = vld [vmem:[#allocation115_spill] sm:$0xff]  ;;  %v7192_v24 = vadd.f32 %v16080_v4, %v17085_v33 }
0x1071   : > { %v7189_v44 = vadd.f32 %v16064_v0, %v17083_v10 }
0x1072   : > { %v7252_v36 = vadd.f32 %v16260_v21, %v7124_v40  ;;  %v7257_v6 = vadd.f32 %v16263_v15, %v7192_v24  ;;  %v17092_v24 = vld [vmem:[#allocation106_spill] sm:$0xff] }
0x1073   : > { %v16273_v31 = vpop.f32.mrf.mxu2 }
0x1074   : > { %v7316_v39 = vmax.f32 %v7252_v36, 0.0  ;;  %v7321_v4 = vmax.f32 %v7257_v6, 0.0 }
0x1075   : > { %v16275_v30 = vpop.f32.mrf.mxu0 }
0x1078   : > { %7576 = vmatmul.f32.vlgmr.msrb.gmra.mxu0 %v7300_v57  ;;  %7641 = vmatmul.f32.vlgmr.msra.gmra.mxu2 %v7301_v43  ;;  %v7253_v57 = vadd.f32 %v16263_v15, %v7189_v44  ;;  %v17090_v44 = vld [vmem:[#allocation64_spill] sm:$0xff] }
0x107a   : > { %v7317_v0 = vmax.f32 %v7253_v57, 0.0 }
0x107b   : > { %v16283_v7 = vpop.f32.mrf.mxu2 }
0x107d   : > { %v16285_v38 = vpop.f32.mrf.mxu0 }
0x1080   : > { %7579 = vmatmul.f32.gmra.mxu0 %v7304_v3  ;;  %7644 = vmatmul.f32.gmra.mxu2 %v7305_v25  ;;  %v7130_v3 = vadd.f32 %v16082_v62, %v17086_v41  ;;  %v17087_v25 = vld [vmem:[#allocation118_spill] sm:$0xff] }
0x1081   : > { %v7195_v34 = vadd.f32 %v16096_v60, %v17087_v25 }
0x1082   : > { %v7260_v5 = vadd.f32 %v16260_v21, %v7130_v3 }
0x1083   : > { %v16293_v61 = vpop.f32.mrf.mxu2  ;;  %v7261_v42 = vadd.f32 %v16263_v15, %v7195_v34  ;;  %v17094_v34 = vld [vmem:[#allocation121_spill] sm:$0xff] }
0x1084   : > { %v7324_v54 = vmax.f32 %v7260_v5, 0.0 }
0x1085   : > { %v16295_v28 = vpop.f32.mrf.mxu0  ;;  %v7325_v60 = vmax.f32 %v7261_v42, 0.0 }
0x1088   : > { %7582 = vmatmul.f32.gmra.mxu0 %v7308_v13  ;;  %7647 = vmatmul.f32.gmra.mxu2 %v7309_v16  ;;  %v7133_v13 = vadd.f32 %v16098_v52, %v17088_v27  ;;  %v17089_v16 = vld [vmem:[#allocation99_spill] sm:$0xff] }
0x1089   : > { %v7198_v62 = vadd.f32 %v16112_v12, %v17089_v16 }
0x108a   : > { %v7264_v1 = vadd.f32 %v16260_v21, %v7133_v13 }
0x108b   : > { %v16303_v50 = vpop.f32.mrf.mxu2  ;;  %v7265_v9 = vadd.f32 %v16263_v15, %v7198_v62 }
0x108c   : > { %v7328_v36 = vmax.f32 %v7264_v1, 0.0 }
0x108d   : > { %v16305_v17 = vpop.f32.mrf.mxu0  ;;  %v7329_v12 = vmax.f32 %v7265_v9, 0.0 }
0x1090   : > { %7585 = vmatmul.f32.gmra.mxu0 %v7312_v51  ;;  %7650 = vmatmul.f32.gmra.mxu2 %v7313_v32  ;;  %v7136_v51 = vadd.f32 %v16114_v37, %v17090_v44  ;;  %v17091_v32 = vld [vmem:[#allocation119_spill] sm:$0xff] }
0x1091   : > { %v7201_v52 = vadd.f32 %v16128_v19, %v17091_v32 }
0x1092   : > { %v7268_v57 = vadd.f32 %v16260_v21, %v7136_v51 }
0x1093   : > { %v16313_v43 = vpop.f32.mrf.mxu2  ;;  %v7269_v18 = vadd.f32 %v16263_v15, %v7201_v52 }
0x1094   : > { %v7332_v63 = vmax.f32 %v7268_v57, 0.0 }
0x1095   : > { %v16315_v47 = vpop.f32.mrf.mxu0  ;;  %v7333_v19 = vmax.f32 %v7269_v18, 0.0 }
0x1098   : > { %7588 = vmatmul.f32.gmra.mxu0 %v7316_v39  ;;  %7653 = vmatmul.f32.gmra.mxu2 %v7317_v0  ;;  %v7139_v39 = vadd.f32 %v16130_v26, %v17092_v24  ;;  %v17093_v0 = vld [vmem:[#allocation74_spill] sm:$0xff]  ;;  %v17098_v24 = vld [vmem:[#allocation120_spill] sm:$0xff] }
0x1099   : > { %v7204_v37 = vadd.f32 %v16144_v2, %v17093_v0  ;;  %v16369_v2 = vld [vmem:[#allocation17] ss:$0 sm:$0xff] }
0x109a   : > { %v7272_v6 = vadd.f32 %v16260_v21, %v7139_v39  ;;  %v17099_v39 = vld [vmem:[#allocation107_spill] sm:$0xff] }
0x109b   : > { %v16323_v14 = vpop.f32.mrf.mxu2  ;;  %v7273_v41 = vadd.f32 %v16263_v15, %v7204_v37 }
0x109c   : > { %v7336_v5 = vmax.f32 %v7272_v6, 0.0 }
0x109d   : > { %v16325_v56 = vpop.f32.mrf.mxu0  ;;  %v7337_v42 = vmax.f32 %v7273_v41, 0.0 }
0x10a0   : > { %7591 = vmatmul.f32.gmra.mxu0 %v7320_v53  ;;  %7656 = vmatmul.f32.gmra.mxu2 %v7321_v4  ;;  %v7142_v53 = vadd.f32 %v16146_v46, %v17094_v34  ;;  %v17095_v4 = vld [vmem:[#allocation40_spill] sm:$0xff]  ;;  %v17096_v46 = vld [vmem:[#allocation102_spill] sm:$0xff] }
0x10a1   : > { %v7207_v26 = vadd.f32 %v16175_v8, %v17095_v4  ;;  %v7145_v1 = vadd.f32 %v16177_v58, %v17096_v46  ;;  %v17097_v8 = vld [vmem:[#allocation62_spill] sm:$0xff]  ;;  %v7148_v58 = vadd.f32 %v16211_v23, %v17098_v24  ;;  %v17101_v4 = vld [vmem:[#allocation41_spill] sm:$0xff]  ;;  %v17105_v24 = vld [vmem:[#allocation75_spill] sm:$0xff] }
0x10a2   : > { %v7276_v27 = vadd.f32 %v16260_v21, %v7142_v53  ;;  %v7210_v9 = vadd.f32 %v16209_v49, %v17097_v8  ;;  %v7213_v49 = vadd.f32 %v16237_v35, %v17099_v39  ;;  %v17100_v53 = vld [vmem:[#allocation39_spill] sm:$0xff]  ;;  %v7216_v35 = vadd.f32 %v16247_v48, %v17101_v4  ;;  %v17102_v46 = vld [vmem:[#allocation110_spill] sm:$0xff] }
0x10a3   : > { %v16333_v45 = vpop.f32.mrf.mxu2  ;;  %v7277_v13 = vadd.f32 %v16263_v15, %v7207_v26  ;;  %v7280_v32 = vadd.f32 %v16260_v21, %v7145_v1  ;;  %v7151_v23 = vadd.f32 %v16239_v11, %v17100_v53  ;;  %v7154_v11 = vadd.f32 %v16249_v20, %v17102_v46  ;;  %v17103_v1 = vld [vmem:[#allocation96_spill] sm:$0xff] }
0x10a4   : > { %v7340_v44 = vmax.f32 %v7276_v27, 0.0  ;;  %v7281_v52 = vadd.f32 %v16263_v15, %v7210_v9  ;;  %v7289_v27 = vadd.f32 %v16263_v15, %v7216_v35  ;;  %v7219_v48 = vadd.f32 %v16257_v55, %v17103_v1 }
0x10a5   : > { %v16335_v29 = vpop.f32.mrf.mxu0  ;;  %v7341_v51 = vmax.f32 %v7277_v13, 0.0  ;;  %v7344_v0 = vmax.f32 %v7280_v32, 0.0  ;;  %v7222_v55 = vadd.f32 %v16273_v31, %v17105_v24  ;;  %v7451_v35 = vadd.f32 %v16369_v2, %v16285_v38 }
0x10a6   : > { %v7345_v37 = vmax.f32 %v7281_v52, 0.0  ;;  %v7353_v9 = vmax.f32 %v7289_v27, 0.0  ;;  %v7457_v38 = vadd.f32 %v16369_v2, %v16305_v17  ;;  %v7463_v17 = vadd.f32 %v16369_v2, %v16325_v56 }
0x10a8   : > { %7594 = vmatmul.f32.gmra.mxu0 %v7324_v54  ;;  %7659 = vmatmul.f32.gmra.mxu2 %v7325_v60 }
0x10ab   : > { %v16343_v40 = vpop.f32.mrf.mxu2 }
0x10ad   : > { %v16345_v10 = vpop.f32.mrf.mxu0 }
0x10ae   : > { %v7469_v56 = vadd.f32 %v16369_v2, %v16345_v10 }
0x10b0   : > { %7597 = vmatmul.f32.gmra.mxu0 %v7328_v36  ;;  %7662 = vmatmul.f32.gmra.mxu2 %v7329_v12 }
0x10b3   : > { %v16353_v22 = vpop.f32.mrf.mxu2 }
0x10b5   : > { %v16355_v33 = vpop.f32.mrf.mxu0 }
0x10b8   : > { %7600 = vmatmul.f32.gmra.mxu0 %v7332_v63  ;;  %7665 = vmatmul.f32.gmra.mxu2 %v7333_v19  ;;  %v7284_v63 = vadd.f32 %v16260_v21, %v7148_v58  ;;  %v7285_v19 = vadd.f32 %v16263_v15, %v7213_v49 }
0x10ba   : > { %v7348_v26 = vmax.f32 %v7284_v63, 0.0 }
0x10bb   : > { %v16363_v3 = vpop.f32.mrf.mxu2 }
0x10bd   : > { %v7474_v25 = vpop.f32.mrf.mxu0 }
0x10be   : > { %v7475_v16 = vadd.f32 %v16369_v2, %v7474_v25 }
0x10c0   : > { %7603 = vmatmul.f32.gmra.mxu0 %v7336_v5  ;;  %7668 = vmatmul.f32.gmra.mxu2 %v7337_v42  ;;  %v7349_v5 = vmax.f32 %v7285_v19, 0.0  ;;  %v7288_v42 = vadd.f32 %v16260_v21, %v7151_v23 }
0x10c2   : > { %v7352_v8 = vmax.f32 %v7288_v42, 0.0 }
0x10c3   : > { %v7539_v62 = vpop.f32.mrf.mxu2 }
0x10c4   : > { %v16374_v54 = vadd.f32 %v7539_v62, %v7475_v16 }
0x10c5   : > { %v7477_v60 = vpop.f32.mrf.mxu0 }
0x10c6   : > { %v7478_v36 = vadd.f32 %v16369_v2, %v7477_v60 }
0x10c8   : > { %7606 = vmatmul.f32.gmra.mxu0 %v7340_v44  ;;  %7671 = vmatmul.f32.gmra.mxu2 %v7341_v51  ;;  %v7292_v44 = vadd.f32 %v16260_v21, %v7154_v11  ;;  %v7293_v51 = vadd.f32 %v16263_v15, %v7219_v48 }
0x10ca   : > { %v7356_v58 = vmax.f32 %v7292_v44, 0.0  ;;  %v7357_v39 = vmax.f32 %v7293_v51, 0.0 }
0x10cb   : > { %v7542_v12 = vpop.f32.mrf.mxu2 }
0x10cc   : > { %v16383_v57 = vadd.f32 %v7542_v12, %v7478_v36 }
0x10cd   : > { %v7480_v18 = vpop.f32.mrf.mxu0 }
0x10ce   : > { %v7481_v6 = vadd.f32 %v16369_v2, %v7480_v18  ;;  %v17104_v18 = vld [vmem:[#allocation108_spill] sm:$0xff] }
0x10cf   : > { %v7157_v20 = vadd.f32 %v16265_v59, %v17104_v18  ;;  %v7448_v59 = vadd.f32 %v16369_v2, %v16275_v30  ;;  %v7454_v30 = vadd.f32 %v16369_v2, %v16295_v28  ;;  %v7460_v28 = vadd.f32 %v16369_v2, %v16315_v47 }
0x10d0   : > { %7609 = vmatmul.f32.gmra.mxu0 %v7344_v0  ;;  %7674 = vmatmul.f32.gmra.mxu2 %v7345_v37  ;;  %v7297_v0 = vadd.f32 %v16263_v15, %v7222_v55  ;;  %v7466_v47 = vadd.f32 %v16369_v2, %v16335_v29 }
0x10d1   : > { %v7296_v49 = vadd.f32 %v16260_v21, %v7157_v20  ;;  %v7513_v21 = vadd.f32 %v16283_v7, %v7448_v59  ;;  %v7519_v7 = vadd.f32 %v16303_v50, %v7454_v30  ;;  %v7525_v50 = vadd.f32 %v16323_v14, %v7460_v28 }
0x10d2   : > { %v7531_v14 = vadd.f32 %v16343_v40, %v7466_v47  ;;  %v7707_v47 = vld [vmem:[#allocation2] sm:$0x1] }
0x10d3   : > { %v7545_v41 = vpop.f32.mrf.mxu2 }
0x10d4   : > { %v16392_v25 = vadd.f32 %v7545_v41, %v7481_v6  ;;  %v7360_v41 = vmax.f32 %v7296_v49, 0.0 }
0x10d5   : > { %v7483_v34 = vpop.f32.mrf.mxu0 }
0x10d6   : > { %v7484_v13 = vadd.f32 %v16369_v2, %v7483_v34  ;;  %v7361_v34 = vmax.f32 %v7297_v0, 0.0 }
0x10d8   : > { %7612 = vmatmul.f32.gmra.mxu0 %v7348_v26  ;;  %7677 = vmatmul.f32.gmra.mxu2 %v7349_v5  ;;  %v7516_v5 = vadd.f32 %v16293_v61, %v7451_v35  ;;  %v7522_v61 = vadd.f32 %v16313_v43, %v7457_v38  ;;  %v7528_v43 = vadd.f32 %v16333_v45, %v7463_v17 }
0x10d9   : > { %v7534_v45 = vadd.f32 %v16353_v22, %v7469_v56 }
0x10db   : > { %v7548_v16 = vpop.f32.mrf.mxu2 }
0x10dc   : > { %v16401_v62 = vadd.f32 %v7548_v16, %v7484_v13 }
0x10dd   : > { %v7486_v60 = vpop.f32.mrf.mxu0 }
0x10de   : > { %v7487_v32 = vadd.f32 %v16369_v2, %v7486_v60 }
0x10e0   : > { %7615 = vmatmul.f32.gmra.mxu0 %v7352_v8  ;;  %7680 = vmatmul.f32.gmra.mxu2 %v7353_v9 }
0x10e3   : > { %v7551_v52 = vpop.f32.mrf.mxu2 }
0x10e4   : > { %v16410_v36 = vadd.f32 %v7551_v52, %v7487_v32 }
0x10e5   : > { %v7489_v12 = vpop.f32.mrf.mxu0 }
0x10e6   : > { %v7490_v37 = vadd.f32 %v16369_v2, %v7489_v12 }
0x10e8   : > { %7618 = vmatmul.f32.gmra.mxu0 %v7356_v58  ;;  %7683 = vmatmul.f32.gmra.mxu2 %v7357_v39 }
0x10eb   : > { %v7554_v63 = vpop.f32.mrf.mxu2 }
0x10ec   : > { %v16419_v19 = vadd.f32 %v7554_v63, %v7490_v37 }
0x10ed   : > { %v7492_v6 = vpop.f32.mrf.mxu0 }
0x10ee   : > { %v7493_v31 = vadd.f32 %v16369_v2, %v7492_v6 }
0x10f0   : > { %7621 = vmatmul.f32.gmra.mxu0 %v7360_v41  ;;  %7686 = vmatmul.f32.gmra.mxu2 %v7361_v34  ;;  %v7472_v41 = vadd.f32 %v16369_v2, %v16355_v33 }
0x10f2   : > { %v7537_v34 = vadd.f32 %v16363_v3, %v7472_v41 }
0x10f3   : > { %v7557_v53 = vpop.f32.mrf.mxu2 }
0x10f4   : > { %v16425_v23 = vadd.f32 %v7557_v53, %v7493_v31 }
0x10f5   : > { %v7577_v15 = vpop.f32.mrf.mxu0 }
0x10f6   : > { %v7578_v4 = vadd.f32 %v7577_v15, %v7513_v21 }
0x10fb   : > { %v7642_v26 = vpop.f32.mrf.mxu2 }
0x10fc   : > { %v16430_v42 = vadd.f32 %v7642_v26, %v7578_v4 }
0x10fd   : > { %v7580_v27 = vpop.f32.mrf.mxu0 }
0x10fe   : > { %v7581_v13 = vadd.f32 %v7580_v27, %v7516_v5 }
0x1103   : > { %v7645_v16 = vpop.f32.mrf.mxu2 }
0x1104   : > { %v16435_v60 = vadd.f32 %v7645_v16, %v7581_v13 }
0x1105   : > { %v7583_v46 = vpop.f32.mrf.mxu0 }
0x1106   : > { %v7584_v11 = vadd.f32 %v7583_v46, %v7519_v7  ;;  %v7691_v56 = vmax.f32 %v16435_v60, 0.0 }
0x110b   : > { %v7648_v1 = vpop.f32.mrf.mxu2 }
0x110c   : > { %v16440_v48 = vadd.f32 %v7648_v1, %v7584_v11 }
0x110d   : > { %v7586_v8 = vpop.f32.mrf.mxu0 }
0x110e   : > { %v7587_v9 = vadd.f32 %v7586_v8, %v7522_v61 }
0x1113   : > { %v7651_v44 = vpop.f32.mrf.mxu2 }
0x1114   : > { %v16445_v51 = vadd.f32 %v7651_v44, %v7587_v9 }
0x1115   : > { %v7589_v32 = vpop.f32.mrf.mxu0 }
0x1116   : > { %v7590_v52 = vadd.f32 %v7589_v32, %v7525_v50 }
0x111b   : > { %v7654_v12 = vpop.f32.mrf.mxu2 }
0x111c   : > { %v16450_v18 = vadd.f32 %v7654_v12, %v7590_v52 }
0x111d   : > { %v7592_v20 = vpop.f32.mrf.mxu0 }
0x111e   : > { %v7593_v24 = vadd.f32 %v7592_v20, %v7528_v43 }
0x1123   : > { %v7657_v55 = vpop.f32.mrf.mxu2 }
0x1124   : > { %v16455_v58 = vadd.f32 %v7657_v55, %v7593_v24  ;;  %v9743_v55 = vmov 0  }
0x1125   : > { %v7595_v39 = vpop.f32.mrf.mxu0  ;;  %8559 = vset.pattern.permute.xlu0 %v9743_v55 }
0x1126   : > { %v7596_v49 = vadd.f32 %v7595_v39, %v7531_v14  ;;  %7710 = vperm.xlu0 %8559, %v7707_v47   ;;  %v7694_v14 = vmax.f32 %v16450_v18, 0.0  ;;  %v7693_v39 = vmax.f32 %v16445_v51, 0.0 }
0x112b   : > { %v7660_v0 = vpop.f32.mrf.mxu2 }
0x112c   : > { %v7661_v37 = vadd.f32 %v7660_v0, %v7596_v49  ;;  %v7692_v49 = vmax.f32 %v16440_v48, 0.0  ;;  %v7690_v0 = vmax.f32 %v16430_v42, 0.0 }
0x112d   : > { %v7598_v63 = vpop.f32.mrf.mxu0 }
0x112e   : > { %v7599_v6 = vadd.f32 %v7598_v63, %v7534_v45  ;;  %v7706_v45 = vld [vmem:[#allocation18] sm:$0x1] }
0x1133   : > { %v7663_v29 = vpop.f32.mrf.mxu2 }
0x1134   : > { %v7664_v40 = vadd.f32 %v7663_v29, %v7599_v6 }
0x1135   : > { %v7601_v59 = vpop.f32.mrf.mxu0 }
0x1136   : > { %v7602_v31 = vadd.f32 %v7601_v59, %v7537_v34 }
0x113b   : > { %v7666_v53 = vpop.f32.mrf.mxu2 }
0x113c   : > { %v7667_v21 = vadd.f32 %v7666_v53, %v7602_v31 }
0x113d   : > { %v7604_v15 = vpop.f32.mrf.mxu0 }
0x113e   : > { %v7605_v10 = vadd.f32 %v7604_v15, %v16374_v54  ;;  %v7698_v24 = vmax.f32 %v7667_v21, 0.0 }
0x1143   : > { %v7669_v4 = vpop.f32.mrf.mxu2 }
0x1144   : > { %v7670_v35 = vadd.f32 %v7669_v4, %v7605_v10 }
0x1145   : > { %v7607_v22 = vpop.f32.mrf.mxu0 }
0x1146   : > { %v7699_v20 = vmax.f32 %v7670_v35, 0.0 }
0x114b   : > { %v7672_v26 = vpop.f32.mrf.mxu2 }
0x114d   : > { %v7610_v5 = vpop.f32.mrf.mxu0 }
0x114e   : > { %v7611_v52 = vadd.f32 %v7610_v5, %v16392_v25  ;;  %v7696_v25 = vmax.f32 %v7661_v37, 0.0 }
0x1153   : > { %v7675_v27 = vpop.f32.mrf.mxu2 }
0x1155   : > { %v7613_v13 = vpop.f32.mrf.mxu0 }
0x1156   : > { %v7614_v44 = vadd.f32 %v7613_v13, %v16401_v62  ;;  %v7697_v62 = vmax.f32 %v7664_v40, 0.0 }
0x115b   : > { %v7678_v30 = vpop.f32.mrf.mxu2 }
0x115c   : > { %v7679_v50 = vadd.f32 %v7678_v30, %v7614_v44 }
0x115d   : > { %v7616_v33 = vpop.f32.mrf.mxu0 }
0x115e   : > { %v7617_v8 = vadd.f32 %v7616_v33, %v16410_v36  ;;  %v7702_v17 = vmax.f32 %v7679_v50, 0.0 }
0x1163   : > { %v7681_v2 = vpop.f32.mrf.mxu2 }
0x1164   : > { %v7682_v9 = vadd.f32 %v7681_v2, %v7617_v8 }
0x1165   : > { %v7619_v16 = vpop.f32.mrf.mxu0 }
0x1166   : > { %v7620_v38 = vadd.f32 %v7619_v16, %v16419_v19  ;;  %v7703_v32 = vmax.f32 %v7682_v9, 0.0  ;;  %v7608_v19 = vadd.f32 %v7607_v22, %v16383_v57  ;;  %v7695_v57 = vmax.f32 %v16455_v58, 0.0 }
0x1168   : > { %v7673_v12 = vadd.f32 %v7672_v26, %v7608_v19 }
0x116a   : > { %v7700_v36 = vmax.f32 %v7673_v12, 0.0 }
0x116b   : > { %v7684_v3 = vpop.f32.mrf.mxu2 }
0x116c   : > { %v7685_v54 = vadd.f32 %v7684_v3, %v7620_v38 }
0x116d   : > { %v7622_v7 = vpop.f32.mrf.mxu0 }
0x116e   : > { %v7623_v46 = vadd.f32 %v7622_v7, %v16425_v23  ;;  %v7704_v28 = vmax.f32 %v7685_v54, 0.0  ;;  %v7676_v23 = vadd.f32 %v7675_v27, %v7611_v52 }
0x1170   : > { %v7701_v43 = vmax.f32 %v7676_v23, 0.0 }
0x1173   : > { %v7687_v11 = vpop.f32.mrf.mxu2 }
0x1174   : > { %v7688_v1 = vadd.f32 %v7687_v11, %v7623_v46 }
0x1176   : > { %v7705_v61 = vmax.f32 %v7688_v1, 0.0 }
0x1178   : > { %7714 = vmatpush.xpose.msra.mxu0 %v7705_v61 }
0x117c   : > { %7715 = vmatpush.xpose.msra.mxu0 %v7704_v28 }
0x1180   : > { %7716 = vmatpush.xpose.msra.mxu0 %v7703_v32 }
0x1184   : > { %7717 = vmatpush.xpose.msra.mxu0 %v7702_v17 }
0x1188   : > { %7718 = vmatpush.xpose.msra.mxu0 %v7701_v43 }
0x118c   : > { %7719 = vmatpush.xpose.msra.mxu0 %v7700_v36 }
0x1190   : > { %7720 = vmatpush.xpose.msra.mxu0 %v7699_v20 }
0x1194   : > { %7721 = vmatpush.xpose.msra.mxu0 %v7698_v24 }
0x1198   : > { %7722 = vmatpush.xpose.msra.mxu0 %v7697_v62  ;;  %v7711_v37 = vpop.permute.xlu0 %7710 }
0x1199   : > { %v7713_v58 = vperm.slane %v7711_v37, 0 }
0x119c   : > { %7723 = vmatpush.xpose.msra.mxu0 %v7696_v25 }
0x11a0   : > { %7724 = vmatpush.xpose.msra.mxu0 %v7695_v57 }
0x11a4   : > { %7725 = vmatpush.xpose.msra.mxu0 %v7694_v14 }
0x11a8   : > { %7726 = vmatpush.xpose.msra.mxu0 %v7693_v39 }
0x11ac   : > { %7727 = vmatpush.xpose.msra.mxu0 %v7692_v49 }
0x11b0   : > { %7728 = vmatpush.xpose.msra.mxu0 %v7691_v56 }
0x11b4   : > { %7729 = vmatpush.xpose.msra.mxu0 %v7690_v0 }
0x11b7   : > { %7730 = vmatmul.f32.vlgmr.msra.gmra.mxu0 %v7706_v45 }
0x1234   : > { %v7731_v63 = vpop.f32.mrf.mxu0 }
0x1235   : > { %v7732_v6 = vadd.f32 %v7731_v63, %v7713_v58 }
0x1237   : > { %v8370_v18 = vmul.f32 -1.442695, %v7732_v6 }
0x1239   : > { %9109 = vpow2.f32 %v8370_v18 }
0x123f   : > { %v9110_v41 = vpop.eup %9109 }
0x1240   : > { %v7737_v51 = vadd.f32 1.0, %v9110_v41 }
0x1242   : > { %9111 = vrcp.f32 %v7737_v51  ;;  %v7749_v60 = vand.u32 2147483648, %v7737_v51  ;;  %v7747_v42 = vand.u32 2147483647, %v7737_v51  ;;  %vm7743_vm7 = vweird.f32 %v7737_v51 }
0x1244   : > { %v7750_v31 = vor.u32 1.1754944e-38, %v7749_v60  ;;  %vm7748_vm9 = vcmp.eq.f32.partialorder %v7747_v42, 8.507059e+37 }
0x1248   : > { %v9112_v29 = vpop.eup %9111 }
0x1249   : > { %v7739_v48 = vmul.f32 %v9112_v29, %v7737_v51  ;;  %vm7744_vm0 = vweird.f32 %v9112_v29 }
0x124a   : > { %vm7745_vm8 = vmor %vm7743_vm7, %vm7744_vm0 }
0x124b   : > { %v7740_v34 = vsub.f32 1.0, %v7739_v48 }
0x124d   : > { %v7741_v40 = vmul.f32 %v9112_v29, %v7740_v34 }
0x124f   : > { %v7742_v59 = vadd.f32 %v9112_v29, %v7741_v40 }
0x1251   : > { %v7746_v53 = vsel %vm7745_vm8, %v9112_v29, %v7742_v59 }
0x1252   : > { %v7751_v21 = vsel %vm7748_vm9, %v7750_v31, %v7746_v53 }
0x1253   : > { %7754 = vrot.lane.b32.xlu1 %v7751_v21, %s9744_s17 }
0x1254   : > { %9634 = shalt.err (!%p9631_p8)
}
0x1255   : > { %8442 = dma.vmem_to_hbm [thread:$0]  (%p9881_p5), %s7809_s6, 128, %s7811_s0, %s7783_s25  }
0x1256   : > { %s17107_s29 = sld [smem:[#allocation144_spill]]  ;;  %s743_s6 = scalar_lea.vmem [#allocation21], %s15020_s19 }
0x1257   : > { %s7794_s0 = sshll.u32 %s743_s6, 4  ;;  %s7795_s0 = int_to_ptr.vmem [resolvable:$true] %s7794_s0 }
0x125c   : > { %s17108_s4 = smov %s17107_s29  ;;  %s7792_s18 = scalar_lea.hbm %s17107_s29, %s9864_s13 }
0x125d   : > { %s7796_s25 = sshll.u32 %s7792_s18, 4  ;;  %s7779_s13 = scalar_lea.sflag [#allocation5], %s15020_s19  ;;  %s7797_s25 = int_to_ptr.hbm [resolvable:$true] %s7796_s25 }
0x125e   : > { %s9649_s20 = sshra.s32 %s7797_s25, 4  ;;  %s9655_s27 = scalar_lea.hbm %s17108_s4, 4  ;;  %s9650_s20 = int_to_ptr.hbm [resolvable:$true] %s9649_s20 }
0x125f   : > { %s9651_s24 = scalar_lea.hbm %s9650_s20, 1  ;;  %p9656_p12 = scmp.lt.s32.totalorder %s9650_s20, %s17108_s4 }
0x1260   : > { %p9652_p9 = scmp.ne.s32.totalorder %s9650_s20, %s9651_s24  ;;  %p9657_p13 = scmp.lt.s32.totalorder %s9655_s27, %s9651_s24 }
0x1262   : > { %p9653_p10 = pnand %p9652_p9, %p9881_p5  ;;  %p9658_p0 = por %p9657_p13, %p9656_p12 }
0x1264   : > { %p9654_p11 = pneg %p9653_p10 }
0x1266   : > { %p9659_p1 = pnand %p9658_p0, %p9654_p11 }
0x12c5   : > { %v7755_v15 = vpop.permute.xlu1 %7754 }
0x12c6   : > { %v7757_v10 = vsub.f32 %v7751_v21, %v7755_v15 }
0x12c8   : > { %v8371_v4 = vmul.f32 -1.442695, %v7757_v10 }
0x12ca   : > { %9113 = vpow2.f32 %v8371_v4 }
0x12d0   : > { %v9114_v35 = vpop.eup %9113 }
0x12d1   : > { %v7761_v22 = vadd.f32 1.0, %v9114_v35 }
0x12d3   : > { %9115 = vrcp.f32 %v7761_v22  ;;  %v7773_v13 = vand.u32 2147483648, %v7761_v22  ;;  %v7771_v33 = vand.u32 2147483647, %v7761_v22  ;;  %vm7767_vm11 = vweird.f32 %v7761_v22 }
0x12d5   : > { %v7774_v16 = vor.u32 1.1754944e-38, %v7773_v13  ;;  %vm7772_vm13 = vcmp.eq.f32.partialorder %v7771_v33, 8.507059e+37 }
0x12d9   : > { %v9116_v26 = vpop.eup %9115 }
0x12da   : > { %v7763_v5 = vmul.f32 %v9116_v26, %v7761_v22  ;;  %vm7768_vm10 = vweird.f32 %v9116_v26 }
0x12db   : > { %vm7769_vm12 = vmor %vm7767_vm11, %vm7768_vm10 }
0x12dc   : > { %v7764_v27 = vsub.f32 1.0, %v7763_v5 }
0x12de   : > { %v7765_v30 = vmul.f32 %v9116_v26, %v7764_v27 }
0x12e0   : > { %v7766_v2 = vadd.f32 %v9116_v26, %v7765_v30 }
0x12e2   : > { %v7770_v3 = vsel %vm7769_vm12, %v9116_v26, %v7766_v2 }
0x12e3   : > { %v7775_v7 = vsel %vm7772_vm13, %v7774_v16, %v7770_v3 }
0x12e4   : > { %7777 = vst [vmem:[%s743_s6] sm:$0x1] %v7775_v7 }
0x12e5   : > { %9662 = shalt.err (!%p9659_p1)
}
0x12e6   : > { %8441 = dma.vmem_to_hbm [thread:$0]  (%p9881_p5), %s7795_s0, 16, %s7797_s25, %s7779_s13  }
0x12e7 PF: > { %s17109_s19 = sld [smem:[#allocation34_spill]] }
0x12e8   : > { %s17110_s17 = sld [smem:[#allocation32_spill]] }
0x12ed   : > { %p8508_p2 = scmp.ge.s32.totalorder %s17109_s19, 2 }
0x12ee   : > { %s7822_s29 = sand.u32 1, %s17110_s17  }
0x12ef   : > { %p8480_p3 = pnand %p8508_p2, %p9885_p6  ;;  %s7823_s18 = scalar_lea.sflag [#allocation5], %s7822_s29 }
0x12f1   : > { %p8481_p4 = pneg %p8480_p3 }
0x12f3   : > { %9704 = dma.done.wait (%p8481_p4), %s7823_s18, 16  }
0x12f4   : > { %9706 = vsyncadd (%p8481_p4), %s7823_s18, 4294967280  ;;  %s7832_s6 = scalar_lea.sflag [#allocation23], %s7822_s29 }
0x12f5   : > { %9708 = dma.done.wait (%p8481_p4), %s7832_s6, 128  }
0x12f6   : > { %9710 = vsyncadd (%p8481_p4), %s7832_s6, 4294967168  ;;  %s17112_s19 = sld [smem:[#allocation35_spill]]  ;;  %s17115_s29 = smov %s9717_s30 }
0x12f7   : > { %s17113_s20 = sld [smem:[#allocation33_spill]] }
0x12f8   : > { %s17114_s0 = sld [smem:[#allocation36_spill]] }
0x12fc   : > { %p40_p5 = scmp.ge.s32.totalorder %s17112_s19, 6  }
0x12fd   : > { %s17116_s30 = smov %s17113_s20 }
0x12fe   :  { %42 = sbr.rel (!%p40_p5) target bundleno = 19 (0x13), region = 185 }
0x1303   :  { %7838 = vsyncpa [#allocation4], 1 }
0x1304   :  { %7840 = vsyncpa [#allocation4 + $0x1], 1 }
0x1305   :  { %7841 = vsyncpa [#allocation7], 1 }
0x1306   :  { %7842 = vsyncpa [#allocation10], 1 }
0x1307   :  { %7843 = vsyncpa [#allocation13], 1 }
0x1308   :  { %7844 = vsyncpa [#allocation16], 1 }
0x1309   :  { %7845 = vsyncpa [#allocation19], 1 }
0x130a   :  { %7846 = vsyncpa [#allocation5], 1 }
0x130b   :  { %7848 = vsyncpa [#allocation5 + $0x1], 1 }
0x130c   :  { %7849 = vsyncpa [#allocation23], 1 }
0x130d   :  { %7851 = vsyncpa [#allocation23 + $0x1], 1 }

</bundles_post_ra>
